<compile_context>
chip_gen: v7x
topology: tpu7x:2x2x1
jax: 0.10.0
libtpu: 0.0.40
codegen_flags: <defaults>
</compile_context>

<pallas_src>
import functools

import jax
import jax.numpy as jnp
from jax import lax
from jax.experimental import pallas as pl
from jax.experimental.pallas import tpu as pltpu

# ---------------------------------------------------------------------------
# Scaled-down VGG16 configuration
# (original: 64,64,M,128,128,M,256x3,M,512x3,M,512x3,M; 4096-dim classifier)
# ---------------------------------------------------------------------------
CFG = [4, 4, 'M', 8, 8, 'M', 16, 16, 16, 'M', 32, 32, 32, 'M', 32, 32, 32, 'M']
INPUT_CHANNELS = 1       # ModifiedVGG16(input_channels=1)
HIDDEN = 64              # stands in for 4096
NUM_CLASSES = 2
SPATIAL = 32             # 5 maxpools -> 1x1 final spatial (224 -> 7 in real VGG16)

_N_CONV = sum(1 for v in CFG if v != 'M')
_N_POOL = CFG.count('M')
_FINAL_SPATIAL = SPATIAL // (2 ** _N_POOL)
FLAT_DIM = [v for v in CFG if v != 'M'][-1] * _FINAL_SPATIAL * _FINAL_SPATIAL


# ---------------------------------------------------------------------------
# In-kernel helpers (traced jnp on VMEM-resident values)
# ---------------------------------------------------------------------------
def _shift_flat(a, s):
    """b[:, i] = a[:, i + s] (zero where i + s is out of [0, L)).  a: (C, L)."""
    if s == 0:
        return a
    C, L = a.shape
    if abs(s) >= L:
        return jnp.zeros_like(a)
    z = jnp.zeros((C, abs(s)), a.dtype)
    if s > 0:
        return jnp.concatenate([a[:, s:], z], axis=1)
    return jnp.concatenate([z, a[:, :L + s]], axis=1)


def _row_col_iota(H, W):
    """(1, H*W) int32 row / col coordinate maps (W is a power of two)."""
    idx = lax.broadcasted_iota(jnp.int32, (1, H * W), 1)
    shift = W.bit_length() - 1
    return idx >> shift, idx & (W - 1)


def _conv3x3_relu(act, w2, b, H, W):
    """act: (Cin, H*W) f32; w2: (Cout, 9*Cin) bf16; b: (Cout, 1) f32.

    3x3 conv (padding=1, stride=1) as ONE im2col MXU matmul with K = 9*Cin,
    then bias + fused ReLU.  Output stays lane-dense: (Cout, H*W)."""
    r, c = _row_col_iota(H, W)
    taps = []
    for oy in (-1, 0, 1):
        for ox in (-1, 0, 1):
            t = _shift_flat(act, oy * W + ox)
            conds = []
            if oy < 0:
                conds.append(r >= -oy)
            if oy > 0:
                conds.append(r < H - oy)
            if ox < 0:
                conds.append(c >= -ox)
            if ox > 0:
                conds.append(c < W - ox)
            if conds:
                valid = functools.reduce(jnp.logical_and, conds)
                t = jnp.where(valid, t, jnp.zeros_like(t))
            taps.append(t)
    patches = jnp.concatenate(taps, axis=0)               # (9*Cin, H*W), f32
    out = jnp.dot(w2, patches.astype(jnp.bfloat16),       # bf16 operands,
                  preferred_element_type=jnp.float32)     # f32 accumulation
    return jnp.maximum(out + b, 0.0)


def _maxpool2x2(act, H, W):
    """act: (C, H*W) f32 -> (C, (H//2)*(W//2)); 2x2 max pool, stride 2.

    Max over the 2x2 window via lane shifts, then compact the even-(y, x)
    anchors with a 0/1 selection matmul (keeps everything 2-D, MXU+VPU only)."""
    Ho, Wo = H // 2, W // 2
    HW, HWo = H * W, Ho * Wo
    m = jnp.maximum(act, _shift_flat(act, 1))
    m = jnp.maximum(m, jnp.maximum(_shift_flat(act, W), _shift_flat(act, W + 1)))
    i_idx = lax.broadcasted_iota(jnp.int32, (HW, HWo), 0)
    j_idx = lax.broadcasted_iota(jnp.int32, (HW, HWo), 1)
    jr = j_idx >> (Wo.bit_length() - 1)
    jc = j_idx & (Wo - 1)
    anchor = (jr << W.bit_length()) + (jc << 1)            # 2*jr*W + 2*jc
    sel = (i_idx == anchor).astype(jnp.float32)            # (HW, HWo) 0/1
    return jnp.dot(m, sel, preferred_element_type=jnp.float32)


# ---------------------------------------------------------------------------
# Single fused kernel: features + flatten + classifier
# ---------------------------------------------------------------------------
def _vgg16_fused_kernel(*refs):
    x_ref = refs[0]
    conv_refs = refs[1:1 + 2 * _N_CONV]
    lin_refs = refs[1 + 2 * _N_CONV:1 + 2 * _N_CONV + 6]
    feat_ref = refs[-2]
    logit_ref = refs[-1]

    H = W = SPATIAL
    act = x_ref[0].astype(jnp.float32)          # (Cin0, H*W), NCHW-flat image
    ci = 0
    for v in CFG:
        if v == 'M':
            act = _maxpool2x2(act, H, W)
            H //= 2
            W //= 2
        else:
            w2 = conv_refs[2 * ci][...]          # (Cout, 9*Cin) bf16
            b = conv_refs[2 * ci + 1][...]       # (Cout, 1) f32
            act = _conv3x3_relu(act, w2, b, H, W)
            ci += 1

    # x = x.view(N, -1): (C, H*W) row-major == NCHW flatten order.
    act = act.reshape(FLAT_DIM, 1)

    w1, b1, w2l, b2, w3, b3 = (r[...] for r in lin_refs)
    h1 = jnp.maximum(jnp.dot(w1, act.astype(jnp.bfloat16),
                             preferred_element_type=jnp.float32) + b1, 0.0)
    # Dropout -> identity (inference mode)
    h2 = jnp.maximum(jnp.dot(w2l, h1.astype(jnp.bfloat16),
                             preferred_element_type=jnp.float32) + b2, 0.0)
    # Dropout -> identity (inference mode)
    logits = jnp.dot(w3, h2.astype(jnp.bfloat16),
                     preferred_element_type=jnp.float32) + b3

    feat_ref[...] = h2[None].astype(feat_ref.dtype)        # (1, HIDDEN, 1)
    logit_ref[...] = logits[None].astype(logit_ref.dtype)  # (1, NUM_CLASSES, 1)


def _fused_forward(x_flat, params):
    """x_flat: (N, INPUT_CHANNELS, SPATIAL*SPATIAL) f32.
    Returns (features (N, HIDDEN), logits (N, NUM_CLASSES))."""
    N = x_flat.shape[0]

    args = [x_flat]
    in_specs = [pl.BlockSpec((1,) + x_flat.shape[1:], lambda n: (n, 0, 0))]
    for w2, b in params["features"]:
        args += [w2, b]
        in_specs += [pl.BlockSpec(w2.shape, lambda n: (0, 0)),
                     pl.BlockSpec(b.shape, lambda n: (0, 0))]
    for w, b in params["classifier"]:
        args += [w, b]
        in_specs += [pl.BlockSpec(w.shape, lambda n: (0, 0)),
                     pl.BlockSpec(b.shape, lambda n: (0, 0))]

    feats, logits = pl.pallas_call(
        _vgg16_fused_kernel,
        out_shape=(jax.ShapeDtypeStruct((N, HIDDEN, 1), jnp.float32),
                   jax.ShapeDtypeStruct((N, NUM_CLASSES, 1), jnp.float32)),
        grid=(N,),
        in_specs=in_specs,
        out_specs=(pl.BlockSpec((1, HIDDEN, 1), lambda n: (n, 0, 0)),
                   pl.BlockSpec((1, NUM_CLASSES, 1), lambda n: (n, 0, 0))),
        compiler_params=pltpu.CompilerParams(
            dimension_semantics=("parallel",)),
    )(*args)
    return feats[:, :, 0], logits[:, :, 0]


_fused_forward_jit = jax.jit(_fused_forward)


# ---------------------------------------------------------------------------
# Parameters (deterministic synthetic init; weights pre-folded for the kernel)
# ---------------------------------------------------------------------------
def init_params(key):
    params = {"features": [], "classifier": []}
    in_c = INPUT_CHANNELS
    for v in CFG:
        if v == 'M':
            continue
        key, kw = jax.random.split(key)
        fan_in = 9 * in_c
        w = jax.random.normal(kw, (3, 3, in_c, v), jnp.float32) * jnp.sqrt(2.0 / fan_in)
        # Pre-fold to im2col layout (Cout, 9*Cin); column order = (ky*3+kx)*Cin + ci.
        w2 = jnp.transpose(w.reshape(9 * in_c, v)).astype(jnp.bfloat16)
        b = jnp.zeros((v, 1), jnp.float32)
        params["features"].append((w2, b))
        in_c = v
    dims = [(FLAT_DIM, HIDDEN), (HIDDEN, HIDDEN), (HIDDEN, NUM_CLASSES)]
    for din, dout in dims:
        key, kw = jax.random.split(key)
        w = (jax.random.normal(kw, (dout, din), jnp.float32)      # PyTorch (out, in)
             * jnp.sqrt(2.0 / din)).astype(jnp.bfloat16)
        b = jnp.zeros((dout, 1), jnp.float32)
        params["classifier"].append((w, b))
    return params


# ---------------------------------------------------------------------------
# Forward pass == ModifiedVGG16.forward
# ---------------------------------------------------------------------------
def modified_vgg16_forward(x_nchw, params, extract_features=False):
    N = x_nchw.shape[0]
    # NCHW -> per-image (C, H*W) flat layout (this IS the NCHW flatten order).
    x_flat = x_nchw.reshape(N, INPUT_CHANNELS, SPATIAL * SPATIAL).astype(jnp.float32)
    feats, logits = _fused_forward_jit(x_flat, params)
    return feats if extract_features else logits


# ---------------------------------------------------------------------------
if __name__ == "__main__":
    key = jax.random.PRNGKey(0)
    k_in, k_par = jax.random.split(key)

    # small, module-consistent input: batch=2, input_channels=1, 32x32 (NCHW)
    x = jax.random.normal(k_in, (2, INPUT_CHANNELS, SPATIAL, SPATIAL), jnp.float32)
    params = init_params(k_par)

    logits = jax.block_until_ready(modified_vgg16_forward(x, params, extract_features=False))
    feats = jax.block_until_ready(modified_vgg16_forward(x, params, extract_features=True))

    assert logits.shape == (2, NUM_CLASSES), logits.shape
    assert feats.shape == (2, HIDDEN), feats.shape
    assert jnp.all(jnp.isfinite(logits)) and jnp.all(jnp.isfinite(feats))
    print("KERNEL_OK")
</pallas_src>

<mosaic_0001>
module attributes {stable_mosaic.version = 11 : i64} {
  func.func @_vgg16_fused_kernel(%arg0: i32, %arg1: memref<1x1x1024xf32, #tpu.memory_space<vmem>>, %arg2: memref<4x9xbf16, #tpu.memory_space<vmem>>, %arg3: memref<4x1xf32, #tpu.memory_space<vmem>>, %arg4: memref<4x36xbf16, #tpu.memory_space<vmem>>, %arg5: memref<4x1xf32, #tpu.memory_space<vmem>>, %arg6: memref<8x36xbf16, #tpu.memory_space<vmem>>, %arg7: memref<8x1xf32, #tpu.memory_space<vmem>>, %arg8: memref<8x72xbf16, #tpu.memory_space<vmem>>, %arg9: memref<8x1xf32, #tpu.memory_space<vmem>>, %arg10: memref<16x72xbf16, #tpu.memory_space<vmem>>, %arg11: memref<16x1xf32, #tpu.memory_space<vmem>>, %arg12: memref<16x144xbf16, #tpu.memory_space<vmem>>, %arg13: memref<16x1xf32, #tpu.memory_space<vmem>>, %arg14: memref<16x144xbf16, #tpu.memory_space<vmem>>, %arg15: memref<16x1xf32, #tpu.memory_space<vmem>>, %arg16: memref<32x144xbf16, #tpu.memory_space<vmem>>, %arg17: memref<32x1xf32, #tpu.memory_space<vmem>>, %arg18: memref<32x288xbf16, #tpu.memory_space<vmem>>, %arg19: memref<32x1xf32, #tpu.memory_space<vmem>>, %arg20: memref<32x288xbf16, #tpu.memory_space<vmem>>, %arg21: memref<32x1xf32, #tpu.memory_space<vmem>>, %arg22: memref<32x288xbf16, #tpu.memory_space<vmem>>, %arg23: memref<32x1xf32, #tpu.memory_space<vmem>>, %arg24: memref<32x288xbf16, #tpu.memory_space<vmem>>, %arg25: memref<32x1xf32, #tpu.memory_space<vmem>>, %arg26: memref<32x288xbf16, #tpu.memory_space<vmem>>, %arg27: memref<32x1xf32, #tpu.memory_space<vmem>>, %arg28: memref<64x32xbf16, #tpu.memory_space<vmem>>, %arg29: memref<64x1xf32, #tpu.memory_space<vmem>>, %arg30: memref<64x64xbf16, #tpu.memory_space<vmem>>, %arg31: memref<64x1xf32, #tpu.memory_space<vmem>>, %arg32: memref<2x64xbf16, #tpu.memory_space<vmem>>, %arg33: memref<2x1xf32, #tpu.memory_space<vmem>>, %arg34: memref<1x64x1xf32, #tpu.memory_space<vmem>>, %arg35: memref<1x2x1xf32, #tpu.memory_space<vmem>>) attributes {dimension_semantics = [#tpu.dimension_semantics<parallel>], iteration_bounds = array<i64: 2>, scalar_prefetch = 0 : i64, scratch_operands = 0 : i64, tpu.core_type = #tpu.core_type<tc>, window_params = [{transform_indices = @transform_0, window_bounds = array<i64: 1, 1, 1024>}, {pipeline_mode = #tpu.pipeline_mode<synchronous>, transform_indices = @transform_1, window_bounds = array<i64: 4, 9>}, {pipeline_mode = #tpu.pipeline_mode<synchronous>, transform_indices = @transform_2, window_bounds = array<i64: 4, 1>}, {pipeline_mode = #tpu.pipeline_mode<synchronous>, transform_indices = @transform_3, window_bounds = array<i64: 4, 36>}, {pipeline_mode = #tpu.pipeline_mode<synchronous>, transform_indices = @transform_4, window_bounds = array<i64: 4, 1>}, {pipeline_mode = #tpu.pipeline_mode<synchronous>, transform_indices = @transform_5, window_bounds = array<i64: 8, 36>}, {pipeline_mode = #tpu.pipeline_mode<synchronous>, transform_indices = @transform_6, window_bounds = array<i64: 8, 1>}, {pipeline_mode = #tpu.pipeline_mode<synchronous>, transform_indices = @transform_7, window_bounds = array<i64: 8, 72>}, {pipeline_mode = #tpu.pipeline_mode<synchronous>, transform_indices = @transform_8, window_bounds = array<i64: 8, 1>}, {pipeline_mode = #tpu.pipeline_mode<synchronous>, transform_indices = @transform_9, window_bounds = array<i64: 16, 72>}, {pipeline_mode = #tpu.pipeline_mode<synchronous>, transform_indices = @transform_10, window_bounds = array<i64: 16, 1>}, {pipeline_mode = #tpu.pipeline_mode<synchronous>, transform_indices = @transform_11, window_bounds = array<i64: 16, 144>}, {pipeline_mode = #tpu.pipeline_mode<synchronous>, transform_indices = @transform_12, window_bounds = array<i64: 16, 1>}, {pipeline_mode = #tpu.pipeline_mode<synchronous>, transform_indices = @transform_13, window_bounds = array<i64: 16, 144>}, {pipeline_mode = #tpu.pipeline_mode<synchronous>, transform_indices = @transform_14, window_bounds = array<i64: 16, 1>}, {pipeline_mode = #tpu.pipeline_mode<synchronous>, transform_indices = @transform_15, window_bounds = array<i64: 32, 144>}, {pipeline_mode = #tpu.pipeline_mode<synchronous>, transform_indices = @transform_16, window_bounds = array<i64: 32, 1>}, {pipeline_mode = #tpu.pipeline_mode<synchronous>, transform_indices = @transform_17, window_bounds = array<i64: 32, 288>}, {pipeline_mode = #tpu.pipeline_mode<synchronous>, transform_indices = @transform_18, window_bounds = array<i64: 32, 1>}, {pipeline_mode = #tpu.pipeline_mode<synchronous>, transform_indices = @transform_19, window_bounds = array<i64: 32, 288>}, {pipeline_mode = #tpu.pipeline_mode<synchronous>, transform_indices = @transform_20, window_bounds = array<i64: 32, 1>}, {pipeline_mode = #tpu.pipeline_mode<synchronous>, transform_indices = @transform_21, window_bounds = array<i64: 32, 288>}, {pipeline_mode = #tpu.pipeline_mode<synchronous>, transform_indices = @transform_22, window_bounds = array<i64: 32, 1>}, {pipeline_mode = #tpu.pipeline_mode<synchronous>, transform_indices = @transform_23, window_bounds = array<i64: 32, 288>}, {pipeline_mode = #tpu.pipeline_mode<synchronous>, transform_indices = @transform_24, window_bounds = array<i64: 32, 1>}, {pipeline_mode = #tpu.pipeline_mode<synchronous>, transform_indices = @transform_25, window_bounds = array<i64: 32, 288>}, {pipeline_mode = #tpu.pipeline_mode<synchronous>, transform_indices = @transform_26, window_bounds = array<i64: 32, 1>}, {pipeline_mode = #tpu.pipeline_mode<synchronous>, transform_indices = @transform_27, window_bounds = array<i64: 64, 32>}, {pipeline_mode = #tpu.pipeline_mode<synchronous>, transform_indices = @transform_28, window_bounds = array<i64: 64, 1>}, {pipeline_mode = #tpu.pipeline_mode<synchronous>, transform_indices = @transform_29, window_bounds = array<i64: 64, 64>}, {pipeline_mode = #tpu.pipeline_mode<synchronous>, transform_indices = @transform_30, window_bounds = array<i64: 64, 1>}, {pipeline_mode = #tpu.pipeline_mode<synchronous>, transform_indices = @transform_31, window_bounds = array<i64: 2, 64>}, {pipeline_mode = #tpu.pipeline_mode<synchronous>, transform_indices = @transform_32, window_bounds = array<i64: 2, 1>}, {transform_indices = @transform_33, window_bounds = array<i64: 1, 64, 1>}, {transform_indices = @transform_34, window_bounds = array<i64: 1, 2, 1>}]} {
    %c0 = arith.constant 0 : index
    %c0_0 = arith.constant 0 : index
    %c0_1 = arith.constant 0 : index
    %0 = vector.load %arg1[%c0, %c0_0, %c0_1] : memref<1x1x1024xf32, #tpu.memory_space<vmem>>, vector<1x1x1024xf32>
    %1 = vector.shape_cast %0 : vector<1x1x1024xf32> to vector<1x1024xf32>
    %c0_2 = arith.constant 0 : index
    %c0_3 = arith.constant 0 : index
    %2 = vector.load %arg2[%c0_2, %c0_3] : memref<4x9xbf16, #tpu.memory_space<vmem>>, vector<4x9xbf16>
    %c0_4 = arith.constant 0 : index
    %c0_5 = arith.constant 0 : index
    %3 = vector.load %arg3[%c0_4, %c0_5] : memref<4x1xf32, #tpu.memory_space<vmem>>, vector<4x1xf32>
    %4 = tpu.iota {dimensions = array<i32: 1>} : vector<1x1024xi32>
    %c5_i32 = arith.constant 5 : i32
    %5 = vector.broadcast %c5_i32 : i32 to vector<1x1024xi32>
    %6 = arith.shrsi %4, %5 : vector<1x1024xi32>
    %c31_i32 = arith.constant 31 : i32
    %7 = vector.broadcast %c31_i32 : i32 to vector<1x1024xi32>
    %8 = arith.andi %4, %7 : vector<1x1024xi32>
    %cst = arith.constant 0.000000e+00 : f32
    %9 = vector.broadcast %cst : f32 to vector<1x33xf32>
    %10 = vector.extract_strided_slice %1 {offsets = [0, 0], sizes = [1, 991], strides = [1, 1]} : vector<1x1024xf32> to vector<1x991xf32>
    %11 = tpu.concatenate %9, %10 in 1 : vector<1x33xf32>, vector<1x991xf32> -> vector<1x1024xf32>
    %c1_i32 = arith.constant 1 : i32
    %12 = vector.broadcast %c1_i32 : i32 to vector<1x1024xi32>
    %13 = arith.cmpi sge, %6, %12 : vector<1x1024xi32>
    %c1_i32_6 = arith.constant 1 : i32
    %14 = vector.broadcast %c1_i32_6 : i32 to vector<1x1024xi32>
    %15 = arith.cmpi sge, %8, %14 : vector<1x1024xi32>
    %16 = arith.andi %13, %15 : vector<1x1024xi1>
    %cst_7 = arith.constant 0.000000e+00 : f32
    %17 = vector.broadcast %cst_7 : f32 to vector<1x1024xf32>
    %18 = arith.select %16, %11, %17 : vector<1x1024xi1>, vector<1x1024xf32>
    %cst_8 = arith.constant 0.000000e+00 : f32
    %19 = vector.broadcast %cst_8 : f32 to vector<1x32xf32>
    %20 = vector.extract_strided_slice %1 {offsets = [0, 0], sizes = [1, 992], strides = [1, 1]} : vector<1x1024xf32> to vector<1x992xf32>
    %21 = tpu.concatenate %19, %20 in 1 : vector<1x32xf32>, vector<1x992xf32> -> vector<1x1024xf32>
    %c1_i32_9 = arith.constant 1 : i32
    %22 = vector.broadcast %c1_i32_9 : i32 to vector<1x1024xi32>
    %23 = arith.cmpi sge, %6, %22 : vector<1x1024xi32>
    %cst_10 = arith.constant 0.000000e+00 : f32
    %24 = vector.broadcast %cst_10 : f32 to vector<1x1024xf32>
    %25 = arith.select %23, %21, %24 : vector<1x1024xi1>, vector<1x1024xf32>
    %cst_11 = arith.constant 0.000000e+00 : f32
    %26 = vector.broadcast %cst_11 : f32 to vector<1x31xf32>
    %27 = vector.extract_strided_slice %1 {offsets = [0, 0], sizes = [1, 993], strides = [1, 1]} : vector<1x1024xf32> to vector<1x993xf32>
    %28 = tpu.concatenate %26, %27 in 1 : vector<1x31xf32>, vector<1x993xf32> -> vector<1x1024xf32>
    %c1_i32_12 = arith.constant 1 : i32
    %29 = vector.broadcast %c1_i32_12 : i32 to vector<1x1024xi32>
    %30 = arith.cmpi sge, %6, %29 : vector<1x1024xi32>
    %c31_i32_13 = arith.constant 31 : i32
    %31 = vector.broadcast %c31_i32_13 : i32 to vector<1x1024xi32>
    %32 = arith.cmpi slt, %8, %31 : vector<1x1024xi32>
    %33 = arith.andi %30, %32 : vector<1x1024xi1>
    %cst_14 = arith.constant 0.000000e+00 : f32
    %34 = vector.broadcast %cst_14 : f32 to vector<1x1024xf32>
    %35 = arith.select %33, %28, %34 : vector<1x1024xi1>, vector<1x1024xf32>
    %cst_15 = arith.constant 0.000000e+00 : f32
    %36 = vector.broadcast %cst_15 : f32 to vector<1x1xf32>
    %37 = vector.extract_strided_slice %1 {offsets = [0, 0], sizes = [1, 1023], strides = [1, 1]} : vector<1x1024xf32> to vector<1x1023xf32>
    %38 = tpu.concatenate %36, %37 in 1 : vector<1x1xf32>, vector<1x1023xf32> -> vector<1x1024xf32>
    %c1_i32_16 = arith.constant 1 : i32
    %39 = vector.broadcast %c1_i32_16 : i32 to vector<1x1024xi32>
    %40 = arith.cmpi sge, %8, %39 : vector<1x1024xi32>
    %cst_17 = arith.constant 0.000000e+00 : f32
    %41 = vector.broadcast %cst_17 : f32 to vector<1x1024xf32>
    %42 = arith.select %40, %38, %41 : vector<1x1024xi1>, vector<1x1024xf32>
    %cst_18 = arith.constant 0.000000e+00 : f32
    %43 = vector.broadcast %cst_18 : f32 to vector<1x1xf32>
    %44 = vector.extract_strided_slice %1 {offsets = [0, 1], sizes = [1, 1023], strides = [1, 1]} : vector<1x1024xf32> to vector<1x1023xf32>
    %45 = tpu.concatenate %44, %43 in 1 : vector<1x1023xf32>, vector<1x1xf32> -> vector<1x1024xf32>
    %c31_i32_19 = arith.constant 31 : i32
    %46 = vector.broadcast %c31_i32_19 : i32 to vector<1x1024xi32>
    %47 = arith.cmpi slt, %8, %46 : vector<1x1024xi32>
    %cst_20 = arith.constant 0.000000e+00 : f32
    %48 = vector.broadcast %cst_20 : f32 to vector<1x1024xf32>
    %49 = arith.select %47, %45, %48 : vector<1x1024xi1>, vector<1x1024xf32>
    %cst_21 = arith.constant 0.000000e+00 : f32
    %50 = vector.broadcast %cst_21 : f32 to vector<1x31xf32>
    %51 = vector.extract_strided_slice %1 {offsets = [0, 31], sizes = [1, 993], strides = [1, 1]} : vector<1x1024xf32> to vector<1x993xf32>
    %52 = tpu.concatenate %51, %50 in 1 : vector<1x993xf32>, vector<1x31xf32> -> vector<1x1024xf32>
    %c31_i32_22 = arith.constant 31 : i32
    %53 = vector.broadcast %c31_i32_22 : i32 to vector<1x1024xi32>
    %54 = arith.cmpi slt, %6, %53 : vector<1x1024xi32>
    %c1_i32_23 = arith.constant 1 : i32
    %55 = vector.broadcast %c1_i32_23 : i32 to vector<1x1024xi32>
    %56 = arith.cmpi sge, %8, %55 : vector<1x1024xi32>
    %57 = arith.andi %54, %56 : vector<1x1024xi1>
    %cst_24 = arith.constant 0.000000e+00 : f32
    %58 = vector.broadcast %cst_24 : f32 to vector<1x1024xf32>
    %59 = arith.select %57, %52, %58 : vector<1x1024xi1>, vector<1x1024xf32>
    %cst_25 = arith.constant 0.000000e+00 : f32
    %60 = vector.broadcast %cst_25 : f32 to vector<1x32xf32>
    %61 = vector.extract_strided_slice %1 {offsets = [0, 32], sizes = [1, 992], strides = [1, 1]} : vector<1x1024xf32> to vector<1x992xf32>
    %62 = tpu.concatenate %61, %60 in 1 : vector<1x992xf32>, vector<1x32xf32> -> vector<1x1024xf32>
    %c31_i32_26 = arith.constant 31 : i32
    %63 = vector.broadcast %c31_i32_26 : i32 to vector<1x1024xi32>
    %64 = arith.cmpi slt, %6, %63 : vector<1x1024xi32>
    %cst_27 = arith.constant 0.000000e+00 : f32
    %65 = vector.broadcast %cst_27 : f32 to vector<1x1024xf32>
    %66 = arith.select %64, %62, %65 : vector<1x1024xi1>, vector<1x1024xf32>
    %cst_28 = arith.constant 0.000000e+00 : f32
    %67 = vector.broadcast %cst_28 : f32 to vector<1x33xf32>
    %68 = vector.extract_strided_slice %1 {offsets = [0, 33], sizes = [1, 991], strides = [1, 1]} : vector<1x1024xf32> to vector<1x991xf32>
    %69 = tpu.concatenate %68, %67 in 1 : vector<1x991xf32>, vector<1x33xf32> -> vector<1x1024xf32>
    %c31_i32_29 = arith.constant 31 : i32
    %70 = vector.broadcast %c31_i32_29 : i32 to vector<1x1024xi32>
    %71 = arith.cmpi slt, %6, %70 : vector<1x1024xi32>
    %c31_i32_30 = arith.constant 31 : i32
    %72 = vector.broadcast %c31_i32_30 : i32 to vector<1x1024xi32>
    %73 = arith.cmpi slt, %8, %72 : vector<1x1024xi32>
    %74 = arith.andi %71, %73 : vector<1x1024xi1>
    %cst_31 = arith.constant 0.000000e+00 : f32
    %75 = vector.broadcast %cst_31 : f32 to vector<1x1024xf32>
    %76 = arith.select %74, %69, %75 : vector<1x1024xi1>, vector<1x1024xf32>
    %77 = tpu.concatenate %18, %25, %35, %42, %1, %49, %59, %66, %76 in 0 : vector<1x1024xf32>, vector<1x1024xf32>, vector<1x1024xf32>, vector<1x1024xf32>, vector<1x1024xf32>, vector<1x1024xf32>, vector<1x1024xf32>, vector<1x1024xf32>, vector<1x1024xf32> -> vector<9x1024xf32>
    %78 = arith.truncf %77 : vector<9x1024xf32> to vector<9x1024xbf16>
    %cst_32 = arith.constant dense<0.000000e+00> : vector<4x1024xf32>
    %79 = tpu.matmul %2, %78, %cst_32 {dimension_numbers = #tpu.dot_dimension_numbers<[1], [0], [0], [1], [0, 0, 1, 1], [], []>} : vector<4x9xbf16>, vector<9x1024xbf16>, vector<4x1024xf32> -> vector<4x1024xf32>
    %80 = vector.broadcast %3 : vector<4x1xf32> to vector<4x1024xf32>
    %81 = arith.addf %79, %80 : vector<4x1024xf32>
    %cst_33 = arith.constant 0.000000e+00 : f32
    %82 = vector.broadcast %cst_33 : f32 to vector<4x1024xf32>
    %83 = arith.maximumf %81, %82 : vector<4x1024xf32>
    %c0_34 = arith.constant 0 : index
    %c0_35 = arith.constant 0 : index
    %84 = vector.load %arg4[%c0_34, %c0_35] : memref<4x36xbf16, #tpu.memory_space<vmem>>, vector<4x36xbf16>
    %c0_36 = arith.constant 0 : index
    %c0_37 = arith.constant 0 : index
    %85 = vector.load %arg5[%c0_36, %c0_37] : memref<4x1xf32, #tpu.memory_space<vmem>>, vector<4x1xf32>
    %86 = tpu.iota {dimensions = array<i32: 1>} : vector<1x1024xi32>
    %c5_i32_38 = arith.constant 5 : i32
    %87 = vector.broadcast %c5_i32_38 : i32 to vector<1x1024xi32>
    %88 = arith.shrsi %86, %87 : vector<1x1024xi32>
    %c31_i32_39 = arith.constant 31 : i32
    %89 = vector.broadcast %c31_i32_39 : i32 to vector<1x1024xi32>
    %90 = arith.andi %86, %89 : vector<1x1024xi32>
    %cst_40 = arith.constant 0.000000e+00 : f32
    %91 = vector.broadcast %cst_40 : f32 to vector<4x33xf32>
    %92 = vector.extract_strided_slice %83 {offsets = [0, 0], sizes = [4, 991], strides = [1, 1]} : vector<4x1024xf32> to vector<4x991xf32>
    %93 = tpu.concatenate %91, %92 in 1 : vector<4x33xf32>, vector<4x991xf32> -> vector<4x1024xf32>
    %c1_i32_41 = arith.constant 1 : i32
    %94 = vector.broadcast %c1_i32_41 : i32 to vector<1x1024xi32>
    %95 = arith.cmpi sge, %88, %94 : vector<1x1024xi32>
    %c1_i32_42 = arith.constant 1 : i32
    %96 = vector.broadcast %c1_i32_42 : i32 to vector<1x1024xi32>
    %97 = arith.cmpi sge, %90, %96 : vector<1x1024xi32>
    %98 = arith.andi %95, %97 : vector<1x1024xi1>
    %cst_43 = arith.constant 0.000000e+00 : f32
    %99 = vector.broadcast %cst_43 : f32 to vector<4x1024xf32>
    %100 = vector.shape_cast %98 : vector<1x1024xi1> to vector<1x1024xi1>
    %101 = vector.broadcast %100 : vector<1x1024xi1> to vector<4x1024xi1>
    %102 = arith.select %101, %93, %99 : vector<4x1024xi1>, vector<4x1024xf32>
    %cst_44 = arith.constant 0.000000e+00 : f32
    %103 = vector.broadcast %cst_44 : f32 to vector<4x32xf32>
    %104 = vector.extract_strided_slice %83 {offsets = [0, 0], sizes = [4, 992], strides = [1, 1]} : vector<4x1024xf32> to vector<4x992xf32>
    %105 = tpu.concatenate %103, %104 in 1 : vector<4x32xf32>, vector<4x992xf32> -> vector<4x1024xf32>
    %c1_i32_45 = arith.constant 1 : i32
    %106 = vector.broadcast %c1_i32_45 : i32 to vector<1x1024xi32>
    %107 = arith.cmpi sge, %88, %106 : vector<1x1024xi32>
    %cst_46 = arith.constant 0.000000e+00 : f32
    %108 = vector.broadcast %cst_46 : f32 to vector<4x1024xf32>
    %109 = vector.shape_cast %107 : vector<1x1024xi1> to vector<1x1024xi1>
    %110 = vector.broadcast %109 : vector<1x1024xi1> to vector<4x1024xi1>
    %111 = arith.select %110, %105, %108 : vector<4x1024xi1>, vector<4x1024xf32>
    %cst_47 = arith.constant 0.000000e+00 : f32
    %112 = vector.broadcast %cst_47 : f32 to vector<4x31xf32>
    %113 = vector.extract_strided_slice %83 {offsets = [0, 0], sizes = [4, 993], strides = [1, 1]} : vector<4x1024xf32> to vector<4x993xf32>
    %114 = tpu.concatenate %112, %113 in 1 : vector<4x31xf32>, vector<4x993xf32> -> vector<4x1024xf32>
    %c1_i32_48 = arith.constant 1 : i32
    %115 = vector.broadcast %c1_i32_48 : i32 to vector<1x1024xi32>
    %116 = arith.cmpi sge, %88, %115 : vector<1x1024xi32>
    %c31_i32_49 = arith.constant 31 : i32
    %117 = vector.broadcast %c31_i32_49 : i32 to vector<1x1024xi32>
    %118 = arith.cmpi slt, %90, %117 : vector<1x1024xi32>
    %119 = arith.andi %116, %118 : vector<1x1024xi1>
    %cst_50 = arith.constant 0.000000e+00 : f32
    %120 = vector.broadcast %cst_50 : f32 to vector<4x1024xf32>
    %121 = vector.shape_cast %119 : vector<1x1024xi1> to vector<1x1024xi1>
    %122 = vector.broadcast %121 : vector<1x1024xi1> to vector<4x1024xi1>
    %123 = arith.select %122, %114, %120 : vector<4x1024xi1>, vector<4x1024xf32>
    %cst_51 = arith.constant 0.000000e+00 : f32
    %124 = vector.broadcast %cst_51 : f32 to vector<4x1xf32>
    %125 = vector.extract_strided_slice %83 {offsets = [0, 0], sizes = [4, 1023], strides = [1, 1]} : vector<4x1024xf32> to vector<4x1023xf32>
    %126 = tpu.concatenate %124, %125 in 1 : vector<4x1xf32>, vector<4x1023xf32> -> vector<4x1024xf32>
    %c1_i32_52 = arith.constant 1 : i32
    %127 = vector.broadcast %c1_i32_52 : i32 to vector<1x1024xi32>
    %128 = arith.cmpi sge, %90, %127 : vector<1x1024xi32>
    %cst_53 = arith.constant 0.000000e+00 : f32
    %129 = vector.broadcast %cst_53 : f32 to vector<4x1024xf32>
    %130 = vector.shape_cast %128 : vector<1x1024xi1> to vector<1x1024xi1>
    %131 = vector.broadcast %130 : vector<1x1024xi1> to vector<4x1024xi1>
    %132 = arith.select %131, %126, %129 : vector<4x1024xi1>, vector<4x1024xf32>
    %cst_54 = arith.constant 0.000000e+00 : f32
    %133 = vector.broadcast %cst_54 : f32 to vector<4x1xf32>
    %134 = vector.extract_strided_slice %83 {offsets = [0, 1], sizes = [4, 1023], strides = [1, 1]} : vector<4x1024xf32> to vector<4x1023xf32>
    %135 = tpu.concatenate %134, %133 in 1 : vector<4x1023xf32>, vector<4x1xf32> -> vector<4x1024xf32>
    %c31_i32_55 = arith.constant 31 : i32
    %136 = vector.broadcast %c31_i32_55 : i32 to vector<1x1024xi32>
    %137 = arith.cmpi slt, %90, %136 : vector<1x1024xi32>
    %cst_56 = arith.constant 0.000000e+00 : f32
    %138 = vector.broadcast %cst_56 : f32 to vector<4x1024xf32>
    %139 = vector.shape_cast %137 : vector<1x1024xi1> to vector<1x1024xi1>
    %140 = vector.broadcast %139 : vector<1x1024xi1> to vector<4x1024xi1>
    %141 = arith.select %140, %135, %138 : vector<4x1024xi1>, vector<4x1024xf32>
    %cst_57 = arith.constant 0.000000e+00 : f32
    %142 = vector.broadcast %cst_57 : f32 to vector<4x31xf32>
    %143 = vector.extract_strided_slice %83 {offsets = [0, 31], sizes = [4, 993], strides = [1, 1]} : vector<4x1024xf32> to vector<4x993xf32>
    %144 = tpu.concatenate %143, %142 in 1 : vector<4x993xf32>, vector<4x31xf32> -> vector<4x1024xf32>
    %c31_i32_58 = arith.constant 31 : i32
    %145 = vector.broadcast %c31_i32_58 : i32 to vector<1x1024xi32>
    %146 = arith.cmpi slt, %88, %145 : vector<1x1024xi32>
    %c1_i32_59 = arith.constant 1 : i32
    %147 = vector.broadcast %c1_i32_59 : i32 to vector<1x1024xi32>
    %148 = arith.cmpi sge, %90, %147 : vector<1x1024xi32>
    %149 = arith.andi %146, %148 : vector<1x1024xi1>
    %cst_60 = arith.constant 0.000000e+00 : f32
    %150 = vector.broadcast %cst_60 : f32 to vector<4x1024xf32>
    %151 = vector.shape_cast %149 : vector<1x1024xi1> to vector<1x1024xi1>
    %152 = vector.broadcast %151 : vector<1x1024xi1> to vector<4x1024xi1>
    %153 = arith.select %152, %144, %150 : vector<4x1024xi1>, vector<4x1024xf32>
    %cst_61 = arith.constant 0.000000e+00 : f32
    %154 = vector.broadcast %cst_61 : f32 to vector<4x32xf32>
    %155 = vector.extract_strided_slice %83 {offsets = [0, 32], sizes = [4, 992], strides = [1, 1]} : vector<4x1024xf32> to vector<4x992xf32>
    %156 = tpu.concatenate %155, %154 in 1 : vector<4x992xf32>, vector<4x32xf32> -> vector<4x1024xf32>
    %c31_i32_62 = arith.constant 31 : i32
    %157 = vector.broadcast %c31_i32_62 : i32 to vector<1x1024xi32>
    %158 = arith.cmpi slt, %88, %157 : vector<1x1024xi32>
    %cst_63 = arith.constant 0.000000e+00 : f32
    %159 = vector.broadcast %cst_63 : f32 to vector<4x1024xf32>
    %160 = vector.shape_cast %158 : vector<1x1024xi1> to vector<1x1024xi1>
    %161 = vector.broadcast %160 : vector<1x1024xi1> to vector<4x1024xi1>
    %162 = arith.select %161, %156, %159 : vector<4x1024xi1>, vector<4x1024xf32>
    %cst_64 = arith.constant 0.000000e+00 : f32
    %163 = vector.broadcast %cst_64 : f32 to vector<4x33xf32>
    %164 = vector.extract_strided_slice %83 {offsets = [0, 33], sizes = [4, 991], strides = [1, 1]} : vector<4x1024xf32> to vector<4x991xf32>
    %165 = tpu.concatenate %164, %163 in 1 : vector<4x991xf32>, vector<4x33xf32> -> vector<4x1024xf32>
    %c31_i32_65 = arith.constant 31 : i32
    %166 = vector.broadcast %c31_i32_65 : i32 to vector<1x1024xi32>
    %167 = arith.cmpi slt, %88, %166 : vector<1x1024xi32>
    %c31_i32_66 = arith.constant 31 : i32
    %168 = vector.broadcast %c31_i32_66 : i32 to vector<1x1024xi32>
    %169 = arith.cmpi slt, %90, %168 : vector<1x1024xi32>
    %170 = arith.andi %167, %169 : vector<1x1024xi1>
    %cst_67 = arith.constant 0.000000e+00 : f32
    %171 = vector.broadcast %cst_67 : f32 to vector<4x1024xf32>
    %172 = vector.shape_cast %170 : vector<1x1024xi1> to vector<1x1024xi1>
    %173 = vector.broadcast %172 : vector<1x1024xi1> to vector<4x1024xi1>
    %174 = arith.select %173, %165, %171 : vector<4x1024xi1>, vector<4x1024xf32>
    %175 = tpu.concatenate %102, %111, %123, %132, %83, %141, %153, %162, %174 in 0 : vector<4x1024xf32>, vector<4x1024xf32>, vector<4x1024xf32>, vector<4x1024xf32>, vector<4x1024xf32>, vector<4x1024xf32>, vector<4x1024xf32>, vector<4x1024xf32>, vector<4x1024xf32> -> vector<36x1024xf32>
    %176 = arith.truncf %175 : vector<36x1024xf32> to vector<36x1024xbf16>
    %cst_68 = arith.constant dense<0.000000e+00> : vector<4x1024xf32>
    %177 = tpu.matmul %84, %176, %cst_68 {dimension_numbers = #tpu.dot_dimension_numbers<[1], [0], [0], [1], [0, 0, 1, 1], [], []>} : vector<4x36xbf16>, vector<36x1024xbf16>, vector<4x1024xf32> -> vector<4x1024xf32>
    %178 = vector.broadcast %85 : vector<4x1xf32> to vector<4x1024xf32>
    %179 = arith.addf %177, %178 : vector<4x1024xf32>
    %cst_69 = arith.constant 0.000000e+00 : f32
    %180 = vector.broadcast %cst_69 : f32 to vector<4x1024xf32>
    %181 = arith.maximumf %179, %180 : vector<4x1024xf32>
    %cst_70 = arith.constant 0.000000e+00 : f32
    %182 = vector.broadcast %cst_70 : f32 to vector<4x1xf32>
    %183 = vector.extract_strided_slice %181 {offsets = [0, 1], sizes = [4, 1023], strides = [1, 1]} : vector<4x1024xf32> to vector<4x1023xf32>
    %184 = tpu.concatenate %183, %182 in 1 : vector<4x1023xf32>, vector<4x1xf32> -> vector<4x1024xf32>
    %185 = arith.maximumf %181, %184 : vector<4x1024xf32>
    %cst_71 = arith.constant 0.000000e+00 : f32
    %186 = vector.broadcast %cst_71 : f32 to vector<4x32xf32>
    %187 = vector.extract_strided_slice %181 {offsets = [0, 32], sizes = [4, 992], strides = [1, 1]} : vector<4x1024xf32> to vector<4x992xf32>
    %188 = tpu.concatenate %187, %186 in 1 : vector<4x992xf32>, vector<4x32xf32> -> vector<4x1024xf32>
    %cst_72 = arith.constant 0.000000e+00 : f32
    %189 = vector.broadcast %cst_72 : f32 to vector<4x33xf32>
    %190 = vector.extract_strided_slice %181 {offsets = [0, 33], sizes = [4, 991], strides = [1, 1]} : vector<4x1024xf32> to vector<4x991xf32>
    %191 = tpu.concatenate %190, %189 in 1 : vector<4x991xf32>, vector<4x33xf32> -> vector<4x1024xf32>
    %192 = arith.maximumf %188, %191 : vector<4x1024xf32>
    %193 = arith.maximumf %185, %192 : vector<4x1024xf32>
    %194 = tpu.iota {dimensions = array<i32: 0>} : vector<1024x256xi32>
    %195 = tpu.iota {dimensions = array<i32: 1>} : vector<1024x256xi32>
    %c4_i32 = arith.constant 4 : i32
    %196 = vector.broadcast %c4_i32 : i32 to vector<1024x256xi32>
    %197 = arith.shrsi %195, %196 : vector<1024x256xi32>
    %c15_i32 = arith.constant 15 : i32
    %198 = vector.broadcast %c15_i32 : i32 to vector<1024x256xi32>
    %199 = arith.andi %195, %198 : vector<1024x256xi32>
    %c6_i32 = arith.constant 6 : i32
    %200 = vector.broadcast %c6_i32 : i32 to vector<1024x256xi32>
    %201 = arith.shli %197, %200 : vector<1024x256xi32>
    %c1_i32_73 = arith.constant 1 : i32
    %202 = vector.broadcast %c1_i32_73 : i32 to vector<1024x256xi32>
    %203 = arith.shli %199, %202 : vector<1024x256xi32>
    %204 = arith.addi %201, %203 : vector<1024x256xi32>
    %205 = arith.cmpi eq, %194, %204 : vector<1024x256xi32>
    %206 = arith.extui %205 : vector<1024x256xi1> to vector<1024x256xi32>
    %207 = arith.sitofp %206 : vector<1024x256xi32> to vector<1024x256xf32>
    %cst_74 = arith.constant dense<0.000000e+00> : vector<4x256xf32>
    %208 = tpu.matmul %193, %207, %cst_74 {dimension_numbers = #tpu.dot_dimension_numbers<[1], [0], [0], [1], [0, 0, 1, 1], [], []>} : vector<4x1024xf32>, vector<1024x256xf32>, vector<4x256xf32> -> vector<4x256xf32>
    %c0_75 = arith.constant 0 : index
    %c0_76 = arith.constant 0 : index
    %209 = vector.load %arg6[%c0_75, %c0_76] : memref<8x36xbf16, #tpu.memory_space<vmem>>, vector<8x36xbf16>
    %c0_77 = arith.constant 0 : index
    %c0_78 = arith.constant 0 : index
    %210 = vector.load %arg7[%c0_77, %c0_78] : memref<8x1xf32, #tpu.memory_space<vmem>>, vector<8x1xf32>
    %211 = tpu.iota {dimensions = array<i32: 1>} : vector<1x256xi32>
    %c4_i32_79 = arith.constant 4 : i32
    %212 = vector.broadcast %c4_i32_79 : i32 to vector<1x256xi32>
    %213 = arith.shrsi %211, %212 : vector<1x256xi32>
    %c15_i32_80 = arith.constant 15 : i32
    %214 = vector.broadcast %c15_i32_80 : i32 to vector<1x256xi32>
    %215 = arith.andi %211, %214 : vector<1x256xi32>
    %cst_81 = arith.constant 0.000000e+00 : f32
    %216 = vector.broadcast %cst_81 : f32 to vector<4x17xf32>
    %217 = vector.extract_strided_slice %208 {offsets = [0, 0], sizes = [4, 239], strides = [1, 1]} : vector<4x256xf32> to vector<4x239xf32>
    %218 = tpu.concatenate %216, %217 in 1 : vector<4x17xf32>, vector<4x239xf32> -> vector<4x256xf32>
    %c1_i32_82 = arith.constant 1 : i32
    %219 = vector.broadcast %c1_i32_82 : i32 to vector<1x256xi32>
    %220 = arith.cmpi sge, %213, %219 : vector<1x256xi32>
    %c1_i32_83 = arith.constant 1 : i32
    %221 = vector.broadcast %c1_i32_83 : i32 to vector<1x256xi32>
    %222 = arith.cmpi sge, %215, %221 : vector<1x256xi32>
    %223 = arith.andi %220, %222 : vector<1x256xi1>
    %cst_84 = arith.constant 0.000000e+00 : f32
    %224 = vector.broadcast %cst_84 : f32 to vector<4x256xf32>
    %225 = vector.shape_cast %223 : vector<1x256xi1> to vector<1x256xi1>
    %226 = vector.broadcast %225 : vector<1x256xi1> to vector<4x256xi1>
    %227 = arith.select %226, %218, %224 : vector<4x256xi1>, vector<4x256xf32>
    %cst_85 = arith.constant 0.000000e+00 : f32
    %228 = vector.broadcast %cst_85 : f32 to vector<4x16xf32>
    %229 = vector.extract_strided_slice %208 {offsets = [0, 0], sizes = [4, 240], strides = [1, 1]} : vector<4x256xf32> to vector<4x240xf32>
    %230 = tpu.concatenate %228, %229 in 1 : vector<4x16xf32>, vector<4x240xf32> -> vector<4x256xf32>
    %c1_i32_86 = arith.constant 1 : i32
    %231 = vector.broadcast %c1_i32_86 : i32 to vector<1x256xi32>
    %232 = arith.cmpi sge, %213, %231 : vector<1x256xi32>
    %cst_87 = arith.constant 0.000000e+00 : f32
    %233 = vector.broadcast %cst_87 : f32 to vector<4x256xf32>
    %234 = vector.shape_cast %232 : vector<1x256xi1> to vector<1x256xi1>
    %235 = vector.broadcast %234 : vector<1x256xi1> to vector<4x256xi1>
    %236 = arith.select %235, %230, %233 : vector<4x256xi1>, vector<4x256xf32>
    %cst_88 = arith.constant 0.000000e+00 : f32
    %237 = vector.broadcast %cst_88 : f32 to vector<4x15xf32>
    %238 = vector.extract_strided_slice %208 {offsets = [0, 0], sizes = [4, 241], strides = [1, 1]} : vector<4x256xf32> to vector<4x241xf32>
    %239 = tpu.concatenate %237, %238 in 1 : vector<4x15xf32>, vector<4x241xf32> -> vector<4x256xf32>
    %c1_i32_89 = arith.constant 1 : i32
    %240 = vector.broadcast %c1_i32_89 : i32 to vector<1x256xi32>
    %241 = arith.cmpi sge, %213, %240 : vector<1x256xi32>
    %c15_i32_90 = arith.constant 15 : i32
    %242 = vector.broadcast %c15_i32_90 : i32 to vector<1x256xi32>
    %243 = arith.cmpi slt, %215, %242 : vector<1x256xi32>
    %244 = arith.andi %241, %243 : vector<1x256xi1>
    %cst_91 = arith.constant 0.000000e+00 : f32
    %245 = vector.broadcast %cst_91 : f32 to vector<4x256xf32>
    %246 = vector.shape_cast %244 : vector<1x256xi1> to vector<1x256xi1>
    %247 = vector.broadcast %246 : vector<1x256xi1> to vector<4x256xi1>
    %248 = arith.select %247, %239, %245 : vector<4x256xi1>, vector<4x256xf32>
    %cst_92 = arith.constant 0.000000e+00 : f32
    %249 = vector.broadcast %cst_92 : f32 to vector<4x1xf32>
    %250 = vector.extract_strided_slice %208 {offsets = [0, 0], sizes = [4, 255], strides = [1, 1]} : vector<4x256xf32> to vector<4x255xf32>
    %251 = tpu.concatenate %249, %250 in 1 : vector<4x1xf32>, vector<4x255xf32> -> vector<4x256xf32>
    %c1_i32_93 = arith.constant 1 : i32
    %252 = vector.broadcast %c1_i32_93 : i32 to vector<1x256xi32>
    %253 = arith.cmpi sge, %215, %252 : vector<1x256xi32>
    %cst_94 = arith.constant 0.000000e+00 : f32
    %254 = vector.broadcast %cst_94 : f32 to vector<4x256xf32>
    %255 = vector.shape_cast %253 : vector<1x256xi1> to vector<1x256xi1>
    %256 = vector.broadcast %255 : vector<1x256xi1> to vector<4x256xi1>
    %257 = arith.select %256, %251, %254 : vector<4x256xi1>, vector<4x256xf32>
    %cst_95 = arith.constant 0.000000e+00 : f32
    %258 = vector.broadcast %cst_95 : f32 to vector<4x1xf32>
    %259 = vector.extract_strided_slice %208 {offsets = [0, 1], sizes = [4, 255], strides = [1, 1]} : vector<4x256xf32> to vector<4x255xf32>
    %260 = tpu.concatenate %259, %258 in 1 : vector<4x255xf32>, vector<4x1xf32> -> vector<4x256xf32>
    %c15_i32_96 = arith.constant 15 : i32
    %261 = vector.broadcast %c15_i32_96 : i32 to vector<1x256xi32>
    %262 = arith.cmpi slt, %215, %261 : vector<1x256xi32>
    %cst_97 = arith.constant 0.000000e+00 : f32
    %263 = vector.broadcast %cst_97 : f32 to vector<4x256xf32>
    %264 = vector.shape_cast %262 : vector<1x256xi1> to vector<1x256xi1>
    %265 = vector.broadcast %264 : vector<1x256xi1> to vector<4x256xi1>
    %266 = arith.select %265, %260, %263 : vector<4x256xi1>, vector<4x256xf32>
    %cst_98 = arith.constant 0.000000e+00 : f32
    %267 = vector.broadcast %cst_98 : f32 to vector<4x15xf32>
    %268 = vector.extract_strided_slice %208 {offsets = [0, 15], sizes = [4, 241], strides = [1, 1]} : vector<4x256xf32> to vector<4x241xf32>
    %269 = tpu.concatenate %268, %267 in 1 : vector<4x241xf32>, vector<4x15xf32> -> vector<4x256xf32>
    %c15_i32_99 = arith.constant 15 : i32
    %270 = vector.broadcast %c15_i32_99 : i32 to vector<1x256xi32>
    %271 = arith.cmpi slt, %213, %270 : vector<1x256xi32>
    %c1_i32_100 = arith.constant 1 : i32
    %272 = vector.broadcast %c1_i32_100 : i32 to vector<1x256xi32>
    %273 = arith.cmpi sge, %215, %272 : vector<1x256xi32>
    %274 = arith.andi %271, %273 : vector<1x256xi1>
    %cst_101 = arith.constant 0.000000e+00 : f32
    %275 = vector.broadcast %cst_101 : f32 to vector<4x256xf32>
    %276 = vector.shape_cast %274 : vector<1x256xi1> to vector<1x256xi1>
    %277 = vector.broadcast %276 : vector<1x256xi1> to vector<4x256xi1>
    %278 = arith.select %277, %269, %275 : vector<4x256xi1>, vector<4x256xf32>
    %cst_102 = arith.constant 0.000000e+00 : f32
    %279 = vector.broadcast %cst_102 : f32 to vector<4x16xf32>
    %280 = vector.extract_strided_slice %208 {offsets = [0, 16], sizes = [4, 240], strides = [1, 1]} : vector<4x256xf32> to vector<4x240xf32>
    %281 = tpu.concatenate %280, %279 in 1 : vector<4x240xf32>, vector<4x16xf32> -> vector<4x256xf32>
    %c15_i32_103 = arith.constant 15 : i32
    %282 = vector.broadcast %c15_i32_103 : i32 to vector<1x256xi32>
    %283 = arith.cmpi slt, %213, %282 : vector<1x256xi32>
    %cst_104 = arith.constant 0.000000e+00 : f32
    %284 = vector.broadcast %cst_104 : f32 to vector<4x256xf32>
    %285 = vector.shape_cast %283 : vector<1x256xi1> to vector<1x256xi1>
    %286 = vector.broadcast %285 : vector<1x256xi1> to vector<4x256xi1>
    %287 = arith.select %286, %281, %284 : vector<4x256xi1>, vector<4x256xf32>
    %cst_105 = arith.constant 0.000000e+00 : f32
    %288 = vector.broadcast %cst_105 : f32 to vector<4x17xf32>
    %289 = vector.extract_strided_slice %208 {offsets = [0, 17], sizes = [4, 239], strides = [1, 1]} : vector<4x256xf32> to vector<4x239xf32>
    %290 = tpu.concatenate %289, %288 in 1 : vector<4x239xf32>, vector<4x17xf32> -> vector<4x256xf32>
    %c15_i32_106 = arith.constant 15 : i32
    %291 = vector.broadcast %c15_i32_106 : i32 to vector<1x256xi32>
    %292 = arith.cmpi slt, %213, %291 : vector<1x256xi32>
    %c15_i32_107 = arith.constant 15 : i32
    %293 = vector.broadcast %c15_i32_107 : i32 to vector<1x256xi32>
    %294 = arith.cmpi slt, %215, %293 : vector<1x256xi32>
    %295 = arith.andi %292, %294 : vector<1x256xi1>
    %cst_108 = arith.constant 0.000000e+00 : f32
    %296 = vector.broadcast %cst_108 : f32 to vector<4x256xf32>
    %297 = vector.shape_cast %295 : vector<1x256xi1> to vector<1x256xi1>
    %298 = vector.broadcast %297 : vector<1x256xi1> to vector<4x256xi1>
    %299 = arith.select %298, %290, %296 : vector<4x256xi1>, vector<4x256xf32>
    %300 = tpu.concatenate %227, %236, %248, %257, %208, %266, %278, %287, %299 in 0 : vector<4x256xf32>, vector<4x256xf32>, vector<4x256xf32>, vector<4x256xf32>, vector<4x256xf32>, vector<4x256xf32>, vector<4x256xf32>, vector<4x256xf32>, vector<4x256xf32> -> vector<36x256xf32>
    %301 = arith.truncf %300 : vector<36x256xf32> to vector<36x256xbf16>
    %cst_109 = arith.constant dense<0.000000e+00> : vector<8x256xf32>
    %302 = tpu.matmul %209, %301, %cst_109 {dimension_numbers = #tpu.dot_dimension_numbers<[1], [0], [0], [1], [0, 0, 1, 1], [], []>} : vector<8x36xbf16>, vector<36x256xbf16>, vector<8x256xf32> -> vector<8x256xf32>
    %303 = vector.broadcast %210 : vector<8x1xf32> to vector<8x256xf32>
    %304 = arith.addf %302, %303 : vector<8x256xf32>
    %cst_110 = arith.constant 0.000000e+00 : f32
    %305 = vector.broadcast %cst_110 : f32 to vector<8x256xf32>
    %306 = arith.maximumf %304, %305 : vector<8x256xf32>
    %c0_111 = arith.constant 0 : index
    %c0_112 = arith.constant 0 : index
    %307 = vector.load %arg8[%c0_111, %c0_112] : memref<8x72xbf16, #tpu.memory_space<vmem>>, vector<8x72xbf16>
    %c0_113 = arith.constant 0 : index
    %c0_114 = arith.constant 0 : index
    %308 = vector.load %arg9[%c0_113, %c0_114] : memref<8x1xf32, #tpu.memory_space<vmem>>, vector<8x1xf32>
    %309 = tpu.iota {dimensions = array<i32: 1>} : vector<1x256xi32>
    %c4_i32_115 = arith.constant 4 : i32
    %310 = vector.broadcast %c4_i32_115 : i32 to vector<1x256xi32>
    %311 = arith.shrsi %309, %310 : vector<1x256xi32>
    %c15_i32_116 = arith.constant 15 : i32
    %312 = vector.broadcast %c15_i32_116 : i32 to vector<1x256xi32>
    %313 = arith.andi %309, %312 : vector<1x256xi32>
    %cst_117 = arith.constant 0.000000e+00 : f32
    %314 = vector.broadcast %cst_117 : f32 to vector<8x17xf32>
    %315 = vector.extract_strided_slice %306 {offsets = [0, 0], sizes = [8, 239], strides = [1, 1]} : vector<8x256xf32> to vector<8x239xf32>
    %316 = tpu.concatenate %314, %315 in 1 : vector<8x17xf32>, vector<8x239xf32> -> vector<8x256xf32>
    %c1_i32_118 = arith.constant 1 : i32
    %317 = vector.broadcast %c1_i32_118 : i32 to vector<1x256xi32>
    %318 = arith.cmpi sge, %311, %317 : vector<1x256xi32>
    %c1_i32_119 = arith.constant 1 : i32
    %319 = vector.broadcast %c1_i32_119 : i32 to vector<1x256xi32>
    %320 = arith.cmpi sge, %313, %319 : vector<1x256xi32>
    %321 = arith.andi %318, %320 : vector<1x256xi1>
    %cst_120 = arith.constant 0.000000e+00 : f32
    %322 = vector.broadcast %cst_120 : f32 to vector<8x256xf32>
    %323 = vector.shape_cast %321 : vector<1x256xi1> to vector<1x256xi1>
    %324 = vector.broadcast %323 : vector<1x256xi1> to vector<8x256xi1>
    %325 = arith.select %324, %316, %322 : vector<8x256xi1>, vector<8x256xf32>
    %cst_121 = arith.constant 0.000000e+00 : f32
    %326 = vector.broadcast %cst_121 : f32 to vector<8x16xf32>
    %327 = vector.extract_strided_slice %306 {offsets = [0, 0], sizes = [8, 240], strides = [1, 1]} : vector<8x256xf32> to vector<8x240xf32>
    %328 = tpu.concatenate %326, %327 in 1 : vector<8x16xf32>, vector<8x240xf32> -> vector<8x256xf32>
    %c1_i32_122 = arith.constant 1 : i32
    %329 = vector.broadcast %c1_i32_122 : i32 to vector<1x256xi32>
    %330 = arith.cmpi sge, %311, %329 : vector<1x256xi32>
    %cst_123 = arith.constant 0.000000e+00 : f32
    %331 = vector.broadcast %cst_123 : f32 to vector<8x256xf32>
    %332 = vector.shape_cast %330 : vector<1x256xi1> to vector<1x256xi1>
    %333 = vector.broadcast %332 : vector<1x256xi1> to vector<8x256xi1>
    %334 = arith.select %333, %328, %331 : vector<8x256xi1>, vector<8x256xf32>
    %cst_124 = arith.constant 0.000000e+00 : f32
    %335 = vector.broadcast %cst_124 : f32 to vector<8x15xf32>
    %336 = vector.extract_strided_slice %306 {offsets = [0, 0], sizes = [8, 241], strides = [1, 1]} : vector<8x256xf32> to vector<8x241xf32>
    %337 = tpu.concatenate %335, %336 in 1 : vector<8x15xf32>, vector<8x241xf32> -> vector<8x256xf32>
    %c1_i32_125 = arith.constant 1 : i32
    %338 = vector.broadcast %c1_i32_125 : i32 to vector<1x256xi32>
    %339 = arith.cmpi sge, %311, %338 : vector<1x256xi32>
    %c15_i32_126 = arith.constant 15 : i32
    %340 = vector.broadcast %c15_i32_126 : i32 to vector<1x256xi32>
    %341 = arith.cmpi slt, %313, %340 : vector<1x256xi32>
    %342 = arith.andi %339, %341 : vector<1x256xi1>
    %cst_127 = arith.constant 0.000000e+00 : f32
    %343 = vector.broadcast %cst_127 : f32 to vector<8x256xf32>
    %344 = vector.shape_cast %342 : vector<1x256xi1> to vector<1x256xi1>
    %345 = vector.broadcast %344 : vector<1x256xi1> to vector<8x256xi1>
    %346 = arith.select %345, %337, %343 : vector<8x256xi1>, vector<8x256xf32>
    %cst_128 = arith.constant 0.000000e+00 : f32
    %347 = vector.broadcast %cst_128 : f32 to vector<8x1xf32>
    %348 = vector.extract_strided_slice %306 {offsets = [0, 0], sizes = [8, 255], strides = [1, 1]} : vector<8x256xf32> to vector<8x255xf32>
    %349 = tpu.concatenate %347, %348 in 1 : vector<8x1xf32>, vector<8x255xf32> -> vector<8x256xf32>
    %c1_i32_129 = arith.constant 1 : i32
    %350 = vector.broadcast %c1_i32_129 : i32 to vector<1x256xi32>
    %351 = arith.cmpi sge, %313, %350 : vector<1x256xi32>
    %cst_130 = arith.constant 0.000000e+00 : f32
    %352 = vector.broadcast %cst_130 : f32 to vector<8x256xf32>
    %353 = vector.shape_cast %351 : vector<1x256xi1> to vector<1x256xi1>
    %354 = vector.broadcast %353 : vector<1x256xi1> to vector<8x256xi1>
    %355 = arith.select %354, %349, %352 : vector<8x256xi1>, vector<8x256xf32>
    %cst_131 = arith.constant 0.000000e+00 : f32
    %356 = vector.broadcast %cst_131 : f32 to vector<8x1xf32>
    %357 = vector.extract_strided_slice %306 {offsets = [0, 1], sizes = [8, 255], strides = [1, 1]} : vector<8x256xf32> to vector<8x255xf32>
    %358 = tpu.concatenate %357, %356 in 1 : vector<8x255xf32>, vector<8x1xf32> -> vector<8x256xf32>
    %c15_i32_132 = arith.constant 15 : i32
    %359 = vector.broadcast %c15_i32_132 : i32 to vector<1x256xi32>
    %360 = arith.cmpi slt, %313, %359 : vector<1x256xi32>
    %cst_133 = arith.constant 0.000000e+00 : f32
    %361 = vector.broadcast %cst_133 : f32 to vector<8x256xf32>
    %362 = vector.shape_cast %360 : vector<1x256xi1> to vector<1x256xi1>
    %363 = vector.broadcast %362 : vector<1x256xi1> to vector<8x256xi1>
    %364 = arith.select %363, %358, %361 : vector<8x256xi1>, vector<8x256xf32>
    %cst_134 = arith.constant 0.000000e+00 : f32
    %365 = vector.broadcast %cst_134 : f32 to vector<8x15xf32>
    %366 = vector.extract_strided_slice %306 {offsets = [0, 15], sizes = [8, 241], strides = [1, 1]} : vector<8x256xf32> to vector<8x241xf32>
    %367 = tpu.concatenate %366, %365 in 1 : vector<8x241xf32>, vector<8x15xf32> -> vector<8x256xf32>
    %c15_i32_135 = arith.constant 15 : i32
    %368 = vector.broadcast %c15_i32_135 : i32 to vector<1x256xi32>
    %369 = arith.cmpi slt, %311, %368 : vector<1x256xi32>
    %c1_i32_136 = arith.constant 1 : i32
    %370 = vector.broadcast %c1_i32_136 : i32 to vector<1x256xi32>
    %371 = arith.cmpi sge, %313, %370 : vector<1x256xi32>
    %372 = arith.andi %369, %371 : vector<1x256xi1>
    %cst_137 = arith.constant 0.000000e+00 : f32
    %373 = vector.broadcast %cst_137 : f32 to vector<8x256xf32>
    %374 = vector.shape_cast %372 : vector<1x256xi1> to vector<1x256xi1>
    %375 = vector.broadcast %374 : vector<1x256xi1> to vector<8x256xi1>
    %376 = arith.select %375, %367, %373 : vector<8x256xi1>, vector<8x256xf32>
    %cst_138 = arith.constant 0.000000e+00 : f32
    %377 = vector.broadcast %cst_138 : f32 to vector<8x16xf32>
    %378 = vector.extract_strided_slice %306 {offsets = [0, 16], sizes = [8, 240], strides = [1, 1]} : vector<8x256xf32> to vector<8x240xf32>
    %379 = tpu.concatenate %378, %377 in 1 : vector<8x240xf32>, vector<8x16xf32> -> vector<8x256xf32>
    %c15_i32_139 = arith.constant 15 : i32
    %380 = vector.broadcast %c15_i32_139 : i32 to vector<1x256xi32>
    %381 = arith.cmpi slt, %311, %380 : vector<1x256xi32>
    %cst_140 = arith.constant 0.000000e+00 : f32
    %382 = vector.broadcast %cst_140 : f32 to vector<8x256xf32>
    %383 = vector.shape_cast %381 : vector<1x256xi1> to vector<1x256xi1>
    %384 = vector.broadcast %383 : vector<1x256xi1> to vector<8x256xi1>
    %385 = arith.select %384, %379, %382 : vector<8x256xi1>, vector<8x256xf32>
    %cst_141 = arith.constant 0.000000e+00 : f32
    %386 = vector.broadcast %cst_141 : f32 to vector<8x17xf32>
    %387 = vector.extract_strided_slice %306 {offsets = [0, 17], sizes = [8, 239], strides = [1, 1]} : vector<8x256xf32> to vector<8x239xf32>
    %388 = tpu.concatenate %387, %386 in 1 : vector<8x239xf32>, vector<8x17xf32> -> vector<8x256xf32>
    %c15_i32_142 = arith.constant 15 : i32
    %389 = vector.broadcast %c15_i32_142 : i32 to vector<1x256xi32>
    %390 = arith.cmpi slt, %311, %389 : vector<1x256xi32>
    %c15_i32_143 = arith.constant 15 : i32
    %391 = vector.broadcast %c15_i32_143 : i32 to vector<1x256xi32>
    %392 = arith.cmpi slt, %313, %391 : vector<1x256xi32>
    %393 = arith.andi %390, %392 : vector<1x256xi1>
    %cst_144 = arith.constant 0.000000e+00 : f32
    %394 = vector.broadcast %cst_144 : f32 to vector<8x256xf32>
    %395 = vector.shape_cast %393 : vector<1x256xi1> to vector<1x256xi1>
    %396 = vector.broadcast %395 : vector<1x256xi1> to vector<8x256xi1>
    %397 = arith.select %396, %388, %394 : vector<8x256xi1>, vector<8x256xf32>
    %398 = tpu.concatenate %325, %334, %346, %355, %306, %364, %376, %385, %397 in 0 : vector<8x256xf32>, vector<8x256xf32>, vector<8x256xf32>, vector<8x256xf32>, vector<8x256xf32>, vector<8x256xf32>, vector<8x256xf32>, vector<8x256xf32>, vector<8x256xf32> -> vector<72x256xf32>
    %399 = arith.truncf %398 : vector<72x256xf32> to vector<72x256xbf16>
    %cst_145 = arith.constant dense<0.000000e+00> : vector<8x256xf32>
    %400 = tpu.matmul %307, %399, %cst_145 {dimension_numbers = #tpu.dot_dimension_numbers<[1], [0], [0], [1], [0, 0, 1, 1], [], []>} : vector<8x72xbf16>, vector<72x256xbf16>, vector<8x256xf32> -> vector<8x256xf32>
    %401 = vector.broadcast %308 : vector<8x1xf32> to vector<8x256xf32>
    %402 = arith.addf %400, %401 : vector<8x256xf32>
    %cst_146 = arith.constant 0.000000e+00 : f32
    %403 = vector.broadcast %cst_146 : f32 to vector<8x256xf32>
    %404 = arith.maximumf %402, %403 : vector<8x256xf32>
    %cst_147 = arith.constant 0.000000e+00 : f32
    %405 = vector.broadcast %cst_147 : f32 to vector<8x1xf32>
    %406 = vector.extract_strided_slice %404 {offsets = [0, 1], sizes = [8, 255], strides = [1, 1]} : vector<8x256xf32> to vector<8x255xf32>
    %407 = tpu.concatenate %406, %405 in 1 : vector<8x255xf32>, vector<8x1xf32> -> vector<8x256xf32>
    %408 = arith.maximumf %404, %407 : vector<8x256xf32>
    %cst_148 = arith.constant 0.000000e+00 : f32
    %409 = vector.broadcast %cst_148 : f32 to vector<8x16xf32>
    %410 = vector.extract_strided_slice %404 {offsets = [0, 16], sizes = [8, 240], strides = [1, 1]} : vector<8x256xf32> to vector<8x240xf32>
    %411 = tpu.concatenate %410, %409 in 1 : vector<8x240xf32>, vector<8x16xf32> -> vector<8x256xf32>
    %cst_149 = arith.constant 0.000000e+00 : f32
    %412 = vector.broadcast %cst_149 : f32 to vector<8x17xf32>
    %413 = vector.extract_strided_slice %404 {offsets = [0, 17], sizes = [8, 239], strides = [1, 1]} : vector<8x256xf32> to vector<8x239xf32>
    %414 = tpu.concatenate %413, %412 in 1 : vector<8x239xf32>, vector<8x17xf32> -> vector<8x256xf32>
    %415 = arith.maximumf %411, %414 : vector<8x256xf32>
    %416 = arith.maximumf %408, %415 : vector<8x256xf32>
    %417 = tpu.iota {dimensions = array<i32: 0>} : vector<256x64xi32>
    %418 = tpu.iota {dimensions = array<i32: 1>} : vector<256x64xi32>
    %c3_i32 = arith.constant 3 : i32
    %419 = vector.broadcast %c3_i32 : i32 to vector<256x64xi32>
    %420 = arith.shrsi %418, %419 : vector<256x64xi32>
    %c7_i32 = arith.constant 7 : i32
    %421 = vector.broadcast %c7_i32 : i32 to vector<256x64xi32>
    %422 = arith.andi %418, %421 : vector<256x64xi32>
    %c5_i32_150 = arith.constant 5 : i32
    %423 = vector.broadcast %c5_i32_150 : i32 to vector<256x64xi32>
    %424 = arith.shli %420, %423 : vector<256x64xi32>
    %c1_i32_151 = arith.constant 1 : i32
    %425 = vector.broadcast %c1_i32_151 : i32 to vector<256x64xi32>
    %426 = arith.shli %422, %425 : vector<256x64xi32>
    %427 = arith.addi %424, %426 : vector<256x64xi32>
    %428 = arith.cmpi eq, %417, %427 : vector<256x64xi32>
    %429 = arith.extui %428 : vector<256x64xi1> to vector<256x64xi32>
    %430 = arith.sitofp %429 : vector<256x64xi32> to vector<256x64xf32>
    %cst_152 = arith.constant dense<0.000000e+00> : vector<8x64xf32>
    %431 = tpu.matmul %416, %430, %cst_152 {dimension_numbers = #tpu.dot_dimension_numbers<[1], [0], [0], [1], [0, 0, 1, 1], [], []>} : vector<8x256xf32>, vector<256x64xf32>, vector<8x64xf32> -> vector<8x64xf32>
    %c0_153 = arith.constant 0 : index
    %c0_154 = arith.constant 0 : index
    %432 = vector.load %arg10[%c0_153, %c0_154] : memref<16x72xbf16, #tpu.memory_space<vmem>>, vector<16x72xbf16>
    %c0_155 = arith.constant 0 : index
    %c0_156 = arith.constant 0 : index
    %433 = vector.load %arg11[%c0_155, %c0_156] : memref<16x1xf32, #tpu.memory_space<vmem>>, vector<16x1xf32>
    %434 = tpu.iota {dimensions = array<i32: 1>} : vector<1x64xi32>
    %c3_i32_157 = arith.constant 3 : i32
    %435 = vector.broadcast %c3_i32_157 : i32 to vector<1x64xi32>
    %436 = arith.shrsi %434, %435 : vector<1x64xi32>
    %c7_i32_158 = arith.constant 7 : i32
    %437 = vector.broadcast %c7_i32_158 : i32 to vector<1x64xi32>
    %438 = arith.andi %434, %437 : vector<1x64xi32>
    %cst_159 = arith.constant 0.000000e+00 : f32
    %439 = vector.broadcast %cst_159 : f32 to vector<8x9xf32>
    %440 = vector.extract_strided_slice %431 {offsets = [0, 0], sizes = [8, 55], strides = [1, 1]} : vector<8x64xf32> to vector<8x55xf32>
    %441 = tpu.concatenate %439, %440 in 1 : vector<8x9xf32>, vector<8x55xf32> -> vector<8x64xf32>
    %c1_i32_160 = arith.constant 1 : i32
    %442 = vector.broadcast %c1_i32_160 : i32 to vector<1x64xi32>
    %443 = arith.cmpi sge, %436, %442 : vector<1x64xi32>
    %c1_i32_161 = arith.constant 1 : i32
    %444 = vector.broadcast %c1_i32_161 : i32 to vector<1x64xi32>
    %445 = arith.cmpi sge, %438, %444 : vector<1x64xi32>
    %446 = arith.andi %443, %445 : vector<1x64xi1>
    %cst_162 = arith.constant 0.000000e+00 : f32
    %447 = vector.broadcast %cst_162 : f32 to vector<8x64xf32>
    %448 = vector.shape_cast %446 : vector<1x64xi1> to vector<1x64xi1>
    %449 = vector.broadcast %448 : vector<1x64xi1> to vector<8x64xi1>
    %450 = arith.select %449, %441, %447 : vector<8x64xi1>, vector<8x64xf32>
    %cst_163 = arith.constant 0.000000e+00 : f32
    %451 = vector.broadcast %cst_163 : f32 to vector<8x8xf32>
    %452 = vector.extract_strided_slice %431 {offsets = [0, 0], sizes = [8, 56], strides = [1, 1]} : vector<8x64xf32> to vector<8x56xf32>
    %453 = tpu.concatenate %451, %452 in 1 : vector<8x8xf32>, vector<8x56xf32> -> vector<8x64xf32>
    %c1_i32_164 = arith.constant 1 : i32
    %454 = vector.broadcast %c1_i32_164 : i32 to vector<1x64xi32>
    %455 = arith.cmpi sge, %436, %454 : vector<1x64xi32>
    %cst_165 = arith.constant 0.000000e+00 : f32
    %456 = vector.broadcast %cst_165 : f32 to vector<8x64xf32>
    %457 = vector.shape_cast %455 : vector<1x64xi1> to vector<1x64xi1>
    %458 = vector.broadcast %457 : vector<1x64xi1> to vector<8x64xi1>
    %459 = arith.select %458, %453, %456 : vector<8x64xi1>, vector<8x64xf32>
    %cst_166 = arith.constant 0.000000e+00 : f32
    %460 = vector.broadcast %cst_166 : f32 to vector<8x7xf32>
    %461 = vector.extract_strided_slice %431 {offsets = [0, 0], sizes = [8, 57], strides = [1, 1]} : vector<8x64xf32> to vector<8x57xf32>
    %462 = tpu.concatenate %460, %461 in 1 : vector<8x7xf32>, vector<8x57xf32> -> vector<8x64xf32>
    %c1_i32_167 = arith.constant 1 : i32
    %463 = vector.broadcast %c1_i32_167 : i32 to vector<1x64xi32>
    %464 = arith.cmpi sge, %436, %463 : vector<1x64xi32>
    %c7_i32_168 = arith.constant 7 : i32
    %465 = vector.broadcast %c7_i32_168 : i32 to vector<1x64xi32>
    %466 = arith.cmpi slt, %438, %465 : vector<1x64xi32>
    %467 = arith.andi %464, %466 : vector<1x64xi1>
    %cst_169 = arith.constant 0.000000e+00 : f32
    %468 = vector.broadcast %cst_169 : f32 to vector<8x64xf32>
    %469 = vector.shape_cast %467 : vector<1x64xi1> to vector<1x64xi1>
    %470 = vector.broadcast %469 : vector<1x64xi1> to vector<8x64xi1>
    %471 = arith.select %470, %462, %468 : vector<8x64xi1>, vector<8x64xf32>
    %cst_170 = arith.constant 0.000000e+00 : f32
    %472 = vector.broadcast %cst_170 : f32 to vector<8x1xf32>
    %473 = vector.extract_strided_slice %431 {offsets = [0, 0], sizes = [8, 63], strides = [1, 1]} : vector<8x64xf32> to vector<8x63xf32>
    %474 = tpu.concatenate %472, %473 in 1 : vector<8x1xf32>, vector<8x63xf32> -> vector<8x64xf32>
    %c1_i32_171 = arith.constant 1 : i32
    %475 = vector.broadcast %c1_i32_171 : i32 to vector<1x64xi32>
    %476 = arith.cmpi sge, %438, %475 : vector<1x64xi32>
    %cst_172 = arith.constant 0.000000e+00 : f32
    %477 = vector.broadcast %cst_172 : f32 to vector<8x64xf32>
    %478 = vector.shape_cast %476 : vector<1x64xi1> to vector<1x64xi1>
    %479 = vector.broadcast %478 : vector<1x64xi1> to vector<8x64xi1>
    %480 = arith.select %479, %474, %477 : vector<8x64xi1>, vector<8x64xf32>
    %cst_173 = arith.constant 0.000000e+00 : f32
    %481 = vector.broadcast %cst_173 : f32 to vector<8x1xf32>
    %482 = vector.extract_strided_slice %431 {offsets = [0, 1], sizes = [8, 63], strides = [1, 1]} : vector<8x64xf32> to vector<8x63xf32>
    %483 = tpu.concatenate %482, %481 in 1 : vector<8x63xf32>, vector<8x1xf32> -> vector<8x64xf32>
    %c7_i32_174 = arith.constant 7 : i32
    %484 = vector.broadcast %c7_i32_174 : i32 to vector<1x64xi32>
    %485 = arith.cmpi slt, %438, %484 : vector<1x64xi32>
    %cst_175 = arith.constant 0.000000e+00 : f32
    %486 = vector.broadcast %cst_175 : f32 to vector<8x64xf32>
    %487 = vector.shape_cast %485 : vector<1x64xi1> to vector<1x64xi1>
    %488 = vector.broadcast %487 : vector<1x64xi1> to vector<8x64xi1>
    %489 = arith.select %488, %483, %486 : vector<8x64xi1>, vector<8x64xf32>
    %cst_176 = arith.constant 0.000000e+00 : f32
    %490 = vector.broadcast %cst_176 : f32 to vector<8x7xf32>
    %491 = vector.extract_strided_slice %431 {offsets = [0, 7], sizes = [8, 57], strides = [1, 1]} : vector<8x64xf32> to vector<8x57xf32>
    %492 = tpu.concatenate %491, %490 in 1 : vector<8x57xf32>, vector<8x7xf32> -> vector<8x64xf32>
    %c7_i32_177 = arith.constant 7 : i32
    %493 = vector.broadcast %c7_i32_177 : i32 to vector<1x64xi32>
    %494 = arith.cmpi slt, %436, %493 : vector<1x64xi32>
    %c1_i32_178 = arith.constant 1 : i32
    %495 = vector.broadcast %c1_i32_178 : i32 to vector<1x64xi32>
    %496 = arith.cmpi sge, %438, %495 : vector<1x64xi32>
    %497 = arith.andi %494, %496 : vector<1x64xi1>
    %cst_179 = arith.constant 0.000000e+00 : f32
    %498 = vector.broadcast %cst_179 : f32 to vector<8x64xf32>
    %499 = vector.shape_cast %497 : vector<1x64xi1> to vector<1x64xi1>
    %500 = vector.broadcast %499 : vector<1x64xi1> to vector<8x64xi1>
    %501 = arith.select %500, %492, %498 : vector<8x64xi1>, vector<8x64xf32>
    %cst_180 = arith.constant 0.000000e+00 : f32
    %502 = vector.broadcast %cst_180 : f32 to vector<8x8xf32>
    %503 = vector.extract_strided_slice %431 {offsets = [0, 8], sizes = [8, 56], strides = [1, 1]} : vector<8x64xf32> to vector<8x56xf32>
    %504 = tpu.concatenate %503, %502 in 1 : vector<8x56xf32>, vector<8x8xf32> -> vector<8x64xf32>
    %c7_i32_181 = arith.constant 7 : i32
    %505 = vector.broadcast %c7_i32_181 : i32 to vector<1x64xi32>
    %506 = arith.cmpi slt, %436, %505 : vector<1x64xi32>
    %cst_182 = arith.constant 0.000000e+00 : f32
    %507 = vector.broadcast %cst_182 : f32 to vector<8x64xf32>
    %508 = vector.shape_cast %506 : vector<1x64xi1> to vector<1x64xi1>
    %509 = vector.broadcast %508 : vector<1x64xi1> to vector<8x64xi1>
    %510 = arith.select %509, %504, %507 : vector<8x64xi1>, vector<8x64xf32>
    %cst_183 = arith.constant 0.000000e+00 : f32
    %511 = vector.broadcast %cst_183 : f32 to vector<8x9xf32>
    %512 = vector.extract_strided_slice %431 {offsets = [0, 9], sizes = [8, 55], strides = [1, 1]} : vector<8x64xf32> to vector<8x55xf32>
    %513 = tpu.concatenate %512, %511 in 1 : vector<8x55xf32>, vector<8x9xf32> -> vector<8x64xf32>
    %c7_i32_184 = arith.constant 7 : i32
    %514 = vector.broadcast %c7_i32_184 : i32 to vector<1x64xi32>
    %515 = arith.cmpi slt, %436, %514 : vector<1x64xi32>
    %c7_i32_185 = arith.constant 7 : i32
    %516 = vector.broadcast %c7_i32_185 : i32 to vector<1x64xi32>
    %517 = arith.cmpi slt, %438, %516 : vector<1x64xi32>
    %518 = arith.andi %515, %517 : vector<1x64xi1>
    %cst_186 = arith.constant 0.000000e+00 : f32
    %519 = vector.broadcast %cst_186 : f32 to vector<8x64xf32>
    %520 = vector.shape_cast %518 : vector<1x64xi1> to vector<1x64xi1>
    %521 = vector.broadcast %520 : vector<1x64xi1> to vector<8x64xi1>
    %522 = arith.select %521, %513, %519 : vector<8x64xi1>, vector<8x64xf32>
    %523 = tpu.concatenate %450, %459, %471, %480, %431, %489, %501, %510, %522 in 0 : vector<8x64xf32>, vector<8x64xf32>, vector<8x64xf32>, vector<8x64xf32>, vector<8x64xf32>, vector<8x64xf32>, vector<8x64xf32>, vector<8x64xf32>, vector<8x64xf32> -> vector<72x64xf32>
    %524 = arith.truncf %523 : vector<72x64xf32> to vector<72x64xbf16>
    %cst_187 = arith.constant dense<0.000000e+00> : vector<16x64xf32>
    %525 = tpu.matmul %432, %524, %cst_187 {dimension_numbers = #tpu.dot_dimension_numbers<[1], [0], [0], [1], [0, 0, 1, 1], [], []>} : vector<16x72xbf16>, vector<72x64xbf16>, vector<16x64xf32> -> vector<16x64xf32>
    %526 = vector.broadcast %433 : vector<16x1xf32> to vector<16x64xf32>
    %527 = arith.addf %525, %526 : vector<16x64xf32>
    %cst_188 = arith.constant 0.000000e+00 : f32
    %528 = vector.broadcast %cst_188 : f32 to vector<16x64xf32>
    %529 = arith.maximumf %527, %528 : vector<16x64xf32>
    %c0_189 = arith.constant 0 : index
    %c0_190 = arith.constant 0 : index
    %530 = vector.load %arg12[%c0_189, %c0_190] : memref<16x144xbf16, #tpu.memory_space<vmem>>, vector<16x144xbf16>
    %c0_191 = arith.constant 0 : index
    %c0_192 = arith.constant 0 : index
    %531 = vector.load %arg13[%c0_191, %c0_192] : memref<16x1xf32, #tpu.memory_space<vmem>>, vector<16x1xf32>
    %532 = tpu.iota {dimensions = array<i32: 1>} : vector<1x64xi32>
    %c3_i32_193 = arith.constant 3 : i32
    %533 = vector.broadcast %c3_i32_193 : i32 to vector<1x64xi32>
    %534 = arith.shrsi %532, %533 : vector<1x64xi32>
    %c7_i32_194 = arith.constant 7 : i32
    %535 = vector.broadcast %c7_i32_194 : i32 to vector<1x64xi32>
    %536 = arith.andi %532, %535 : vector<1x64xi32>
    %cst_195 = arith.constant 0.000000e+00 : f32
    %537 = vector.broadcast %cst_195 : f32 to vector<16x9xf32>
    %538 = vector.extract_strided_slice %529 {offsets = [0, 0], sizes = [16, 55], strides = [1, 1]} : vector<16x64xf32> to vector<16x55xf32>
    %539 = tpu.concatenate %537, %538 in 1 : vector<16x9xf32>, vector<16x55xf32> -> vector<16x64xf32>
    %c1_i32_196 = arith.constant 1 : i32
    %540 = vector.broadcast %c1_i32_196 : i32 to vector<1x64xi32>
    %541 = arith.cmpi sge, %534, %540 : vector<1x64xi32>
    %c1_i32_197 = arith.constant 1 : i32
    %542 = vector.broadcast %c1_i32_197 : i32 to vector<1x64xi32>
    %543 = arith.cmpi sge, %536, %542 : vector<1x64xi32>
    %544 = arith.andi %541, %543 : vector<1x64xi1>
    %cst_198 = arith.constant 0.000000e+00 : f32
    %545 = vector.broadcast %cst_198 : f32 to vector<16x64xf32>
    %546 = vector.shape_cast %544 : vector<1x64xi1> to vector<1x64xi1>
    %547 = vector.broadcast %546 : vector<1x64xi1> to vector<16x64xi1>
    %548 = arith.select %547, %539, %545 : vector<16x64xi1>, vector<16x64xf32>
    %cst_199 = arith.constant 0.000000e+00 : f32
    %549 = vector.broadcast %cst_199 : f32 to vector<16x8xf32>
    %550 = vector.extract_strided_slice %529 {offsets = [0, 0], sizes = [16, 56], strides = [1, 1]} : vector<16x64xf32> to vector<16x56xf32>
    %551 = tpu.concatenate %549, %550 in 1 : vector<16x8xf32>, vector<16x56xf32> -> vector<16x64xf32>
    %c1_i32_200 = arith.constant 1 : i32
    %552 = vector.broadcast %c1_i32_200 : i32 to vector<1x64xi32>
    %553 = arith.cmpi sge, %534, %552 : vector<1x64xi32>
    %cst_201 = arith.constant 0.000000e+00 : f32
    %554 = vector.broadcast %cst_201 : f32 to vector<16x64xf32>
    %555 = vector.shape_cast %553 : vector<1x64xi1> to vector<1x64xi1>
    %556 = vector.broadcast %555 : vector<1x64xi1> to vector<16x64xi1>
    %557 = arith.select %556, %551, %554 : vector<16x64xi1>, vector<16x64xf32>
    %cst_202 = arith.constant 0.000000e+00 : f32
    %558 = vector.broadcast %cst_202 : f32 to vector<16x7xf32>
    %559 = vector.extract_strided_slice %529 {offsets = [0, 0], sizes = [16, 57], strides = [1, 1]} : vector<16x64xf32> to vector<16x57xf32>
    %560 = tpu.concatenate %558, %559 in 1 : vector<16x7xf32>, vector<16x57xf32> -> vector<16x64xf32>
    %c1_i32_203 = arith.constant 1 : i32
    %561 = vector.broadcast %c1_i32_203 : i32 to vector<1x64xi32>
    %562 = arith.cmpi sge, %534, %561 : vector<1x64xi32>
    %c7_i32_204 = arith.constant 7 : i32
    %563 = vector.broadcast %c7_i32_204 : i32 to vector<1x64xi32>
    %564 = arith.cmpi slt, %536, %563 : vector<1x64xi32>
    %565 = arith.andi %562, %564 : vector<1x64xi1>
    %cst_205 = arith.constant 0.000000e+00 : f32
    %566 = vector.broadcast %cst_205 : f32 to vector<16x64xf32>
    %567 = vector.shape_cast %565 : vector<1x64xi1> to vector<1x64xi1>
    %568 = vector.broadcast %567 : vector<1x64xi1> to vector<16x64xi1>
    %569 = arith.select %568, %560, %566 : vector<16x64xi1>, vector<16x64xf32>
    %cst_206 = arith.constant 0.000000e+00 : f32
    %570 = vector.broadcast %cst_206 : f32 to vector<16x1xf32>
    %571 = vector.extract_strided_slice %529 {offsets = [0, 0], sizes = [16, 63], strides = [1, 1]} : vector<16x64xf32> to vector<16x63xf32>
    %572 = tpu.concatenate %570, %571 in 1 : vector<16x1xf32>, vector<16x63xf32> -> vector<16x64xf32>
    %c1_i32_207 = arith.constant 1 : i32
    %573 = vector.broadcast %c1_i32_207 : i32 to vector<1x64xi32>
    %574 = arith.cmpi sge, %536, %573 : vector<1x64xi32>
    %cst_208 = arith.constant 0.000000e+00 : f32
    %575 = vector.broadcast %cst_208 : f32 to vector<16x64xf32>
    %576 = vector.shape_cast %574 : vector<1x64xi1> to vector<1x64xi1>
    %577 = vector.broadcast %576 : vector<1x64xi1> to vector<16x64xi1>
    %578 = arith.select %577, %572, %575 : vector<16x64xi1>, vector<16x64xf32>
    %cst_209 = arith.constant 0.000000e+00 : f32
    %579 = vector.broadcast %cst_209 : f32 to vector<16x1xf32>
    %580 = vector.extract_strided_slice %529 {offsets = [0, 1], sizes = [16, 63], strides = [1, 1]} : vector<16x64xf32> to vector<16x63xf32>
    %581 = tpu.concatenate %580, %579 in 1 : vector<16x63xf32>, vector<16x1xf32> -> vector<16x64xf32>
    %c7_i32_210 = arith.constant 7 : i32
    %582 = vector.broadcast %c7_i32_210 : i32 to vector<1x64xi32>
    %583 = arith.cmpi slt, %536, %582 : vector<1x64xi32>
    %cst_211 = arith.constant 0.000000e+00 : f32
    %584 = vector.broadcast %cst_211 : f32 to vector<16x64xf32>
    %585 = vector.shape_cast %583 : vector<1x64xi1> to vector<1x64xi1>
    %586 = vector.broadcast %585 : vector<1x64xi1> to vector<16x64xi1>
    %587 = arith.select %586, %581, %584 : vector<16x64xi1>, vector<16x64xf32>
    %cst_212 = arith.constant 0.000000e+00 : f32
    %588 = vector.broadcast %cst_212 : f32 to vector<16x7xf32>
    %589 = vector.extract_strided_slice %529 {offsets = [0, 7], sizes = [16, 57], strides = [1, 1]} : vector<16x64xf32> to vector<16x57xf32>
    %590 = tpu.concatenate %589, %588 in 1 : vector<16x57xf32>, vector<16x7xf32> -> vector<16x64xf32>
    %c7_i32_213 = arith.constant 7 : i32
    %591 = vector.broadcast %c7_i32_213 : i32 to vector<1x64xi32>
    %592 = arith.cmpi slt, %534, %591 : vector<1x64xi32>
    %c1_i32_214 = arith.constant 1 : i32
    %593 = vector.broadcast %c1_i32_214 : i32 to vector<1x64xi32>
    %594 = arith.cmpi sge, %536, %593 : vector<1x64xi32>
    %595 = arith.andi %592, %594 : vector<1x64xi1>
    %cst_215 = arith.constant 0.000000e+00 : f32
    %596 = vector.broadcast %cst_215 : f32 to vector<16x64xf32>
    %597 = vector.shape_cast %595 : vector<1x64xi1> to vector<1x64xi1>
    %598 = vector.broadcast %597 : vector<1x64xi1> to vector<16x64xi1>
    %599 = arith.select %598, %590, %596 : vector<16x64xi1>, vector<16x64xf32>
    %cst_216 = arith.constant 0.000000e+00 : f32
    %600 = vector.broadcast %cst_216 : f32 to vector<16x8xf32>
    %601 = vector.extract_strided_slice %529 {offsets = [0, 8], sizes = [16, 56], strides = [1, 1]} : vector<16x64xf32> to vector<16x56xf32>
    %602 = tpu.concatenate %601, %600 in 1 : vector<16x56xf32>, vector<16x8xf32> -> vector<16x64xf32>
    %c7_i32_217 = arith.constant 7 : i32
    %603 = vector.broadcast %c7_i32_217 : i32 to vector<1x64xi32>
    %604 = arith.cmpi slt, %534, %603 : vector<1x64xi32>
    %cst_218 = arith.constant 0.000000e+00 : f32
    %605 = vector.broadcast %cst_218 : f32 to vector<16x64xf32>
    %606 = vector.shape_cast %604 : vector<1x64xi1> to vector<1x64xi1>
    %607 = vector.broadcast %606 : vector<1x64xi1> to vector<16x64xi1>
    %608 = arith.select %607, %602, %605 : vector<16x64xi1>, vector<16x64xf32>
    %cst_219 = arith.constant 0.000000e+00 : f32
    %609 = vector.broadcast %cst_219 : f32 to vector<16x9xf32>
    %610 = vector.extract_strided_slice %529 {offsets = [0, 9], sizes = [16, 55], strides = [1, 1]} : vector<16x64xf32> to vector<16x55xf32>
    %611 = tpu.concatenate %610, %609 in 1 : vector<16x55xf32>, vector<16x9xf32> -> vector<16x64xf32>
    %c7_i32_220 = arith.constant 7 : i32
    %612 = vector.broadcast %c7_i32_220 : i32 to vector<1x64xi32>
    %613 = arith.cmpi slt, %534, %612 : vector<1x64xi32>
    %c7_i32_221 = arith.constant 7 : i32
    %614 = vector.broadcast %c7_i32_221 : i32 to vector<1x64xi32>
    %615 = arith.cmpi slt, %536, %614 : vector<1x64xi32>
    %616 = arith.andi %613, %615 : vector<1x64xi1>
    %cst_222 = arith.constant 0.000000e+00 : f32
    %617 = vector.broadcast %cst_222 : f32 to vector<16x64xf32>
    %618 = vector.shape_cast %616 : vector<1x64xi1> to vector<1x64xi1>
    %619 = vector.broadcast %618 : vector<1x64xi1> to vector<16x64xi1>
    %620 = arith.select %619, %611, %617 : vector<16x64xi1>, vector<16x64xf32>
    %621 = tpu.concatenate %548, %557, %569, %578, %529, %587, %599, %608, %620 in 0 : vector<16x64xf32>, vector<16x64xf32>, vector<16x64xf32>, vector<16x64xf32>, vector<16x64xf32>, vector<16x64xf32>, vector<16x64xf32>, vector<16x64xf32>, vector<16x64xf32> -> vector<144x64xf32>
    %622 = arith.truncf %621 : vector<144x64xf32> to vector<144x64xbf16>
    %cst_223 = arith.constant dense<0.000000e+00> : vector<16x64xf32>
    %623 = tpu.matmul %530, %622, %cst_223 {dimension_numbers = #tpu.dot_dimension_numbers<[1], [0], [0], [1], [0, 0, 1, 1], [], []>} : vector<16x144xbf16>, vector<144x64xbf16>, vector<16x64xf32> -> vector<16x64xf32>
    %624 = vector.broadcast %531 : vector<16x1xf32> to vector<16x64xf32>
    %625 = arith.addf %623, %624 : vector<16x64xf32>
    %cst_224 = arith.constant 0.000000e+00 : f32
    %626 = vector.broadcast %cst_224 : f32 to vector<16x64xf32>
    %627 = arith.maximumf %625, %626 : vector<16x64xf32>
    %c0_225 = arith.constant 0 : index
    %c0_226 = arith.constant 0 : index
    %628 = vector.load %arg14[%c0_225, %c0_226] : memref<16x144xbf16, #tpu.memory_space<vmem>>, vector<16x144xbf16>
    %c0_227 = arith.constant 0 : index
    %c0_228 = arith.constant 0 : index
    %629 = vector.load %arg15[%c0_227, %c0_228] : memref<16x1xf32, #tpu.memory_space<vmem>>, vector<16x1xf32>
    %630 = tpu.iota {dimensions = array<i32: 1>} : vector<1x64xi32>
    %c3_i32_229 = arith.constant 3 : i32
    %631 = vector.broadcast %c3_i32_229 : i32 to vector<1x64xi32>
    %632 = arith.shrsi %630, %631 : vector<1x64xi32>
    %c7_i32_230 = arith.constant 7 : i32
    %633 = vector.broadcast %c7_i32_230 : i32 to vector<1x64xi32>
    %634 = arith.andi %630, %633 : vector<1x64xi32>
    %cst_231 = arith.constant 0.000000e+00 : f32
    %635 = vector.broadcast %cst_231 : f32 to vector<16x9xf32>
    %636 = vector.extract_strided_slice %627 {offsets = [0, 0], sizes = [16, 55], strides = [1, 1]} : vector<16x64xf32> to vector<16x55xf32>
    %637 = tpu.concatenate %635, %636 in 1 : vector<16x9xf32>, vector<16x55xf32> -> vector<16x64xf32>
    %c1_i32_232 = arith.constant 1 : i32
    %638 = vector.broadcast %c1_i32_232 : i32 to vector<1x64xi32>
    %639 = arith.cmpi sge, %632, %638 : vector<1x64xi32>
    %c1_i32_233 = arith.constant 1 : i32
    %640 = vector.broadcast %c1_i32_233 : i32 to vector<1x64xi32>
    %641 = arith.cmpi sge, %634, %640 : vector<1x64xi32>
    %642 = arith.andi %639, %641 : vector<1x64xi1>
    %cst_234 = arith.constant 0.000000e+00 : f32
    %643 = vector.broadcast %cst_234 : f32 to vector<16x64xf32>
    %644 = vector.shape_cast %642 : vector<1x64xi1> to vector<1x64xi1>
    %645 = vector.broadcast %644 : vector<1x64xi1> to vector<16x64xi1>
    %646 = arith.select %645, %637, %643 : vector<16x64xi1>, vector<16x64xf32>
    %cst_235 = arith.constant 0.000000e+00 : f32
    %647 = vector.broadcast %cst_235 : f32 to vector<16x8xf32>
    %648 = vector.extract_strided_slice %627 {offsets = [0, 0], sizes = [16, 56], strides = [1, 1]} : vector<16x64xf32> to vector<16x56xf32>
    %649 = tpu.concatenate %647, %648 in 1 : vector<16x8xf32>, vector<16x56xf32> -> vector<16x64xf32>
    %c1_i32_236 = arith.constant 1 : i32
    %650 = vector.broadcast %c1_i32_236 : i32 to vector<1x64xi32>
    %651 = arith.cmpi sge, %632, %650 : vector<1x64xi32>
    %cst_237 = arith.constant 0.000000e+00 : f32
    %652 = vector.broadcast %cst_237 : f32 to vector<16x64xf32>
    %653 = vector.shape_cast %651 : vector<1x64xi1> to vector<1x64xi1>
    %654 = vector.broadcast %653 : vector<1x64xi1> to vector<16x64xi1>
    %655 = arith.select %654, %649, %652 : vector<16x64xi1>, vector<16x64xf32>
    %cst_238 = arith.constant 0.000000e+00 : f32
    %656 = vector.broadcast %cst_238 : f32 to vector<16x7xf32>
    %657 = vector.extract_strided_slice %627 {offsets = [0, 0], sizes = [16, 57], strides = [1, 1]} : vector<16x64xf32> to vector<16x57xf32>
    %658 = tpu.concatenate %656, %657 in 1 : vector<16x7xf32>, vector<16x57xf32> -> vector<16x64xf32>
    %c1_i32_239 = arith.constant 1 : i32
    %659 = vector.broadcast %c1_i32_239 : i32 to vector<1x64xi32>
    %660 = arith.cmpi sge, %632, %659 : vector<1x64xi32>
    %c7_i32_240 = arith.constant 7 : i32
    %661 = vector.broadcast %c7_i32_240 : i32 to vector<1x64xi32>
    %662 = arith.cmpi slt, %634, %661 : vector<1x64xi32>
    %663 = arith.andi %660, %662 : vector<1x64xi1>
    %cst_241 = arith.constant 0.000000e+00 : f32
    %664 = vector.broadcast %cst_241 : f32 to vector<16x64xf32>
    %665 = vector.shape_cast %663 : vector<1x64xi1> to vector<1x64xi1>
    %666 = vector.broadcast %665 : vector<1x64xi1> to vector<16x64xi1>
    %667 = arith.select %666, %658, %664 : vector<16x64xi1>, vector<16x64xf32>
    %cst_242 = arith.constant 0.000000e+00 : f32
    %668 = vector.broadcast %cst_242 : f32 to vector<16x1xf32>
    %669 = vector.extract_strided_slice %627 {offsets = [0, 0], sizes = [16, 63], strides = [1, 1]} : vector<16x64xf32> to vector<16x63xf32>
    %670 = tpu.concatenate %668, %669 in 1 : vector<16x1xf32>, vector<16x63xf32> -> vector<16x64xf32>
    %c1_i32_243 = arith.constant 1 : i32
    %671 = vector.broadcast %c1_i32_243 : i32 to vector<1x64xi32>
    %672 = arith.cmpi sge, %634, %671 : vector<1x64xi32>
    %cst_244 = arith.constant 0.000000e+00 : f32
    %673 = vector.broadcast %cst_244 : f32 to vector<16x64xf32>
    %674 = vector.shape_cast %672 : vector<1x64xi1> to vector<1x64xi1>
    %675 = vector.broadcast %674 : vector<1x64xi1> to vector<16x64xi1>
    %676 = arith.select %675, %670, %673 : vector<16x64xi1>, vector<16x64xf32>
    %cst_245 = arith.constant 0.000000e+00 : f32
    %677 = vector.broadcast %cst_245 : f32 to vector<16x1xf32>
    %678 = vector.extract_strided_slice %627 {offsets = [0, 1], sizes = [16, 63], strides = [1, 1]} : vector<16x64xf32> to vector<16x63xf32>
    %679 = tpu.concatenate %678, %677 in 1 : vector<16x63xf32>, vector<16x1xf32> -> vector<16x64xf32>
    %c7_i32_246 = arith.constant 7 : i32
    %680 = vector.broadcast %c7_i32_246 : i32 to vector<1x64xi32>
    %681 = arith.cmpi slt, %634, %680 : vector<1x64xi32>
    %cst_247 = arith.constant 0.000000e+00 : f32
    %682 = vector.broadcast %cst_247 : f32 to vector<16x64xf32>
    %683 = vector.shape_cast %681 : vector<1x64xi1> to vector<1x64xi1>
    %684 = vector.broadcast %683 : vector<1x64xi1> to vector<16x64xi1>
    %685 = arith.select %684, %679, %682 : vector<16x64xi1>, vector<16x64xf32>
    %cst_248 = arith.constant 0.000000e+00 : f32
    %686 = vector.broadcast %cst_248 : f32 to vector<16x7xf32>
    %687 = vector.extract_strided_slice %627 {offsets = [0, 7], sizes = [16, 57], strides = [1, 1]} : vector<16x64xf32> to vector<16x57xf32>
    %688 = tpu.concatenate %687, %686 in 1 : vector<16x57xf32>, vector<16x7xf32> -> vector<16x64xf32>
    %c7_i32_249 = arith.constant 7 : i32
    %689 = vector.broadcast %c7_i32_249 : i32 to vector<1x64xi32>
    %690 = arith.cmpi slt, %632, %689 : vector<1x64xi32>
    %c1_i32_250 = arith.constant 1 : i32
    %691 = vector.broadcast %c1_i32_250 : i32 to vector<1x64xi32>
    %692 = arith.cmpi sge, %634, %691 : vector<1x64xi32>
    %693 = arith.andi %690, %692 : vector<1x64xi1>
    %cst_251 = arith.constant 0.000000e+00 : f32
    %694 = vector.broadcast %cst_251 : f32 to vector<16x64xf32>
    %695 = vector.shape_cast %693 : vector<1x64xi1> to vector<1x64xi1>
    %696 = vector.broadcast %695 : vector<1x64xi1> to vector<16x64xi1>
    %697 = arith.select %696, %688, %694 : vector<16x64xi1>, vector<16x64xf32>
    %cst_252 = arith.constant 0.000000e+00 : f32
    %698 = vector.broadcast %cst_252 : f32 to vector<16x8xf32>
    %699 = vector.extract_strided_slice %627 {offsets = [0, 8], sizes = [16, 56], strides = [1, 1]} : vector<16x64xf32> to vector<16x56xf32>
    %700 = tpu.concatenate %699, %698 in 1 : vector<16x56xf32>, vector<16x8xf32> -> vector<16x64xf32>
    %c7_i32_253 = arith.constant 7 : i32
    %701 = vector.broadcast %c7_i32_253 : i32 to vector<1x64xi32>
    %702 = arith.cmpi slt, %632, %701 : vector<1x64xi32>
    %cst_254 = arith.constant 0.000000e+00 : f32
    %703 = vector.broadcast %cst_254 : f32 to vector<16x64xf32>
    %704 = vector.shape_cast %702 : vector<1x64xi1> to vector<1x64xi1>
    %705 = vector.broadcast %704 : vector<1x64xi1> to vector<16x64xi1>
    %706 = arith.select %705, %700, %703 : vector<16x64xi1>, vector<16x64xf32>
    %cst_255 = arith.constant 0.000000e+00 : f32
    %707 = vector.broadcast %cst_255 : f32 to vector<16x9xf32>
    %708 = vector.extract_strided_slice %627 {offsets = [0, 9], sizes = [16, 55], strides = [1, 1]} : vector<16x64xf32> to vector<16x55xf32>
    %709 = tpu.concatenate %708, %707 in 1 : vector<16x55xf32>, vector<16x9xf32> -> vector<16x64xf32>
    %c7_i32_256 = arith.constant 7 : i32
    %710 = vector.broadcast %c7_i32_256 : i32 to vector<1x64xi32>
    %711 = arith.cmpi slt, %632, %710 : vector<1x64xi32>
    %c7_i32_257 = arith.constant 7 : i32
    %712 = vector.broadcast %c7_i32_257 : i32 to vector<1x64xi32>
    %713 = arith.cmpi slt, %634, %712 : vector<1x64xi32>
    %714 = arith.andi %711, %713 : vector<1x64xi1>
    %cst_258 = arith.constant 0.000000e+00 : f32
    %715 = vector.broadcast %cst_258 : f32 to vector<16x64xf32>
    %716 = vector.shape_cast %714 : vector<1x64xi1> to vector<1x64xi1>
    %717 = vector.broadcast %716 : vector<1x64xi1> to vector<16x64xi1>
    %718 = arith.select %717, %709, %715 : vector<16x64xi1>, vector<16x64xf32>
    %719 = tpu.concatenate %646, %655, %667, %676, %627, %685, %697, %706, %718 in 0 : vector<16x64xf32>, vector<16x64xf32>, vector<16x64xf32>, vector<16x64xf32>, vector<16x64xf32>, vector<16x64xf32>, vector<16x64xf32>, vector<16x64xf32>, vector<16x64xf32> -> vector<144x64xf32>
    %720 = arith.truncf %719 : vector<144x64xf32> to vector<144x64xbf16>
    %cst_259 = arith.constant dense<0.000000e+00> : vector<16x64xf32>
    %721 = tpu.matmul %628, %720, %cst_259 {dimension_numbers = #tpu.dot_dimension_numbers<[1], [0], [0], [1], [0, 0, 1, 1], [], []>} : vector<16x144xbf16>, vector<144x64xbf16>, vector<16x64xf32> -> vector<16x64xf32>
    %722 = vector.broadcast %629 : vector<16x1xf32> to vector<16x64xf32>
    %723 = arith.addf %721, %722 : vector<16x64xf32>
    %cst_260 = arith.constant 0.000000e+00 : f32
    %724 = vector.broadcast %cst_260 : f32 to vector<16x64xf32>
    %725 = arith.maximumf %723, %724 : vector<16x64xf32>
    %cst_261 = arith.constant 0.000000e+00 : f32
    %726 = vector.broadcast %cst_261 : f32 to vector<16x1xf32>
    %727 = vector.extract_strided_slice %725 {offsets = [0, 1], sizes = [16, 63], strides = [1, 1]} : vector<16x64xf32> to vector<16x63xf32>
    %728 = tpu.concatenate %727, %726 in 1 : vector<16x63xf32>, vector<16x1xf32> -> vector<16x64xf32>
    %729 = arith.maximumf %725, %728 : vector<16x64xf32>
    %cst_262 = arith.constant 0.000000e+00 : f32
    %730 = vector.broadcast %cst_262 : f32 to vector<16x8xf32>
    %731 = vector.extract_strided_slice %725 {offsets = [0, 8], sizes = [16, 56], strides = [1, 1]} : vector<16x64xf32> to vector<16x56xf32>
    %732 = tpu.concatenate %731, %730 in 1 : vector<16x56xf32>, vector<16x8xf32> -> vector<16x64xf32>
    %cst_263 = arith.constant 0.000000e+00 : f32
    %733 = vector.broadcast %cst_263 : f32 to vector<16x9xf32>
    %734 = vector.extract_strided_slice %725 {offsets = [0, 9], sizes = [16, 55], strides = [1, 1]} : vector<16x64xf32> to vector<16x55xf32>
    %735 = tpu.concatenate %734, %733 in 1 : vector<16x55xf32>, vector<16x9xf32> -> vector<16x64xf32>
    %736 = arith.maximumf %732, %735 : vector<16x64xf32>
    %737 = arith.maximumf %729, %736 : vector<16x64xf32>
    %738 = tpu.iota {dimensions = array<i32: 0>} : vector<64x16xi32>
    %739 = tpu.iota {dimensions = array<i32: 1>} : vector<64x16xi32>
    %c2_i32 = arith.constant 2 : i32
    %740 = vector.broadcast %c2_i32 : i32 to vector<64x16xi32>
    %741 = arith.shrsi %739, %740 : vector<64x16xi32>
    %c3_i32_264 = arith.constant 3 : i32
    %742 = vector.broadcast %c3_i32_264 : i32 to vector<64x16xi32>
    %743 = arith.andi %739, %742 : vector<64x16xi32>
    %c4_i32_265 = arith.constant 4 : i32
    %744 = vector.broadcast %c4_i32_265 : i32 to vector<64x16xi32>
    %745 = arith.shli %741, %744 : vector<64x16xi32>
    %c1_i32_266 = arith.constant 1 : i32
    %746 = vector.broadcast %c1_i32_266 : i32 to vector<64x16xi32>
    %747 = arith.shli %743, %746 : vector<64x16xi32>
    %748 = arith.addi %745, %747 : vector<64x16xi32>
    %749 = arith.cmpi eq, %738, %748 : vector<64x16xi32>
    %750 = arith.extui %749 : vector<64x16xi1> to vector<64x16xi32>
    %751 = arith.sitofp %750 : vector<64x16xi32> to vector<64x16xf32>
    %cst_267 = arith.constant dense<0.000000e+00> : vector<16x16xf32>
    %752 = tpu.matmul %737, %751, %cst_267 {dimension_numbers = #tpu.dot_dimension_numbers<[1], [0], [0], [1], [0, 0, 1, 1], [], []>} : vector<16x64xf32>, vector<64x16xf32>, vector<16x16xf32> -> vector<16x16xf32>
    %c0_268 = arith.constant 0 : index
    %c0_269 = arith.constant 0 : index
    %753 = vector.load %arg16[%c0_268, %c0_269] : memref<32x144xbf16, #tpu.memory_space<vmem>>, vector<32x144xbf16>
    %c0_270 = arith.constant 0 : index
    %c0_271 = arith.constant 0 : index
    %754 = vector.load %arg17[%c0_270, %c0_271] : memref<32x1xf32, #tpu.memory_space<vmem>>, vector<32x1xf32>
    %755 = tpu.iota {dimensions = array<i32: 1>} : vector<1x16xi32>
    %c2_i32_272 = arith.constant 2 : i32
    %756 = vector.broadcast %c2_i32_272 : i32 to vector<1x16xi32>
    %757 = arith.shrsi %755, %756 : vector<1x16xi32>
    %c3_i32_273 = arith.constant 3 : i32
    %758 = vector.broadcast %c3_i32_273 : i32 to vector<1x16xi32>
    %759 = arith.andi %755, %758 : vector<1x16xi32>
    %cst_274 = arith.constant 0.000000e+00 : f32
    %760 = vector.broadcast %cst_274 : f32 to vector<16x5xf32>
    %761 = vector.extract_strided_slice %752 {offsets = [0, 0], sizes = [16, 11], strides = [1, 1]} : vector<16x16xf32> to vector<16x11xf32>
    %762 = tpu.concatenate %760, %761 in 1 : vector<16x5xf32>, vector<16x11xf32> -> vector<16x16xf32>
    %c1_i32_275 = arith.constant 1 : i32
    %763 = vector.broadcast %c1_i32_275 : i32 to vector<1x16xi32>
    %764 = arith.cmpi sge, %757, %763 : vector<1x16xi32>
    %c1_i32_276 = arith.constant 1 : i32
    %765 = vector.broadcast %c1_i32_276 : i32 to vector<1x16xi32>
    %766 = arith.cmpi sge, %759, %765 : vector<1x16xi32>
    %767 = arith.andi %764, %766 : vector<1x16xi1>
    %cst_277 = arith.constant 0.000000e+00 : f32
    %768 = vector.broadcast %cst_277 : f32 to vector<16x16xf32>
    %769 = vector.shape_cast %767 : vector<1x16xi1> to vector<1x16xi1>
    %770 = vector.broadcast %769 : vector<1x16xi1> to vector<16x16xi1>
    %771 = arith.select %770, %762, %768 : vector<16x16xi1>, vector<16x16xf32>
    %cst_278 = arith.constant 0.000000e+00 : f32
    %772 = vector.broadcast %cst_278 : f32 to vector<16x4xf32>
    %773 = vector.extract_strided_slice %752 {offsets = [0, 0], sizes = [16, 12], strides = [1, 1]} : vector<16x16xf32> to vector<16x12xf32>
    %774 = tpu.concatenate %772, %773 in 1 : vector<16x4xf32>, vector<16x12xf32> -> vector<16x16xf32>
    %c1_i32_279 = arith.constant 1 : i32
    %775 = vector.broadcast %c1_i32_279 : i32 to vector<1x16xi32>
    %776 = arith.cmpi sge, %757, %775 : vector<1x16xi32>
    %cst_280 = arith.constant 0.000000e+00 : f32
    %777 = vector.broadcast %cst_280 : f32 to vector<16x16xf32>
    %778 = vector.shape_cast %776 : vector<1x16xi1> to vector<1x16xi1>
    %779 = vector.broadcast %778 : vector<1x16xi1> to vector<16x16xi1>
    %780 = arith.select %779, %774, %777 : vector<16x16xi1>, vector<16x16xf32>
    %cst_281 = arith.constant 0.000000e+00 : f32
    %781 = vector.broadcast %cst_281 : f32 to vector<16x3xf32>
    %782 = vector.extract_strided_slice %752 {offsets = [0, 0], sizes = [16, 13], strides = [1, 1]} : vector<16x16xf32> to vector<16x13xf32>
    %783 = tpu.concatenate %781, %782 in 1 : vector<16x3xf32>, vector<16x13xf32> -> vector<16x16xf32>
    %c1_i32_282 = arith.constant 1 : i32
    %784 = vector.broadcast %c1_i32_282 : i32 to vector<1x16xi32>
    %785 = arith.cmpi sge, %757, %784 : vector<1x16xi32>
    %c3_i32_283 = arith.constant 3 : i32
    %786 = vector.broadcast %c3_i32_283 : i32 to vector<1x16xi32>
    %787 = arith.cmpi slt, %759, %786 : vector<1x16xi32>
    %788 = arith.andi %785, %787 : vector<1x16xi1>
    %cst_284 = arith.constant 0.000000e+00 : f32
    %789 = vector.broadcast %cst_284 : f32 to vector<16x16xf32>
    %790 = vector.shape_cast %788 : vector<1x16xi1> to vector<1x16xi1>
    %791 = vector.broadcast %790 : vector<1x16xi1> to vector<16x16xi1>
    %792 = arith.select %791, %783, %789 : vector<16x16xi1>, vector<16x16xf32>
    %cst_285 = arith.constant 0.000000e+00 : f32
    %793 = vector.broadcast %cst_285 : f32 to vector<16x1xf32>
    %794 = vector.extract_strided_slice %752 {offsets = [0, 0], sizes = [16, 15], strides = [1, 1]} : vector<16x16xf32> to vector<16x15xf32>
    %795 = tpu.concatenate %793, %794 in 1 : vector<16x1xf32>, vector<16x15xf32> -> vector<16x16xf32>
    %c1_i32_286 = arith.constant 1 : i32
    %796 = vector.broadcast %c1_i32_286 : i32 to vector<1x16xi32>
    %797 = arith.cmpi sge, %759, %796 : vector<1x16xi32>
    %cst_287 = arith.constant 0.000000e+00 : f32
    %798 = vector.broadcast %cst_287 : f32 to vector<16x16xf32>
    %799 = vector.shape_cast %797 : vector<1x16xi1> to vector<1x16xi1>
    %800 = vector.broadcast %799 : vector<1x16xi1> to vector<16x16xi1>
    %801 = arith.select %800, %795, %798 : vector<16x16xi1>, vector<16x16xf32>
    %cst_288 = arith.constant 0.000000e+00 : f32
    %802 = vector.broadcast %cst_288 : f32 to vector<16x1xf32>
    %803 = vector.extract_strided_slice %752 {offsets = [0, 1], sizes = [16, 15], strides = [1, 1]} : vector<16x16xf32> to vector<16x15xf32>
    %804 = tpu.concatenate %803, %802 in 1 : vector<16x15xf32>, vector<16x1xf32> -> vector<16x16xf32>
    %c3_i32_289 = arith.constant 3 : i32
    %805 = vector.broadcast %c3_i32_289 : i32 to vector<1x16xi32>
    %806 = arith.cmpi slt, %759, %805 : vector<1x16xi32>
    %cst_290 = arith.constant 0.000000e+00 : f32
    %807 = vector.broadcast %cst_290 : f32 to vector<16x16xf32>
    %808 = vector.shape_cast %806 : vector<1x16xi1> to vector<1x16xi1>
    %809 = vector.broadcast %808 : vector<1x16xi1> to vector<16x16xi1>
    %810 = arith.select %809, %804, %807 : vector<16x16xi1>, vector<16x16xf32>
    %cst_291 = arith.constant 0.000000e+00 : f32
    %811 = vector.broadcast %cst_291 : f32 to vector<16x3xf32>
    %812 = vector.extract_strided_slice %752 {offsets = [0, 3], sizes = [16, 13], strides = [1, 1]} : vector<16x16xf32> to vector<16x13xf32>
    %813 = tpu.concatenate %812, %811 in 1 : vector<16x13xf32>, vector<16x3xf32> -> vector<16x16xf32>
    %c3_i32_292 = arith.constant 3 : i32
    %814 = vector.broadcast %c3_i32_292 : i32 to vector<1x16xi32>
    %815 = arith.cmpi slt, %757, %814 : vector<1x16xi32>
    %c1_i32_293 = arith.constant 1 : i32
    %816 = vector.broadcast %c1_i32_293 : i32 to vector<1x16xi32>
    %817 = arith.cmpi sge, %759, %816 : vector<1x16xi32>
    %818 = arith.andi %815, %817 : vector<1x16xi1>
    %cst_294 = arith.constant 0.000000e+00 : f32
    %819 = vector.broadcast %cst_294 : f32 to vector<16x16xf32>
    %820 = vector.shape_cast %818 : vector<1x16xi1> to vector<1x16xi1>
    %821 = vector.broadcast %820 : vector<1x16xi1> to vector<16x16xi1>
    %822 = arith.select %821, %813, %819 : vector<16x16xi1>, vector<16x16xf32>
    %cst_295 = arith.constant 0.000000e+00 : f32
    %823 = vector.broadcast %cst_295 : f32 to vector<16x4xf32>
    %824 = vector.extract_strided_slice %752 {offsets = [0, 4], sizes = [16, 12], strides = [1, 1]} : vector<16x16xf32> to vector<16x12xf32>
    %825 = tpu.concatenate %824, %823 in 1 : vector<16x12xf32>, vector<16x4xf32> -> vector<16x16xf32>
    %c3_i32_296 = arith.constant 3 : i32
    %826 = vector.broadcast %c3_i32_296 : i32 to vector<1x16xi32>
    %827 = arith.cmpi slt, %757, %826 : vector<1x16xi32>
    %cst_297 = arith.constant 0.000000e+00 : f32
    %828 = vector.broadcast %cst_297 : f32 to vector<16x16xf32>
    %829 = vector.shape_cast %827 : vector<1x16xi1> to vector<1x16xi1>
    %830 = vector.broadcast %829 : vector<1x16xi1> to vector<16x16xi1>
    %831 = arith.select %830, %825, %828 : vector<16x16xi1>, vector<16x16xf32>
    %cst_298 = arith.constant 0.000000e+00 : f32
    %832 = vector.broadcast %cst_298 : f32 to vector<16x5xf32>
    %833 = vector.extract_strided_slice %752 {offsets = [0, 5], sizes = [16, 11], strides = [1, 1]} : vector<16x16xf32> to vector<16x11xf32>
    %834 = tpu.concatenate %833, %832 in 1 : vector<16x11xf32>, vector<16x5xf32> -> vector<16x16xf32>
    %c3_i32_299 = arith.constant 3 : i32
    %835 = vector.broadcast %c3_i32_299 : i32 to vector<1x16xi32>
    %836 = arith.cmpi slt, %757, %835 : vector<1x16xi32>
    %c3_i32_300 = arith.constant 3 : i32
    %837 = vector.broadcast %c3_i32_300 : i32 to vector<1x16xi32>
    %838 = arith.cmpi slt, %759, %837 : vector<1x16xi32>
    %839 = arith.andi %836, %838 : vector<1x16xi1>
    %cst_301 = arith.constant 0.000000e+00 : f32
    %840 = vector.broadcast %cst_301 : f32 to vector<16x16xf32>
    %841 = vector.shape_cast %839 : vector<1x16xi1> to vector<1x16xi1>
    %842 = vector.broadcast %841 : vector<1x16xi1> to vector<16x16xi1>
    %843 = arith.select %842, %834, %840 : vector<16x16xi1>, vector<16x16xf32>
    %844 = tpu.concatenate %771, %780, %792, %801, %752, %810, %822, %831, %843 in 0 : vector<16x16xf32>, vector<16x16xf32>, vector<16x16xf32>, vector<16x16xf32>, vector<16x16xf32>, vector<16x16xf32>, vector<16x16xf32>, vector<16x16xf32>, vector<16x16xf32> -> vector<144x16xf32>
    %845 = arith.truncf %844 : vector<144x16xf32> to vector<144x16xbf16>
    %cst_302 = arith.constant dense<0.000000e+00> : vector<32x16xf32>
    %846 = tpu.matmul %753, %845, %cst_302 {dimension_numbers = #tpu.dot_dimension_numbers<[1], [0], [0], [1], [0, 0, 1, 1], [], []>} : vector<32x144xbf16>, vector<144x16xbf16>, vector<32x16xf32> -> vector<32x16xf32>
    %847 = vector.broadcast %754 : vector<32x1xf32> to vector<32x16xf32>
    %848 = arith.addf %846, %847 : vector<32x16xf32>
    %cst_303 = arith.constant 0.000000e+00 : f32
    %849 = vector.broadcast %cst_303 : f32 to vector<32x16xf32>
    %850 = arith.maximumf %848, %849 : vector<32x16xf32>
    %c0_304 = arith.constant 0 : index
    %c0_305 = arith.constant 0 : index
    %851 = vector.load %arg18[%c0_304, %c0_305] : memref<32x288xbf16, #tpu.memory_space<vmem>>, vector<32x288xbf16>
    %c0_306 = arith.constant 0 : index
    %c0_307 = arith.constant 0 : index
    %852 = vector.load %arg19[%c0_306, %c0_307] : memref<32x1xf32, #tpu.memory_space<vmem>>, vector<32x1xf32>
    %853 = tpu.iota {dimensions = array<i32: 1>} : vector<1x16xi32>
    %c2_i32_308 = arith.constant 2 : i32
    %854 = vector.broadcast %c2_i32_308 : i32 to vector<1x16xi32>
    %855 = arith.shrsi %853, %854 : vector<1x16xi32>
    %c3_i32_309 = arith.constant 3 : i32
    %856 = vector.broadcast %c3_i32_309 : i32 to vector<1x16xi32>
    %857 = arith.andi %853, %856 : vector<1x16xi32>
    %cst_310 = arith.constant 0.000000e+00 : f32
    %858 = vector.broadcast %cst_310 : f32 to vector<32x5xf32>
    %859 = vector.extract_strided_slice %850 {offsets = [0, 0], sizes = [32, 11], strides = [1, 1]} : vector<32x16xf32> to vector<32x11xf32>
    %860 = tpu.concatenate %858, %859 in 1 : vector<32x5xf32>, vector<32x11xf32> -> vector<32x16xf32>
    %c1_i32_311 = arith.constant 1 : i32
    %861 = vector.broadcast %c1_i32_311 : i32 to vector<1x16xi32>
    %862 = arith.cmpi sge, %855, %861 : vector<1x16xi32>
    %c1_i32_312 = arith.constant 1 : i32
    %863 = vector.broadcast %c1_i32_312 : i32 to vector<1x16xi32>
    %864 = arith.cmpi sge, %857, %863 : vector<1x16xi32>
    %865 = arith.andi %862, %864 : vector<1x16xi1>
    %cst_313 = arith.constant 0.000000e+00 : f32
    %866 = vector.broadcast %cst_313 : f32 to vector<32x16xf32>
    %867 = vector.shape_cast %865 : vector<1x16xi1> to vector<1x16xi1>
    %868 = vector.broadcast %867 : vector<1x16xi1> to vector<32x16xi1>
    %869 = arith.select %868, %860, %866 : vector<32x16xi1>, vector<32x16xf32>
    %cst_314 = arith.constant 0.000000e+00 : f32
    %870 = vector.broadcast %cst_314 : f32 to vector<32x4xf32>
    %871 = vector.extract_strided_slice %850 {offsets = [0, 0], sizes = [32, 12], strides = [1, 1]} : vector<32x16xf32> to vector<32x12xf32>
    %872 = tpu.concatenate %870, %871 in 1 : vector<32x4xf32>, vector<32x12xf32> -> vector<32x16xf32>
    %c1_i32_315 = arith.constant 1 : i32
    %873 = vector.broadcast %c1_i32_315 : i32 to vector<1x16xi32>
    %874 = arith.cmpi sge, %855, %873 : vector<1x16xi32>
    %cst_316 = arith.constant 0.000000e+00 : f32
    %875 = vector.broadcast %cst_316 : f32 to vector<32x16xf32>
    %876 = vector.shape_cast %874 : vector<1x16xi1> to vector<1x16xi1>
    %877 = vector.broadcast %876 : vector<1x16xi1> to vector<32x16xi1>
    %878 = arith.select %877, %872, %875 : vector<32x16xi1>, vector<32x16xf32>
    %cst_317 = arith.constant 0.000000e+00 : f32
    %879 = vector.broadcast %cst_317 : f32 to vector<32x3xf32>
    %880 = vector.extract_strided_slice %850 {offsets = [0, 0], sizes = [32, 13], strides = [1, 1]} : vector<32x16xf32> to vector<32x13xf32>
    %881 = tpu.concatenate %879, %880 in 1 : vector<32x3xf32>, vector<32x13xf32> -> vector<32x16xf32>
    %c1_i32_318 = arith.constant 1 : i32
    %882 = vector.broadcast %c1_i32_318 : i32 to vector<1x16xi32>
    %883 = arith.cmpi sge, %855, %882 : vector<1x16xi32>
    %c3_i32_319 = arith.constant 3 : i32
    %884 = vector.broadcast %c3_i32_319 : i32 to vector<1x16xi32>
    %885 = arith.cmpi slt, %857, %884 : vector<1x16xi32>
    %886 = arith.andi %883, %885 : vector<1x16xi1>
    %cst_320 = arith.constant 0.000000e+00 : f32
    %887 = vector.broadcast %cst_320 : f32 to vector<32x16xf32>
    %888 = vector.shape_cast %886 : vector<1x16xi1> to vector<1x16xi1>
    %889 = vector.broadcast %888 : vector<1x16xi1> to vector<32x16xi1>
    %890 = arith.select %889, %881, %887 : vector<32x16xi1>, vector<32x16xf32>
    %cst_321 = arith.constant 0.000000e+00 : f32
    %891 = vector.broadcast %cst_321 : f32 to vector<32x1xf32>
    %892 = vector.extract_strided_slice %850 {offsets = [0, 0], sizes = [32, 15], strides = [1, 1]} : vector<32x16xf32> to vector<32x15xf32>
    %893 = tpu.concatenate %891, %892 in 1 : vector<32x1xf32>, vector<32x15xf32> -> vector<32x16xf32>
    %c1_i32_322 = arith.constant 1 : i32
    %894 = vector.broadcast %c1_i32_322 : i32 to vector<1x16xi32>
    %895 = arith.cmpi sge, %857, %894 : vector<1x16xi32>
    %cst_323 = arith.constant 0.000000e+00 : f32
    %896 = vector.broadcast %cst_323 : f32 to vector<32x16xf32>
    %897 = vector.shape_cast %895 : vector<1x16xi1> to vector<1x16xi1>
    %898 = vector.broadcast %897 : vector<1x16xi1> to vector<32x16xi1>
    %899 = arith.select %898, %893, %896 : vector<32x16xi1>, vector<32x16xf32>
    %cst_324 = arith.constant 0.000000e+00 : f32
    %900 = vector.broadcast %cst_324 : f32 to vector<32x1xf32>
    %901 = vector.extract_strided_slice %850 {offsets = [0, 1], sizes = [32, 15], strides = [1, 1]} : vector<32x16xf32> to vector<32x15xf32>
    %902 = tpu.concatenate %901, %900 in 1 : vector<32x15xf32>, vector<32x1xf32> -> vector<32x16xf32>
    %c3_i32_325 = arith.constant 3 : i32
    %903 = vector.broadcast %c3_i32_325 : i32 to vector<1x16xi32>
    %904 = arith.cmpi slt, %857, %903 : vector<1x16xi32>
    %cst_326 = arith.constant 0.000000e+00 : f32
    %905 = vector.broadcast %cst_326 : f32 to vector<32x16xf32>
    %906 = vector.shape_cast %904 : vector<1x16xi1> to vector<1x16xi1>
    %907 = vector.broadcast %906 : vector<1x16xi1> to vector<32x16xi1>
    %908 = arith.select %907, %902, %905 : vector<32x16xi1>, vector<32x16xf32>
    %cst_327 = arith.constant 0.000000e+00 : f32
    %909 = vector.broadcast %cst_327 : f32 to vector<32x3xf32>
    %910 = vector.extract_strided_slice %850 {offsets = [0, 3], sizes = [32, 13], strides = [1, 1]} : vector<32x16xf32> to vector<32x13xf32>
    %911 = tpu.concatenate %910, %909 in 1 : vector<32x13xf32>, vector<32x3xf32> -> vector<32x16xf32>
    %c3_i32_328 = arith.constant 3 : i32
    %912 = vector.broadcast %c3_i32_328 : i32 to vector<1x16xi32>
    %913 = arith.cmpi slt, %855, %912 : vector<1x16xi32>
    %c1_i32_329 = arith.constant 1 : i32
    %914 = vector.broadcast %c1_i32_329 : i32 to vector<1x16xi32>
    %915 = arith.cmpi sge, %857, %914 : vector<1x16xi32>
    %916 = arith.andi %913, %915 : vector<1x16xi1>
    %cst_330 = arith.constant 0.000000e+00 : f32
    %917 = vector.broadcast %cst_330 : f32 to vector<32x16xf32>
    %918 = vector.shape_cast %916 : vector<1x16xi1> to vector<1x16xi1>
    %919 = vector.broadcast %918 : vector<1x16xi1> to vector<32x16xi1>
    %920 = arith.select %919, %911, %917 : vector<32x16xi1>, vector<32x16xf32>
    %cst_331 = arith.constant 0.000000e+00 : f32
    %921 = vector.broadcast %cst_331 : f32 to vector<32x4xf32>
    %922 = vector.extract_strided_slice %850 {offsets = [0, 4], sizes = [32, 12], strides = [1, 1]} : vector<32x16xf32> to vector<32x12xf32>
    %923 = tpu.concatenate %922, %921 in 1 : vector<32x12xf32>, vector<32x4xf32> -> vector<32x16xf32>
    %c3_i32_332 = arith.constant 3 : i32
    %924 = vector.broadcast %c3_i32_332 : i32 to vector<1x16xi32>
    %925 = arith.cmpi slt, %855, %924 : vector<1x16xi32>
    %cst_333 = arith.constant 0.000000e+00 : f32
    %926 = vector.broadcast %cst_333 : f32 to vector<32x16xf32>
    %927 = vector.shape_cast %925 : vector<1x16xi1> to vector<1x16xi1>
    %928 = vector.broadcast %927 : vector<1x16xi1> to vector<32x16xi1>
    %929 = arith.select %928, %923, %926 : vector<32x16xi1>, vector<32x16xf32>
    %cst_334 = arith.constant 0.000000e+00 : f32
    %930 = vector.broadcast %cst_334 : f32 to vector<32x5xf32>
    %931 = vector.extract_strided_slice %850 {offsets = [0, 5], sizes = [32, 11], strides = [1, 1]} : vector<32x16xf32> to vector<32x11xf32>
    %932 = tpu.concatenate %931, %930 in 1 : vector<32x11xf32>, vector<32x5xf32> -> vector<32x16xf32>
    %c3_i32_335 = arith.constant 3 : i32
    %933 = vector.broadcast %c3_i32_335 : i32 to vector<1x16xi32>
    %934 = arith.cmpi slt, %855, %933 : vector<1x16xi32>
    %c3_i32_336 = arith.constant 3 : i32
    %935 = vector.broadcast %c3_i32_336 : i32 to vector<1x16xi32>
    %936 = arith.cmpi slt, %857, %935 : vector<1x16xi32>
    %937 = arith.andi %934, %936 : vector<1x16xi1>
    %cst_337 = arith.constant 0.000000e+00 : f32
    %938 = vector.broadcast %cst_337 : f32 to vector<32x16xf32>
    %939 = vector.shape_cast %937 : vector<1x16xi1> to vector<1x16xi1>
    %940 = vector.broadcast %939 : vector<1x16xi1> to vector<32x16xi1>
    %941 = arith.select %940, %932, %938 : vector<32x16xi1>, vector<32x16xf32>
    %942 = tpu.concatenate %869, %878, %890, %899, %850, %908, %920, %929, %941 in 0 : vector<32x16xf32>, vector<32x16xf32>, vector<32x16xf32>, vector<32x16xf32>, vector<32x16xf32>, vector<32x16xf32>, vector<32x16xf32>, vector<32x16xf32>, vector<32x16xf32> -> vector<288x16xf32>
    %943 = arith.truncf %942 : vector<288x16xf32> to vector<288x16xbf16>
    %cst_338 = arith.constant dense<0.000000e+00> : vector<32x16xf32>
    %944 = tpu.matmul %851, %943, %cst_338 {dimension_numbers = #tpu.dot_dimension_numbers<[1], [0], [0], [1], [0, 0, 1, 1], [], []>} : vector<32x288xbf16>, vector<288x16xbf16>, vector<32x16xf32> -> vector<32x16xf32>
    %945 = vector.broadcast %852 : vector<32x1xf32> to vector<32x16xf32>
    %946 = arith.addf %944, %945 : vector<32x16xf32>
    %cst_339 = arith.constant 0.000000e+00 : f32
    %947 = vector.broadcast %cst_339 : f32 to vector<32x16xf32>
    %948 = arith.maximumf %946, %947 : vector<32x16xf32>
    %c0_340 = arith.constant 0 : index
    %c0_341 = arith.constant 0 : index
    %949 = vector.load %arg20[%c0_340, %c0_341] : memref<32x288xbf16, #tpu.memory_space<vmem>>, vector<32x288xbf16>
    %c0_342 = arith.constant 0 : index
    %c0_343 = arith.constant 0 : index
    %950 = vector.load %arg21[%c0_342, %c0_343] : memref<32x1xf32, #tpu.memory_space<vmem>>, vector<32x1xf32>
    %951 = tpu.iota {dimensions = array<i32: 1>} : vector<1x16xi32>
    %c2_i32_344 = arith.constant 2 : i32
    %952 = vector.broadcast %c2_i32_344 : i32 to vector<1x16xi32>
    %953 = arith.shrsi %951, %952 : vector<1x16xi32>
    %c3_i32_345 = arith.constant 3 : i32
    %954 = vector.broadcast %c3_i32_345 : i32 to vector<1x16xi32>
    %955 = arith.andi %951, %954 : vector<1x16xi32>
    %cst_346 = arith.constant 0.000000e+00 : f32
    %956 = vector.broadcast %cst_346 : f32 to vector<32x5xf32>
    %957 = vector.extract_strided_slice %948 {offsets = [0, 0], sizes = [32, 11], strides = [1, 1]} : vector<32x16xf32> to vector<32x11xf32>
    %958 = tpu.concatenate %956, %957 in 1 : vector<32x5xf32>, vector<32x11xf32> -> vector<32x16xf32>
    %c1_i32_347 = arith.constant 1 : i32
    %959 = vector.broadcast %c1_i32_347 : i32 to vector<1x16xi32>
    %960 = arith.cmpi sge, %953, %959 : vector<1x16xi32>
    %c1_i32_348 = arith.constant 1 : i32
    %961 = vector.broadcast %c1_i32_348 : i32 to vector<1x16xi32>
    %962 = arith.cmpi sge, %955, %961 : vector<1x16xi32>
    %963 = arith.andi %960, %962 : vector<1x16xi1>
    %cst_349 = arith.constant 0.000000e+00 : f32
    %964 = vector.broadcast %cst_349 : f32 to vector<32x16xf32>
    %965 = vector.shape_cast %963 : vector<1x16xi1> to vector<1x16xi1>
    %966 = vector.broadcast %965 : vector<1x16xi1> to vector<32x16xi1>
    %967 = arith.select %966, %958, %964 : vector<32x16xi1>, vector<32x16xf32>
    %cst_350 = arith.constant 0.000000e+00 : f32
    %968 = vector.broadcast %cst_350 : f32 to vector<32x4xf32>
    %969 = vector.extract_strided_slice %948 {offsets = [0, 0], sizes = [32, 12], strides = [1, 1]} : vector<32x16xf32> to vector<32x12xf32>
    %970 = tpu.concatenate %968, %969 in 1 : vector<32x4xf32>, vector<32x12xf32> -> vector<32x16xf32>
    %c1_i32_351 = arith.constant 1 : i32
    %971 = vector.broadcast %c1_i32_351 : i32 to vector<1x16xi32>
    %972 = arith.cmpi sge, %953, %971 : vector<1x16xi32>
    %cst_352 = arith.constant 0.000000e+00 : f32
    %973 = vector.broadcast %cst_352 : f32 to vector<32x16xf32>
    %974 = vector.shape_cast %972 : vector<1x16xi1> to vector<1x16xi1>
    %975 = vector.broadcast %974 : vector<1x16xi1> to vector<32x16xi1>
    %976 = arith.select %975, %970, %973 : vector<32x16xi1>, vector<32x16xf32>
    %cst_353 = arith.constant 0.000000e+00 : f32
    %977 = vector.broadcast %cst_353 : f32 to vector<32x3xf32>
    %978 = vector.extract_strided_slice %948 {offsets = [0, 0], sizes = [32, 13], strides = [1, 1]} : vector<32x16xf32> to vector<32x13xf32>
    %979 = tpu.concatenate %977, %978 in 1 : vector<32x3xf32>, vector<32x13xf32> -> vector<32x16xf32>
    %c1_i32_354 = arith.constant 1 : i32
    %980 = vector.broadcast %c1_i32_354 : i32 to vector<1x16xi32>
    %981 = arith.cmpi sge, %953, %980 : vector<1x16xi32>
    %c3_i32_355 = arith.constant 3 : i32
    %982 = vector.broadcast %c3_i32_355 : i32 to vector<1x16xi32>
    %983 = arith.cmpi slt, %955, %982 : vector<1x16xi32>
    %984 = arith.andi %981, %983 : vector<1x16xi1>
    %cst_356 = arith.constant 0.000000e+00 : f32
    %985 = vector.broadcast %cst_356 : f32 to vector<32x16xf32>
    %986 = vector.shape_cast %984 : vector<1x16xi1> to vector<1x16xi1>
    %987 = vector.broadcast %986 : vector<1x16xi1> to vector<32x16xi1>
    %988 = arith.select %987, %979, %985 : vector<32x16xi1>, vector<32x16xf32>
    %cst_357 = arith.constant 0.000000e+00 : f32
    %989 = vector.broadcast %cst_357 : f32 to vector<32x1xf32>
    %990 = vector.extract_strided_slice %948 {offsets = [0, 0], sizes = [32, 15], strides = [1, 1]} : vector<32x16xf32> to vector<32x15xf32>
    %991 = tpu.concatenate %989, %990 in 1 : vector<32x1xf32>, vector<32x15xf32> -> vector<32x16xf32>
    %c1_i32_358 = arith.constant 1 : i32
    %992 = vector.broadcast %c1_i32_358 : i32 to vector<1x16xi32>
    %993 = arith.cmpi sge, %955, %992 : vector<1x16xi32>
    %cst_359 = arith.constant 0.000000e+00 : f32
    %994 = vector.broadcast %cst_359 : f32 to vector<32x16xf32>
    %995 = vector.shape_cast %993 : vector<1x16xi1> to vector<1x16xi1>
    %996 = vector.broadcast %995 : vector<1x16xi1> to vector<32x16xi1>
    %997 = arith.select %996, %991, %994 : vector<32x16xi1>, vector<32x16xf32>
    %cst_360 = arith.constant 0.000000e+00 : f32
    %998 = vector.broadcast %cst_360 : f32 to vector<32x1xf32>
    %999 = vector.extract_strided_slice %948 {offsets = [0, 1], sizes = [32, 15], strides = [1, 1]} : vector<32x16xf32> to vector<32x15xf32>
    %1000 = tpu.concatenate %999, %998 in 1 : vector<32x15xf32>, vector<32x1xf32> -> vector<32x16xf32>
    %c3_i32_361 = arith.constant 3 : i32
    %1001 = vector.broadcast %c3_i32_361 : i32 to vector<1x16xi32>
    %1002 = arith.cmpi slt, %955, %1001 : vector<1x16xi32>
    %cst_362 = arith.constant 0.000000e+00 : f32
    %1003 = vector.broadcast %cst_362 : f32 to vector<32x16xf32>
    %1004 = vector.shape_cast %1002 : vector<1x16xi1> to vector<1x16xi1>
    %1005 = vector.broadcast %1004 : vector<1x16xi1> to vector<32x16xi1>
    %1006 = arith.select %1005, %1000, %1003 : vector<32x16xi1>, vector<32x16xf32>
    %cst_363 = arith.constant 0.000000e+00 : f32
    %1007 = vector.broadcast %cst_363 : f32 to vector<32x3xf32>
    %1008 = vector.extract_strided_slice %948 {offsets = [0, 3], sizes = [32, 13], strides = [1, 1]} : vector<32x16xf32> to vector<32x13xf32>
    %1009 = tpu.concatenate %1008, %1007 in 1 : vector<32x13xf32>, vector<32x3xf32> -> vector<32x16xf32>
    %c3_i32_364 = arith.constant 3 : i32
    %1010 = vector.broadcast %c3_i32_364 : i32 to vector<1x16xi32>
    %1011 = arith.cmpi slt, %953, %1010 : vector<1x16xi32>
    %c1_i32_365 = arith.constant 1 : i32
    %1012 = vector.broadcast %c1_i32_365 : i32 to vector<1x16xi32>
    %1013 = arith.cmpi sge, %955, %1012 : vector<1x16xi32>
    %1014 = arith.andi %1011, %1013 : vector<1x16xi1>
    %cst_366 = arith.constant 0.000000e+00 : f32
    %1015 = vector.broadcast %cst_366 : f32 to vector<32x16xf32>
    %1016 = vector.shape_cast %1014 : vector<1x16xi1> to vector<1x16xi1>
    %1017 = vector.broadcast %1016 : vector<1x16xi1> to vector<32x16xi1>
    %1018 = arith.select %1017, %1009, %1015 : vector<32x16xi1>, vector<32x16xf32>
    %cst_367 = arith.constant 0.000000e+00 : f32
    %1019 = vector.broadcast %cst_367 : f32 to vector<32x4xf32>
    %1020 = vector.extract_strided_slice %948 {offsets = [0, 4], sizes = [32, 12], strides = [1, 1]} : vector<32x16xf32> to vector<32x12xf32>
    %1021 = tpu.concatenate %1020, %1019 in 1 : vector<32x12xf32>, vector<32x4xf32> -> vector<32x16xf32>
    %c3_i32_368 = arith.constant 3 : i32
    %1022 = vector.broadcast %c3_i32_368 : i32 to vector<1x16xi32>
    %1023 = arith.cmpi slt, %953, %1022 : vector<1x16xi32>
    %cst_369 = arith.constant 0.000000e+00 : f32
    %1024 = vector.broadcast %cst_369 : f32 to vector<32x16xf32>
    %1025 = vector.shape_cast %1023 : vector<1x16xi1> to vector<1x16xi1>
    %1026 = vector.broadcast %1025 : vector<1x16xi1> to vector<32x16xi1>
    %1027 = arith.select %1026, %1021, %1024 : vector<32x16xi1>, vector<32x16xf32>
    %cst_370 = arith.constant 0.000000e+00 : f32
    %1028 = vector.broadcast %cst_370 : f32 to vector<32x5xf32>
    %1029 = vector.extract_strided_slice %948 {offsets = [0, 5], sizes = [32, 11], strides = [1, 1]} : vector<32x16xf32> to vector<32x11xf32>
    %1030 = tpu.concatenate %1029, %1028 in 1 : vector<32x11xf32>, vector<32x5xf32> -> vector<32x16xf32>
    %c3_i32_371 = arith.constant 3 : i32
    %1031 = vector.broadcast %c3_i32_371 : i32 to vector<1x16xi32>
    %1032 = arith.cmpi slt, %953, %1031 : vector<1x16xi32>
    %c3_i32_372 = arith.constant 3 : i32
    %1033 = vector.broadcast %c3_i32_372 : i32 to vector<1x16xi32>
    %1034 = arith.cmpi slt, %955, %1033 : vector<1x16xi32>
    %1035 = arith.andi %1032, %1034 : vector<1x16xi1>
    %cst_373 = arith.constant 0.000000e+00 : f32
    %1036 = vector.broadcast %cst_373 : f32 to vector<32x16xf32>
    %1037 = vector.shape_cast %1035 : vector<1x16xi1> to vector<1x16xi1>
    %1038 = vector.broadcast %1037 : vector<1x16xi1> to vector<32x16xi1>
    %1039 = arith.select %1038, %1030, %1036 : vector<32x16xi1>, vector<32x16xf32>
    %1040 = tpu.concatenate %967, %976, %988, %997, %948, %1006, %1018, %1027, %1039 in 0 : vector<32x16xf32>, vector<32x16xf32>, vector<32x16xf32>, vector<32x16xf32>, vector<32x16xf32>, vector<32x16xf32>, vector<32x16xf32>, vector<32x16xf32>, vector<32x16xf32> -> vector<288x16xf32>
    %1041 = arith.truncf %1040 : vector<288x16xf32> to vector<288x16xbf16>
    %cst_374 = arith.constant dense<0.000000e+00> : vector<32x16xf32>
    %1042 = tpu.matmul %949, %1041, %cst_374 {dimension_numbers = #tpu.dot_dimension_numbers<[1], [0], [0], [1], [0, 0, 1, 1], [], []>} : vector<32x288xbf16>, vector<288x16xbf16>, vector<32x16xf32> -> vector<32x16xf32>
    %1043 = vector.broadcast %950 : vector<32x1xf32> to vector<32x16xf32>
    %1044 = arith.addf %1042, %1043 : vector<32x16xf32>
    %cst_375 = arith.constant 0.000000e+00 : f32
    %1045 = vector.broadcast %cst_375 : f32 to vector<32x16xf32>
    %1046 = arith.maximumf %1044, %1045 : vector<32x16xf32>
    %cst_376 = arith.constant 0.000000e+00 : f32
    %1047 = vector.broadcast %cst_376 : f32 to vector<32x1xf32>
    %1048 = vector.extract_strided_slice %1046 {offsets = [0, 1], sizes = [32, 15], strides = [1, 1]} : vector<32x16xf32> to vector<32x15xf32>
    %1049 = tpu.concatenate %1048, %1047 in 1 : vector<32x15xf32>, vector<32x1xf32> -> vector<32x16xf32>
    %1050 = arith.maximumf %1046, %1049 : vector<32x16xf32>
    %cst_377 = arith.constant 0.000000e+00 : f32
    %1051 = vector.broadcast %cst_377 : f32 to vector<32x4xf32>
    %1052 = vector.extract_strided_slice %1046 {offsets = [0, 4], sizes = [32, 12], strides = [1, 1]} : vector<32x16xf32> to vector<32x12xf32>
    %1053 = tpu.concatenate %1052, %1051 in 1 : vector<32x12xf32>, vector<32x4xf32> -> vector<32x16xf32>
    %cst_378 = arith.constant 0.000000e+00 : f32
    %1054 = vector.broadcast %cst_378 : f32 to vector<32x5xf32>
    %1055 = vector.extract_strided_slice %1046 {offsets = [0, 5], sizes = [32, 11], strides = [1, 1]} : vector<32x16xf32> to vector<32x11xf32>
    %1056 = tpu.concatenate %1055, %1054 in 1 : vector<32x11xf32>, vector<32x5xf32> -> vector<32x16xf32>
    %1057 = arith.maximumf %1053, %1056 : vector<32x16xf32>
    %1058 = arith.maximumf %1050, %1057 : vector<32x16xf32>
    %1059 = tpu.iota {dimensions = array<i32: 0>} : vector<16x4xi32>
    %1060 = tpu.iota {dimensions = array<i32: 1>} : vector<16x4xi32>
    %c1_i32_379 = arith.constant 1 : i32
    %1061 = vector.broadcast %c1_i32_379 : i32 to vector<16x4xi32>
    %1062 = arith.shrsi %1060, %1061 : vector<16x4xi32>
    %c1_i32_380 = arith.constant 1 : i32
    %1063 = vector.broadcast %c1_i32_380 : i32 to vector<16x4xi32>
    %1064 = arith.andi %1060, %1063 : vector<16x4xi32>
    %c3_i32_381 = arith.constant 3 : i32
    %1065 = vector.broadcast %c3_i32_381 : i32 to vector<16x4xi32>
    %1066 = arith.shli %1062, %1065 : vector<16x4xi32>
    %c1_i32_382 = arith.constant 1 : i32
    %1067 = vector.broadcast %c1_i32_382 : i32 to vector<16x4xi32>
    %1068 = arith.shli %1064, %1067 : vector<16x4xi32>
    %1069 = arith.addi %1066, %1068 : vector<16x4xi32>
    %1070 = arith.cmpi eq, %1059, %1069 : vector<16x4xi32>
    %1071 = arith.extui %1070 : vector<16x4xi1> to vector<16x4xi32>
    %1072 = arith.sitofp %1071 : vector<16x4xi32> to vector<16x4xf32>
    %cst_383 = arith.constant dense<0.000000e+00> : vector<32x4xf32>
    %1073 = tpu.matmul %1058, %1072, %cst_383 {dimension_numbers = #tpu.dot_dimension_numbers<[1], [0], [0], [1], [0, 0, 1, 1], [], []>} : vector<32x16xf32>, vector<16x4xf32>, vector<32x4xf32> -> vector<32x4xf32>
    %c0_384 = arith.constant 0 : index
    %c0_385 = arith.constant 0 : index
    %1074 = vector.load %arg22[%c0_384, %c0_385] : memref<32x288xbf16, #tpu.memory_space<vmem>>, vector<32x288xbf16>
    %c0_386 = arith.constant 0 : index
    %c0_387 = arith.constant 0 : index
    %1075 = vector.load %arg23[%c0_386, %c0_387] : memref<32x1xf32, #tpu.memory_space<vmem>>, vector<32x1xf32>
    %1076 = tpu.iota {dimensions = array<i32: 1>} : vector<1x4xi32>
    %c1_i32_388 = arith.constant 1 : i32
    %1077 = vector.broadcast %c1_i32_388 : i32 to vector<1x4xi32>
    %1078 = arith.shrsi %1076, %1077 : vector<1x4xi32>
    %c1_i32_389 = arith.constant 1 : i32
    %1079 = vector.broadcast %c1_i32_389 : i32 to vector<1x4xi32>
    %1080 = arith.andi %1076, %1079 : vector<1x4xi32>
    %cst_390 = arith.constant 0.000000e+00 : f32
    %1081 = vector.broadcast %cst_390 : f32 to vector<32x3xf32>
    %1082 = vector.extract_strided_slice %1073 {offsets = [0, 0], sizes = [32, 1], strides = [1, 1]} : vector<32x4xf32> to vector<32x1xf32>
    %1083 = tpu.concatenate %1081, %1082 in 1 : vector<32x3xf32>, vector<32x1xf32> -> vector<32x4xf32>
    %c1_i32_391 = arith.constant 1 : i32
    %1084 = vector.broadcast %c1_i32_391 : i32 to vector<1x4xi32>
    %1085 = arith.cmpi sge, %1078, %1084 : vector<1x4xi32>
    %c1_i32_392 = arith.constant 1 : i32
    %1086 = vector.broadcast %c1_i32_392 : i32 to vector<1x4xi32>
    %1087 = arith.cmpi sge, %1080, %1086 : vector<1x4xi32>
    %1088 = arith.andi %1085, %1087 : vector<1x4xi1>
    %cst_393 = arith.constant 0.000000e+00 : f32
    %1089 = vector.broadcast %cst_393 : f32 to vector<32x4xf32>
    %1090 = vector.shape_cast %1088 : vector<1x4xi1> to vector<1x4xi1>
    %1091 = vector.broadcast %1090 : vector<1x4xi1> to vector<32x4xi1>
    %1092 = arith.select %1091, %1083, %1089 : vector<32x4xi1>, vector<32x4xf32>
    %cst_394 = arith.constant 0.000000e+00 : f32
    %1093 = vector.broadcast %cst_394 : f32 to vector<32x2xf32>
    %1094 = vector.extract_strided_slice %1073 {offsets = [0, 0], sizes = [32, 2], strides = [1, 1]} : vector<32x4xf32> to vector<32x2xf32>
    %1095 = tpu.concatenate %1093, %1094 in 1 : vector<32x2xf32>, vector<32x2xf32> -> vector<32x4xf32>
    %c1_i32_395 = arith.constant 1 : i32
    %1096 = vector.broadcast %c1_i32_395 : i32 to vector<1x4xi32>
    %1097 = arith.cmpi sge, %1078, %1096 : vector<1x4xi32>
    %cst_396 = arith.constant 0.000000e+00 : f32
    %1098 = vector.broadcast %cst_396 : f32 to vector<32x4xf32>
    %1099 = vector.shape_cast %1097 : vector<1x4xi1> to vector<1x4xi1>
    %1100 = vector.broadcast %1099 : vector<1x4xi1> to vector<32x4xi1>
    %1101 = arith.select %1100, %1095, %1098 : vector<32x4xi1>, vector<32x4xf32>
    %cst_397 = arith.constant 0.000000e+00 : f32
    %1102 = vector.broadcast %cst_397 : f32 to vector<32x1xf32>
    %1103 = vector.extract_strided_slice %1073 {offsets = [0, 0], sizes = [32, 3], strides = [1, 1]} : vector<32x4xf32> to vector<32x3xf32>
    %1104 = tpu.concatenate %1102, %1103 in 1 : vector<32x1xf32>, vector<32x3xf32> -> vector<32x4xf32>
    %c1_i32_398 = arith.constant 1 : i32
    %1105 = vector.broadcast %c1_i32_398 : i32 to vector<1x4xi32>
    %1106 = arith.cmpi sge, %1078, %1105 : vector<1x4xi32>
    %c1_i32_399 = arith.constant 1 : i32
    %1107 = vector.broadcast %c1_i32_399 : i32 to vector<1x4xi32>
    %1108 = arith.cmpi slt, %1080, %1107 : vector<1x4xi32>
    %1109 = arith.andi %1106, %1108 : vector<1x4xi1>
    %cst_400 = arith.constant 0.000000e+00 : f32
    %1110 = vector.broadcast %cst_400 : f32 to vector<32x4xf32>
    %1111 = vector.shape_cast %1109 : vector<1x4xi1> to vector<1x4xi1>
    %1112 = vector.broadcast %1111 : vector<1x4xi1> to vector<32x4xi1>
    %1113 = arith.select %1112, %1104, %1110 : vector<32x4xi1>, vector<32x4xf32>
    %cst_401 = arith.constant 0.000000e+00 : f32
    %1114 = vector.broadcast %cst_401 : f32 to vector<32x1xf32>
    %1115 = vector.extract_strided_slice %1073 {offsets = [0, 0], sizes = [32, 3], strides = [1, 1]} : vector<32x4xf32> to vector<32x3xf32>
    %1116 = tpu.concatenate %1114, %1115 in 1 : vector<32x1xf32>, vector<32x3xf32> -> vector<32x4xf32>
    %c1_i32_402 = arith.constant 1 : i32
    %1117 = vector.broadcast %c1_i32_402 : i32 to vector<1x4xi32>
    %1118 = arith.cmpi sge, %1080, %1117 : vector<1x4xi32>
    %cst_403 = arith.constant 0.000000e+00 : f32
    %1119 = vector.broadcast %cst_403 : f32 to vector<32x4xf32>
    %1120 = vector.shape_cast %1118 : vector<1x4xi1> to vector<1x4xi1>
    %1121 = vector.broadcast %1120 : vector<1x4xi1> to vector<32x4xi1>
    %1122 = arith.select %1121, %1116, %1119 : vector<32x4xi1>, vector<32x4xf32>
    %cst_404 = arith.constant 0.000000e+00 : f32
    %1123 = vector.broadcast %cst_404 : f32 to vector<32x1xf32>
    %1124 = vector.extract_strided_slice %1073 {offsets = [0, 1], sizes = [32, 3], strides = [1, 1]} : vector<32x4xf32> to vector<32x3xf32>
    %1125 = tpu.concatenate %1124, %1123 in 1 : vector<32x3xf32>, vector<32x1xf32> -> vector<32x4xf32>
    %c1_i32_405 = arith.constant 1 : i32
    %1126 = vector.broadcast %c1_i32_405 : i32 to vector<1x4xi32>
    %1127 = arith.cmpi slt, %1080, %1126 : vector<1x4xi32>
    %cst_406 = arith.constant 0.000000e+00 : f32
    %1128 = vector.broadcast %cst_406 : f32 to vector<32x4xf32>
    %1129 = vector.shape_cast %1127 : vector<1x4xi1> to vector<1x4xi1>
    %1130 = vector.broadcast %1129 : vector<1x4xi1> to vector<32x4xi1>
    %1131 = arith.select %1130, %1125, %1128 : vector<32x4xi1>, vector<32x4xf32>
    %cst_407 = arith.constant 0.000000e+00 : f32
    %1132 = vector.broadcast %cst_407 : f32 to vector<32x1xf32>
    %1133 = vector.extract_strided_slice %1073 {offsets = [0, 1], sizes = [32, 3], strides = [1, 1]} : vector<32x4xf32> to vector<32x3xf32>
    %1134 = tpu.concatenate %1133, %1132 in 1 : vector<32x3xf32>, vector<32x1xf32> -> vector<32x4xf32>
    %c1_i32_408 = arith.constant 1 : i32
    %1135 = vector.broadcast %c1_i32_408 : i32 to vector<1x4xi32>
    %1136 = arith.cmpi slt, %1078, %1135 : vector<1x4xi32>
    %c1_i32_409 = arith.constant 1 : i32
    %1137 = vector.broadcast %c1_i32_409 : i32 to vector<1x4xi32>
    %1138 = arith.cmpi sge, %1080, %1137 : vector<1x4xi32>
    %1139 = arith.andi %1136, %1138 : vector<1x4xi1>
    %cst_410 = arith.constant 0.000000e+00 : f32
    %1140 = vector.broadcast %cst_410 : f32 to vector<32x4xf32>
    %1141 = vector.shape_cast %1139 : vector<1x4xi1> to vector<1x4xi1>
    %1142 = vector.broadcast %1141 : vector<1x4xi1> to vector<32x4xi1>
    %1143 = arith.select %1142, %1134, %1140 : vector<32x4xi1>, vector<32x4xf32>
    %cst_411 = arith.constant 0.000000e+00 : f32
    %1144 = vector.broadcast %cst_411 : f32 to vector<32x2xf32>
    %1145 = vector.extract_strided_slice %1073 {offsets = [0, 2], sizes = [32, 2], strides = [1, 1]} : vector<32x4xf32> to vector<32x2xf32>
    %1146 = tpu.concatenate %1145, %1144 in 1 : vector<32x2xf32>, vector<32x2xf32> -> vector<32x4xf32>
    %c1_i32_412 = arith.constant 1 : i32
    %1147 = vector.broadcast %c1_i32_412 : i32 to vector<1x4xi32>
    %1148 = arith.cmpi slt, %1078, %1147 : vector<1x4xi32>
    %cst_413 = arith.constant 0.000000e+00 : f32
    %1149 = vector.broadcast %cst_413 : f32 to vector<32x4xf32>
    %1150 = vector.shape_cast %1148 : vector<1x4xi1> to vector<1x4xi1>
    %1151 = vector.broadcast %1150 : vector<1x4xi1> to vector<32x4xi1>
    %1152 = arith.select %1151, %1146, %1149 : vector<32x4xi1>, vector<32x4xf32>
    %cst_414 = arith.constant 0.000000e+00 : f32
    %1153 = vector.broadcast %cst_414 : f32 to vector<32x3xf32>
    %1154 = vector.extract_strided_slice %1073 {offsets = [0, 3], sizes = [32, 1], strides = [1, 1]} : vector<32x4xf32> to vector<32x1xf32>
    %1155 = tpu.concatenate %1154, %1153 in 1 : vector<32x1xf32>, vector<32x3xf32> -> vector<32x4xf32>
    %c1_i32_415 = arith.constant 1 : i32
    %1156 = vector.broadcast %c1_i32_415 : i32 to vector<1x4xi32>
    %1157 = arith.cmpi slt, %1078, %1156 : vector<1x4xi32>
    %c1_i32_416 = arith.constant 1 : i32
    %1158 = vector.broadcast %c1_i32_416 : i32 to vector<1x4xi32>
    %1159 = arith.cmpi slt, %1080, %1158 : vector<1x4xi32>
    %1160 = arith.andi %1157, %1159 : vector<1x4xi1>
    %cst_417 = arith.constant 0.000000e+00 : f32
    %1161 = vector.broadcast %cst_417 : f32 to vector<32x4xf32>
    %1162 = vector.shape_cast %1160 : vector<1x4xi1> to vector<1x4xi1>
    %1163 = vector.broadcast %1162 : vector<1x4xi1> to vector<32x4xi1>
    %1164 = arith.select %1163, %1155, %1161 : vector<32x4xi1>, vector<32x4xf32>
    %1165 = tpu.concatenate %1092, %1101, %1113, %1122, %1073, %1131, %1143, %1152, %1164 in 0 : vector<32x4xf32>, vector<32x4xf32>, vector<32x4xf32>, vector<32x4xf32>, vector<32x4xf32>, vector<32x4xf32>, vector<32x4xf32>, vector<32x4xf32>, vector<32x4xf32> -> vector<288x4xf32>
    %1166 = arith.truncf %1165 : vector<288x4xf32> to vector<288x4xbf16>
    %cst_418 = arith.constant dense<0.000000e+00> : vector<32x4xf32>
    %1167 = tpu.matmul %1074, %1166, %cst_418 {dimension_numbers = #tpu.dot_dimension_numbers<[1], [0], [0], [1], [0, 0, 1, 1], [], []>} : vector<32x288xbf16>, vector<288x4xbf16>, vector<32x4xf32> -> vector<32x4xf32>
    %1168 = vector.broadcast %1075 : vector<32x1xf32> to vector<32x4xf32>
    %1169 = arith.addf %1167, %1168 : vector<32x4xf32>
    %cst_419 = arith.constant 0.000000e+00 : f32
    %1170 = vector.broadcast %cst_419 : f32 to vector<32x4xf32>
    %1171 = arith.maximumf %1169, %1170 : vector<32x4xf32>
    %c0_420 = arith.constant 0 : index
    %c0_421 = arith.constant 0 : index
    %1172 = vector.load %arg24[%c0_420, %c0_421] : memref<32x288xbf16, #tpu.memory_space<vmem>>, vector<32x288xbf16>
    %c0_422 = arith.constant 0 : index
    %c0_423 = arith.constant 0 : index
    %1173 = vector.load %arg25[%c0_422, %c0_423] : memref<32x1xf32, #tpu.memory_space<vmem>>, vector<32x1xf32>
    %1174 = tpu.iota {dimensions = array<i32: 1>} : vector<1x4xi32>
    %c1_i32_424 = arith.constant 1 : i32
    %1175 = vector.broadcast %c1_i32_424 : i32 to vector<1x4xi32>
    %1176 = arith.shrsi %1174, %1175 : vector<1x4xi32>
    %c1_i32_425 = arith.constant 1 : i32
    %1177 = vector.broadcast %c1_i32_425 : i32 to vector<1x4xi32>
    %1178 = arith.andi %1174, %1177 : vector<1x4xi32>
    %cst_426 = arith.constant 0.000000e+00 : f32
    %1179 = vector.broadcast %cst_426 : f32 to vector<32x3xf32>
    %1180 = vector.extract_strided_slice %1171 {offsets = [0, 0], sizes = [32, 1], strides = [1, 1]} : vector<32x4xf32> to vector<32x1xf32>
    %1181 = tpu.concatenate %1179, %1180 in 1 : vector<32x3xf32>, vector<32x1xf32> -> vector<32x4xf32>
    %c1_i32_427 = arith.constant 1 : i32
    %1182 = vector.broadcast %c1_i32_427 : i32 to vector<1x4xi32>
    %1183 = arith.cmpi sge, %1176, %1182 : vector<1x4xi32>
    %c1_i32_428 = arith.constant 1 : i32
    %1184 = vector.broadcast %c1_i32_428 : i32 to vector<1x4xi32>
    %1185 = arith.cmpi sge, %1178, %1184 : vector<1x4xi32>
    %1186 = arith.andi %1183, %1185 : vector<1x4xi1>
    %cst_429 = arith.constant 0.000000e+00 : f32
    %1187 = vector.broadcast %cst_429 : f32 to vector<32x4xf32>
    %1188 = vector.shape_cast %1186 : vector<1x4xi1> to vector<1x4xi1>
    %1189 = vector.broadcast %1188 : vector<1x4xi1> to vector<32x4xi1>
    %1190 = arith.select %1189, %1181, %1187 : vector<32x4xi1>, vector<32x4xf32>
    %cst_430 = arith.constant 0.000000e+00 : f32
    %1191 = vector.broadcast %cst_430 : f32 to vector<32x2xf32>
    %1192 = vector.extract_strided_slice %1171 {offsets = [0, 0], sizes = [32, 2], strides = [1, 1]} : vector<32x4xf32> to vector<32x2xf32>
    %1193 = tpu.concatenate %1191, %1192 in 1 : vector<32x2xf32>, vector<32x2xf32> -> vector<32x4xf32>
    %c1_i32_431 = arith.constant 1 : i32
    %1194 = vector.broadcast %c1_i32_431 : i32 to vector<1x4xi32>
    %1195 = arith.cmpi sge, %1176, %1194 : vector<1x4xi32>
    %cst_432 = arith.constant 0.000000e+00 : f32
    %1196 = vector.broadcast %cst_432 : f32 to vector<32x4xf32>
    %1197 = vector.shape_cast %1195 : vector<1x4xi1> to vector<1x4xi1>
    %1198 = vector.broadcast %1197 : vector<1x4xi1> to vector<32x4xi1>
    %1199 = arith.select %1198, %1193, %1196 : vector<32x4xi1>, vector<32x4xf32>
    %cst_433 = arith.constant 0.000000e+00 : f32
    %1200 = vector.broadcast %cst_433 : f32 to vector<32x1xf32>
    %1201 = vector.extract_strided_slice %1171 {offsets = [0, 0], sizes = [32, 3], strides = [1, 1]} : vector<32x4xf32> to vector<32x3xf32>
    %1202 = tpu.concatenate %1200, %1201 in 1 : vector<32x1xf32>, vector<32x3xf32> -> vector<32x4xf32>
    %c1_i32_434 = arith.constant 1 : i32
    %1203 = vector.broadcast %c1_i32_434 : i32 to vector<1x4xi32>
    %1204 = arith.cmpi sge, %1176, %1203 : vector<1x4xi32>
    %c1_i32_435 = arith.constant 1 : i32
    %1205 = vector.broadcast %c1_i32_435 : i32 to vector<1x4xi32>
    %1206 = arith.cmpi slt, %1178, %1205 : vector<1x4xi32>
    %1207 = arith.andi %1204, %1206 : vector<1x4xi1>
    %cst_436 = arith.constant 0.000000e+00 : f32
    %1208 = vector.broadcast %cst_436 : f32 to vector<32x4xf32>
    %1209 = vector.shape_cast %1207 : vector<1x4xi1> to vector<1x4xi1>
    %1210 = vector.broadcast %1209 : vector<1x4xi1> to vector<32x4xi1>
    %1211 = arith.select %1210, %1202, %1208 : vector<32x4xi1>, vector<32x4xf32>
    %cst_437 = arith.constant 0.000000e+00 : f32
    %1212 = vector.broadcast %cst_437 : f32 to vector<32x1xf32>
    %1213 = vector.extract_strided_slice %1171 {offsets = [0, 0], sizes = [32, 3], strides = [1, 1]} : vector<32x4xf32> to vector<32x3xf32>
    %1214 = tpu.concatenate %1212, %1213 in 1 : vector<32x1xf32>, vector<32x3xf32> -> vector<32x4xf32>
    %c1_i32_438 = arith.constant 1 : i32
    %1215 = vector.broadcast %c1_i32_438 : i32 to vector<1x4xi32>
    %1216 = arith.cmpi sge, %1178, %1215 : vector<1x4xi32>
    %cst_439 = arith.constant 0.000000e+00 : f32
    %1217 = vector.broadcast %cst_439 : f32 to vector<32x4xf32>
    %1218 = vector.shape_cast %1216 : vector<1x4xi1> to vector<1x4xi1>
    %1219 = vector.broadcast %1218 : vector<1x4xi1> to vector<32x4xi1>
    %1220 = arith.select %1219, %1214, %1217 : vector<32x4xi1>, vector<32x4xf32>
    %cst_440 = arith.constant 0.000000e+00 : f32
    %1221 = vector.broadcast %cst_440 : f32 to vector<32x1xf32>
    %1222 = vector.extract_strided_slice %1171 {offsets = [0, 1], sizes = [32, 3], strides = [1, 1]} : vector<32x4xf32> to vector<32x3xf32>
    %1223 = tpu.concatenate %1222, %1221 in 1 : vector<32x3xf32>, vector<32x1xf32> -> vector<32x4xf32>
    %c1_i32_441 = arith.constant 1 : i32
    %1224 = vector.broadcast %c1_i32_441 : i32 to vector<1x4xi32>
    %1225 = arith.cmpi slt, %1178, %1224 : vector<1x4xi32>
    %cst_442 = arith.constant 0.000000e+00 : f32
    %1226 = vector.broadcast %cst_442 : f32 to vector<32x4xf32>
    %1227 = vector.shape_cast %1225 : vector<1x4xi1> to vector<1x4xi1>
    %1228 = vector.broadcast %1227 : vector<1x4xi1> to vector<32x4xi1>
    %1229 = arith.select %1228, %1223, %1226 : vector<32x4xi1>, vector<32x4xf32>
    %cst_443 = arith.constant 0.000000e+00 : f32
    %1230 = vector.broadcast %cst_443 : f32 to vector<32x1xf32>
    %1231 = vector.extract_strided_slice %1171 {offsets = [0, 1], sizes = [32, 3], strides = [1, 1]} : vector<32x4xf32> to vector<32x3xf32>
    %1232 = tpu.concatenate %1231, %1230 in 1 : vector<32x3xf32>, vector<32x1xf32> -> vector<32x4xf32>
    %c1_i32_444 = arith.constant 1 : i32
    %1233 = vector.broadcast %c1_i32_444 : i32 to vector<1x4xi32>
    %1234 = arith.cmpi slt, %1176, %1233 : vector<1x4xi32>
    %c1_i32_445 = arith.constant 1 : i32
    %1235 = vector.broadcast %c1_i32_445 : i32 to vector<1x4xi32>
    %1236 = arith.cmpi sge, %1178, %1235 : vector<1x4xi32>
    %1237 = arith.andi %1234, %1236 : vector<1x4xi1>
    %cst_446 = arith.constant 0.000000e+00 : f32
    %1238 = vector.broadcast %cst_446 : f32 to vector<32x4xf32>
    %1239 = vector.shape_cast %1237 : vector<1x4xi1> to vector<1x4xi1>
    %1240 = vector.broadcast %1239 : vector<1x4xi1> to vector<32x4xi1>
    %1241 = arith.select %1240, %1232, %1238 : vector<32x4xi1>, vector<32x4xf32>
    %cst_447 = arith.constant 0.000000e+00 : f32
    %1242 = vector.broadcast %cst_447 : f32 to vector<32x2xf32>
    %1243 = vector.extract_strided_slice %1171 {offsets = [0, 2], sizes = [32, 2], strides = [1, 1]} : vector<32x4xf32> to vector<32x2xf32>
    %1244 = tpu.concatenate %1243, %1242 in 1 : vector<32x2xf32>, vector<32x2xf32> -> vector<32x4xf32>
    %c1_i32_448 = arith.constant 1 : i32
    %1245 = vector.broadcast %c1_i32_448 : i32 to vector<1x4xi32>
    %1246 = arith.cmpi slt, %1176, %1245 : vector<1x4xi32>
    %cst_449 = arith.constant 0.000000e+00 : f32
    %1247 = vector.broadcast %cst_449 : f32 to vector<32x4xf32>
    %1248 = vector.shape_cast %1246 : vector<1x4xi1> to vector<1x4xi1>
    %1249 = vector.broadcast %1248 : vector<1x4xi1> to vector<32x4xi1>
    %1250 = arith.select %1249, %1244, %1247 : vector<32x4xi1>, vector<32x4xf32>
    %cst_450 = arith.constant 0.000000e+00 : f32
    %1251 = vector.broadcast %cst_450 : f32 to vector<32x3xf32>
    %1252 = vector.extract_strided_slice %1171 {offsets = [0, 3], sizes = [32, 1], strides = [1, 1]} : vector<32x4xf32> to vector<32x1xf32>
    %1253 = tpu.concatenate %1252, %1251 in 1 : vector<32x1xf32>, vector<32x3xf32> -> vector<32x4xf32>
    %c1_i32_451 = arith.constant 1 : i32
    %1254 = vector.broadcast %c1_i32_451 : i32 to vector<1x4xi32>
    %1255 = arith.cmpi slt, %1176, %1254 : vector<1x4xi32>
    %c1_i32_452 = arith.constant 1 : i32
    %1256 = vector.broadcast %c1_i32_452 : i32 to vector<1x4xi32>
    %1257 = arith.cmpi slt, %1178, %1256 : vector<1x4xi32>
    %1258 = arith.andi %1255, %1257 : vector<1x4xi1>
    %cst_453 = arith.constant 0.000000e+00 : f32
    %1259 = vector.broadcast %cst_453 : f32 to vector<32x4xf32>
    %1260 = vector.shape_cast %1258 : vector<1x4xi1> to vector<1x4xi1>
    %1261 = vector.broadcast %1260 : vector<1x4xi1> to vector<32x4xi1>
    %1262 = arith.select %1261, %1253, %1259 : vector<32x4xi1>, vector<32x4xf32>
    %1263 = tpu.concatenate %1190, %1199, %1211, %1220, %1171, %1229, %1241, %1250, %1262 in 0 : vector<32x4xf32>, vector<32x4xf32>, vector<32x4xf32>, vector<32x4xf32>, vector<32x4xf32>, vector<32x4xf32>, vector<32x4xf32>, vector<32x4xf32>, vector<32x4xf32> -> vector<288x4xf32>
    %1264 = arith.truncf %1263 : vector<288x4xf32> to vector<288x4xbf16>
    %cst_454 = arith.constant dense<0.000000e+00> : vector<32x4xf32>
    %1265 = tpu.matmul %1172, %1264, %cst_454 {dimension_numbers = #tpu.dot_dimension_numbers<[1], [0], [0], [1], [0, 0, 1, 1], [], []>} : vector<32x288xbf16>, vector<288x4xbf16>, vector<32x4xf32> -> vector<32x4xf32>
    %1266 = vector.broadcast %1173 : vector<32x1xf32> to vector<32x4xf32>
    %1267 = arith.addf %1265, %1266 : vector<32x4xf32>
    %cst_455 = arith.constant 0.000000e+00 : f32
    %1268 = vector.broadcast %cst_455 : f32 to vector<32x4xf32>
    %1269 = arith.maximumf %1267, %1268 : vector<32x4xf32>
    %c0_456 = arith.constant 0 : index
    %c0_457 = arith.constant 0 : index
    %1270 = vector.load %arg26[%c0_456, %c0_457] : memref<32x288xbf16, #tpu.memory_space<vmem>>, vector<32x288xbf16>
    %c0_458 = arith.constant 0 : index
    %c0_459 = arith.constant 0 : index
    %1271 = vector.load %arg27[%c0_458, %c0_459] : memref<32x1xf32, #tpu.memory_space<vmem>>, vector<32x1xf32>
    %1272 = tpu.iota {dimensions = array<i32: 1>} : vector<1x4xi32>
    %c1_i32_460 = arith.constant 1 : i32
    %1273 = vector.broadcast %c1_i32_460 : i32 to vector<1x4xi32>
    %1274 = arith.shrsi %1272, %1273 : vector<1x4xi32>
    %c1_i32_461 = arith.constant 1 : i32
    %1275 = vector.broadcast %c1_i32_461 : i32 to vector<1x4xi32>
    %1276 = arith.andi %1272, %1275 : vector<1x4xi32>
    %cst_462 = arith.constant 0.000000e+00 : f32
    %1277 = vector.broadcast %cst_462 : f32 to vector<32x3xf32>
    %1278 = vector.extract_strided_slice %1269 {offsets = [0, 0], sizes = [32, 1], strides = [1, 1]} : vector<32x4xf32> to vector<32x1xf32>
    %1279 = tpu.concatenate %1277, %1278 in 1 : vector<32x3xf32>, vector<32x1xf32> -> vector<32x4xf32>
    %c1_i32_463 = arith.constant 1 : i32
    %1280 = vector.broadcast %c1_i32_463 : i32 to vector<1x4xi32>
    %1281 = arith.cmpi sge, %1274, %1280 : vector<1x4xi32>
    %c1_i32_464 = arith.constant 1 : i32
    %1282 = vector.broadcast %c1_i32_464 : i32 to vector<1x4xi32>
    %1283 = arith.cmpi sge, %1276, %1282 : vector<1x4xi32>
    %1284 = arith.andi %1281, %1283 : vector<1x4xi1>
    %cst_465 = arith.constant 0.000000e+00 : f32
    %1285 = vector.broadcast %cst_465 : f32 to vector<32x4xf32>
    %1286 = vector.shape_cast %1284 : vector<1x4xi1> to vector<1x4xi1>
    %1287 = vector.broadcast %1286 : vector<1x4xi1> to vector<32x4xi1>
    %1288 = arith.select %1287, %1279, %1285 : vector<32x4xi1>, vector<32x4xf32>
    %cst_466 = arith.constant 0.000000e+00 : f32
    %1289 = vector.broadcast %cst_466 : f32 to vector<32x2xf32>
    %1290 = vector.extract_strided_slice %1269 {offsets = [0, 0], sizes = [32, 2], strides = [1, 1]} : vector<32x4xf32> to vector<32x2xf32>
    %1291 = tpu.concatenate %1289, %1290 in 1 : vector<32x2xf32>, vector<32x2xf32> -> vector<32x4xf32>
    %c1_i32_467 = arith.constant 1 : i32
    %1292 = vector.broadcast %c1_i32_467 : i32 to vector<1x4xi32>
    %1293 = arith.cmpi sge, %1274, %1292 : vector<1x4xi32>
    %cst_468 = arith.constant 0.000000e+00 : f32
    %1294 = vector.broadcast %cst_468 : f32 to vector<32x4xf32>
    %1295 = vector.shape_cast %1293 : vector<1x4xi1> to vector<1x4xi1>
    %1296 = vector.broadcast %1295 : vector<1x4xi1> to vector<32x4xi1>
    %1297 = arith.select %1296, %1291, %1294 : vector<32x4xi1>, vector<32x4xf32>
    %cst_469 = arith.constant 0.000000e+00 : f32
    %1298 = vector.broadcast %cst_469 : f32 to vector<32x1xf32>
    %1299 = vector.extract_strided_slice %1269 {offsets = [0, 0], sizes = [32, 3], strides = [1, 1]} : vector<32x4xf32> to vector<32x3xf32>
    %1300 = tpu.concatenate %1298, %1299 in 1 : vector<32x1xf32>, vector<32x3xf32> -> vector<32x4xf32>
    %c1_i32_470 = arith.constant 1 : i32
    %1301 = vector.broadcast %c1_i32_470 : i32 to vector<1x4xi32>
    %1302 = arith.cmpi sge, %1274, %1301 : vector<1x4xi32>
    %c1_i32_471 = arith.constant 1 : i32
    %1303 = vector.broadcast %c1_i32_471 : i32 to vector<1x4xi32>
    %1304 = arith.cmpi slt, %1276, %1303 : vector<1x4xi32>
    %1305 = arith.andi %1302, %1304 : vector<1x4xi1>
    %cst_472 = arith.constant 0.000000e+00 : f32
    %1306 = vector.broadcast %cst_472 : f32 to vector<32x4xf32>
    %1307 = vector.shape_cast %1305 : vector<1x4xi1> to vector<1x4xi1>
    %1308 = vector.broadcast %1307 : vector<1x4xi1> to vector<32x4xi1>
    %1309 = arith.select %1308, %1300, %1306 : vector<32x4xi1>, vector<32x4xf32>
    %cst_473 = arith.constant 0.000000e+00 : f32
    %1310 = vector.broadcast %cst_473 : f32 to vector<32x1xf32>
    %1311 = vector.extract_strided_slice %1269 {offsets = [0, 0], sizes = [32, 3], strides = [1, 1]} : vector<32x4xf32> to vector<32x3xf32>
    %1312 = tpu.concatenate %1310, %1311 in 1 : vector<32x1xf32>, vector<32x3xf32> -> vector<32x4xf32>
    %c1_i32_474 = arith.constant 1 : i32
    %1313 = vector.broadcast %c1_i32_474 : i32 to vector<1x4xi32>
    %1314 = arith.cmpi sge, %1276, %1313 : vector<1x4xi32>
    %cst_475 = arith.constant 0.000000e+00 : f32
    %1315 = vector.broadcast %cst_475 : f32 to vector<32x4xf32>
    %1316 = vector.shape_cast %1314 : vector<1x4xi1> to vector<1x4xi1>
    %1317 = vector.broadcast %1316 : vector<1x4xi1> to vector<32x4xi1>
    %1318 = arith.select %1317, %1312, %1315 : vector<32x4xi1>, vector<32x4xf32>
    %cst_476 = arith.constant 0.000000e+00 : f32
    %1319 = vector.broadcast %cst_476 : f32 to vector<32x1xf32>
    %1320 = vector.extract_strided_slice %1269 {offsets = [0, 1], sizes = [32, 3], strides = [1, 1]} : vector<32x4xf32> to vector<32x3xf32>
    %1321 = tpu.concatenate %1320, %1319 in 1 : vector<32x3xf32>, vector<32x1xf32> -> vector<32x4xf32>
    %c1_i32_477 = arith.constant 1 : i32
    %1322 = vector.broadcast %c1_i32_477 : i32 to vector<1x4xi32>
    %1323 = arith.cmpi slt, %1276, %1322 : vector<1x4xi32>
    %cst_478 = arith.constant 0.000000e+00 : f32
    %1324 = vector.broadcast %cst_478 : f32 to vector<32x4xf32>
    %1325 = vector.shape_cast %1323 : vector<1x4xi1> to vector<1x4xi1>
    %1326 = vector.broadcast %1325 : vector<1x4xi1> to vector<32x4xi1>
    %1327 = arith.select %1326, %1321, %1324 : vector<32x4xi1>, vector<32x4xf32>
    %cst_479 = arith.constant 0.000000e+00 : f32
    %1328 = vector.broadcast %cst_479 : f32 to vector<32x1xf32>
    %1329 = vector.extract_strided_slice %1269 {offsets = [0, 1], sizes = [32, 3], strides = [1, 1]} : vector<32x4xf32> to vector<32x3xf32>
    %1330 = tpu.concatenate %1329, %1328 in 1 : vector<32x3xf32>, vector<32x1xf32> -> vector<32x4xf32>
    %c1_i32_480 = arith.constant 1 : i32
    %1331 = vector.broadcast %c1_i32_480 : i32 to vector<1x4xi32>
    %1332 = arith.cmpi slt, %1274, %1331 : vector<1x4xi32>
    %c1_i32_481 = arith.constant 1 : i32
    %1333 = vector.broadcast %c1_i32_481 : i32 to vector<1x4xi32>
    %1334 = arith.cmpi sge, %1276, %1333 : vector<1x4xi32>
    %1335 = arith.andi %1332, %1334 : vector<1x4xi1>
    %cst_482 = arith.constant 0.000000e+00 : f32
    %1336 = vector.broadcast %cst_482 : f32 to vector<32x4xf32>
    %1337 = vector.shape_cast %1335 : vector<1x4xi1> to vector<1x4xi1>
    %1338 = vector.broadcast %1337 : vector<1x4xi1> to vector<32x4xi1>
    %1339 = arith.select %1338, %1330, %1336 : vector<32x4xi1>, vector<32x4xf32>
    %cst_483 = arith.constant 0.000000e+00 : f32
    %1340 = vector.broadcast %cst_483 : f32 to vector<32x2xf32>
    %1341 = vector.extract_strided_slice %1269 {offsets = [0, 2], sizes = [32, 2], strides = [1, 1]} : vector<32x4xf32> to vector<32x2xf32>
    %1342 = tpu.concatenate %1341, %1340 in 1 : vector<32x2xf32>, vector<32x2xf32> -> vector<32x4xf32>
    %c1_i32_484 = arith.constant 1 : i32
    %1343 = vector.broadcast %c1_i32_484 : i32 to vector<1x4xi32>
    %1344 = arith.cmpi slt, %1274, %1343 : vector<1x4xi32>
    %cst_485 = arith.constant 0.000000e+00 : f32
    %1345 = vector.broadcast %cst_485 : f32 to vector<32x4xf32>
    %1346 = vector.shape_cast %1344 : vector<1x4xi1> to vector<1x4xi1>
    %1347 = vector.broadcast %1346 : vector<1x4xi1> to vector<32x4xi1>
    %1348 = arith.select %1347, %1342, %1345 : vector<32x4xi1>, vector<32x4xf32>
    %cst_486 = arith.constant 0.000000e+00 : f32
    %1349 = vector.broadcast %cst_486 : f32 to vector<32x3xf32>
    %1350 = vector.extract_strided_slice %1269 {offsets = [0, 3], sizes = [32, 1], strides = [1, 1]} : vector<32x4xf32> to vector<32x1xf32>
    %1351 = tpu.concatenate %1350, %1349 in 1 : vector<32x1xf32>, vector<32x3xf32> -> vector<32x4xf32>
    %c1_i32_487 = arith.constant 1 : i32
    %1352 = vector.broadcast %c1_i32_487 : i32 to vector<1x4xi32>
    %1353 = arith.cmpi slt, %1274, %1352 : vector<1x4xi32>
    %c1_i32_488 = arith.constant 1 : i32
    %1354 = vector.broadcast %c1_i32_488 : i32 to vector<1x4xi32>
    %1355 = arith.cmpi slt, %1276, %1354 : vector<1x4xi32>
    %1356 = arith.andi %1353, %1355 : vector<1x4xi1>
    %cst_489 = arith.constant 0.000000e+00 : f32
    %1357 = vector.broadcast %cst_489 : f32 to vector<32x4xf32>
    %1358 = vector.shape_cast %1356 : vector<1x4xi1> to vector<1x4xi1>
    %1359 = vector.broadcast %1358 : vector<1x4xi1> to vector<32x4xi1>
    %1360 = arith.select %1359, %1351, %1357 : vector<32x4xi1>, vector<32x4xf32>
    %1361 = tpu.concatenate %1288, %1297, %1309, %1318, %1269, %1327, %1339, %1348, %1360 in 0 : vector<32x4xf32>, vector<32x4xf32>, vector<32x4xf32>, vector<32x4xf32>, vector<32x4xf32>, vector<32x4xf32>, vector<32x4xf32>, vector<32x4xf32>, vector<32x4xf32> -> vector<288x4xf32>
    %1362 = arith.truncf %1361 : vector<288x4xf32> to vector<288x4xbf16>
    %cst_490 = arith.constant dense<0.000000e+00> : vector<32x4xf32>
    %1363 = tpu.matmul %1270, %1362, %cst_490 {dimension_numbers = #tpu.dot_dimension_numbers<[1], [0], [0], [1], [0, 0, 1, 1], [], []>} : vector<32x288xbf16>, vector<288x4xbf16>, vector<32x4xf32> -> vector<32x4xf32>
    %1364 = vector.broadcast %1271 : vector<32x1xf32> to vector<32x4xf32>
    %1365 = arith.addf %1363, %1364 : vector<32x4xf32>
    %cst_491 = arith.constant 0.000000e+00 : f32
    %1366 = vector.broadcast %cst_491 : f32 to vector<32x4xf32>
    %1367 = arith.maximumf %1365, %1366 : vector<32x4xf32>
    %cst_492 = arith.constant 0.000000e+00 : f32
    %1368 = vector.broadcast %cst_492 : f32 to vector<32x1xf32>
    %1369 = vector.extract_strided_slice %1367 {offsets = [0, 1], sizes = [32, 3], strides = [1, 1]} : vector<32x4xf32> to vector<32x3xf32>
    %1370 = tpu.concatenate %1369, %1368 in 1 : vector<32x3xf32>, vector<32x1xf32> -> vector<32x4xf32>
    %1371 = arith.maximumf %1367, %1370 : vector<32x4xf32>
    %cst_493 = arith.constant 0.000000e+00 : f32
    %1372 = vector.broadcast %cst_493 : f32 to vector<32x2xf32>
    %1373 = vector.extract_strided_slice %1367 {offsets = [0, 2], sizes = [32, 2], strides = [1, 1]} : vector<32x4xf32> to vector<32x2xf32>
    %1374 = tpu.concatenate %1373, %1372 in 1 : vector<32x2xf32>, vector<32x2xf32> -> vector<32x4xf32>
    %cst_494 = arith.constant 0.000000e+00 : f32
    %1375 = vector.broadcast %cst_494 : f32 to vector<32x3xf32>
    %1376 = vector.extract_strided_slice %1367 {offsets = [0, 3], sizes = [32, 1], strides = [1, 1]} : vector<32x4xf32> to vector<32x1xf32>
    %1377 = tpu.concatenate %1376, %1375 in 1 : vector<32x1xf32>, vector<32x3xf32> -> vector<32x4xf32>
    %1378 = arith.maximumf %1374, %1377 : vector<32x4xf32>
    %1379 = arith.maximumf %1371, %1378 : vector<32x4xf32>
    %1380 = tpu.iota {dimensions = array<i32: 0>} : vector<4x1xi32>
    %1381 = tpu.iota {dimensions = array<i32: 1>} : vector<4x1xi32>
    %c0_i32 = arith.constant 0 : i32
    %1382 = vector.broadcast %c0_i32 : i32 to vector<4x1xi32>
    %1383 = arith.shrsi %1381, %1382 : vector<4x1xi32>
    %c0_i32_495 = arith.constant 0 : i32
    %1384 = vector.broadcast %c0_i32_495 : i32 to vector<4x1xi32>
    %1385 = arith.andi %1381, %1384 : vector<4x1xi32>
    %c2_i32_496 = arith.constant 2 : i32
    %1386 = vector.broadcast %c2_i32_496 : i32 to vector<4x1xi32>
    %1387 = arith.shli %1383, %1386 : vector<4x1xi32>
    %c1_i32_497 = arith.constant 1 : i32
    %1388 = vector.broadcast %c1_i32_497 : i32 to vector<4x1xi32>
    %1389 = arith.shli %1385, %1388 : vector<4x1xi32>
    %1390 = arith.addi %1387, %1389 : vector<4x1xi32>
    %1391 = arith.cmpi eq, %1380, %1390 : vector<4x1xi32>
    %1392 = arith.extui %1391 : vector<4x1xi1> to vector<4x1xi32>
    %1393 = arith.sitofp %1392 : vector<4x1xi32> to vector<4x1xf32>
    %cst_498 = arith.constant dense<0.000000e+00> : vector<32x1xf32>
    %1394 = tpu.matmul %1379, %1393, %cst_498 {dimension_numbers = #tpu.dot_dimension_numbers<[1], [0], [0], [1], [0, 0, 1, 1], [], []>} : vector<32x4xf32>, vector<4x1xf32>, vector<32x1xf32> -> vector<32x1xf32>
    %c0_499 = arith.constant 0 : index
    %c0_500 = arith.constant 0 : index
    %1395 = vector.load %arg28[%c0_499, %c0_500] : memref<64x32xbf16, #tpu.memory_space<vmem>>, vector<64x32xbf16>
    %c0_501 = arith.constant 0 : index
    %c0_502 = arith.constant 0 : index
    %1396 = vector.load %arg29[%c0_501, %c0_502] : memref<64x1xf32, #tpu.memory_space<vmem>>, vector<64x1xf32>
    %c0_503 = arith.constant 0 : index
    %c0_504 = arith.constant 0 : index
    %1397 = vector.load %arg30[%c0_503, %c0_504] : memref<64x64xbf16, #tpu.memory_space<vmem>>, vector<64x64xbf16>
    %c0_505 = arith.constant 0 : index
    %c0_506 = arith.constant 0 : index
    %1398 = vector.load %arg31[%c0_505, %c0_506] : memref<64x1xf32, #tpu.memory_space<vmem>>, vector<64x1xf32>
    %c0_507 = arith.constant 0 : index
    %c0_508 = arith.constant 0 : index
    %1399 = vector.load %arg32[%c0_507, %c0_508] : memref<2x64xbf16, #tpu.memory_space<vmem>>, vector<2x64xbf16>
    %c0_509 = arith.constant 0 : index
    %c0_510 = arith.constant 0 : index
    %1400 = vector.load %arg33[%c0_509, %c0_510] : memref<2x1xf32, #tpu.memory_space<vmem>>, vector<2x1xf32>
    %1401 = arith.truncf %1394 : vector<32x1xf32> to vector<32x1xbf16>
    %cst_511 = arith.constant dense<0.000000e+00> : vector<64x1xf32>
    %1402 = tpu.matmul %1395, %1401, %cst_511 {dimension_numbers = #tpu.dot_dimension_numbers<[1], [0], [0], [1], [0, 0, 1, 1], [], []>} : vector<64x32xbf16>, vector<32x1xbf16>, vector<64x1xf32> -> vector<64x1xf32>
    %1403 = arith.addf %1402, %1396 : vector<64x1xf32>
    %cst_512 = arith.constant 0.000000e+00 : f32
    %1404 = vector.broadcast %cst_512 : f32 to vector<64x1xf32>
    %1405 = arith.maximumf %1403, %1404 : vector<64x1xf32>
    %1406 = arith.truncf %1405 : vector<64x1xf32> to vector<64x1xbf16>
    %cst_513 = arith.constant dense<0.000000e+00> : vector<64x1xf32>
    %1407 = tpu.matmul %1397, %1406, %cst_513 {dimension_numbers = #tpu.dot_dimension_numbers<[1], [0], [0], [1], [0, 0, 1, 1], [], []>} : vector<64x64xbf16>, vector<64x1xbf16>, vector<64x1xf32> -> vector<64x1xf32>
    %1408 = arith.addf %1407, %1398 : vector<64x1xf32>
    %cst_514 = arith.constant 0.000000e+00 : f32
    %1409 = vector.broadcast %cst_514 : f32 to vector<64x1xf32>
    %1410 = arith.maximumf %1408, %1409 : vector<64x1xf32>
    %1411 = arith.truncf %1410 : vector<64x1xf32> to vector<64x1xbf16>
    %cst_515 = arith.constant dense<0.000000e+00> : vector<2x1xf32>
    %1412 = tpu.matmul %1399, %1411, %cst_515 {dimension_numbers = #tpu.dot_dimension_numbers<[1], [0], [0], [1], [0, 0, 1, 1], [], []>} : vector<2x64xbf16>, vector<64x1xbf16>, vector<2x1xf32> -> vector<2x1xf32>
    %1413 = arith.addf %1412, %1400 : vector<2x1xf32>
    %1414 = vector.shape_cast %1410 : vector<64x1xf32> to vector<1x64x1xf32>
    %c0_516 = arith.constant 0 : index
    %c0_517 = arith.constant 0 : index
    %c0_518 = arith.constant 0 : index
    %1415 = vector.load %arg34[%c0_516, %c0_517, %c0_518] : memref<1x64x1xf32, #tpu.memory_space<vmem>>, vector<1x64x1xf32>
    tpu.vector_store %arg34[%c0_516, %c0_517, %c0_518], %1414 {strides = array<i32>} : memref<1x64x1xf32, #tpu.memory_space<vmem>>, vector<1x64x1xf32>,
    %1416 = vector.shape_cast %1413 : vector<2x1xf32> to vector<1x2x1xf32>
    %c0_519 = arith.constant 0 : index
    %c0_520 = arith.constant 0 : index
    %c0_521 = arith.constant 0 : index
    %1417 = vector.load %arg35[%c0_519, %c0_520, %c0_521] : memref<1x2x1xf32, #tpu.memory_space<vmem>>, vector<1x2x1xf32>
    tpu.vector_store %arg35[%c0_519, %c0_520, %c0_521], %1416 {strides = array<i32>} : memref<1x2x1xf32, #tpu.memory_space<vmem>>, vector<1x2x1xf32>,
    return
  }
  func.func @transform_0(%arg0: i32) -> (i32, i32, i32) {
    %c0_i32 = arith.constant 0 : i32
    %c0_i32_0 = arith.constant 0 : i32
    %c0_i32_1 = arith.constant 0 : i32
    return %arg0, %c0_i32, %c0_i32_0 : i32, i32, i32
  }
  func.func @transform_1(%arg0: i32) -> (i32, i32) {
    %c0_i32 = arith.constant 0 : i32
    %c0_i32_0 = arith.constant 0 : i32
    %c0_i32_1 = arith.constant 0 : i32
    return %c0_i32, %c0_i32_0 : i32, i32
  }
  func.func @transform_2(%arg0: i32) -> (i32, i32) {
    %c0_i32 = arith.constant 0 : i32
    %c0_i32_0 = arith.constant 0 : i32
    %c0_i32_1 = arith.constant 0 : i32
    return %c0_i32, %c0_i32_0 : i32, i32
  }
  func.func @transform_3(%arg0: i32) -> (i32, i32) {
    %c0_i32 = arith.constant 0 : i32
    %c0_i32_0 = arith.constant 0 : i32
    %c0_i32_1 = arith.constant 0 : i32
    return %c0_i32, %c0_i32_0 : i32, i32
  }
  func.func @transform_4(%arg0: i32) -> (i32, i32) {
    %c0_i32 = arith.constant 0 : i32
    %c0_i32_0 = arith.constant 0 : i32
    %c0_i32_1 = arith.constant 0 : i32
    return %c0_i32, %c0_i32_0 : i32, i32
  }
  func.func @transform_5(%arg0: i32) -> (i32, i32) {
    %c0_i32 = arith.constant 0 : i32
    %c0_i32_0 = arith.constant 0 : i32
    %c0_i32_1 = arith.constant 0 : i32
    return %c0_i32, %c0_i32_0 : i32, i32
  }
  func.func @transform_6(%arg0: i32) -> (i32, i32) {
    %c0_i32 = arith.constant 0 : i32
    %c0_i32_0 = arith.constant 0 : i32
    %c0_i32_1 = arith.constant 0 : i32
    return %c0_i32, %c0_i32_0 : i32, i32
  }
  func.func @transform_7(%arg0: i32) -> (i32, i32) {
    %c0_i32 = arith.constant 0 : i32
    %c0_i32_0 = arith.constant 0 : i32
    %c0_i32_1 = arith.constant 0 : i32
    return %c0_i32, %c0_i32_0 : i32, i32
  }
  func.func @transform_8(%arg0: i32) -> (i32, i32) {
    %c0_i32 = arith.constant 0 : i32
    %c0_i32_0 = arith.constant 0 : i32
    %c0_i32_1 = arith.constant 0 : i32
    return %c0_i32, %c0_i32_0 : i32, i32
  }
  func.func @transform_9(%arg0: i32) -> (i32, i32) {
    %c0_i32 = arith.constant 0 : i32
    %c0_i32_0 = arith.constant 0 : i32
    %c0_i32_1 = arith.constant 0 : i32
    return %c0_i32, %c0_i32_0 : i32, i32
  }
  func.func @transform_10(%arg0: i32) -> (i32, i32) {
    %c0_i32 = arith.constant 0 : i32
    %c0_i32_0 = arith.constant 0 : i32
    %c0_i32_1 = arith.constant 0 : i32
    return %c0_i32, %c0_i32_0 : i32, i32
  }
  func.func @transform_11(%arg0: i32) -> (i32, i32) {
    %c0_i32 = arith.constant 0 : i32
    %c0_i32_0 = arith.constant 0 : i32
    %c0_i32_1 = arith.constant 0 : i32
    return %c0_i32, %c0_i32_0 : i32, i32
  }
  func.func @transform_12(%arg0: i32) -> (i32, i32) {
    %c0_i32 = arith.constant 0 : i32
    %c0_i32_0 = arith.constant 0 : i32
    %c0_i32_1 = arith.constant 0 : i32
    return %c0_i32, %c0_i32_0 : i32, i32
  }
  func.func @transform_13(%arg0: i32) -> (i32, i32) {
    %c0_i32 = arith.constant 0 : i32
    %c0_i32_0 = arith.constant 0 : i32
    %c0_i32_1 = arith.constant 0 : i32
    return %c0_i32, %c0_i32_0 : i32, i32
  }
  func.func @transform_14(%arg0: i32) -> (i32, i32) {
    %c0_i32 = arith.constant 0 : i32
    %c0_i32_0 = arith.constant 0 : i32
    %c0_i32_1 = arith.constant 0 : i32
    return %c0_i32, %c0_i32_0 : i32, i32
  }
  func.func @transform_15(%arg0: i32) -> (i32, i32) {
    %c0_i32 = arith.constant 0 : i32
    %c0_i32_0 = arith.constant 0 : i32
    %c0_i32_1 = arith.constant 0 : i32
    return %c0_i32, %c0_i32_0 : i32, i32
  }
  func.func @transform_16(%arg0: i32) -> (i32, i32) {
    %c0_i32 = arith.constant 0 : i32
    %c0_i32_0 = arith.constant 0 : i32
    %c0_i32_1 = arith.constant 0 : i32
    return %c0_i32, %c0_i32_0 : i32, i32
  }
  func.func @transform_17(%arg0: i32) -> (i32, i32) {
    %c0_i32 = arith.constant 0 : i32
    %c0_i32_0 = arith.constant 0 : i32
    %c0_i32_1 = arith.constant 0 : i32
    return %c0_i32, %c0_i32_0 : i32, i32
  }
  func.func @transform_18(%arg0: i32) -> (i32, i32) {
    %c0_i32 = arith.constant 0 : i32
    %c0_i32_0 = arith.constant 0 : i32
    %c0_i32_1 = arith.constant 0 : i32
    return %c0_i32, %c0_i32_0 : i32, i32
  }
  func.func @transform_19(%arg0: i32) -> (i32, i32) {
    %c0_i32 = arith.constant 0 : i32
    %c0_i32_0 = arith.constant 0 : i32
    %c0_i32_1 = arith.constant 0 : i32
    return %c0_i32, %c0_i32_0 : i32, i32
  }
  func.func @transform_20(%arg0: i32) -> (i32, i32) {
    %c0_i32 = arith.constant 0 : i32
    %c0_i32_0 = arith.constant 0 : i32
    %c0_i32_1 = arith.constant 0 : i32
    return %c0_i32, %c0_i32_0 : i32, i32
  }
  func.func @transform_21(%arg0: i32) -> (i32, i32) {
    %c0_i32 = arith.constant 0 : i32
    %c0_i32_0 = arith.constant 0 : i32
    %c0_i32_1 = arith.constant 0 : i32
    return %c0_i32, %c0_i32_0 : i32, i32
  }
  func.func @transform_22(%arg0: i32) -> (i32, i32) {
    %c0_i32 = arith.constant 0 : i32
    %c0_i32_0 = arith.constant 0 : i32
    %c0_i32_1 = arith.constant 0 : i32
    return %c0_i32, %c0_i32_0 : i32, i32
  }
  func.func @transform_23(%arg0: i32) -> (i32, i32) {
    %c0_i32 = arith.constant 0 : i32
    %c0_i32_0 = arith.constant 0 : i32
    %c0_i32_1 = arith.constant 0 : i32
    return %c0_i32, %c0_i32_0 : i32, i32
  }
  func.func @transform_24(%arg0: i32) -> (i32, i32) {
    %c0_i32 = arith.constant 0 : i32
    %c0_i32_0 = arith.constant 0 : i32
    %c0_i32_1 = arith.constant 0 : i32
    return %c0_i32, %c0_i32_0 : i32, i32
  }
  func.func @transform_25(%arg0: i32) -> (i32, i32) {
    %c0_i32 = arith.constant 0 : i32
    %c0_i32_0 = arith.constant 0 : i32
    %c0_i32_1 = arith.constant 0 : i32
    return %c0_i32, %c0_i32_0 : i32, i32
  }
  func.func @transform_26(%arg0: i32) -> (i32, i32) {
    %c0_i32 = arith.constant 0 : i32
    %c0_i32_0 = arith.constant 0 : i32
    %c0_i32_1 = arith.constant 0 : i32
    return %c0_i32, %c0_i32_0 : i32, i32
  }
  func.func @transform_27(%arg0: i32) -> (i32, i32) {
    %c0_i32 = arith.constant 0 : i32
    %c0_i32_0 = arith.constant 0 : i32
    %c0_i32_1 = arith.constant 0 : i32
    return %c0_i32, %c0_i32_0 : i32, i32
  }
  func.func @transform_28(%arg0: i32) -> (i32, i32) {
    %c0_i32 = arith.constant 0 : i32
    %c0_i32_0 = arith.constant 0 : i32
    %c0_i32_1 = arith.constant 0 : i32
    return %c0_i32, %c0_i32_0 : i32, i32
  }
  func.func @transform_29(%arg0: i32) -> (i32, i32) {
    %c0_i32 = arith.constant 0 : i32
    %c0_i32_0 = arith.constant 0 : i32
    %c0_i32_1 = arith.constant 0 : i32
    return %c0_i32, %c0_i32_0 : i32, i32
  }
  func.func @transform_30(%arg0: i32) -> (i32, i32) {
    %c0_i32 = arith.constant 0 : i32
    %c0_i32_0 = arith.constant 0 : i32
    %c0_i32_1 = arith.constant 0 : i32
    return %c0_i32, %c0_i32_0 : i32, i32
  }
  func.func @transform_31(%arg0: i32) -> (i32, i32) {
    %c0_i32 = arith.constant 0 : i32
    %c0_i32_0 = arith.constant 0 : i32
    %c0_i32_1 = arith.constant 0 : i32
    return %c0_i32, %c0_i32_0 : i32, i32
  }
  func.func @transform_32(%arg0: i32) -> (i32, i32) {
    %c0_i32 = arith.constant 0 : i32
    %c0_i32_0 = arith.constant 0 : i32
    %c0_i32_1 = arith.constant 0 : i32
    return %c0_i32, %c0_i32_0 : i32, i32
  }
  func.func @transform_33(%arg0: i32) -> (i32, i32, i32) {
    %c0_i32 = arith.constant 0 : i32
    %c0_i32_0 = arith.constant 0 : i32
    %c0_i32_1 = arith.constant 0 : i32
    return %arg0, %c0_i32, %c0_i32_0 : i32, i32, i32
  }
  func.func @transform_34(%arg0: i32) -> (i32, i32, i32) {
    %c0_i32 = arith.constant 0 : i32
    %c0_i32_0 = arith.constant 0 : i32
    %c0_i32_1 = arith.constant 0 : i32
    return %arg0, %c0_i32, %c0_i32_0 : i32, i32, i32
  }
}

</mosaic_0001>

<bundles_post_ra>
// kernel: _fused_forward.1
= control target key start
LH: loop header
LB: loop body
LE: loop exit
PB: predicated region body
PF: predicated region fallthrough
CT: control target
= control target key end

     0   :  { %s10714_s6 = smov 1   ;;  %s10715_s10 = smov 2   ;;  %s14862_s0 = inlined_call_operand.smem [shape: u32[35], index: -1, kind: input, shape index: {}] }
   0x1   :  { %s10790_s5 = sld [smem:[%s14862_s0]]   ;;  %s10716_s14 = smov 3  }
   0x2   :  { %s10795_s9 = sld [smem:[%s14862_s0 + %s10714_s6]]   ;;  %s10717_s18 = smov 4  }
   0x3   :  { %s10800_s13 = sld [smem:[%s14862_s0 + %s10715_s10]]   ;;  %s10718_s22 = smov 5  }
   0x4   :  { %s10805_s17 = sld [smem:[%s14862_s0 + %s10716_s14]]   ;;  %s10719_s26 = smov 6  }
   0x5   :  { %s10810_s21 = sld [smem:[%s14862_s0 + %s10717_s18]]   ;;  %s10720_s30 = smov 7  }
   0x6   :  { %s10815_s25 = sld [smem:[%s14862_s0 + %s10718_s22]]   ;;  %s10721_s4 = smov 8  }
   0x7   :  { %15078 = sst [smem:[#allocation2_spill]] %s10790_s5  ;;  %s10722_s10 = smov 9  }
   0x8   :  { %15079 = sst [smem:[#allocation3_spill]] %s10795_s9  ;;  %s10723_s15 = smov 10  }
   0x9   :  { %s10820_s29 = sld [smem:[%s14862_s0 + %s10719_s26]]   ;;  %s10724_s20 = smov 11  }
   0xa   :  { %s10825_s3 = sld [smem:[%s14862_s0 + %s10720_s30]]   ;;  %s10725_s26 = smov 12  }
   0xb   :  { %s10830_s8 = sld [smem:[%s14862_s0 + %s10721_s4]]   ;;  %s10726_s1 = smov 13  }
   0xc   :  { %s10835_s14 = sld [smem:[%s14862_s0 + %s10722_s10]]   ;;  %s10727_s7 = smov 14  }
   0xd   :  { %s10840_s19 = sld [smem:[%s14862_s0 + %s10723_s15]]   ;;  %s10728_s15 = smov 15  }
   0xe   :  { %s10845_s24 = sld [smem:[%s14862_s0 + %s10724_s20]]   ;;  %s10729_s22 = smov 16  }
   0xf   :  { %s10850_s30 = sld [smem:[%s14862_s0 + %s10725_s26]]   ;;  %s10730_s28 = smov 17  }
  0x10   :  { %15080 = sst [smem:[#allocation4_spill]] %s10825_s3 }
  0x11   :  { %15081 = sst [smem:[#allocation5_spill]] %s10830_s8 }
  0x12   :  { %s10855_s6 = sld [smem:[%s14862_s0 + %s10726_s1]]  }
  0x13   :  { %s10860_s12 = sld [smem:[%s14862_s0 + %s10727_s7]]   ;;  %s10731_s7 = smov 18  }
  0x14   :  { %s10865_s20 = sld [smem:[%s14862_s0 + %s10728_s15]]   ;;  %s10732_s15 = smov 19  }
  0x15   :  { %s10870_s27 = sld [smem:[%s14862_s0 + %s10729_s22]]   ;;  %s10733_s22 = smov 20  }
  0x16   :  { %s10875_s4 = sld [smem:[%s14862_s0 + %s10730_s28]]   ;;  %s10734_s28 = smov 21  }
  0x18   :  { %15082 = sst [smem:[#allocation6_spill]] %s10855_s6 }
  0x19   :  { %s10880_s6 = sld [smem:[%s14862_s0 + %s10731_s7]]   ;;  %s10735_s7 = smov 22  }
  0x1a   :  { %15083 = sst [smem:[#allocation7_spill]] %s10865_s20 }
  0x1b   :  { %15084 = sst [smem:[#allocation8_spill]] %s10870_s27 }
  0x1c   :  { %15085 = sst [smem:[#allocation9_spill]] %s10875_s4 }
  0x1d   :  { %s10885_s20 = sld [smem:[%s14862_s0 + %s10732_s15]]   ;;  %s10736_s15 = smov 23  }
  0x1e   :  { %s10890_s27 = sld [smem:[%s14862_s0 + %s10733_s22]]   ;;  %s10737_s22 = smov 24  }
  0x1f   :  { %15086 = sst [smem:[#allocation10_spill]] %s10880_s6 }
  0x20   :  { %s10895_s4 = sld [smem:[%s14862_s0 + %s10734_s28]]   ;;  %s10738_s28 = smov 25  }
  0x21   :  { %s10900_s6 = sld [smem:[%s14862_s0 + %s10735_s7]]   ;;  %s10739_s7 = smov 26  }
  0x23   :  { %15087 = sst [smem:[#allocation11_spill]] %s10885_s20 }
  0x24   :  { %15088 = sst [smem:[#allocation12_spill]] %s10890_s27 }
  0x25   :  { %s10905_s20 = sld [smem:[%s14862_s0 + %s10736_s15]]   ;;  %s10740_s15 = smov 27  }
  0x26   :  { %15089 = sst [smem:[#allocation13_spill]] %s10895_s4 }
  0x27   :  { %15090 = sst [smem:[#allocation14_spill]] %s10900_s6 }
  0x28   :  { %s10910_s27 = sld [smem:[%s14862_s0 + %s10737_s22]]   ;;  %s10741_s22 = smov 28  }
  0x29   :  { %s10915_s4 = sld [smem:[%s14862_s0 + %s10738_s28]]   ;;  %s10742_s28 = smov 29  }
  0x2a   :  { %s10920_s6 = sld [smem:[%s14862_s0 + %s10739_s7]]   ;;  %s10743_s7 = smov 30  }
  0x2b   :  { %15091 = sst [smem:[#allocation15_spill]] %s10905_s20 }
  0x2c   :  { %s10925_s20 = sld [smem:[%s14862_s0 + %s10740_s15]]   ;;  %s10744_s15 = smov 31  }
  0x2e   :  { %15092 = sst [smem:[#allocation16_spill]] %s10910_s27 }
  0x2f   :  { %15093 = sst [smem:[#allocation17_spill]] %s10915_s4 }
  0x30   :  { %15094 = sst [smem:[#allocation18_spill]] %s10920_s6 }
  0x31   :  { %s10930_s27 = sld [smem:[%s14862_s0 + %s10741_s22]]   ;;  %s10745_s22 = smov 32  }
  0x32   :  { %15095 = sst [smem:[#allocation19_spill]] %s10925_s20 }
  0x33   :  { %s10935_s4 = sld [smem:[%s14862_s0 + %s10742_s28]]   ;;  %s10746_s28 = smov 33  }
  0x34   :  { %s10940_s6 = sld [smem:[%s14862_s0 + %s10743_s7]]   ;;  %s10747_s7 = smov 34  }
  0x35   :  { %s10945_s20 = sld [smem:[%s14862_s0 + %s10744_s15]]   ;;  %s10962_s15 = smov 0  }
  0x37   :  { %15096 = sst [smem:[#allocation20_spill]] %s10930_s27 }
  0x38   :  { %s10950_s27 = sld [smem:[%s14862_s0 + %s10745_s22]]  }
  0x39   :  { %15097 = sst [smem:[#allocation21_spill]] %s10935_s4 }
  0x3a   :  { %15098 = sst [smem:[#allocation22_spill]] %s10940_s6 }
  0x3b   :  { %s10955_s4 = sld [smem:[%s14862_s0 + %s10746_s28]]  }
  0x3c   :  { %s10960_s6 = sld [smem:[%s14862_s0 + %s10747_s7]]  }
  0x3d LB: > { %s7946_s16 = sadd.s32 4294967295, %s10712_s15   ;;  %p7950_p0 = scmp.ge.s32.totalorder %s10712_s15, 1  ;;  %s10712_s15 = sphi %s10962_s15, %s80_s15  }
  0x3e   : > { %p949_p1 = scmp.lt.s32.totalorder %s10712_s15, 3 }
  0x40   : > { %p950_p2 = pnand %p7950_p0, %p949_p1 }
  0x42   : > { %953 = sbr.rel (%p950_p2) target bundleno = 7628 (0x1dcc), region = 152 }
  0x49   : > { %p1038_p3 = scmp.lt.s32.totalorder %s7946_s16, 1  ;;  %s15099_s5 = sld [smem:[#allocation2_spill]]  ;;  %v1055_v0 = vlaneseq  ;;  %v14885_v23 = vmov 0   ;;  %v1054_v27 = vld [vmem:[%s10800_s13] sm:$0xf]  ;;  %vm14882_vm0 = vcmask 269312  }
  0x4a   : > { %s10748_s22 = smov 33   ;;  %s10749_s23 = smov 32   ;;  %1795 = vmatprep.mubr.bf16.mxu0 %v14885_v23  ;;  %1836 = vmatprep.mubr.bf16.mxu1 %v14885_v23  ;;  %vm14883_vm1 = vcmask 261120   ;;  %v15103_v38 = vmov 0  ;;  %v15106_v39 = vmov 0  ;;  %v15109_v40 = vmov 0 }
  0x4b   : > { %s15902_s16 = smov (!%p1038_p3, %s7946_s16), 1  ;;  %v10973_v1 = vshrl.u32 %v1055_v0, 7  ;;  %s15056_s26 = smov 1   ;;  %9903 = vset.pattern.permute.xlu0 %v14885_v23  ;;  %10169 = vset.pattern.permute.xlu1 %v14885_v23  ;;  %v11065_v28 = vand.u32 127, %v1055_v0  ;;  %v15112_v41 = vmov 0  ;;  %v15115_v42 = vmov 0 }
  0x4c   : > { %s7951_s0 = sshll.u32 %s15902_s16, 3  ;;  %s10751_s28 = smov 31   ;;  %vm14880_vm10 = vcmask 1043456   ;;  %v15117_v47 = vmov 0  ;;  %v15120_v48 = vmov 0  ;;  %vm14881_vm13 = vcmask 1044480  }
  0x4d   : > { %15100 = vst [vmem:[#allocation23_spill] sm:$0xff] %v10973_v1  ;;  %v1083_v2 = vsub.s32 0, %v10973_v1  ;;  %v1087_v3 = vsub.s32 1, %v10973_v1  ;;  %v1091_v5 = vsub.s32 2, %v10973_v1  ;;  %v1095_v8 = vsub.s32 3, %v10973_v1  ;;  %s15058_s1 = smov 127  }
  0x4e   : > { %v1099_v14 = vsub.s32 4, %v10973_v1  ;;  %v1103_v16 = vsub.s32 5, %v10973_v1  ;;  %s10753_s2 = smov 97   ;;  %s10754_s7 = smov 96   ;;  %v1107_v20 = vsub.s32 6, %v10973_v1  ;;  %v1111_v22 = vsub.s32 7, %v10973_v1 }
  0x4f   : > { %s1041_s18 = scalar_lea.vmem %s15099_s5, %s7951_s0  ;;  %s10755_s10 = smov 95   ;;  %15101 = vst [vmem:[#allocation24_spill] sm:$0xff] %v11065_v28  ;;  %v11068_v29 = vadd.s32 128, %v11065_v28  ;;  %v11071_v30 = vadd.s32 256, %v11065_v28  ;;  %v1064_v31 = vshra.s32 %v11065_v28, 5  ;;  %v1072_v33 = vand.u32 31, %v11065_v28 }
  0x50   : > { %v1052_v4 = vld [vmem:[%s1041_s18] sm:$0xff]  ;;  %v11078_v35 = vadd.s32 384, %v11065_v28  ;;  %v11109_v45 = vadd.s32 512, %v11065_v28  ;;  %v11112_v46 = vadd.s32 640, %v11065_v28  ;;  %v15122_v49 = vmov 0  ;;  %s15305_s9 = sld [smem:[#allocation3_spill]] }
  0x51   : > { %v10980_v6 = vrot.slane %v1052_v4, %v1083_v2  ;;  %v10982_v7 = vrot.slane %v1052_v4, %v1087_v3  ;;  %v10987_v10 = vrot.slane %v1052_v4, %v1091_v5  ;;  %v10991_v11 = vrot.slane %v1052_v4, %v1095_v8  ;;  %15102 = vst [vmem:[#allocation25_spill] sm:$0xff] %v11068_v29  ;;  %s10759_s11 = smov 16   ;;  %s10760_s0 = smov 15  }
  0x52   : > { %v11007_v17 = vrot.slane %v1052_v4, %v1099_v14  ;;  %v11011_v18 = vrot.slane %v1052_v4, %v1103_v16  ;;  %v11029_v21 = vrot.slane %v1052_v4, %v1107_v20  ;;  %v11045_v25 = vrot.slane %v1052_v4, %v1111_v22  ;;  %s10761_s18 = smov 17   ;;  %s15645_s8 = sld [smem:[#allocation5_spill]] }
  0x53   : > { %v9773_v9 = vpack.i.bf16 %v10982_v7, %v10980_v6  ;;  %v9788_v12 = vpack.i.bf16 %v10991_v11, %v10987_v10  ;;  %v9793_v13 = vpack.i.bf16 %v10987_v10, %v10982_v7  ;;  %v9808_v15 = vpack.i.bf16 %v10991_v11, %v10980_v6  ;;  %s15667_s3 = sld [smem:[#allocation4_spill]]  ;;  %s15785_s5 = smov 125  }
  0x54   : > { %v9828_v19 = vpack.i.bf16 %v11011_v18, %v11007_v17  ;;  %v9878_v24 = vpack.i.bf16 %v11029_v21, %v11011_v18  ;;  %v9888_v26 = vpack.i.bf16 %v11045_v25, %v11029_v21  ;;  %v1065_v32 = vshra.s32 %v11068_v29, 5 }
  0x55   : > { %9774 = vrot.lane.b32.xlu1 %v9773_v9, %s10748_s22  ;;  %9764 = vrot.lane.b32.xlu0 %v9773_v9, %s10749_s23  ;;  %v1073_v34 = vand.u32 31, %v11068_v29  ;;  %v1066_v36 = vshra.s32 %v11071_v30, 5  ;;  %v1074_v37 = vand.u32 31, %v11071_v30  ;;  %vm11084_vm2 = vcmp.ge.s32.totalorder %v1064_v31, 1 }
  0x56   : > { %v15104_v38 = vsel %vm11084_vm2, 4294967295, %v15103_v38  ;;  %vm11090_vm3 = vcmp.ge.s32.totalorder %v1065_v32, 1  ;;  %vm11094_vm4 = vcmp.ge.s32.totalorder %v1072_v33, 1  ;;  %vm11102_vm8 = vcmp.lt.s32.totalorder %v1072_v33, 31 }
  0x57   : > { %15105 = vst [vmem:[#allocation26_spill] sm:$0xff] %v15104_v38  ;;  %v15107_v39 = vsel %vm11090_vm3, 4294967295, %v15106_v39  ;;  %v15110_v40 = vsel %vm11094_vm4, 4294967295, %v15109_v40  ;;  %vm11098_vm6 = vcmp.ge.s32.totalorder %v1073_v34, 1  ;;  %v15116_v42 = vsel %vm11102_vm8, 4294967295, %v15115_v42 }
  0x58   : > { %15108 = vst [vmem:[#allocation27_spill] sm:$0xff] %v15107_v39  ;;  %15111 = vst [vmem:[#allocation28_spill] sm:$0xff] %v15110_v40  ;;  %v15113_v41 = vsel %vm11098_vm6, 4294967295, %v15112_v41  ;;  %v14889_v43 = vshra.s32 %v11078_v35, 5  ;;  %v1075_v44 = vand.u32 31, %v11078_v35  ;;  %vm11116_vm11 = vcmp.ge.s32.totalorder %v1066_v36, 1 }
  0x59   : > { %9779 = vrot.lane.b32.xlu1 %v9773_v9, %s15056_s26  ;;  %9769 = vrot.lane.b32.xlu0 %v9773_v9, %s10751_s28  ;;  %15114 = vst [vmem:[#allocation29_spill] sm:$0xff] %v15113_v41  ;;  %v15118_v47 = vsel %vm11116_vm11, 4294967295, %v15117_v47  ;;  %vm11120_vm12 = vcmp.lt.s32.totalorder %v1074_v37, 31  ;;  %vm11124_vm14 = vcmp.lt.s32.totalorder %v1073_v34, 31  ;;  %v14901_v52 = vand.u32 31, %v11109_v45 }
  0x5a   : > { %15119 = vst [vmem:[#allocation30_spill] sm:$0xff] %v15118_v47  ;;  %v15121_v48 = vsel %vm11120_vm12, 4294967295, %v15120_v48  ;;  %v15123_v49 = vsel %vm11124_vm14, 4294967295, %v15122_v49  ;;  %v10757_v53 = vmov 65535   ;;  %v11135_v55 = vadd.s32 768, %v11065_v28 }
  0x5b   : > { %15124 = vst [vmem:[#allocation31_spill] sm:$0xff] %v15123_v49  ;;  %v1737_v54 = vsel %vm14880_vm10, 4294967295, %v10757_v53  ;;  %v11138_v56 = vadd.s32 896, %v11065_v28  ;;  %vm11144_vm9 = vcmp.ge.s32.totalorder %v1074_v37, 1  ;;  %v15125_v61 = vmov 0 }
  0x5c   : > { %v15126_v61 = vsel %vm11144_vm9, 4294967295, %v15125_v61  ;;  %v1068_v62 = vshra.s32 %v11109_v45, 5  ;;  %vm11151_vm10 = vcmp.lt.s32.totalorder %v1075_v44, 31  ;;  %v15128_v2 = vmov 0 }
  0x5d   : > { %9789 = vrot.lane.b32.xlu1 %v9788_v12, %s10751_s28  ;;  %9784 = vrot.lane.b32.xlu0 %v9788_v12, %s10749_s23  ;;  %15127 = vst [vmem:[#allocation32_spill] sm:$0xff] %v15126_v61  ;;  %v15129_v2 = vsel %vm11151_vm10, 4294967295, %v15128_v2  ;;  %vm11164_vm15 = vcmp.ge.s32.totalorder %v14889_v43, 1  ;;  %v15130_v8 = vmov 0  ;;  %vm11168_vm5 = vcmp.ge.s32.totalorder %v1075_v44, 1 }
  0x5e   : > { %v15131_v8 = vsel %vm11164_vm15, 4294967295, %v15130_v8  ;;  %v15133_v9 = vmov 0  ;;  %vm15140_vm7 = vcmask 252928   ;;  %v15152_v30 = vmov 0 }
  0x5f   : > { %15132 = vst [vmem:[#allocation33_spill] sm:$0xff] %v15131_v8  ;;  %v15134_v9 = vsel %vm11168_vm5, 4294967295, %v15133_v9  ;;  %v15205_v61 = vand.u32 31, %v11112_v46  ;;  %v15206_v8 = vmov 0 }
  0x60   : > { %15135 = vst [vmem:[#allocation34_spill] sm:$0xff] %v15134_v9 }
  0x61   : > { %9799 = vrot.lane.b32.xlu1 %v9788_v12, %s10748_s22  ;;  %9794 = vrot.lane.b32.xlu0 %v9793_v13, %s15058_s1 }
  0x65   : > { %9809 = vrot.lane.b32.xlu1 %v9808_v15, %s15058_s1  ;;  %9804 = vrot.lane.b32.xlu0 %v9788_v12, %s15056_s26  ;;  %v11173_v12 = vsel %vm14881_vm13, %v1737_v54, 0  ;;  %vm15137_vm13 = vmand %vm11090_vm3, %vm11098_vm6 }
  0x69   : > { %9819 = vrot.lane.b32.xlu1 %v9808_v15, %s10753_s2  ;;  %9814 = vrot.lane.b32.xlu0 %v9793_v13, %s10753_s2 }
  0x6d   : > { %9829 = vrot.lane.b32.xlu1 %v9828_v19, %s15058_s1  ;;  %9824 = vrot.lane.b32.xlu0 %v9793_v13, %s10754_s7 }
  0x71   : > { %9839 = vrot.lane.b32.xlu1 %v9828_v19, %s10749_s23  ;;  %9834 = vrot.lane.b32.xlu0 %v9808_v15, %s10754_s7 }
  0x75   : > { %9849 = vrot.lane.b32.xlu1 %v9828_v19, %s10751_s28  ;;  %9844 = vrot.lane.b32.xlu0 %v9828_v19, %s10753_s2 }
  0x79   : > { %9854 = vrot.lane.b32.xlu1 %v9793_v13, %s10755_s10  ;;  %1423 = vrot.lane.b32.xlu0 %v11007_v17, %s10754_s7 }
  0x7d   : > { %9864 = vrot.lane.b32.xlu1 %v9828_v19, %s15056_s26  ;;  %9859 = vrot.lane.b32.xlu0 %v9828_v19, %s10748_s22 }
  0x81   : > { %1329 = vrot.lane.b32.xlu1 %v11029_v21, %s15058_s1  ;;  %9869 = vrot.lane.b32.xlu0 %v9808_v15, %s10755_s10 }
  0x85   : > { %1370 = vrot.lane.b32.xlu1 %v11029_v21, %s10753_s2  ;;  %1464 = vrot.lane.b32.xlu0 %v11007_v17, %s10755_s10 }
  0x89   : > { %9879 = vrot.lane.b32.xlu1 %v9878_v24, %s10755_s10  ;;  %9874 = vrot.lane.b32.xlu0 %v9878_v24, %s10754_s7 }
  0x8d   : > { %9889 = vrot.lane.b32.xlu1 %v9888_v26, %s10751_s28  ;;  %9884 = vrot.lane.b32.xlu0 %v9888_v26, %s10749_s23 }
  0x91   : > { %9899 = vrot.lane.b32.xlu1 %v9888_v26, %s15056_s26  ;;  %9894 = vrot.lane.b32.xlu0 %v9888_v26, %s10748_s22 }
  0x95   : > { %1331 = vrot.lane.b32.xlu0 %v11045_v25, %s15058_s1  ;;  %1372 = vrot.lane.b32.xlu1 %v11045_v25, %s10753_s2 }
  0x99   : > { %1429 = vrot.lane.b32.xlu0 %v11045_v25, %s10754_s7  ;;  %1470 = vrot.lane.b32.xlu1 %v11045_v25, %s10755_s10 }
  0x9d   : > { %1730 = vperm.xlu0 %9903, %v1054_v27  }
  0xc7   : > { %v11128_v50 = vpop.permute.xlu1 %9774  ;;  %v11130_v51 = vpop.permute.xlu0 %9764 }
  0xc8   : > { %v9777_v57 = vunpack.i.h.bf16 %v11128_v50  ;;  %v9776_v58 = vunpack.i.l.bf16 %v11128_v50  ;;  %v9767_v59 = vunpack.i.h.bf16 %v11130_v51  ;;  %v9766_v60 = vunpack.i.l.bf16 %v11130_v51 }
  0xca   : > { %v1145_v3 = vsel %vm14882_vm0, 0.0, %v9776_v58  ;;  %v1195_v4 = vsel %vm14883_vm1, %v9766_v60, %v9767_v59  ;;  %v1210_v5 = vsel %vm14883_vm1, 0.0, %v9766_v60  ;;  %v1130_v13 = vsel %vm14882_vm0, %v9776_v58, %v9777_v57  ;;  %vm15136_vm0 = vmand %vm11084_vm2, %vm11094_vm4 }
  0xcb   : > { %v1211_v14 = vsel %vm11084_vm2, %v1210_v5, 0.0  ;;  %v1212_v15 = vsel %vm11090_vm3, %v1195_v4, 0.0  ;;  %v11186_v16 = vpop.permute.xlu1 %9779  ;;  %v9770_v19 = vpop.permute.xlu0 %9769  ;;  %v1170_v33 = vsel %vm15136_vm0, %v1145_v3, 0.0  ;;  %v1171_v51 = vsel %vm15137_vm13, %v1130_v13, 0.0  ;;  %vm15141_vm1 = vmmov %vm15140_vm7 }
  0xcc   : > { %v1513_v22 = vrot.slane %v1211_v14, 7  ;;  %v9782_v24 = vunpack.i.h.bf16 %v11186_v16  ;;  %v9781_v26 = vunpack.i.l.bf16 %v11186_v16  ;;  %v9772_v34 = vunpack.i.h.bf16 %v9770_v19  ;;  %vm14890_vm13 = vmand %vm11090_vm3, %vm11124_vm14 }
  0xcd   : > { %v9771_v37 = vunpack.i.l.bf16 %v9770_v19  ;;  %v1514_v53 = vrot.slane %v1212_v15, 7  ;;  %vm15138_vm0 = vcmask 7168   ;;  %vm11296_vm3 = vcmp.lt.s32.totalorder %v1065_v32, 31 }
  0xce   : > { %v1293_v54 = vsel %vm15138_vm0, %v9781_v26, %v9782_v24  ;;  %vm15139_vm5 = vmmov %vm15138_vm0 }
  0xcf   : > { %v1308_v58 = vsel %vm15139_vm5, 0.0, %v9781_v26  ;;  %v1310_v3 = vsel %vm11098_vm6, %v1293_v54, 0.0  ;;  %v1236_v4 = vsel %vm15140_vm7, %v9771_v37, %v9772_v34  ;;  %v1251_v5 = vsel %vm15141_vm1, 0.0, %v9771_v37  ;;  %v11217_v14 = vpop.permute.xlu1 %9789  ;;  %v11219_v13 = vpop.permute.xlu0 %9784  ;;  %vm15143_vm0 = vmand %vm11084_vm2, %vm11102_vm8 }
  0xd0   : > { %v1309_v60 = vsel %vm11094_vm4, %v1308_v58, 0.0  ;;  %vm15142_vm5 = vcmask 1040384   ;;  %v1268_v19 = vsel %vm15143_vm0, %v1251_v5, 0.0  ;;  %v14893_v26 = vunpack.i.h.bf16 %v11217_v14  ;;  %vm15146_vm0 = vmmov %vm15141_vm1 }
  0xd1   : > { %v1658_v15 = vsel %vm15142_vm5, %v1170_v33, %v1513_v22  ;;  %v1537_v54 = vrot.slane %v1268_v19, 6  ;;  %v9791_v58 = vunpack.i.l.bf16 %v11217_v14  ;;  %v14894_v22 = vunpack.i.h.bf16 %v11219_v13  ;;  %vm15144_vm7 = vmmov %vm15142_vm5 }
  0xd2   : > { %v9786_v33 = vunpack.i.l.bf16 %v11219_v13  ;;  %v1659_v23 = vsel %vm15144_vm7, %v1171_v51, %v1514_v53  ;;  %v1561_v27 = vrot.slane %v1309_v60, 5  ;;  %v11241_v5 = vrot.slane %v1310_v3, 5  ;;  %vm15147_vm1 = vmmov %vm15146_vm0 }
  0xd3   : > { %v1269_v19 = vsel %vm14890_vm13, %v1236_v4, 0.0  ;;  %vm15145_vm5 = vcmask 1041408   ;;  %v1237_v44 = vsel %vm15146_vm0, %v9772_v34, %v9791_v58  ;;  %v1238_v20 = vsel %vm15147_vm1, %v9791_v58, %v14893_v26  ;;  %v11258_v51 = vpop.permute.xlu1 %9799  ;;  %v9795_v53 = vpop.permute.xlu0 %9794  ;;  %vm15151_vm1 = vmand %vm11116_vm11, %vm11120_vm12 }
  0xd4   : > { %v1667_v37 = vsel %vm15145_vm5, %v1658_v15, %v1537_v54  ;;  %vm15148_vm2 = vcmask 261120   ;;  %vm11262_vm13 = vcmp.lt.s32.totalorder %v1066_v36, 31  ;;  %v15149_v60 = vmov 0 }
  0xd5   : > { %v1196_v43 = vsel %vm15148_vm2, %v9767_v59, %v9786_v33  ;;  %v15150_v60 = vsel %vm11262_vm13, 4294967295, %v15149_v60  ;;  %v1270_v59 = vsel %vm15151_vm1, %v1237_v44, 0.0  ;;  %v1197_v34 = vsel %vm15148_vm2, %v9786_v33, %v14894_v22 }
  0xd6   : > { %v1213_v3 = vsel %vm11116_vm11, %v1196_v43, 0.0  ;;  %v14900_v4 = vunpack.i.h.bf16 %v11258_v51  ;;  %vm11279_vm5 = vcmp.lt.s32.totalorder %v1064_v31, 31  ;;  %v1539_v36 = vrot.slane %v1270_v59, 6 }
  0xd7   : > { %v15153_v30 = vsel %vm11279_vm5, 4294967295, %v15152_v30  ;;  %v1214_v44 = vsel %vm11164_vm15, %v1197_v34, 0.0  ;;  %v1515_v15 = vrot.slane %v1213_v3, 7  ;;  %vm15154_vm1 = vnez %v15134_v9  ;;  %v11306_v26 = vpop.permute.xlu1 %9809  ;;  %v11308_v22 = vpop.permute.xlu0 %9804 }
  0xd8   : > { %v9801_v31 = vunpack.i.l.bf16 %v11258_v51  ;;  %v15155_v43 = vmov 0  ;;  %v1516_v54 = vrot.slane %v1214_v44, 7  ;;  %v9797_v58 = vunpack.i.h.bf16 %v9795_v53 }
  0xd9   : > { %v15156_v43 = vsel %vm11296_vm3, 4294967295, %v15155_v43  ;;  %v9796_v33 = vunpack.i.l.bf16 %v9795_v53  ;;  %v1538_v59 = vrot.slane %v1269_v19, 6  ;;  %vm15158_vm0 = vcmask 269312   ;;  %vm15161_vm3 = vmand %vm11164_vm15, %vm11151_vm10 }
  0xda   : > { %15157 = vst [vmem:[#allocation35_spill] sm:$0xff] %v15156_v43  ;;  %v1131_v34 = vsel %vm15158_vm0, %v9777_v57, %v9801_v31  ;;  %vm15159_vm2 = vmmov %vm15158_vm0  ;;  %vm15160_vm7 = vcmask 1042432   ;;  %v11316_v19 = vsel %vm15161_vm3, %v1238_v20, 0.0  ;;  %vm11332_vm3 = vcmp.lt.s32.totalorder %v14901_v52, 31 }
  0xdb   : > { %v1132_v3 = vsel %vm15159_vm2, %v9801_v31, %v14900_v4  ;;  %v1676_v32 = vsel %vm15160_vm7, %v1667_v37, %v1561_v27  ;;  %vm15162_vm0 = vmand %vm11116_vm11, %vm11144_vm9  ;;  %vm15164_vm7 = vcmask 1039360   ;;  %v9812_v37 = vunpack.i.h.bf16 %v11306_v26 }
  0xdc   : > { %v1172_v50 = vsel %vm15162_vm0, %v1131_v34, 0.0  ;;  %vm15163_vm2 = vmand %vm11164_vm15, %vm15154_vm1  ;;  %v1335_v27 = vsel %vm15164_vm7, %v9796_v33, %v9797_v58  ;;  %v15165_v20 = vmov 0  ;;  %vm15167_vm6 = vcmask 1040384  }
  0xdd   : > { %v1173_v57 = vsel %vm15163_vm2, %v1132_v3, 0.0  ;;  %v15166_v20 = vsel %vm11332_vm3, 4294967295, %v15165_v20  ;;  %v1660_v53 = vsel %vm15167_vm6, %v1172_v50, %v1515_v15  ;;  %vm15168_vm0 = vmmov %vm15167_vm6  ;;  %v9811_v31 = vunpack.i.l.bf16 %v11306_v26  ;;  %v9815_v26 = vpop.permute.xlu0 %9814 }
  0xde   : > { %v11338_v44 = vsel %vm15168_vm0, %v1173_v57, %v1516_v54  ;;  %v14904_v34 = vunpack.i.h.bf16 %v11308_v22  ;;  %vm15169_vm2 = vcmask 1041408   ;;  %v1336_v4 = vsel %vm15164_vm7, %v9797_v58, %v9812_v37  ;;  %vm15170_vm10 = vmmov %vm15164_vm7  ;;  %v11352_v54 = vpop.permute.xlu1 %9819 }
  0xdf   : > { %v11343_v3 = vsel %vm15169_vm2, %v1660_v53, %v1539_v36  ;;  %v9806_v0 = vunpack.i.l.bf16 %v11308_v22  ;;  %v1351_v52 = vsel %vm11124_vm14, %v1335_v27, 0.0  ;;  %v1334_v63 = vsel %vm15170_vm10, %v9811_v31, %v9796_v33  ;;  %vm15171_vm6 = vmmov %vm15169_vm2 }
  0xe0   : > { %v1352_v15 = vsel %vm11120_vm12, %v1336_v4, 0.0  ;;  %v11354_v50 = vrot.slane %v1351_v52, 3  ;;  %v1668_v36 = vsel %vm15171_vm6, %v1659_v23, %v1538_v59  ;;  %v1350_v58 = vsel %vm11102_vm8, %v1334_v63, 0.0 }
  0xe1   : > { %v11359_v57 = vrot.slane %v1352_v15, 3  ;;  %vm15172_vm0 = vcmask 7168   ;;  %vm11369_vm2 = vcmp.ge.s32.totalorder %v1068_v62, 1  ;;  %v15174_v52 = vmov 0 }
  0xe2   : > { %v1294_v27 = vsel %vm15172_vm0, %v9782_v24, %v9806_v0  ;;  %vm15173_vm10 = vmmov %vm15172_vm0  ;;  %v15175_v52 = vsel %vm11369_vm2, 4294967295, %v15174_v52  ;;  %v15176_v23 = vshra.s32 %v11112_v46, 5  ;;  %v15177_v63 = vmov 0 }
  0xe3   : > { %v1295_v4 = vsel %vm15173_vm10, %v9806_v0, %v14904_v34  ;;  %v11379_v33 = vrot.slane %v1350_v58, 3  ;;  %v1311_v16 = vsel %vm11144_vm9, %v1294_v27, 0.0  ;;  %v9821_v31 = vunpack.i.l.bf16 %v11352_v54 }
  0xe4   : > { %vm11375_vm7 = vcmp.ge.s32.totalorder %v15176_v23, 1  ;;  %v1312_v0 = vsel %vm15154_vm1, %v1295_v4, 0.0  ;;  %v11386_v59 = vrot.slane %v1311_v16, 5  ;;  %v9817_v15 = vunpack.i.h.bf16 %v9815_v26  ;;  %v11411_v16 = vpop.permute.xlu1 %9829 }
  0xe5   : > { %v15178_v63 = vsel %vm11375_vm7, 4294967295, %v15177_v63  ;;  %v11388_v53 = vrot.slane %v1312_v0, 5  ;;  %v15179_v58 = vand.u32 31, %v11109_v45  ;;  %v15180_v27 = vmov 0  ;;  %v9825_v0 = vpop.permute.xlu0 %9824 }
  0xe6   : > { %vm11403_vm10 = vcmp.lt.s32.totalorder %v1068_v62, 31  ;;  %v15182_v4 = vmov 0  ;;  %v9816_v23 = vunpack.i.l.bf16 %v9815_v26  ;;  %v15185_v34 = vmov 0 }
  0xe7   : > { %vm11397_vm0 = vcmp.ge.s32.totalorder %v15179_v58, 1  ;;  %v15183_v4 = vsel %vm11403_vm10, 4294967295, %v15182_v4  ;;  %v15184_v58 = vand.u32 31, %v11112_v46  ;;  %vm15187_vm15 = vcmask 1042432  }
  0xe8   : > { %v15181_v27 = vsel %vm11397_vm0, 4294967295, %v15180_v27  ;;  %v1677_v45 = vsel %vm15187_vm15, %v1668_v36, %v11241_v5  ;;  %vm15188_vm8 = vcmask 1043456   ;;  %v15189_v26 = vunpack.i.h.bf16 %v11352_v54  ;;  %vm15198_vm15 = vmand %vm11279_vm5, %vm11094_vm4  ;;  %v11466_v1 = vpop.permute.xlu1 %9839 }
  0xe9   : > { %vm11415_vm6 = vcmp.lt.s32.totalorder %v15184_v58, 31  ;;  %v1685_v62 = vsel %vm15188_vm8, %v1676_v32, %v10980_v6  ;;  %vm15190_vm11 = vcmask 793600   ;;  %v9831_v58 = vunpack.i.l.bf16 %v11411_v16  ;;  %vm15193_vm8 = vmand %vm11262_vm13, %vm11144_vm9  ;;  %v9835_v47 = vpop.permute.xlu0 %9834 }
  0xea   : > { %v15186_v34 = vsel %vm11415_vm6, 4294967295, %v15185_v34  ;;  %v1377_v28 = vsel %vm15190_vm11, %v9817_v15, %v15189_v26  ;;  %v9827_v29 = vunpack.i.h.bf16 %v9825_v0  ;;  %vm15191_vm1 = vnez %v15113_v41  ;;  %vm15194_vm12 = vmmov %vm15190_vm11 }
  0xeb   : > { %vm15192_vm14 = vnez %v15156_v43  ;;  %v11438_v6 = vsel %vm15193_vm8, %v1377_v28, 0.0  ;;  %v1375_v5 = vsel %vm15194_vm12, %v9821_v31, %v9816_v23  ;;  %v1376_v32 = vsel %vm15190_vm11, %v9816_v23, %v9817_v15 }
  0xec   : > { %v9826_v36 = vunpack.i.l.bf16 %v9825_v0  ;;  %v15195_v26 = vshra.s32 %v11078_v35, 5  ;;  %v15196_v24 = vmov 0  ;;  %v11454_v28 = vsel %vm15198_vm15, %v1375_v5, 0.0  ;;  %vm15203_vm15 = vmand %vm15192_vm14, %vm15191_vm1 }
  0xed   : > { %vm15199_vm8 = vcmask 1039360   ;;  %v15200_v15 = vunpack.i.h.bf16 %v11411_v16  ;;  %vm15202_vm11 = vcmask 785408   ;;  %v9836_v23 = vunpack.i.l.bf16 %v9835_v47 }
  0xee   : > { %vm11444_vm6 = vcmp.lt.s32.totalorder %v15195_v26, 31  ;;  %v11457_v31 = vsel %vm15199_vm8, %v9812_v37, %v9831_v58  ;;  %vm15201_vm12 = vmmov %vm15199_vm8  ;;  %v1433_v26 = vsel %vm15202_vm11, %v9826_v36, %v9827_v29  ;;  %v1408_v37 = vsel %vm15203_vm15, %v1376_v32, 0.0 }
  0xef   : > { %v15197_v24 = vsel %vm11444_vm6, 4294967295, %v15196_v24  ;;  %v1338_v35 = vsel %vm15201_vm12, %v9831_v58, %v15200_v15  ;;  %v9841_v15 = vunpack.i.l.bf16 %v11466_v1  ;;  %vm11479_vm12 = vcmp.ge.s32.totalorder %v15205_v61, 1 }
  0xf0   : > { %v1354_v0 = vsel %vm11332_vm3, %v1338_v35, 0.0  ;;  %v9837_v35 = vunpack.i.h.bf16 %v9835_v47  ;;  %v15207_v8 = vsel %vm11479_vm12, 4294967295, %v15206_v8  ;;  %v1449_v41 = vsel %vm15192_vm14, %v1433_v26, 0.0 }
  0xf1   : > { %v11473_v5 = vrot.slane %v1354_v0, 3  ;;  %v1618_v32 = vrot.slane %v1408_v37, 2  ;;  %vm15208_vm11 = vcmask 1043456   ;;  %v15209_v40 = vunpack.i.h.bf16 %v11219_v13  ;;  %v11504_v13 = vpop.permute.xlu1 %9849 }
  0xf2   : > { %v1686_v0 = vsel %vm15208_vm11, %v1677_v45, %v10982_v7  ;;  %vm15210_vm15 = vcmask 261120   ;;  %v15211_v39 = vunpack.i.h.bf16 %v11466_v1  ;;  %vm15213_vm8 = vcmask 785408   ;;  %v11506_v45 = vpop.permute.xlu0 %9844 }
  0xf3   : > { %15204 = vst [vmem:[#allocation36_spill] sm:$0xff] %v11473_v5  ;;  %v1198_v58 = vsel %vm15210_vm15, %v15209_v40, %v9841_v15  ;;  %vm15212_vm9 = vmmov %vm15210_vm15  ;;  %v11494_v61 = vsel %vm15213_vm8, %v9827_v29, %v9837_v35  ;;  %v1642_v38 = vrot.slane %v1449_v41, 1  ;;  %vm15219_vm15 = vnez %v15186_v34 }
  0xf4   : > { %v1199_v47 = vsel %vm15212_vm9, %v9841_v15, %v15211_v39  ;;  %v1215_v5 = vsel %vm11369_vm2, %v1198_v58, 0.0  ;;  %vm15214_vm1 = vmmov %vm15213_vm8  ;;  %vm15215_vm8 = vcmask 1044480   ;;  %v15216_v15 = vshra.s32 %v11112_v46, 5 }
  0xf5   : > { %v1216_v26 = vsel %vm11375_vm7, %v1199_v47, 0.0  ;;  %v1432_v7 = vsel %vm15214_vm1, %v9836_v23, %v9826_v36  ;;  %v11508_v39 = vrot.slane %v1215_v5, 7  ;;  %v14946_v36 = vunpack.i.h.bf16 %v11504_v13  ;;  %vm15221_vm1 = vmmov %vm15215_vm8 }
  0xf6   : > { %v11510_v29 = vrot.slane %v1216_v26, 7  ;;  %v1448_v41 = vsel %vm11279_vm5, %v1432_v7, 0.0  ;;  %v9851_v23 = vunpack.i.l.bf16 %v11504_v13  ;;  %v9846_v5 = vunpack.i.l.bf16 %v11506_v45 }
  0xf7   : > { %v1695_v58 = vsel %vm15215_vm8, %v1686_v0, %v11354_v50  ;;  %vm11530_vm11 = vcmp.lt.s32.totalorder %v15216_v15, 31  ;;  %v15217_v47 = vmov 0  ;;  %vm15220_vm4 = vcmask 1045504  }
  0xf8   : > { %v15218_v47 = vsel %vm11530_vm11, 4294967295, %v15217_v47  ;;  %v1704_v26 = vsel %vm15220_vm4, %v1695_v58, %v1618_v32  ;;  %v1641_v7 = vrot.slane %v1448_v41, 1  ;;  %v1694_v40 = vsel %vm15221_vm1, %v1685_v62, %v11379_v33  ;;  %v11556_v62 = vpop.permute.xlu1 %9854  ;;  %v11558_v58 = vpop.permute.xlu0 %1423 }
  0xf9   : > { %vm15222_vm8 = vnez %v15129_v2  ;;  %v15223_v46 = vunpack.i.h.bf16 %v11217_v14  ;;  %vm15224_vm13 = vcmask 252928   ;;  %v15226_v37 = vunpack.i.h.bf16 %v11352_v54 }
  0xfa   : > { %v1353_v50 = vsel %vm15222_vm8, %v11457_v31, 0.0  ;;  %vm15225_vm5 = vmmov %vm15224_vm13  ;;  %vm15227_vm9 = vcmask 793600   ;;  %v15228_v41 = vunpack.i.h.bf16 %v11506_v45  ;;  %vm15230_vm1 = vnez %v15123_v49 }
  0xfb   : > { %v1239_v0 = vsel %vm15224_vm13, %v15223_v46, %v9851_v23  ;;  %v1240_v15 = vsel %vm15225_vm5, %v9851_v23, %v14946_v36  ;;  %v1378_v32 = vsel %vm15227_vm9, %v15226_v37, %v9846_v5  ;;  %vm15229_vm4 = vmmov %vm15227_vm9  ;;  %v14947_v31 = vunpack.i.h.bf16 %v11556_v62 }
  0xfc   : > { %v1379_v33 = vsel %vm15229_vm4, %v9846_v5, %v15228_v41  ;;  %vm15231_vm5 = vmand %vm11369_vm2, %vm11332_vm3  ;;  %v14948_v23 = vunpack.i.l.bf16 %v11556_v62  ;;  %vm15234_vm4 = vnez %v15134_v9  ;;  %vm15237_vm13 = vcmask 777216  }
  0xfd   : > { %v1272_v14 = vsel %vm15231_vm5, %v1239_v0, 0.0  ;;  %vm15232_vm9 = vmand %vm11403_vm10, %vm11397_vm0  ;;  %vm15235_vm5 = vcmask 785408   ;;  %vm15238_vm10 = vcmask 1046528  }
  0xfe   : > { %v11574_v54 = vsel %vm15232_vm9, %v1379_v33, 0.0  ;;  %v1541_v37 = vrot.slane %v1272_v14, 6  ;;  %v1435_v46 = vsel %vm15235_vm5, %v9837_v35, %v11558_v58  ;;  %vm15236_vm9 = vmand %vm11375_vm7, %vm15219_vm15  ;;  %v1474_v14 = vsel %vm15237_vm13, %v14948_v23, %v14947_v31  ;;  %v11600_v35 = vpop.permute.xlu1 %9864 }
  0xff   : > { %15233 = vst [vmem:[#allocation37_spill] sm:$0xff] %v11574_v54  ;;  %v1273_v0 = vsel %vm15236_vm9, %v1240_v15, 0.0  ;;  %v1451_v41 = vsel %vm11444_vm6, %v1435_v46, 0.0  ;;  %v1713_v5 = vsel %vm15238_vm10, %v1704_v26, %v1642_v38  ;;  %v11606_v15 = vpop.permute.xlu0 %9859  ;;  %vm15239_vm9 = vmand %vm15192_vm14, %vm15230_vm1  ;;  %vm15241_vm10 = vcmask 1045504  }
 0x100   : > { %v1542_v33 = vrot.slane %v1273_v0, 6  ;;  %v11598_v36 = vrot.slane %v1451_v41, 1  ;;  %v1498_v46 = vsel %vm15239_vm9, %v1474_v14, 0.0  ;;  %v15240_v0 = vrot.slane %v11454_v28, 2  ;;  %vm15242_vm13 = vmand %vm11444_vm6, %vm15234_vm4 }
 0x101   : > { %v11621_v26 = vsel %vm15242_vm13, %v1378_v32, 0.0  ;;  %v9866_v31 = vunpack.i.l.bf16 %v11600_v35  ;;  %v1721_v14 = vpack.c.bf16 %v1498_v46, %v1713_v5  ;;  %v1596_v23 = vrot.slane %v1353_v50, 3 }
 0x102   : > { %v1703_v38 = vsel %vm15241_vm10, %v1694_v40, %v15240_v0  ;;  %v9861_v40 = vunpack.i.l.bf16 %v11606_v15  ;;  %vm15243_vm10 = vcmask 1046528   ;;  %v1620_v32 = vrot.slane %v11621_v26, 2 }
 0x103   : > { %v11632_v0 = vsel %vm15243_vm10, %v1703_v38, %v1641_v7  ;;  %v15244_v41 = vunpack.i.h.bf16 %v11308_v22  ;;  %vm15245_vm13 = vcmask 7168   ;;  %v15246_v49 = vunpack.i.h.bf16 %v11600_v35  ;;  %vm15252_vm10 = vmand %vm11369_vm2, %vm11397_vm0 }
 0x104   : > { %vm15247_vm5 = vmmov %vm15245_vm13  ;;  %v15248_v54 = vunpack.i.h.bf16 %v11258_v51  ;;  %vm15249_vm9 = vcmask 269312   ;;  %v15250_v5 = vunpack.i.h.bf16 %v11606_v15  ;;  %vm15274_vm1 = vcmask 793600  }
 0x105   : > { %v1296_v43 = vsel %vm15245_vm13, %v15244_v41, %v9866_v31  ;;  %v1297_v9 = vsel %vm15247_vm5, %v9866_v31, %v15246_v49  ;;  %vm15251_vm14 = vmmov %vm15249_vm9  ;;  %v9870_v31 = vpop.permute.xlu0 %9869  ;;  %vm15270_vm13 = vcmask 1043456  }
 0x106   : > { %v1133_v28 = vsel %vm15249_vm9, %v15248_v54, %v9861_v40  ;;  %v1134_v7 = vsel %vm15251_vm14, %v9861_v40, %v15250_v5  ;;  %v1313_v50 = vsel %vm11397_vm0, %v1296_v43, 0.0  ;;  %v1314_v22 = vsel %vm11479_vm12, %v1297_v9, 0.0  ;;  %vm15253_vm5 = vmand %vm11375_vm7, %vm11479_vm12  ;;  %v11661_v54 = vpop.permute.xlu1 %1329 }
 0x107   : > { %v1174_v49 = vsel %vm15252_vm10, %v1133_v28, 0.0  ;;  %v1175_v51 = vsel %vm15253_vm5, %v1134_v7, 0.0  ;;  %v1565_v46 = vrot.slane %v1313_v50, 5  ;;  %v1566_v43 = vrot.slane %v1314_v22, 5 }
 0x108   : > { %vm15254_vm14 = vcmask 1040384   ;;  %vm15256_vm10 = vcmask 1041408   ;;  %v15257_v28 = vunpack.i.h.bf16 %v11411_v16  ;;  %vm15258_vm5 = vcmask 1039360  }
 0x109   : > { %v1662_v9 = vsel %vm15254_vm14, %v1174_v49, %v11508_v39  ;;  %vm15255_vm9 = vmmov %vm15254_vm14  ;;  %v9872_v7 = vunpack.i.h.bf16 %v9870_v31  ;;  %vm15260_vm14 = vnez %v15116_v42  ;;  %vm15261_vm7 = vnez %v15153_v30 }
 0x10a   : > { %v1663_v38 = vsel %vm15255_vm9, %v1175_v51, %v11510_v29  ;;  %v1671_v41 = vsel %vm15256_vm10, %v1662_v9, %v1541_v37  ;;  %v1339_v40 = vsel %vm15258_vm5, %v15257_v28, %v11661_v54  ;;  %vm15259_vm0 = vmmov %vm15256_vm10  ;;  %v15262_v39 = vshra.s32 %v11135_v55, 5  ;;  %v11706_v28 = vpop.permute.xlu1 %1370 }
 0x10b   : > { %v1672_v5 = vsel %vm15259_vm0, %v1663_v38, %v1542_v33  ;;  %v15263_v29 = vmov 0  ;;  %v15265_v37 = vand.u32 31, %v11135_v55  ;;  %v15266_v16 = vmov 0 }
 0x10c   : > { %vm11683_vm2 = vcmp.ge.s32.totalorder %v15262_v39, 1  ;;  %vm15268_vm5 = vcmask 1042432   ;;  %v1355_v50 = vsel %vm15219_vm15, %v1339_v40, 0.0  ;;  %v9871_v49 = vunpack.i.l.bf16 %v9870_v31 }
 0x10d   : > { %v15264_v29 = vsel %vm11683_vm2, 4294967295, %v15263_v29  ;;  %vm11689_vm10 = vcmp.lt.s32.totalorder %v15265_v37, 31  ;;  %v11694_v33 = vsel %vm15268_vm5, %v1671_v41, %v1565_v46  ;;  %vm15269_vm0 = vmmov %vm15268_vm5  ;;  %v1598_v51 = vrot.slane %v1355_v50, 3  ;;  %v1465_v46 = vpop.permute.xlu0 %1464 }
 0x10e   : > { %v15267_v16 = vsel %vm11689_vm10, 4294967295, %v15266_v16  ;;  %v1681_v22 = vsel %vm15269_vm0, %v1672_v5, %v1566_v43  ;;  %v1743_v38 = vand.u32 %v11173_v12, %v1721_v14  ;;  %v15271_v41 = vrot.slane %v11316_v19, 6  ;;  %vm15278_vm4 = vmmov %vm15269_vm0 }
 0x10f   : > { %v1690_v9 = vsel %vm15270_vm13, %v1681_v22, %v11011_v18  ;;  %vm15272_vm5 = vcmask 1041408   ;;  %v15273_v31 = vunpack.i.h.bf16 %v11506_v45  ;;  %vm15275_vm9 = vcmask 777216  }
 0x110   : > { %v1670_v43 = vsel %vm15272_vm5, %v11338_v44, %v15271_v41  ;;  %v1476_v5 = vsel %vm15275_vm9, %v9872_v7, %v1465_v46  ;;  %v15276_v18 = vunpack.i.l.bf16 %v11556_v62  ;;  %vm15277_vm13 = vmmov %vm15275_vm9  ;;  %v15279_v19 = vshra.s32 %v11138_v56, 5  ;;  %1763 = vmatprep.subr.bf16.mxu0 %v1743_v38 }
 0x111   : > { %v1380_v40 = vsel %vm15274_vm1, %v15273_v31, %v11706_v28  ;;  %v1679_v39 = vsel %vm15278_vm4, %v1670_v43, %v11388_v53  ;;  %v15280_v37 = vmov 0  ;;  %vm15282_vm5 = vnez %v15121_v48  ;;  %vm15288_vm4 = vmand %vm11530_vm11, %vm11479_vm12 }
 0x112   : > { %v1473_v14 = vsel %vm15277_vm13, %v9871_v49, %v15276_v18  ;;  %vm11724_vm15 = vcmp.ge.s32.totalorder %v15279_v19, 1  ;;  %vm15283_vm0 = vnez %v15150_v60  ;;  %v15284_v44 = vand.u32 31, %v11138_v56  ;;  %vm15289_vm1 = vmand %vm15261_vm7, %vm15260_vm14  ;;  %v11766_v18 = vpop.permute.xlu1 %9879 }
 0x113   : > { %v15281_v37 = vsel %vm11724_vm15, 4294967295, %v15280_v37  ;;  %v15285_v45 = vmov 0  ;;  %vm15287_vm13 = vcmask 1044480   ;;  %v1412_v53 = vsel %vm15288_vm4, %v1380_v40, 0.0  ;;  %vm15290_vm15 = vmand %vm11444_vm6, %vm15222_vm8 }
 0x114   : > { %vm11734_vm9 = vcmp.lt.s32.totalorder %v15284_v44, 31  ;;  %v1699_v50 = vsel %vm15287_vm13, %v1690_v9, %v1598_v51  ;;  %v1497_v22 = vsel %vm15289_vm1, %v1473_v14, 0.0  ;;  %v1500_v49 = vsel %vm15290_vm15, %v1476_v5, 0.0  ;;  %v11768_v14 = vpop.permute.xlu0 %9874  ;;  %vm15298_vm1 = vmand %vm15283_vm0, %vm15282_vm5 }
 0x115   : > { %v15286_v45 = vsel %vm11734_vm9, 4294967295, %v15285_v45  ;;  %v1622_v51 = vrot.slane %v1412_v53, 2  ;;  %v1720_v9 = vpack.c.bf16 %v1497_v22, %v11632_v0  ;;  %vm15291_vm13 = vcmask 1043456  }
 0x116   : > { %v1688_v38 = vsel %vm15291_vm13, %v1679_v39, %v10991_v11  ;;  %v15292_v41 = vunpack.i.h.bf16 %v11556_v62  ;;  %vm15293_vm4 = vcmask 777216   ;;  %v15294_v31 = vand.u32 31, %v11135_v55 }
 0x117   : > { %v15295_v40 = vmov 0  ;;  %vm15297_vm15 = vcmask 1044480   ;;  %v15299_v62 = vsel %vm15283_vm0, %v11494_v61, 0.0  ;;  %vm15300_vm13 = vcmask 1042432  }
 0x118   : > { %v1475_v43 = vsel %vm15293_vm4, %v15292_v41, %v9872_v7  ;;  %vm11762_vm12 = vcmp.ge.s32.totalorder %v15294_v31, 1  ;;  %v1697_v5 = vsel %vm15297_vm15, %v1688_v38, %v1596_v23  ;;  %v1643_v0 = vrot.slane %v15299_v62, 1 }
 0x119   : > { %v15296_v40 = vsel %vm11762_vm12, 4294967295, %v15295_v40  ;;  %v1499_v11 = vsel %vm15298_vm1, %v1475_v43, 0.0  ;;  %v1678_v7 = vsel %vm15300_vm13, %v11343_v3, %v11386_v59  ;;  %v15301_v39 = vmov %v15284_v44 }
 0x11a   : > { %vm11785_vm4 = vcmp.ge.s32.totalorder %v15301_v39, 1  ;;  %v15302_v19 = vmov 0  ;;  %vm15304_vm15 = vnez %v15183_v4  ;;  %v9882_v23 = vunpack.i.h.bf16 %v11766_v18 }
 0x11b   : > { %v15303_v19 = vsel %vm11785_vm4, 4294967295, %v15302_v19  ;;  %v9881_v61 = vunpack.i.l.bf16 %v11766_v18  ;;  %v9877_v44 = vunpack.i.h.bf16 %v11768_v14  ;;  %v9876_v53 = vunpack.i.l.bf16 %v11768_v14 }
 0x11c   : > { %v1740_v3 = vand.u32 %v11173_v12, %v1720_v9  ;;  %vm15306_vm13 = vcmask 1045504   ;;  %vm15307_vm6 = vcmask 1043456   ;;  %vm15309_vm1 = vcmask 777216   ;;  %v11826_v9 = vld [vmem:[%s15305_s9] sm:$0x3]  ;;  %s15863_s9 = sld [smem:[#allocation17_spill]] }
 0x11d   : > { %v1706_v59 = vsel %vm15306_vm13, %v1697_v5, %v1620_v32  ;;  %v1687_v22 = vsel %vm15307_vm6, %v1678_v7, %v10987_v10  ;;  %vm15308_vm0 = vmmov %vm15306_vm13  ;;  %v1477_v41 = vsel %vm15309_vm1, %v1465_v46, %v9881_v61  ;;  %vm15310_vm7 = vcmask 785408  }
 0x11e   : > { %v11804_v38 = vsel %vm15308_vm0, %v1699_v50, %v1622_v51  ;;  %v1436_v43 = vsel %vm15310_vm7, %v11558_v58, %v9876_v53  ;;  %vm15311_vm8 = vmmov %vm15310_vm7  ;;  %vm15312_vm5 = vcmask 1046528   ;;  %1764 = vmatpush1.bf16.msra.mxu0 %v1740_v3  ;;  %v9890_v50 = vpop.permute.xlu1 %9889  ;;  %v9885_v51 = vpop.permute.xlu0 %9884  ;;  %v15314_v39 = vshra.s32 %v11135_v55, 5 }
 0x11f   : > { %v1437_v31 = vsel %vm15311_vm8, %v9876_v53, %v9877_v44  ;;  %v1715_v26 = vsel %vm15312_vm5, %v1706_v59, %v11598_v36  ;;  %vm15313_vm6 = vmand %vm15304_vm15, %vm11332_vm3  ;;  %v1452_v32 = vsel %vm15304_vm15, %v1436_v43, 0.0  ;;  %v9892_v62 = vunpack.i.h.bf16 %v9890_v50 }
 0x120   : > { %v11819_v10 = vsel %vm15313_vm6, %v1477_v41, 0.0  ;;  %v1453_v58 = vsel %vm11530_vm11, %v1437_v31, 0.0  ;;  %v1723_v46 = vpack.c.bf16 %v1500_v49, %v1715_v26  ;;  %v11828_v36 = vrot.slane %v1452_v32, 1 }
 0x121   : > { %v11830_v5 = vrot.slane %v1453_v58, 1  ;;  %v9891_v7 = vunpack.i.l.bf16 %v9890_v50  ;;  %vm11838_vm8 = vcmp.lt.s32.totalorder %v15314_v39, 31  ;;  %v15315_v53 = vmov 0 }
 0x122   : > { %v15316_v53 = vsel %vm11838_vm8, 4294967295, %v15315_v53  ;;  %v1749_v49 = vand.u32 %v11173_v12, %v1723_v46  ;;  %v9887_v3 = vunpack.i.h.bf16 %v9885_v51  ;;  %v9886_v59 = vunpack.i.l.bf16 %v9885_v51  ;;  %v9900_v51 = vpop.permute.xlu1 %9899 }
 0x123   : > { %vm15317_vm0 = vcmask 1044480   ;;  %v15318_v43 = vshra.s32 %v11138_v56, 5  ;;  %v15319_v31 = vmov 0  ;;  %v15322_v26 = vunpack.i.h.bf16 %v11504_v13 }
 0x124   : > { %v1696_v41 = vsel %vm15317_vm0, %v1687_v22, %v11359_v57  ;;  %vm15323_vm1 = vcmask 252928   ;;  %vm15325_vm6 = vcmask 72704   ;;  %v15326_v58 = vrot.slane %v11438_v6, 2  ;;  %1804 = vmatprep.subr.bf16.mxu1 %v1749_v49 }
 0x125   : > { %vm11847_vm5 = vcmp.lt.s32.totalorder %v15318_v43, 31  ;;  %v1241_v55 = vsel %vm15323_vm1, %v15322_v26, %v9891_v7  ;;  %vm15324_vm13 = vmmov %vm15323_vm1  ;;  %7955 = vmatmul.mubr.msk.bf16.vlgmr.msra.gmra.mrb[0].mxu0 %vm15325_vm6, %v11826_v9  ;;  %vm15327_vm7 = vcmask 1045504   ;;  %vm15328_vm0 = vcmask 777216  }
 0x126   : > { %v15320_v31 = vsel %vm11847_vm5, 4294967295, %v15319_v31  ;;  %v1242_v32 = vsel %vm15324_vm13, %v9891_v7, %v9892_v62  ;;  %v1705_v46 = vsel %vm15327_vm7, %v1696_v41, %v15326_v58  ;;  %v1478_v56 = vsel %vm15328_vm0, %v9881_v61, %v9882_v23  ;;  %v9895_v62 = vpop.permute.xlu0 %9894  ;;  %vm15334_vm6 = vmand %vm11683_vm2, %vm11689_vm10 }
 0x127   : > { %15321 = vst [vmem:[#allocation38_spill] sm:$0xff] %v15320_v31  ;;  %v15329_v57 = vunpack.i.h.bf16 %v11466_v1  ;;  %vm15330_vm15 = vcmask 261120   ;;  %vm15332_vm1 = vcmask 1046528   ;;  %vm15333_vm13 = vnez %v15281_v37 }
 0x128   : > { %vm15331_vm3 = vmmov %vm15330_vm15  ;;  %v1714_v50 = vsel %vm15332_vm1, %v1705_v46, %v1643_v0  ;;  %v1274_v6 = vsel %vm15334_vm6, %v1241_v55, 0.0  ;;  %v15335_v1 = vmov 0   ;;  %v9902_v39 = vunpack.i.h.bf16 %v9900_v51 }
 0x129   : > { %v1200_v13 = vsel %vm15330_vm15, %v15329_v57, %v9886_v59  ;;  %v1201_v22 = vsel %vm15331_vm3, %v9886_v59, %v9887_v3  ;;  %vm14978_vm7 = vmand %vm15333_vm13, %vm11734_vm9  ;;  %1877 = vmatprep.mubr.bf16.mxu0 %v15335_v1  ;;  %v1722_v7 = vpack.c.bf16 %v1499_v11, %v1714_v50  ;;  %vm15336_vm3 = vnez %v15186_v34 }
 0x12a   : > { %v1217_v61 = vsel %vm11683_vm2, %v1200_v13, 0.0  ;;  %v1218_v0 = vsel %vm15333_vm13, %v1201_v22, 0.0  ;;  %vm14979_vm15 = vmand %vm11530_vm11, %vm15336_vm3  ;;  %v9901_v59 = vunpack.i.l.bf16 %v9900_v51  ;;  %v9897_v41 = vunpack.i.h.bf16 %v9895_v62  ;;  %v1332_v22 = vpop.permute.xlu0 %1331 }
 0x12b   : > { %v1519_v49 = vrot.slane %v1217_v61, 7  ;;  %v1520_v3 = vrot.slane %v1218_v0, 7  ;;  %v1746_v43 = vand.u32 %v11173_v12, %v1722_v7  ;;  %vm14983_vm1 = vmand %vm15333_vm13, %vm11785_vm4  ;;  %v9896_v11 = vunpack.i.l.bf16 %v9895_v62 }
 0x12c   : > { %v1275_v26 = vsel %vm14978_vm7, %v1242_v32, 0.0  ;;  %v1543_v55 = vrot.slane %v1274_v6, 6  ;;  %v15337_v58 = vunpack.i.h.bf16 %v11600_v35  ;;  %vm15338_vm6 = vcmask 7168   ;;  %vm15343_vm7 = vmand %vm11683_vm2, %vm11762_vm12 }
 0x12d   : > { %vm15339_vm0 = vmmov %vm15338_vm6  ;;  %v1544_v13 = vrot.slane %v1275_v26, 6  ;;  %v1502_v50 = vsel %vm14979_vm15, %v1478_v56, 0.0  ;;  %1805 = vmatpush1.bf16.msra.mxu1 %v1746_v43  ;;  %v15340_v35 = vunpack.i.h.bf16 %v11606_v15  ;;  %vm15344_vm15 = vcmask 1040384   ;;  %v1373_v43 = vpop.permute.xlu1 %1372 }
 0x12e   : > { %v1298_v46 = vsel %vm15338_vm6, %v15337_v58, %v9901_v59  ;;  %v1299_v57 = vsel %vm15339_vm0, %v9901_v59, %v9902_v39  ;;  %vm15341_vm6 = vcmask 269312   ;;  %vm15345_vm11 = vmmov %vm15344_vm15  ;;  %vm15348_vm3 = vcmask 72704  }
 0x12f   : > { %v1315_v51 = vsel %vm11762_vm12, %v1298_v46, 0.0  ;;  %v1316_v32 = vsel %vm11785_vm4, %v1299_v57, 0.0  ;;  %v1135_v62 = vsel %vm15341_vm6, %v15340_v35, %v9896_v11  ;;  %vm15342_vm0 = vmmov %vm15341_vm6  ;;  %vm15346_vm6 = vcmask 1039360  }
 0x130   : > { %v1136_v6 = vsel %vm15342_vm0, %v9896_v11, %v9897_v41  ;;  %v1567_v61 = vrot.slane %v1315_v51, 5  ;;  %v1568_v0 = vrot.slane %v1316_v32, 5  ;;  %v1176_v56 = vsel %vm15343_vm7, %v1135_v62, 0.0  ;;  %vm15347_vm0 = vmmov %vm15346_vm6  ;;  %7956 = vmatmul.mubr.msk.bf16.vlgmr.msra.gmra.mrb[0].mxu1 %vm15348_vm3, %v11826_v9 }
 0x131   : > { %v1177_v7 = vsel %vm14983_vm1, %v1136_v6, 0.0  ;;  %v1664_v15 = vsel %vm15344_vm15, %v1176_v56, %v1519_v49  ;;  %v1340_v59 = vsel %vm15346_vm6, %v11661_v54, %v1332_v22  ;;  %v1349_v41 = vsel %vm15347_vm0, %v1332_v22, 0.0  ;;  %v1430_v22 = vpop.permute.xlu0 %1429  ;;  %1918 = vmatprep.mubr.bf16.mxu1 %v15335_v1 }
 0x132   : > { %v1665_v39 = vsel %vm15345_vm11, %v1177_v7, %v1520_v3  ;;  %v1356_v11 = vsel %vm11689_vm10, %v1340_v59, 0.0  ;;  %v1357_v26 = vsel %vm11734_vm9, %v1349_v41, 0.0  ;;  %vm15349_vm7 = vcmask 1041408   ;;  %v15363_v7 = vld [vmem:[#allocation36_spill] sm:$0xff] }
 0x133   : > { %v1673_v58 = vsel %vm15349_vm7, %v1664_v15, %v1543_v55  ;;  %vm15350_vm15 = vmmov %vm15349_vm7  ;;  %v1599_v54 = vrot.slane %v1356_v11, 3  ;;  %v1600_v3 = vrot.slane %v1357_v26, 3  ;;  %vm15351_vm6 = vcmask 1042432  }
 0x134   : > { %v1674_v49 = vsel %vm15350_vm15, %v1665_v39, %v1544_v13  ;;  %v1682_v46 = vsel %vm15351_vm6, %v1673_v58, %v1567_v61  ;;  %vm15352_vm3 = vmmov %vm15351_vm6  ;;  %vm15353_vm7 = vcmask 1043456   ;;  %vm15355_vm1 = vcmask 1046528  }
 0x135   : > { %v1683_v57 = vsel %vm15352_vm3, %v1674_v49, %v1568_v0  ;;  %v1691_v55 = vsel %vm15353_vm7, %v1682_v46, %v11029_v21  ;;  %vm15354_vm15 = vmmov %vm15353_vm7  ;;  %v1717_v51 = vsel %vm15355_vm1, %v11804_v38, %v11830_v5  ;;  %vm15356_vm6 = vcmask 793600   ;;  %v1471_v0 = vpop.permute.xlu1 %1470 }
 0x136   : > { %v1692_v13 = vsel %vm15354_vm15, %v1683_v57, %v11045_v25  ;;  %v1381_v32 = vsel %vm15356_vm6, %v11706_v28, %v1373_v43  ;;  %vm15357_vm3 = vcmask 1044480   ;;  %v1725_v6 = vpack.c.bf16 %v1502_v50, %v1717_v51  ;;  %vm15359_vm0 = vmmov %vm15356_vm6  ;;  %v1731_v51 = vpop.permute.xlu0 %1730 }
 0x137   : > { %v1700_v35 = vsel %vm15357_vm3, %v1691_v55, %v1599_v54  ;;  %vm15358_vm11 = vmmov %vm15357_vm3  ;;  %v1390_v61 = vsel %vm15359_vm0, %v1373_v43, 0.0  ;;  %v1689_v28 = vsel %vm15354_vm15, %v11694_v33, %v11007_v17  ;;  %v15365_v17 = vld [vmem:[#allocation37_spill] sm:$0xff]  ;;  %vm15369_vm15 = vcmask 777216  }
 0x138   : > { %v1701_v62 = vsel %vm15358_vm11, %v1692_v13, %v1600_v3  ;;  %vm15360_vm7 = vmand %vm11838_vm8, %vm11762_vm12  ;;  %vm15362_vm11 = vcmask 785408   ;;  %v1755_v5 = vand.u32 %v11173_v12, %v1725_v6  ;;  %v15366_v33 = vrot.slane %v15365_v17, 2 }
 0x139   : > { %v1413_v21 = vsel %vm15360_vm7, %v1381_v32, 0.0  ;;  %vm15361_vm1 = vmand %vm11847_vm5, %vm11785_vm4  ;;  %v1438_v38 = vsel %vm15362_vm11, %v9877_v44, %v1430_v22  ;;  %vm15367_vm7 = vcmask 1045504   ;;  %v1479_v59 = vsel %vm15369_vm15, %v9882_v23, %v1471_v0 }
 0x13a   : > { %v1414_v25 = vsel %vm15361_vm1, %v1390_v61, 0.0  ;;  %vm14984_vm0 = vmand %vm11838_vm8, %vm11689_vm10  ;;  %v1623_v50 = vrot.slane %v1413_v21, 2  ;;  %v1454_v39 = vsel %vm11838_vm8, %v1438_v38, 0.0  ;;  %1845 = vmatprep.subr.bf16.mxu0 %v1755_v5  ;;  %vm15405_vm4 = vcmask 252928  }
 0x13b   : > { %v1624_v56 = vrot.slane %v1414_v25, 2  ;;  %vm15364_vm6 = vmmov %vm15357_vm3  ;;  %v1647_v11 = vrot.slane %v1454_v39, 1  ;;  %v1503_v18 = vsel %vm14984_vm0, %v1479_v59, 0.0  ;;  %vm15414_vm13 = vcmask 269312  }
 0x13c   : > { %v1698_v15 = vsel %vm15364_vm6, %v1689_v28, %v15363_v7  ;;  %vm14985_vm3 = vmand %vm11847_vm5, %vm11734_vm9 }
 0x13d   : > { %v1707_v14 = vsel %vm15367_vm7, %v1698_v15, %v15366_v33  ;;  %vm15368_vm1 = vmmov %vm15362_vm11  ;;  %vm15370_vm11 = vcmask 1046528  }
 0x13e   : > { %v1447_v44 = vsel %vm15368_vm1, %v1430_v22, 0.0  ;;  %v1716_v41 = vsel %vm15370_vm11, %v1707_v14, %v11828_v36  ;;  %vm15371_vm6 = vmmov %vm15369_vm15  ;;  %v1709_v36 = vsel %vm15367_vm7, %v1700_v35, %v1623_v50 }
 0x13f   : > { %v1455_v43 = vsel %vm11847_vm5, %v1447_v44, 0.0  ;;  %v1488_v26 = vsel %vm15371_vm6, %v1471_v0, 0.0  ;;  %v1724_v58 = vpack.c.bf16 %v11819_v10, %v1716_v41  ;;  %vm15372_vm1 = vmmov %vm15367_vm7  ;;  %vm15374_vm6 = vcmask 72704  }
 0x140   : > { %v1648_v49 = vrot.slane %v1455_v43, 1  ;;  %v1504_v23 = vsel %vm14985_vm3, %v1488_v26, 0.0  ;;  %v1710_v54 = vsel %vm15372_vm1, %v1701_v62, %v1624_v56  ;;  %vm15373_vm15 = vmmov %vm15370_vm11  ;;  %vm15378_vm1 = vcmask 261120  }
 0x141   : > { %v1752_v3 = vand.u32 %v11173_v12, %v1724_v58  ;;  %v1718_v10 = vsel %vm15373_vm15, %v1709_v36, %v1647_v11  ;;  %vm15375_vm7 = vmmov %vm15374_vm6  ;;  %vm15392_vm3 = vcmask 7168  }
 0x142   : > { %v1719_v46 = vsel %vm15370_vm11, %v1710_v54, %v1648_v49  ;;  %v1726_v57 = vpack.c.bf16 %v1503_v18, %v1718_v10  ;;  %vm15379_vm15 = vmmov %vm15378_vm1 }
 0x143   : > { %v1727_v22 = vpack.c.bf16 %v1504_v23, %v1719_v46  ;;  %1846 = vmatpush1.bf16.msra.mxu0 %v1752_v3  ;;  %vm15393_vm5 = vmmov %vm15392_vm3 }
 0x144   : > { %v1758_v13 = vand.u32 %v11173_v12, %v1726_v57  ;;  %vm15406_vm12 = vmmov %vm15405_vm4 }
 0x145   : > { %v1761_v55 = vand.u32 %v11173_v12, %v1727_v22 }
 0x146   : > { %7957 = vmatmul.mubr.msk.bf16.vlgmr.msra.gmra.mrb[4].mxu0 %vm15374_vm6, %v11826_v9  ;;  %vm15382_vm6 = vcmask 7168  }
 0x147   : > { %1886 = vmatprep.subr.bf16.mxu1 %v1761_v55  ;;  %2610 = vmatprep.mubr.bf16.mxu0 %v15335_v1 }
 0x148   : > { %1887 = vmatpush1.bf16.msra.mxu1 %v1758_v13  ;;  %v1936_v13 = vld [vmem:[%s10810_s21] sm:$0xf] }
 0x14b   : > { %7958 = vmatmul.mubr.msk.bf16.vlgmr.msra.gmra.mrb[4].mxu1 %vm15375_vm7, %v11826_v9  ;;  %vm15383_vm7 = vmmov %vm15382_vm6 }
 0x14c   : > { %2651 = vmatprep.mubr.bf16.mxu1 %v15335_v1 }
 0x1f8   : > { %v1797_v32 = vpop.f32.mrb[0].mxu0 }
 0x1f9   : > { %v1798_v35 = vadd.f32 %v1797_v32, %v1731_v51  ;;  %v1799_v62 = vpop.f32.mrb[1].mxu0 }
 0x1fa   : > { %v1800_v6 = vadd.f32 %v1799_v62, %v1731_v51  ;;  %v1801_v61 = vpop.f32.mrb[2].mxu0 }
 0x1fb   : > { %v12028_v0 = vmax.f32 %v1798_v35, 0.0  ;;  %v1802_v12 = vpop.f32.mrb[3].mxu0 }
 0x1fc   : > { %v12030_v21 = vmax.f32 %v1800_v6, 0.0 }
 0x1fe   : > { %v9904_v25 = vpack.i.bf16 %v12030_v21, %v12028_v0 }
 0x200   : > { %9905 = vrot.lane.b32.xlu1 %v9904_v25, %s10749_s23 }
 0x203   : > { %v1838_v28 = vpop.f32.mrb[0].mxu1 }
 0x204   : > { %v1839_v9 = vadd.f32 %v1838_v28, %v1731_v51  ;;  %v1840_v38 = vpop.f32.mrb[1].mxu1  ;;  %9910 = vrot.lane.b32.xlu1 %v9904_v25, %s15056_s26  ;;  %v15380_v28 = vld [vmem:[#allocation26_spill] sm:$0xff] }
 0x205   : > { %v1841_v5 = vadd.f32 %v1840_v38, %v1731_v51  ;;  %v1842_v50 = vpop.f32.mrb[2].mxu1  ;;  %vm15381_vm11 = vnez %v15380_v28 }
 0x206   : > { %v12035_v56 = vmax.f32 %v1839_v9, 0.0  ;;  %v1843_v7 = vpop.f32.mrb[3].mxu1  ;;  %v15384_v50 = vld [vmem:[#allocation27_spill] sm:$0xff] }
 0x207   : > { %v12038_v15 = vmax.f32 %v1841_v5, 0.0  ;;  %vm15385_vm0 = vnez %v15384_v50 }
 0x208   : > { %v9944_v39 = vpack.i.bf16 %v12035_v56, %v12030_v21 }
 0x209   : > { %v9914_v17 = vpack.i.bf16 %v12038_v15, %v12035_v56  ;;  %v9954_v58 = vpack.i.bf16 %v12038_v15, %v12028_v0 }
 0x20b   : > { %9915 = vrot.lane.b32.xlu0 %v9914_v17, %s10749_s23  ;;  %9920 = vrot.lane.b32.xlu1 %v9914_v17, %s15056_s26 }
 0x20f   : > { %9925 = vrot.lane.b32.xlu0 %v9904_v25, %s10748_s22  ;;  %9930 = vrot.lane.b32.xlu1 %v9904_v25, %s10751_s28 }
 0x213   : > { %9935 = vrot.lane.b32.xlu0 %v9914_v17, %s10748_s22  ;;  %9940 = vrot.lane.b32.xlu1 %v9914_v17, %s10751_s28 }
 0x217   : > { %9945 = vrot.lane.b32.xlu0 %v9944_v39, %s15058_s1  ;;  %9950 = vrot.lane.b32.xlu1 %v9944_v39, %s10754_s7 }
 0x219   : > { %v1879_v33 = vpop.f32.mrb[4].mxu0 }
 0x21a   : > { %v1881_v14 = vpop.f32.mrb[5].mxu0  ;;  %v1880_v26 = vadd.f32 %v1879_v33, %v1731_v51 }
 0x21b   : > { %v1883_v44 = vpop.f32.mrb[6].mxu0  ;;  %9955 = vrot.lane.b32.xlu0 %v9954_v58, %s15058_s1  ;;  %9970 = vrot.lane.b32.xlu1 %v9954_v58, %s10753_s2  ;;  %v1882_v23 = vadd.f32 %v1881_v14, %v1731_v51 }
 0x21c   : > { %v1884_v59 = vpop.f32.mrb[7].mxu0  ;;  %v12056_v18 = vmax.f32 %v1880_v26, 0.0  ;;  %v15388_v26 = vld [vmem:[#allocation29_spill] sm:$0xff] }
 0x21d   : > { %v12067_v36 = vmax.f32 %v1882_v23, 0.0 }
 0x21e   : > { %v1920_v41 = vpop.f32.mrb[4].mxu1 }
 0x21f   : > { %v1922_v43 = vpop.f32.mrb[5].mxu1  ;;  %9960 = vrot.lane.b32.xlu0 %v9954_v58, %s10754_s7  ;;  %2177 = vrot.lane.b32.xlu1 %v12056_v18, %s15058_s1  ;;  %v1921_v54 = vadd.f32 %v1920_v41, %v1731_v51  ;;  %v9984_v3 = vpack.i.bf16 %v12067_v36, %v12056_v18 }
 0x220   : > { %v1924_v11 = vpop.f32.mrb[6].mxu1  ;;  %v1923_v46 = vadd.f32 %v1922_v43, %v1731_v51  ;;  %v15386_v43 = vld [vmem:[#allocation28_spill] sm:$0xff] }
 0x221   : > { %v1925_v49 = vpop.f32.mrb[7].mxu1  ;;  %v12076_v10 = vmax.f32 %v1921_v54, 0.0 }
 0x222   : > { %v12084_v22 = vmax.f32 %v1923_v46, 0.0 }
 0x223   : > { %9965 = vrot.lane.b32.xlu0 %v9944_v39, %s10753_s2  ;;  %2289 = vrot.lane.b32.xlu1 %v12056_v18, %s10754_s7  ;;  %15376 = vst [vmem:[#allocation36_spill] sm:$0xff] %v12076_v10  ;;  %v10004_v57 = vpack.i.bf16 %v12076_v10, %v12067_v36 }
 0x224   : > { %15377 = vst [vmem:[#allocation37_spill] sm:$0xff] %v12084_v22  ;;  %v10024_v55 = vpack.i.bf16 %v12084_v22, %v12076_v10 }
 0x227   : > { %2233 = vrot.lane.b32.xlu0 %v12056_v18, %s10753_s2  ;;  %9975 = vrot.lane.b32.xlu1 %v9904_v25, %s10755_s10 }
 0x22b   : > { %9980 = vrot.lane.b32.xlu0 %v9914_v17, %s10755_s10  ;;  %2345 = vrot.lane.b32.xlu1 %v12056_v18, %s10755_s10 }
 0x22f   : > { %9985 = vrot.lane.b32.xlu0 %v9984_v3, %s10749_s23  ;;  %9990 = vrot.lane.b32.xlu1 %v9984_v3, %s15056_s26 }
 0x233   : > { %9995 = vrot.lane.b32.xlu0 %v9984_v3, %s10748_s22  ;;  %10000 = vrot.lane.b32.xlu1 %v9984_v3, %s10751_s28 }
 0x237   : > { %10005 = vrot.lane.b32.xlu0 %v10004_v57, %s15058_s1  ;;  %10010 = vrot.lane.b32.xlu1 %v10004_v57, %s10754_s7 }
 0x23b   : > { %10015 = vrot.lane.b32.xlu0 %v10004_v57, %s10753_s2  ;;  %10020 = vrot.lane.b32.xlu1 %v10004_v57, %s10755_s10  ;;  %v15394_v57 = vld [vmem:[#allocation33_spill] sm:$0xff] }
 0x23c   : > { %vm15395_vm8 = vnez %v15394_v57 }
 0x23f   : > { %10025 = vrot.lane.b32.xlu0 %v10024_v55, %s10749_s23  ;;  %10030 = vrot.lane.b32.xlu1 %v10024_v55, %s15056_s26  ;;  %s10763_s23 = smov 111  }
 0x243   : > { %10035 = vrot.lane.b32.xlu0 %v10024_v55, %s10748_s22  ;;  %10040 = vrot.lane.b32.xlu1 %v10024_v55, %s10751_s28  ;;  %s10762_s22 = smov 112   ;;  %s10764_s28 = smov 113  }
 0x247   : > { %2183 = vrot.lane.b32.xlu0 %v12084_v22, %s15058_s1  ;;  %2295 = vrot.lane.b32.xlu1 %v12084_v22, %s10754_s7 }
 0x24b   : > { %2239 = vrot.lane.b32.xlu0 %v12084_v22, %s10753_s2  ;;  %2351 = vrot.lane.b32.xlu1 %v12084_v22, %s10755_s10  ;;  %s10767_s2 = smov 8  }
 0x24f   : > { %2547 = vperm.xlu0 %9903, %v1936_v13  }
 0x272   : > { %v9906_v51 = vpop.permute.xlu1 %9905 }
 0x273   : > { %v9907_v32 = vunpack.i.l.bf16 %v9906_v51  ;;  %v9908_v35 = vunpack.i.h.bf16 %v9906_v51  ;;  %v15396_v51 = vld [vmem:[#allocation32_spill] sm:$0xff] }
 0x274   : > { %vm15397_vm9 = vnez %v15396_v51 }
 0x275   : > { %v2032_v6 = vsel %vm15378_vm1, 0.0, %v9907_v32  ;;  %v2017_v25 = vsel %vm15379_vm15, %v9907_v32, %v9908_v35  ;;  %vm15387_vm1 = vnez %v15386_v43  ;;  %vm15389_vm15 = vnez %v15388_v26 }
 0x276   : > { %v9911_v62 = vpop.permute.xlu1 %9910  ;;  %v2049_v9 = vsel %vm15381_vm11, %v2032_v6, 0.0  ;;  %v2050_v7 = vsel %vm15385_vm0, %v2017_v25, 0.0  ;;  %vm15404_vm10 = vmand %vm15381_vm11, %vm15387_vm1 }
 0x277   : > { %v9913_v61 = vunpack.i.h.bf16 %v9911_v62  ;;  %v9912_v12 = vunpack.i.l.bf16 %v9911_v62  ;;  %v2401_v41 = vrot.slane %v2049_v9, 4  ;;  %v2402_v46 = vrot.slane %v2050_v7, 4  ;;  %v15398_v62 = vld [vmem:[#allocation34_spill] sm:$0xff] }
 0x279   : > { %v2129_v38 = vsel %vm15382_vm6, %v9912_v12, %v9913_v61  ;;  %v2144_v5 = vsel %vm15383_vm7, 0.0, %v9912_v12  ;;  %vm15390_vm6 = vcmask 261120  }
 0x27a   : > { %v2161_v11 = vsel %vm15387_vm1, %v2144_v5, 0.0  ;;  %v2162_v58 = vsel %vm15389_vm15, %v2129_v38, 0.0  ;;  %vm15391_vm7 = vmmov %vm15390_vm6  ;;  %v15400_v38 = vld [vmem:[#allocation30_spill] sm:$0xff] }
 0x27b   : > { %v2425_v12 = vrot.slane %v2161_v11, 4  ;;  %v2426_v25 = vrot.slane %v2162_v58, 4 }
 0x27d   : > { %v12111_v17 = vpop.permute.xlu0 %9915  ;;  %v12113_v33 = vpop.permute.xlu1 %9920 }
 0x27e   : > { %v14993_v14 = vunpack.i.h.bf16 %v12111_v17  ;;  %v9917_v44 = vunpack.i.l.bf16 %v12111_v17  ;;  %v14992_v39 = vunpack.i.h.bf16 %v12113_v33  ;;  %v9922_v59 = vunpack.i.l.bf16 %v12113_v33 }
 0x280   : > { %v2018_v49 = vsel %vm15390_vm6, %v9908_v35, %v9917_v44  ;;  %v2019_v23 = vsel %vm15391_vm7, %v9917_v44, %v14993_v14  ;;  %v2130_v54 = vsel %vm15392_vm3, %v9913_v61, %v9922_v59  ;;  %v2131_v3 = vsel %vm15393_vm5, %v9922_v59, %v14992_v39 }
 0x281   : > { %v2052_v55 = vsel %vm15395_vm8, %v2019_v23, 0.0  ;;  %v9926_v13 = vpop.permute.xlu0 %9925  ;;  %v2163_v32 = vsel %vm15397_vm9, %v2130_v54, 0.0  ;;  %vm15399_vm6 = vnez %v15398_v62  ;;  %v9931_v6 = vpop.permute.xlu1 %9930  ;;  %vm15401_vm3 = vnez %v15400_v38 }
 0x282   : > { %v2164_v35 = vsel %vm15399_vm6, %v2131_v3, 0.0  ;;  %v9928_v9 = vunpack.i.h.bf16 %v9926_v13  ;;  %v9927_v61 = vunpack.i.l.bf16 %v9926_v13  ;;  %v2051_v5 = vsel %vm15401_vm3, %v2018_v49, 0.0 }
 0x283   : > { %v2404_v44 = vrot.slane %v2052_v55, 4  ;;  %v9933_v7 = vunpack.i.h.bf16 %v9931_v6  ;;  %v9932_v59 = vunpack.i.l.bf16 %v9931_v6  ;;  %vm15402_vm5 = vcmask 269312  }
 0x284   : > { %v1961_v23 = vsel %vm15402_vm5, %v9927_v61, %v9928_v9  ;;  %vm15403_vm7 = vmmov %vm15402_vm5  ;;  %v2427_v14 = vrot.slane %v2163_v32, 4  ;;  %v2428_v54 = vrot.slane %v2164_v35, 4 }
 0x285   : > { %v1976_v39 = vsel %vm15403_vm7, 0.0, %v9927_v61  ;;  %v12146_v58 = vpop.permute.xlu0 %9935  ;;  %v2073_v3 = vsel %vm15405_vm4, %v9932_v59, %v9933_v7  ;;  %v2088_v49 = vsel %vm15406_vm12, 0.0, %v9932_v59  ;;  %v12150_v55 = vpop.permute.xlu1 %9940  ;;  %vm15407_vm5 = vmand %vm15385_vm0, %vm15389_vm15  ;;  %v15409_v59 = vld [vmem:[#allocation31_spill] sm:$0xff]  ;;  %vm15412_vm7 = vcmask 1043456  }
 0x286   : > { %v1993_v11 = vsel %vm15404_vm10, %v1976_v39, 0.0  ;;  %v1994_v13 = vsel %vm15407_vm5, %v1961_v23, 0.0  ;;  %v9937_v35 = vunpack.i.l.bf16 %v12146_v58  ;;  %vm15408_vm10 = vmand %vm15381_vm11, %vm15260_vm14  ;;  %v9942_v61 = vunpack.i.l.bf16 %v12150_v55 }
 0x287   : > { %v2105_v39 = vsel %vm15408_vm10, %v2088_v49, 0.0  ;;  %vm15410_vm12 = vnez %v15409_v59  ;;  %v2490_v32 = vsel %vm15412_vm7, %v1994_v13, %v2402_v46  ;;  %vm15413_vm5 = vmmov %vm15412_vm7  ;;  %v15415_v22 = vunpack.i.h.bf16 %v12146_v58 }
 0x288   : > { %vm15411_vm4 = vmand %vm15385_vm0, %vm15410_vm12  ;;  %v2489_v10 = vsel %vm15413_vm5, %v1993_v11, %v2401_v41  ;;  %v1962_v28 = vsel %vm15414_vm13, %v9928_v9, %v9937_v35  ;;  %v15421_v41 = vunpack.i.h.bf16 %v12150_v55 }
 0x289   : > { %v2106_v23 = vsel %vm15411_vm4, %v2073_v3, 0.0  ;;  %vm15416_vm11 = vmmov %vm15414_vm13  ;;  %v9946_v3 = vpop.permute.xlu0 %9945  ;;  %vm15420_vm4 = vcmask 252928   ;;  %v9951_v11 = vpop.permute.xlu1 %9950 }
 0x28a   : > { %v1963_v49 = vsel %vm15416_vm11, %v9937_v35, %v15415_v22  ;;  %vm15417_vm10 = vmmov %vm15413_vm5  ;;  %v2074_v46 = vsel %vm15420_vm4, %v9933_v7, %v9942_v61  ;;  %v9948_v22 = vunpack.i.h.bf16 %v9946_v3  ;;  %v9947_v35 = vunpack.i.l.bf16 %v9946_v3 }
 0x28b   : > { %v2498_v6 = vsel %vm15417_vm10, %v2106_v23, %v2426_v25  ;;  %vm15418_vm2 = vmmov %vm15413_vm5  ;;  %v9953_v25 = vunpack.i.h.bf16 %v9951_v11  ;;  %vm15426_vm11 = vnez %v15129_v2 }
 0x28c   : > { %v2497_v31 = vsel %vm15418_vm2, %v2105_v39, %v2425_v12  ;;  %vm15419_vm0 = vmand %vm15401_vm3, %vm15397_vm9  ;;  %v2522_v13 = vpack.c.bf16 %v2498_v6, %v2490_v32  ;;  %vm15423_vm2 = vnez %v15121_v48  ;;  %v9952_v39 = vunpack.i.l.bf16 %v9951_v11 }
 0x28d   : > { %v1995_v50 = vsel %vm15419_vm0, %v1962_v28, 0.0  ;;  %vm15422_vm13 = vmmov %vm15420_vm4  ;;  %v2521_v23 = vpack.c.bf16 %v2497_v31, %v2489_v10  ;;  %v2403_v32 = vrot.slane %v2051_v5, 4  ;;  %vm15428_vm0 = vcmask 1039360   ;;  %v9956_v31 = vpop.permute.xlu0 %9955  ;;  %v9971_v3 = vpop.permute.xlu1 %9970 }
 0x28e   : > { %v2075_v9 = vsel %vm15422_vm13, %v9942_v61, %v15421_v41  ;;  %vm15424_vm7 = vmand %vm15401_vm3, %vm15423_vm2  ;;  %2578 = vmatprep.subr.bf16.mxu0 %v2522_v13  ;;  %v2186_v6 = vsel %vm15428_vm0, %v9947_v35, %v9948_v22  ;;  %vm15429_vm3 = vcmask 1043456   ;;  %vm15431_vm13 = vcmask 785408   ;;  %v15436_v13 = vld [vmem:[#allocation35_spill] sm:$0xff] }
 0x28f   : > { %v2107_v12 = vsel %vm15424_vm7, %v2074_v46, 0.0  ;;  %vm15425_vm5 = vmand %vm15395_vm8, %vm15399_vm6  ;;  %v2298_v10 = vsel %vm15431_vm13, %v9952_v39, %v9953_v25  ;;  %2579 = vmatpush1.bf16.msra.mxu0 %v2521_v23  ;;  %v2218_v57 = vsel %vm15410_vm12, %v2186_v6, 0.0  ;;  %v9958_v41 = vunpack.i.h.bf16 %v9956_v31 }
 0x290   : > { %v1996_v7 = vsel %vm15425_vm5, %v1963_v49, 0.0  ;;  %vm15427_vm10 = vmand %vm15395_vm8, %vm15426_vm11 }
 0x291   : > { %v2108_v38 = vsel %vm15427_vm10, %v2075_v9, 0.0  ;;  %v2492_v61 = vsel %vm15429_vm3, %v1996_v7, %v2404_v44  ;;  %vm15430_vm4 = vmmov %vm15429_vm3  ;;  %v9957_v9 = vunpack.i.l.bf16 %v9956_v31  ;;  %v2450_v7 = vrot.slane %v2218_v57, 4 }
 0x292   : > { %v2500_v28 = vsel %vm15430_vm4, %v2108_v38, %v2428_v54  ;;  %vm15432_vm7 = vmmov %vm15429_vm3  ;;  %v12217_v38 = vpop.permute.xlu1 %2177 }
 0x293   : > { %v2524_v46 = vpack.c.bf16 %v2500_v28, %v2492_v61  ;;  %v2499_v49 = vsel %vm15432_vm7, %v2107_v12, %v2427_v14  ;;  %vm15433_vm8 = vmmov %vm15429_vm3  ;;  %v9961_v12 = vpop.permute.xlu0 %9960  ;;  %vm15441_vm7 = vnez %v15153_v30 }
 0x294   : > { %v2491_v5 = vsel %vm15433_vm8, %v1995_v50, %v2403_v32  ;;  %vm15434_vm5 = vmmov %vm15428_vm0  ;;  %v9963_v61 = vunpack.i.h.bf16 %v9961_v12  ;;  %v9962_v50 = vunpack.i.l.bf16 %v9961_v12  ;;  %vm15442_vm8 = vnez %v15150_v60 }
 0x295   : > { %2619 = vmatprep.subr.bf16.mxu1 %v2524_v46  ;;  %v2523_v11 = vpack.c.bf16 %v2499_v49, %v2491_v5  ;;  %v2185_v44 = vsel %vm15434_vm5, %v9957_v9, %v9947_v35  ;;  %vm15435_vm10 = vmmov %vm15428_vm0  ;;  %vm15437_vm0 = vnez %v15436_v13  ;;  %v9972_v9 = vunpack.i.l.bf16 %v9971_v3 }
 0x296   : > { %v2187_v54 = vsel %vm15435_vm10, %v9948_v22, %v9958_v41  ;;  %v2330_v23 = vsel %vm15437_vm0, %v2298_v10, 0.0  ;;  %v2217_v14 = vsel %vm15260_vm14, %v2185_v44, 0.0  ;;  %vm15438_vm3 = vmmov %vm15434_vm5  ;;  %v9973_v10 = vunpack.i.h.bf16 %v9971_v3 }
 0x297   : > { %2620 = vmatpush1.bf16.msra.mxu1 %v2523_v11  ;;  %v2449_v6 = vrot.slane %v2217_v14, 4  ;;  %v2219_v32 = vsel %vm15423_vm2, %v2187_v54, 0.0  ;;  %v2474_v35 = vrot.slane %v2330_v23, 4  ;;  %v2188_v22 = vsel %vm15438_vm3, %v9958_v41, %v12217_v38  ;;  %vm15439_vm4 = vmmov %vm15431_vm13  ;;  %v9966_v5 = vpop.permute.xlu0 %9965  ;;  %v12231_v11 = vpop.permute.xlu1 %2289 }
 0x298   : > { %v2297_v28 = vsel %vm15439_vm4, %v9962_v50, %v9952_v39  ;;  %vm15440_vm13 = vmmov %vm15439_vm4  ;;  %v2220_v46 = vsel %vm15426_vm11, %v2188_v22, 0.0  ;;  %vm15443_vm5 = vcmask 1043456   ;;  %v2451_v39 = vrot.slane %v2219_v32, 4 }
 0x299   : > { %v2299_v31 = vsel %vm15440_vm13, %v9953_v25, %v9963_v61  ;;  %v2329_v49 = vsel %vm15441_vm7, %v2297_v28, 0.0  ;;  %v2506_v41 = vsel %vm15443_vm5, %v12030_v21, %v2450_v7  ;;  %v9968_v44 = vunpack.i.h.bf16 %v9966_v5  ;;  %vm15444_vm10 = vmmov %vm15443_vm5 }
 0x29a   : > { %v2331_v57 = vsel %vm15442_vm8, %v2299_v31, 0.0  ;;  %v9967_v25 = vunpack.i.l.bf16 %v9966_v5  ;;  %v2505_v54 = vsel %vm15444_vm10, %v12028_v0, %v2449_v6  ;;  %v2473_v23 = vrot.slane %v2329_v49, 4  ;;  %vm15445_vm3 = vmmov %vm15439_vm4 }
 0x29b   : > { %v2475_v14 = vrot.slane %v2331_v57, 4  ;;  %v2452_v12 = vrot.slane %v2220_v46, 4  ;;  %v2300_v50 = vsel %vm15445_vm3, %v9963_v61, %v12231_v11  ;;  %vm15446_vm4 = vcmask 793600   ;;  %vm15450_vm10 = vmand %vm15441_vm7, %vm15387_vm1  ;;  %v12254_v6 = vpop.permute.xlu0 %2233  ;;  %v9976_v31 = vpop.permute.xlu1 %9975 }
 0x29c   : > { %v2241_v3 = vsel %vm15446_vm4, %v9972_v9, %v9967_v25  ;;  %vm15447_vm13 = vmmov %vm15446_vm4  ;;  %vm15449_vm5 = vnez %v15197_v24  ;;  %v2244_v43 = vsel %vm15446_vm4, %v9973_v10, %v12254_v6  ;;  %vm15453_vm1 = vcmask 1043456  }
 0x29d   : > { %v2242_v22 = vsel %vm15447_vm13, %v9967_v25, %v9968_v44  ;;  %vm15448_vm2 = vmmov %vm15446_vm4  ;;  %v2332_v21 = vsel %vm15449_vm5, %v2300_v50, 0.0  ;;  %v2273_v0 = vsel %vm15450_vm10, %v2241_v3, 0.0  ;;  %v9978_v49 = vunpack.i.h.bf16 %v9976_v31 }
 0x29e   : > { %v2243_v28 = vsel %vm15448_vm2, %v9968_v44, %v9973_v10  ;;  %vm15451_vm3 = vmand %vm15442_vm8, %vm15397_vm9  ;;  %v2476_v61 = vrot.slane %v2332_v21, 4  ;;  %v9977_v57 = vunpack.i.l.bf16 %v9976_v31 }
 0x29f   : > { %v2275_v7 = vsel %vm15451_vm3, %v2243_v28, 0.0  ;;  %vm15452_vm2 = vmand %vm15437_vm0, %vm15389_vm15  ;;  %v9981_v50 = vpop.permute.xlu0 %9980  ;;  %v12275_v3 = vpop.permute.xlu1 %2345 }
 0x2a0   : > { %v2274_v32 = vsel %vm15452_vm2, %v2242_v22, 0.0  ;;  %vm15454_vm9 = vmand %vm15449_vm5, %vm15399_vm6  ;;  %vm15459_vm2 = vcmask 777216  }
 0x2a1   : > { %v2514_v46 = vsel %vm15453_vm1, %v2274_v32, %v2474_v35  ;;  %v2276_v51 = vsel %vm15454_vm9, %v2244_v43, 0.0  ;;  %vm15455_vm13 = vmmov %vm15453_vm1  ;;  %v2353_v35 = vsel %vm15459_vm2, %v9977_v57, %v9978_v49  ;;  %v15470_v43 = vunpack.i.h.bf16 %v12111_v17 }
 0x2a2   : > { %v2530_v9 = vpack.c.bf16 %v2514_v46, %v2506_v41  ;;  %v2513_v5 = vsel %vm15455_vm13, %v2273_v0, %v2473_v23  ;;  %vm15456_vm10 = vmmov %vm15453_vm1  ;;  %v9983_v23 = vunpack.i.h.bf16 %v9981_v50 }
 0x2a3   : > { %v2515_v26 = vsel %vm15456_vm10, %v2275_v7, %v2475_v14  ;;  %v2529_v44 = vpack.c.bf16 %v2513_v5, %v2505_v54  ;;  %vm15457_vm15 = vmmov %vm15453_vm1  ;;  %v12300_v21 = vpop.permute.xlu1 %9990  ;;  %vm15467_vm10 = vcmask 1041408  }
 0x2a4   : > { %v2508_v25 = vsel %vm15457_vm15, %v12038_v15, %v2452_v12  ;;  %vm15458_vm3 = vmmov %vm15453_vm1  ;;  %2580 = vmatprep.subr.bf16.mxu0 %v2530_v9  ;;  %v9982_v15 = vunpack.i.l.bf16 %v9981_v50  ;;  %vm15468_vm15 = vnez %v15121_v48  ;;  %v9993_v59 = vunpack.i.h.bf16 %v12300_v21 }
 0x2a5   : > { %v2516_v10 = vsel %vm15458_vm3, %v2276_v51, %v2476_v61  ;;  %vm15460_vm6 = vmmov %vm15453_vm1  ;;  %2581 = vmatpush1.bf16.msra.mxu0 %v2529_v44  ;;  %v9992_v32 = vunpack.i.l.bf16 %v12300_v21  ;;  %v12329_v51 = vld [vmem:[%s10805_s17] sm:$0x3] }
 0x2a6   : > { %v2532_v62 = vpack.c.bf16 %v2516_v10, %v2508_v25  ;;  %v2507_v41 = vsel %vm15460_vm6, %v12035_v56, %v2451_v39  ;;  %vm15461_vm4 = vmand %vm15441_vm7, %vm15260_vm14  ;;  %v12288_v39 = vpop.permute.xlu0 %9985  ;;  %vm15030_vm6 = vcmask 293888  }
 0x2a7   : > { %v2385_v54 = vsel %vm15461_vm4, %v2353_v35, 0.0  ;;  %v2531_v14 = vpack.c.bf16 %v2515_v26, %v2507_v41  ;;  %vm15462_vm1 = vmmov %vm15459_vm2  ;;  %v9988_v2 = vunpack.i.h.bf16 %v12288_v39  ;;  %v9987_v7 = vunpack.i.l.bf16 %v12288_v39  ;;  %v12331_v9 = vpop.permute.xlu1 %10000 }
 0x2a8   : > { %v2537_v12 = vpack.c.bf16 %v2385_v54, %v2385_v54  ;;  %2621 = vmatprep.subr.bf16.mxu1 %v2532_v62  ;;  %v2354_v22 = vsel %vm15462_vm1, %v9978_v49, %v9982_v15  ;;  %vm15463_vm9 = vmmov %vm15462_vm1  ;;  %v15475_v49 = vunpack.i.h.bf16 %v12113_v33  ;;  %vm15478_vm4 = vnez %v15175_v52 }
 0x2a9   : > { %v2356_v28 = vsel %vm15463_vm9, %v9983_v23, %v12275_v3  ;;  %2622 = vmatpush1.bf16.msra.mxu1 %v2531_v14  ;;  %vm15464_vm13 = vmmov %vm15462_vm1  ;;  %vm15479_vm1 = vnez %v15178_v63  ;;  %vm15480_vm9 = vnez %v15181_v27  ;;  %v15482_v35 = vunpack.i.h.bf16 %v12146_v58 }
 0x2aa   : > { %v2355_v56 = vsel %vm15464_vm13, %v9982_v15, %v9983_v23  ;;  %vm15465_vm14 = vmand %vm15449_vm5, %vm15426_vm11  ;;  %v2555_v0 = vsel %vm15467_vm10, %v2537_v12, 0  ;;  %v12320_v46 = vpop.permute.xlu0 %9995  ;;  %vm15476_vm5 = vcmask 7168   ;;  %v10003_v54 = vunpack.i.h.bf16 %v12331_v9 }
 0x2ab   : > { %v2388_v42 = vsel %vm15465_vm14, %v2356_v28, 0.0  ;;  %vm15466_vm7 = vmand %vm15437_vm0, %vm15410_vm12  ;;  %vm15471_vm12 = vcmask 261120   ;;  %v2132_v57 = vsel %vm15476_vm5, %v15475_v49, %v9992_v32  ;;  %v9998_v33 = vunpack.i.h.bf16 %v12320_v46  ;;  %v12356_v12 = vpop.permute.xlu1 %10010 }
 0x2ac   : > { %v2386_v30 = vsel %vm15466_vm7, %v2354_v22, 0.0  ;;  %vm15469_vm3 = vmand %vm15442_vm8, %vm15468_vm15  ;;  %v2540_v13 = vpack.c.bf16 %v2388_v42, %v2388_v42  ;;  %v2020_v60 = vsel %vm15471_vm12, %v15470_v43, %v9987_v7  ;;  %v9997_v44 = vunpack.i.l.bf16 %v12320_v46 }
 0x2ad   : > { %v2387_v24 = vsel %vm15469_vm3, %v2355_v56, 0.0  ;;  %v2538_v61 = vpack.c.bf16 %v2386_v30, %v2386_v30  ;;  %vm15472_vm11 = vmmov %vm15471_vm12  ;;  %v2053_v5 = vsel %vm15478_vm4, %v2020_v60, 0.0  ;;  %v2165_v25 = vsel %vm15480_vm9, %v2132_v57, 0.0 }
 0x2ae   : > { %v2539_v31 = vpack.c.bf16 %v2387_v24, %v2387_v24  ;;  %v2021_v48 = vsel %vm15472_vm11, %v9987_v7, %v9988_v2  ;;  %vm15473_vm0 = vmmov %vm15467_vm10  ;;  %vm15483_vm14 = vcmask 269312   ;;  %vm15485_vm10 = vnez %v15207_v8  ;;  %v12353_v14 = vpop.permute.xlu0 %10005 }
 0x2af   : > { %7959 = vmatprep.subr.msk.bf16.mxu0 %vm15473_vm0, %v2538_v61  ;;  %vm15474_vm8 = vmmov %vm15473_vm0  ;;  %v2054_v26 = vsel %vm15479_vm1, %v2021_v48, 0.0  ;;  %v1964_v50 = vsel %vm15483_vm14, %v15482_v35, %v9997_v44  ;;  %v2405_v23 = vrot.slane %v2053_v5, 4  ;;  %v10002_v58 = vunpack.i.l.bf16 %v12331_v9  ;;  %v12398_v57 = vpop.permute.xlu1 %10020 }
 0x2b0   : > { %7961 = vmatprep.subr.msk.bf16.mxu1 %vm15474_vm8, %v2540_v13  ;;  %vm15477_vm2 = vmmov %vm15476_vm5  ;;  %2583 = vmatpush1.bf16.msra.mxu0 %v2555_v0  ;;  %v2406_v15 = vrot.slane %v2054_v26, 4  ;;  %v10008_v28 = vunpack.i.h.bf16 %v12353_v14  ;;  %v10007_v56 = vunpack.i.l.bf16 %v12353_v14  ;;  %v10013_v42 = vunpack.i.h.bf16 %v12356_v12 }
 0x2b1   : > { %v2133_v17 = vsel %vm15477_vm2, %v9992_v32, %v9993_v59  ;;  %vm15481_vm13 = vmmov %vm15473_vm0  ;;  %v10012_v30 = vunpack.i.l.bf16 %v12356_v12  ;;  %v2429_v24 = vrot.slane %v2165_v25, 4  ;;  %v15488_v13 = vunpack.i.h.bf16 %v12150_v55  ;;  %v15539_v12 = vld [vmem:[#allocation38_spill] sm:$0xff] }
 0x2b2   : > { %v2561_v10 = vsel %vm15481_vm13, %v2539_v31, 0  ;;  %vm15484_vm7 = vmmov %vm15483_vm14  ;;  %v2166_v41 = vsel %vm15485_vm10, %v2133_v17, 0.0  ;;  %vm15489_vm12 = vcmask 252928   ;;  %vm15490_vm11 = vcmask 1039360  }
 0x2b3   : > { %v1965_v62 = vsel %vm15484_vm7, %v9997_v44, %v9998_v33  ;;  %2624 = vmatpush1.bf16.msra.mxu1 %v2561_v10  ;;  %7960 = vmatmul.mubr.msk.bf16.vlgmr.msra.gmra.mrb[8].mxu0 %vm15030_vm6, %v12329_v51  ;;  %vm15486_vm15 = vmand %vm15479_vm1, %vm15485_vm10  ;;  %v2430_v7 = vrot.slane %v2166_v41, 4  ;;  %v2076_v61 = vsel %vm15489_vm12, %v15488_v13, %v10002_v58  ;;  %v2189_v32 = vsel %vm15490_vm11, %v12217_v38, %v10007_v56  ;;  %v12393_v38 = vpop.permute.xlu0 %10015 }
 0x2b4   : > { %v1998_v22 = vsel %vm15486_vm15, %v1965_v62, 0.0  ;;  %2692 = vmatprep.mubr.bf16.mxu0 %v15335_v1  ;;  %vm15487_vm3 = vmand %vm15478_vm4, %vm15480_vm9  ;;  %vm15493_vm5 = vcmask 785408   ;;  %vm15494_vm2 = vnez %v15166_v20  ;;  %vm15495_vm13 = vnez %v15186_v34 }
 0x2b5   : > { %v1997_v0 = vsel %vm15487_vm3, %v1964_v50, 0.0  ;;  %vm15491_vm0 = vmmov %vm15490_vm11  ;;  %v2301_v60 = vsel %vm15493_vm5, %v12231_v11, %v10012_v30  ;;  %v2221_v55 = vsel %vm15494_vm2, %v2189_v32, 0.0  ;;  %vm15497_vm7 = vcmask 1043456  }
 0x2b6   : > { %7962 = vmatmul.mubr.msk.bf16.vlgmr.msra.gmra.mrb[8].mxu1 %vm15030_vm6, %v12329_v51  ;;  %v2190_v31 = vsel %vm15491_vm0, %v10007_v56, %v10008_v28  ;;  %vm15492_vm8 = vmmov %vm15489_vm12  ;;  %v2494_v17 = vsel %vm15497_vm7, %v1998_v22, %v2406_v15  ;;  %v10018_v5 = vunpack.i.h.bf16 %v12393_v38  ;;  %v10017_v26 = vunpack.i.l.bf16 %v12393_v38 }
 0x2b7   : > { %v2077_v43 = vsel %vm15492_vm8, %v10002_v58, %v10003_v54  ;;  %2733 = vmatprep.mubr.bf16.mxu1 %v15335_v1  ;;  %v2222_v48 = vsel %vm15495_vm13, %v2190_v31, 0.0  ;;  %vm15496_vm14 = vmmov %vm15493_vm5  ;;  %v2453_v25 = vrot.slane %v2221_v55, 4  ;;  %vm15500_vm12 = vnez %v15183_v4  ;;  %v10026_v58 = vpop.permute.xlu0 %10025 }
 0x2b8   : > { %v2302_v49 = vsel %vm15496_vm14, %v10012_v30, %v10013_v42  ;;  %vm15498_vm15 = vmand %vm15478_vm4, %vm15494_vm2  ;;  %v2454_v10 = vrot.slane %v2222_v48, 4  ;;  %v2333_v35 = vsel %vm15500_vm12, %v2301_v60, 0.0  ;;  %vm15501_vm11 = vnez %v15218_v47 }
 0x2b9   : > { %v2109_v11 = vsel %vm15498_vm15, %v2076_v61, 0.0  ;;  %vm15499_vm3 = vmmov %vm15497_vm7  ;;  %v2334_v50 = vsel %vm15501_vm11, %v2302_v49, 0.0  ;;  %vm15502_vm0 = vcmask 793600   ;;  %v10023_v41 = vunpack.i.h.bf16 %v12398_v57 }
 0x2ba   : > { %v2493_v44 = vsel %vm15499_vm3, %v1997_v0, %v2405_v23  ;;  %v2246_v52 = vsel %vm15502_vm0, %v10017_v26, %v10018_v5  ;;  %v2478_v62 = vrot.slane %v2334_v50, 4  ;;  %vm15503_vm4 = vmand %vm15479_vm1, %vm15495_vm13  ;;  %v10022_v22 = vunpack.i.l.bf16 %v12398_v57  ;;  %v10031_v0 = vpop.permute.xlu1 %10030 }
 0x2bb   : > { %v2110_v23 = vsel %vm15503_vm4, %v2077_v43, 0.0  ;;  %vm15504_vm8 = vmmov %vm15502_vm0  ;;  %v10028_v13 = vunpack.i.h.bf16 %v10026_v58  ;;  %v10027_v61 = vunpack.i.l.bf16 %v10026_v58  ;;  %v2477_v63 = vrot.slane %v2333_v35, 4  ;;  %v10036_v49 = vpop.permute.xlu0 %10035 }
 0x2bc   : > { %v2245_v15 = vsel %vm15504_vm8, %v12254_v6, %v10017_v26  ;;  %vm15505_vm5 = vmmov %vm15499_vm3  ;;  %v10033_v60 = vunpack.i.h.bf16 %v10031_v0  ;;  %v10032_v55 = vunpack.i.l.bf16 %v10031_v0  ;;  %vm15508_vm7 = vcmask 261120  }
 0x2bd   : > { %v2502_v56 = vsel %vm15505_vm5, %v2110_v23, %v2430_v7  ;;  %vm15506_vm14 = vmmov %vm15499_vm3  ;;  %v2022_v7 = vsel %vm15508_vm7, %v9988_v2, %v10027_v61  ;;  %vm15511_vm4 = vnez %v15264_v29  ;;  %vm15514_vm5 = vnez %v15281_v37 }
 0x2be   : > { %v2501_v30 = vsel %vm15506_vm14, %v2109_v11, %v2429_v24  ;;  %v2526_v32 = vpack.c.bf16 %v2502_v56, %v2494_v17  ;;  %vm15507_vm1 = vmand %vm15501_vm11, %vm15485_vm10  ;;  %v2055_v8 = vsel %vm15511_vm4, %v2022_v7, 0.0  ;;  %vm15512_vm10 = vcmask 7168   ;;  %v10041_v17 = vpop.permute.xlu1 %10040 }
 0x2bf   : > { %v2525_v31 = vpack.c.bf16 %v2501_v30, %v2493_v44  ;;  %v2278_v6 = vsel %vm15507_vm1, %v2246_v52, 0.0  ;;  %vm15509_vm15 = vmmov %vm15508_vm7  ;;  %v2134_v39 = vsel %vm15512_vm10, %v9993_v59, %v10032_v55  ;;  %vm15515_vm14 = vcmask 777216  }
 0x2c0   : > { %v2023_v24 = vsel %vm15509_vm15, %v10027_v61, %v10028_v13  ;;  %2660 = vmatprep.subr.bf16.mxu0 %v2526_v32  ;;  %v2518_v43 = vsel %vm15499_vm3, %v2278_v6, %v2478_v62  ;;  %vm15510_vm0 = vmand %vm15500_vm12, %vm15480_vm9  ;;  %v2358_v27 = vsel %vm15515_vm14, %v10022_v22, %v10023_v41  ;;  %v10037_v26 = vunpack.i.l.bf16 %v10036_v49 }
 0x2c1   : > { %v2277_v48 = vsel %vm15510_vm0, %v2245_v15, 0.0  ;;  %2661 = vmatpush1.bf16.msra.mxu0 %v2525_v31  ;;  %vm15513_vm8 = vmmov %vm15512_vm10  ;;  %v2056_v11 = vsel %vm15514_vm5, %v2023_v24, 0.0  ;;  %v10038_v35 = vunpack.i.h.bf16 %v10036_v49  ;;  %v2407_v52 = vrot.slane %v2055_v8, 4 }
 0x2c2   : > { %v2135_v2 = vsel %vm15513_vm8, %v10032_v55, %v10033_v60  ;;  %vm15516_vm9 = vmmov %vm15499_vm3  ;;  %vm15519_vm15 = vcmask 269312   ;;  %vm15521_vm0 = vnez %v15303_v19  ;;  %v2408_v58 = vrot.slane %v2056_v11, 4 }
 0x2c3   : > { %v2510_v44 = vsel %vm15516_vm9, %v12067_v36, %v2454_v10  ;;  %vm15517_vm1 = vmmov %vm15499_vm3  ;;  %v1966_v62 = vsel %vm15519_vm15, %v9998_v33, %v10037_v26  ;;  %vm15520_vm3 = vnez %v15296_v40  ;;  %v2168_v15 = vsel %vm15521_vm0, %v2135_v2, 0.0  ;;  %v2184_v36 = vpop.permute.xlu0 %2183 }
 0x2c4   : > { %v2534_v50 = vpack.c.bf16 %v2518_v43, %v2510_v44  ;;  %v2509_v21 = vsel %vm15517_vm1, %v12056_v18, %v2453_v25  ;;  %vm15518_vm7 = vmmov %vm15517_vm1  ;;  %v2167_v23 = vsel %vm15520_vm3, %v2134_v39, 0.0  ;;  %v10043_v56 = vunpack.i.h.bf16 %v10041_v17  ;;  %v2296_v18 = vpop.permute.xlu1 %2295  ;;  %v15553_v44 = vld [vmem:[#allocation37_spill] sm:$0xff] }
 0x2c5   : > { %v2517_v59 = vsel %vm15518_vm7, %v2277_v48, %v2477_v63  ;;  %v10042_v30 = vunpack.i.l.bf16 %v10041_v17  ;;  %vm15522_vm10 = vcmask 1039360   ;;  %vm15524_vm14 = vmand %vm15501_vm11, %vm15495_vm13  ;;  %vm15525_vm9 = vcmask 777216  }
 0x2c6   : > { %2662 = vmatprep.subr.bf16.mxu0 %v2534_v50  ;;  %v2533_v10 = vpack.c.bf16 %v2517_v59, %v2509_v21  ;;  %v2191_v25 = vsel %vm15522_vm10, %v10008_v28, %v2184_v36  ;;  %vm15523_vm8 = vmmov %vm15522_vm10  ;;  %v2390_v33 = vsel %vm15524_vm14, %v2358_v27, 0.0  ;;  %v2357_v0 = vsel %vm15525_vm9, %v12275_v3, %v10022_v22  ;;  %v15558_v59 = vld [vmem:[#allocation36_spill] sm:$0xff] }
 0x2c7   : > { %v2200_v46 = vsel %vm15523_vm8, %v2184_v36, 0.0  ;;  %vm15526_vm1 = vmmov %vm15519_vm15  ;;  %v2431_v28 = vrot.slane %v2167_v23, 4  ;;  %v2432_v61 = vrot.slane %v2168_v15, 4  ;;  %vm15528_vm15 = vnez %v15267_v16  ;;  %v2240_v31 = vpop.permute.xlu0 %2239 }
 0x2c8   : > { %v1967_v13 = vsel %vm15526_vm1, %v10037_v26, %v10038_v35  ;;  %vm15527_vm7 = vmand %vm15511_vm4, %vm15520_vm3  ;;  %2663 = vmatpush1.bf16.msra.mxu0 %v2533_v10  ;;  %v2223_v47 = vsel %vm15528_vm15, %v2191_v25, 0.0  ;;  %vm15529_vm13 = vnez %v15286_v45  ;;  %vm15530_vm11 = vcmask 252928   ;;  %v2352_v4 = vpop.permute.xlu1 %2351 }
 0x2c9   : > { %v1999_v14 = vsel %vm15527_vm7, %v1966_v62, 0.0  ;;  %v2224_v34 = vsel %vm15529_vm13, %v2200_v46, 0.0  ;;  %v2078_v3 = vsel %vm15530_vm11, %v10003_v54, %v10042_v30  ;;  %v2542_v22 = vpack.c.bf16 %v2390_v33, %v2390_v33  ;;  %vm15531_vm10 = vmmov %vm15530_vm11 }
 0x2ca   : > { %v2079_v32 = vsel %vm15531_vm10, %v10042_v30, %v10043_v56  ;;  %vm15532_vm8 = vmand %vm15500_vm12, %vm15494_vm2  ;;  %vm15533_vm14 = vcmask 785408   ;;  %vm15535_vm1 = vcmask 1041408   ;;  %vm15536_vm7 = vcmask 793600  }
 0x2cb   : > { %v2389_v63 = vsel %vm15532_vm8, %v2357_v0, 0.0  ;;  %v2303_v60 = vsel %vm15533_vm14, %v10013_v42, %v2296_v18  ;;  %vm15534_vm9 = vmmov %vm15533_vm14  ;;  %7963 = vmatprep.subr.msk.bf16.mxu0 %vm15535_vm1, %v2542_v22  ;;  %v2247_v9 = vsel %vm15536_vm7, %v10018_v5, %v2240_v31  ;;  %vm15538_vm10 = vnez %v15316_v53  ;;  %v15563_v53 = vld [vmem:[#allocation25_spill] sm:$0xff] }
 0x2cc   : > { %v2312_v55 = vsel %vm15534_vm9, %v2296_v18, 0.0  ;;  %vm15537_vm11 = vmmov %vm15536_vm7  ;;  %v2541_v6 = vpack.c.bf16 %v2389_v63, %v2389_v63  ;;  %v2335_v20 = vsel %vm15538_vm10, %v2303_v60, 0.0  ;;  %v2455_v7 = vrot.slane %v2223_v47, 4  ;;  %v15564_v18 = vld [vmem:[#allocation23_spill] sm:$0xff] }
 0x2cd   : > { %v2256_v54 = vsel %vm15537_vm11, %v2240_v31, 0.0  ;;  %v2456_v24 = vrot.slane %v2224_v34, 4  ;;  %vm15540_vm2 = vnez %v15539_v12  ;;  %vm15541_vm12 = vmand %vm15514_vm5, %vm15521_vm0  ;;  %v2479_v48 = vrot.slane %v2335_v20, 4 }
 0x2ce   : > { %v2336_v42 = vsel %vm15540_vm2, %v2312_v55, 0.0  ;;  %v2000_v38 = vsel %vm15541_vm12, %v1967_v13, 0.0  ;;  %vm15542_vm8 = vmand %vm15511_vm4, %vm15528_vm15  ;;  %vm15546_vm7 = vcmask 777216   ;;  %v12566_v16 = vshra.s32 %v15563_v53, 4 }
 0x2cf   : > { %v2111_v5 = vsel %vm15542_vm8, %v2078_v3, 0.0  ;;  %vm15543_vm14 = vmmov %vm15535_vm1  ;;  %v2480_v8 = vrot.slane %v2336_v42, 4  ;;  %v2368_v39 = vsel %vm15546_vm7, %v2352_v4, 0.0  ;;  %v12569_v36 = vand.u32 15, %v15563_v53 }
 0x2d0   : > { %v2567_v43 = vsel %vm15543_vm14, %v2541_v6, 0  ;;  %vm15544_vm9 = vmand %vm15538_vm10, %vm15520_vm3  ;;  %vm15549_vm3 = vcmask 1043456   ;;  %v3012_v10 = vshll.u32 %v12566_v16, 6  ;;  %v12576_v25 = vadd.s32 8, %v15564_v18 }
 0x2d1   : > { %v2279_v49 = vsel %vm15544_vm9, %v2247_v9, 0.0  ;;  %vm15545_vm1 = vmand %vm15540_vm2, %vm15521_vm0  ;;  %2665 = vmatpush1.bf16.msra.mxu0 %v2567_v43  ;;  %v2496_v17 = vsel %vm15549_vm3, %v2000_v38, %v2408_v58  ;;  %v3014_v56 = vshll.u32 %v12569_v36, 1  ;;  %v12587_v0 = vadd.s32 16, %v15564_v18 }
 0x2d2   : > { %v2280_v29 = vsel %vm15545_vm1, %v2256_v54, 0.0  ;;  %vm15547_vm4 = vmand %vm15514_vm5, %vm15529_vm13  ;;  %v12590_v13 = vadd.s32 24, %v15564_v18  ;;  %v12602_v47 = vadd.s32 32, %v15564_v18  ;;  %v12605_v34 = vadd.s32 40, %v15564_v18 }
 0x2d3   : > { %v2112_v2 = vsel %vm15547_vm4, %v2079_v32, 0.0  ;;  %vm15548_vm11 = vmmov %vm15546_vm7  ;;  %v12573_v30 = vadd.s32 %v3014_v56, %v3012_v10  ;;  %v12622_v22 = vadd.s32 48, %v15564_v18  ;;  %v12625_v32 = vadd.s32 56, %v15564_v18 }
 0x2d4   : > { %v2359_v40 = vsel %vm15548_vm11, %v10023_v41, %v2352_v4  ;;  %vm15550_vm12 = vmmov %vm15549_vm3  ;;  %7964 = vmatmul.mubr.msk.bf16.vlgmr.msra.gmra.mrb[12].mxu0 %vm15030_vm6, %v12329_v51  ;;  %v12638_v31 = vadd.s32 64, %v15564_v18  ;;  %v12641_v63 = vadd.s32 72, %v15564_v18  ;;  %v12654_v60 = vadd.s32 80, %v15564_v18 }
 0x2d5   : > { %v2504_v11 = vsel %vm15550_vm12, %v2112_v2, %v2432_v61  ;;  %vm15551_vm8 = vmmov %vm15549_vm3  ;;  %v15013_v61 = vmov 1.0|1.0   ;;  %vm3024_vm12 = vcmp.eq.s32.totalorder %v12590_v13, %v12573_v30  ;;  %v12657_v55 = vadd.s32 88, %v15564_v18 }
 0x2d6   : > { %v2495_v19 = vsel %vm15551_vm8, %v1999_v14, %v2407_v52  ;;  %v2528_v27 = vpack.c.bf16 %v2504_v11, %v2496_v17  ;;  %vm15552_vm0 = vmmov %vm15549_vm3  ;;  %vm3022_vm3 = vcmp.eq.s32.totalorder %v12587_v0, %v12573_v30  ;;  %v12670_v9 = vadd.s32 96, %v15564_v18 }
 0x2d7   : > { %v2503_v26 = vsel %vm15552_vm0, %v2111_v5, %v2431_v28  ;;  %vm15554_vm14 = vmmov %vm15552_vm0  ;;  %15566 = vst [vmem:[#allocation26_spill] sm:$0xff] %v12657_v55  ;;  %v12673_v54 = vadd.s32 104, %v15564_v18  ;;  %v12686_v6 = vadd.s32 112, %v15564_v18  ;;  %v12689_v20 = vadd.s32 120, %v15564_v18 }
 0x2d8   : > { %v2512_v37 = vsel %vm15554_vm14, %v15553_v44, %v2456_v24  ;;  %vm15555_vm9 = vmmov %vm15552_vm0  ;;  %v2527_v41 = vpack.c.bf16 %v2503_v26, %v2495_v19  ;;  %2701 = vmatprep.subr.bf16.mxu1 %v2528_v27  ;;  %15567 = vst [vmem:[#allocation27_spill] sm:$0xff] %v12670_v9  ;;  %v12702_v4 = vadd.s32 128, %v15564_v18  ;;  %v12718_v24 = vadd.s32 144, %v15564_v18 }
 0x2d9   : > { %v2520_v35 = vsel %vm15555_vm9, %v2280_v29, %v2480_v8  ;;  %vm15556_vm5 = vmand %vm15540_vm2, %vm15529_vm13  ;;  %vm15561_vm13 = vcmask 1041408   ;;  %15568 = vst [vmem:[#allocation28_spill] sm:$0xff] %v12673_v54  ;;  %v12721_v12 = vadd.s32 152, %v15564_v18  ;;  %v12734_v42 = vadd.s32 160, %v15564_v18 }
 0x2da   : > { %v2392_v57 = vsel %vm15556_vm5, %v2368_v39, 0.0  ;;  %v2536_v50 = vpack.c.bf16 %v2520_v35, %v2512_v37  ;;  %vm15557_vm1 = vmmov %vm15552_vm0  ;;  %2702 = vmatpush1.bf16.msra.mxu1 %v2527_v41  ;;  %15569 = vst [vmem:[#allocation29_spill] sm:$0xff] %v12686_v6  ;;  %v12737_v38 = vadd.s32 168, %v15564_v18  ;;  %v12750_v5 = vadd.s32 176, %v15564_v18  ;;  %v12804_v39 = vpop.permute.xlu0 %2547 }
 0x2db   : > { %v2519_v21 = vsel %vm15557_vm1, %v2279_v49, %v2479_v48  ;;  %vm15559_vm7 = vmmov %vm15552_vm0  ;;  %v2544_v15 = vpack.c.bf16 %v2392_v57, %v2392_v57  ;;  %15570 = vst [vmem:[#allocation33_spill] sm:$0xff] %v12689_v20  ;;  %v12753_v43 = vadd.s32 184, %v15564_v18  ;;  %v12775_v48 = vadd.s32 192, %v15564_v18 }
 0x2dc   : > { %v2511_v52 = vsel %vm15559_vm7, %v15558_v59, %v2455_v7  ;;  %vm15560_vm4 = vmand %vm15538_vm10, %vm15528_vm15  ;;  %2703 = vmatprep.subr.bf16.mxu1 %v2536_v50  ;;  %vm3018_vm15 = vcmp.eq.s32.totalorder %v15564_v18, %v12573_v30  ;;  %vm3020_vm10 = vcmp.eq.s32.totalorder %v12576_v25, %v12573_v30  ;;  %vm3026_vm7 = vcmp.eq.s32.totalorder %v12602_v47, %v12573_v30 }
 0x2dd   : > { %v2391_v62 = vsel %vm15560_vm4, %v2359_v40, 0.0  ;;  %v2535_v23 = vpack.c.bf16 %v2519_v21, %v2511_v52  ;;  %vm15562_vm2 = vmmov %vm15561_vm13  ;;  %vm3028_vm4 = vcmp.eq.s32.totalorder %v12605_v34, %v12573_v30  ;;  %v12705_v7 = vadd.s32 136, %v15564_v18 }
 0x2de   : > { %v2543_v45 = vpack.c.bf16 %v2391_v62, %v2391_v62  ;;  %vm9373_vm11 = vmpackc.low %vm3020_vm10, %vm3018_vm15  ;;  %v12778_v8 = vadd.s32 200, %v15564_v18  ;;  %v12791_v49 = vadd.s32 208, %v15564_v18  ;;  %v12794_v29 = vadd.s32 216, %v15564_v18 }
 0x2df   : > { %2704 = vmatpush1.bf16.msra.mxu1 %v2535_v23  ;;  %9374 = vmatprep.subr.msk.bf16.mxu0 %vm9373_vm11, %v15013_v61  ;;  %vm9377_vm14 = vmpackc.low %vm3024_vm12, %vm3022_vm3  ;;  %vm3030_vm11 = vcmp.eq.s32.totalorder %v12622_v22, %v12573_v30  ;;  %vm3032_vm3 = vcmp.eq.s32.totalorder %v12625_v32, %v12573_v30  ;;  %v12815_v37 = vadd.s32 224, %v15564_v18  ;;  %v12818_v35 = vadd.s32 232, %v15564_v18 }
 0x2e0   : > { %7965 = vmatprep.subr.msk.bf16.mxu1 %vm15561_vm13, %v2544_v15  ;;  %v2573_v58 = vsel %vm15562_vm2, %v2543_v45, 0  ;;  %vm9381_vm2 = vmpackc.low %vm3028_vm4, %vm3026_vm7  ;;  %v12842_v23 = vadd.s32 240, %v15564_v18  ;;  %v12845_v15 = vadd.s32 248, %v15564_v18  ;;  %v2911_v45 = vadd.s32 256, %v15564_v18 }
 0x2e1   : > { %15571 = vst [vmem:[#allocation32_spill] sm:$0xff] %v12815_v37  ;;  %15572 = vst [vmem:[#allocation34_spill] sm:$0xff] %v12818_v35 }
 0x2e2   : > { %15573 = vst [vmem:[#allocation30_spill] sm:$0xff] %v12842_v23  ;;  %15574 = vst [vmem:[#allocation31_spill] sm:$0xff] %v12845_v15 }
 0x2e3   : > { %2706 = vmatpush1.bf16.msra.mxu1 %v2573_v58  ;;  %v2912_v58 = vadd.s32 264, %v15564_v18 }
 0x2e6   : > { %7966 = vmatmul.mubr.msk.bf16.vlgmr.msra.gmra.mrb[12].mxu1 %vm15030_vm6, %v12329_v51  ;;  %v15565_v51 = vld [vmem:[#allocation24_spill] sm:$0xff] }
 0x2e7   : > { %4291 = vmatprep.mubr.bf16.mxu1 %v15335_v1  ;;  %v12581_v46 = vshra.s32 %v15565_v51, 4  ;;  %v12584_v33 = vand.u32 15, %v15565_v51 }
 0x2e9   : > { %v3011_v14 = vshll.u32 %v12581_v46, 6  ;;  %v3013_v28 = vshll.u32 %v12584_v33, 1 }
 0x2eb   : > { %v12607_v3 = vadd.s32 %v3013_v28, %v3011_v14 }
 0x2ed   : > { %vm3017_vm8 = vcmp.eq.s32.totalorder %v15564_v18, %v12607_v3  ;;  %vm3019_vm0 = vcmp.eq.s32.totalorder %v12576_v25, %v12607_v3  ;;  %vm3021_vm9 = vcmp.eq.s32.totalorder %v12587_v0, %v12607_v3  ;;  %vm3023_vm5 = vcmp.eq.s32.totalorder %v12590_v13, %v12607_v3 }
 0x2ee   : > { %vm9375_vm1 = vmpackc.low %vm3019_vm0, %vm3017_vm8  ;;  %vm3025_vm15 = vcmp.eq.s32.totalorder %v12602_v47, %v12607_v3  ;;  %vm3027_vm10 = vcmp.eq.s32.totalorder %v12605_v34, %v12607_v3  ;;  %vm3029_vm0 = vcmp.eq.s32.totalorder %v12622_v22, %v12607_v3  ;;  %vm3033_vm4 = vcmp.eq.s32.totalorder %v12638_v31, %v12607_v3 }
 0x2ef   : > { %9376 = vmatpush1.bf16.msk.msra.mxu0 %vm9375_vm1, %v15013_v61  ;;  %vm9379_vm13 = vmpackc.low %vm3023_vm5, %vm3021_vm9  ;;  %vm3034_vm9 = vcmp.eq.s32.totalorder %v12638_v31, %v12573_v30  ;;  %vm3036_vm5 = vcmp.eq.s32.totalorder %v12641_v63, %v12573_v30 }
 0x2f0   : > { %9378 = vmatprep.subr.msk.bf16.mxu0 %vm9377_vm14, %v15013_v61  ;;  %vm9383_vm12 = vmpackc.low %vm3027_vm10, %vm3025_vm15  ;;  %vm3031_vm14 = vcmp.eq.s32.totalorder %v12625_v32, %v12607_v3  ;;  %vm3040_vm15 = vcmp.eq.s32.totalorder %v12657_v55, %v12573_v30 }
 0x2f1   : > { %vm9385_vm8 = vmpackc.low %vm3032_vm3, %vm3030_vm11  ;;  %vm3037_vm3 = vcmp.eq.s32.totalorder %v12654_v60, %v12607_v3 }
 0x2f2   : > { %vm9387_vm1 = vmpackc.low %vm3031_vm14, %vm3029_vm0  ;;  %vm3044_vm0 = vcmp.eq.s32.totalorder %v12673_v54, %v12573_v30 }
 0x2f3   : > { %9380 = vmatpush1.bf16.msk.msra.mxu0 %vm9379_vm13, %v15013_v61  ;;  %vm9389_vm7 = vmpackc.low %vm3036_vm5, %vm3034_vm9  ;;  %vm3035_vm13 = vcmp.eq.s32.totalorder %v12641_v63, %v12607_v3  ;;  %vm3041_vm5 = vcmp.eq.s32.totalorder %v12670_v9, %v12607_v3 }
 0x2f4   : > { %9382 = vmatprep.subr.msk.bf16.mxu0 %vm9381_vm2, %v15013_v61  ;;  %vm3038_vm2 = vcmp.eq.s32.totalorder %v12654_v60, %v12573_v30  ;;  %vm9391_vm10 = vmpackc.low %vm3035_vm13, %vm3033_vm4  ;;  %vm3048_vm4 = vcmp.eq.s32.totalorder %v12689_v20, %v12573_v30 }
 0x2f5   : > { %vm9393_vm11 = vmpackc.low %vm3040_vm15, %vm3038_vm2  ;;  %vm3045_vm15 = vcmp.eq.s32.totalorder %v12686_v6, %v12607_v3 }
 0x2f7   : > { %9384 = vmatpush1.bf16.msk.msra.mxu0 %vm9383_vm12, %v15013_v61  ;;  %vm3039_vm12 = vcmp.eq.s32.totalorder %v12657_v55, %v12607_v3 }
 0x2f8   : > { %9386 = vmatprep.subr.msk.bf16.mxu0 %vm9385_vm8, %v15013_v61  ;;  %vm3042_vm8 = vcmp.eq.s32.totalorder %v12670_v9, %v12573_v30  ;;  %vm9395_vm14 = vmpackc.low %vm3039_vm12, %vm3037_vm3  ;;  %vm3052_vm3 = vcmp.eq.s32.totalorder %v12705_v7, %v12573_v30 }
 0x2f9   : > { %vm9397_vm9 = vmpackc.low %vm3044_vm0, %vm3042_vm8  ;;  %vm3049_vm0 = vcmp.eq.s32.totalorder %v12702_v4, %v12607_v3 }
 0x2fb   : > { %9388 = vmatpush1.bf16.msk.msra.mxu0 %vm9387_vm1, %v15013_v61  ;;  %vm3043_vm1 = vcmp.eq.s32.totalorder %v12673_v54, %v12607_v3 }
 0x2fc   : > { %9390 = vmatprep.subr.msk.bf16.mxu0 %vm9389_vm7, %v15013_v61  ;;  %vm3046_vm7 = vcmp.eq.s32.totalorder %v12686_v6, %v12573_v30  ;;  %vm9399_vm13 = vmpackc.low %vm3043_vm1, %vm3041_vm5  ;;  %vm3056_vm5 = vcmp.eq.s32.totalorder %v12721_v12, %v12573_v30 }
 0x2fd   : > { %vm9401_vm2 = vmpackc.low %vm3048_vm4, %vm3046_vm7  ;;  %vm3053_vm4 = vcmp.eq.s32.totalorder %v12718_v24, %v12607_v3 }
 0x2ff   : > { %9392 = vmatpush1.bf16.msk.msra.mxu0 %vm9391_vm10, %v15013_v61  ;;  %vm3047_vm10 = vcmp.eq.s32.totalorder %v12689_v20, %v12607_v3 }
 0x300   : > { %9394 = vmatprep.subr.msk.bf16.mxu0 %vm9393_vm11, %v15013_v61  ;;  %vm3050_vm11 = vcmp.eq.s32.totalorder %v12702_v4, %v12573_v30  ;;  %vm9403_vm12 = vmpackc.low %vm3047_vm10, %vm3045_vm15  ;;  %vm3060_vm15 = vcmp.eq.s32.totalorder %v12737_v38, %v12573_v30 }
 0x301   : > { %vm9405_vm8 = vmpackc.low %vm3052_vm3, %vm3050_vm11  ;;  %vm3057_vm3 = vcmp.eq.s32.totalorder %v12734_v42, %v12607_v3 }
 0x303   : > { %9396 = vmatpush1.bf16.msk.msra.mxu0 %vm9395_vm14, %v15013_v61  ;;  %vm3051_vm14 = vcmp.eq.s32.totalorder %v12705_v7, %v12607_v3 }
 0x304   : > { %9398 = vmatprep.subr.msk.bf16.mxu0 %vm9397_vm9, %v15013_v61  ;;  %vm3054_vm9 = vcmp.eq.s32.totalorder %v12718_v24, %v12573_v30  ;;  %vm9407_vm1 = vmpackc.low %vm3051_vm14, %vm3049_vm0  ;;  %vm3064_vm0 = vcmp.eq.s32.totalorder %v12753_v43, %v12573_v30 }
 0x305   : > { %vm9409_vm7 = vmpackc.low %vm3056_vm5, %vm3054_vm9  ;;  %vm3061_vm5 = vcmp.eq.s32.totalorder %v12750_v5, %v12607_v3 }
 0x307   : > { %9400 = vmatpush1.bf16.msk.msra.mxu0 %vm9399_vm13, %v15013_v61  ;;  %vm3055_vm13 = vcmp.eq.s32.totalorder %v12721_v12, %v12607_v3 }
 0x308   : > { %9402 = vmatprep.subr.msk.bf16.mxu0 %vm9401_vm2, %v15013_v61  ;;  %vm3058_vm2 = vcmp.eq.s32.totalorder %v12734_v42, %v12573_v30  ;;  %vm9411_vm10 = vmpackc.low %vm3055_vm13, %vm3053_vm4  ;;  %vm3066_vm4 = vcmp.eq.s32.totalorder %v12775_v48, %v12573_v30  ;;  %vm3068_vm13 = vcmp.eq.s32.totalorder %v12778_v8, %v12573_v30 }
 0x309   : > { %vm9413_vm11 = vmpackc.low %vm3060_vm15, %vm3058_vm2  ;;  %vm3065_vm2 = vcmp.eq.s32.totalorder %v12775_v48, %v12607_v3  ;;  %vm3067_vm15 = vcmp.eq.s32.totalorder %v12778_v8, %v12607_v3 }
 0x30b   : > { %9404 = vmatpush1.bf16.msk.msra.mxu0 %vm9403_vm12, %v15013_v61  ;;  %vm3059_vm12 = vcmp.eq.s32.totalorder %v12737_v38, %v12607_v3 }
 0x30c   : > { %9406 = vmatprep.subr.msk.bf16.mxu0 %vm9405_vm8, %v15013_v61  ;;  %vm3062_vm8 = vcmp.eq.s32.totalorder %v12750_v5, %v12573_v30  ;;  %vm9415_vm14 = vmpackc.low %vm3059_vm12, %vm3057_vm3  ;;  %vm3070_vm3 = vcmp.eq.s32.totalorder %v12791_v49, %v12573_v30  ;;  %vm3072_vm12 = vcmp.eq.s32.totalorder %v12794_v29, %v12573_v30 }
 0x30d   : > { %vm9417_vm9 = vmpackc.low %vm3064_vm0, %vm3062_vm8  ;;  %vm3069_vm8 = vcmp.eq.s32.totalorder %v12791_v49, %v12607_v3  ;;  %vm3071_vm0 = vcmp.eq.s32.totalorder %v12794_v29, %v12607_v3 }
 0x30f   : > { %9408 = vmatpush1.bf16.msk.msra.mxu0 %vm9407_vm1, %v15013_v61  ;;  %vm3063_vm1 = vcmp.eq.s32.totalorder %v12753_v43, %v12607_v3 }
 0x310   : > { %9410 = vmatprep.subr.msk.bf16.mxu0 %vm9409_vm7, %v15013_v61  ;;  %vm9419_vm7 = vmpackc.low %vm3063_vm1, %vm3061_vm5  ;;  %vm3074_vm5 = vcmp.eq.s32.totalorder %v12815_v37, %v12573_v30  ;;  %vm3076_vm1 = vcmp.eq.s32.totalorder %v12818_v35, %v12573_v30 }
 0x313   : > { %9412 = vmatpush1.bf16.msk.msra.mxu0 %vm9411_vm10, %v15013_v61  ;;  %vm9421_vm10 = vmpackc.low %vm3068_vm13, %vm3066_vm4  ;;  %vm3075_vm13 = vcmp.eq.s32.totalorder %v12818_v35, %v12607_v3 }
 0x314   : > { %9414 = vmatprep.subr.msk.bf16.mxu0 %vm9413_vm11, %v15013_v61  ;;  %vm9423_vm11 = vmpackc.low %vm3067_vm15, %vm3065_vm2  ;;  %vm3078_vm15 = vcmp.eq.s32.totalorder %v12842_v23, %v12573_v30 }
 0x315   : > { %vm9429_vm4 = vmpackc.low %vm3076_vm1, %vm3074_vm5 }
 0x317   : > { %9416 = vmatpush1.bf16.msk.msra.mxu0 %vm9415_vm14, %v15013_v61  ;;  %vm9425_vm14 = vmpackc.low %vm3072_vm12, %vm3070_vm3  ;;  %vm3079_vm3 = vcmp.eq.s32.totalorder %v12845_v15, %v12607_v3  ;;  %vm3082_vm12 = vcmp.eq.s32.totalorder %v2911_v45, %v12573_v30 }
 0x318   : > { %9418 = vmatprep.subr.msk.bf16.mxu0 %vm9417_vm9, %v15013_v61  ;;  %vm9427_vm9 = vmpackc.low %vm3071_vm0, %vm3069_vm8  ;;  %vm3084_vm8 = vcmp.eq.s32.totalorder %v2912_v58, %v12573_v30 }
 0x319   : > { %vm9437_vm1 = vmpackc.low %vm3084_vm8, %vm3082_vm12 }
 0x31b   : > { %9420 = vmatpush1.bf16.msk.msra.mxu0 %vm9419_vm7, %v15013_v61  ;;  %vm3073_vm7 = vcmp.eq.s32.totalorder %v12815_v37, %v12607_v3  ;;  %v2916_v37 = vadd.s32 296, %v15564_v18 }
 0x31c   : > { %9422 = vmatprep.subr.msk.bf16.mxu0 %vm9421_vm10, %v15013_v61  ;;  %vm9431_vm2 = vmpackc.low %vm3075_vm13, %vm3073_vm7  ;;  %vm3077_vm10 = vcmp.eq.s32.totalorder %v12842_v23, %v12607_v3 }
 0x31d   : > { %vm9435_vm5 = vmpackc.low %vm3079_vm3, %vm3077_vm10 }
 0x31f   : > { %9424 = vmatpush1.bf16.msk.msra.mxu0 %vm9423_vm11, %v15013_v61  ;;  %vm3080_vm11 = vcmp.eq.s32.totalorder %v12845_v15, %v12573_v30 }
 0x320   : > { %9426 = vmatprep.subr.msk.bf16.mxu0 %vm9425_vm14, %v15013_v61  ;;  %vm9433_vm0 = vmpackc.low %vm3080_vm11, %vm3078_vm15  ;;  %vm3081_vm14 = vcmp.eq.s32.totalorder %v2911_v45, %v12607_v3  ;;  %vm15580_vm15 = vcmask 777216  }
 0x321   : > { %vm15582_vm11 = vmmov %vm15580_vm15 }
 0x323   : > { %9428 = vmatpush1.bf16.msk.msra.mxu0 %vm9427_vm9, %v15013_v61  ;;  %vm3083_vm9 = vcmp.eq.s32.totalorder %v2912_v58, %v12607_v3 }
 0x324   : > { %9430 = vmatprep.subr.msk.bf16.mxu0 %vm9429_vm4, %v15013_v61  ;;  %vm12868_vm7 = vmpackc.low %vm3083_vm9, %vm3081_vm14  ;;  %vm15577_vm4 = vcmask 1039360  }
 0x325   : > { %vm15578_vm13 = vmmov %vm15577_vm4 }
 0x327   : > { %9432 = vmatpush1.bf16.msk.msra.mxu0 %vm9431_vm2, %v15013_v61  ;;  %vm15579_vm2 = vcmask 785408  }
 0x328   : > { %9434 = vmatprep.subr.msk.bf16.mxu0 %vm9433_vm0, %v15013_v61  ;;  %vm15583_vm3 = vmmov %vm15579_vm2 }
 0x32b   : > { %9436 = vmatpush1.bf16.msk.msra.mxu0 %vm9435_vm5, %v15013_v61  ;;  %vm3092_vm5 = vcmp.eq.s32.totalorder %v2916_v37, %v12573_v30 }
 0x32c   : > { %9438 = vmatprep.subr.msk.bf16.mxu0 %vm9437_vm1, %v15013_v61 }
 0x386   : > { %v2612_v2 = vpop.f32.mrb[8].mxu0 }
 0x387   : > { %v2613_v40 = vadd.f32 %v2612_v2, %v12804_v39  ;;  %v2614_v17 = vpop.f32.mrb[9].mxu0 }
 0x388   : > { %v12809_v11 = vadd.f32 %v2614_v17, %v12804_v39  ;;  %v2616_v19 = vpop.f32.mrb[10].mxu0 }
 0x389   : > { %v12812_v27 = vmax.f32 %v2613_v40, 0.0  ;;  %v2653_v26 = vpop.f32.mrb[8].mxu1  ;;  %v2617_v44 = vpop.f32.mrb[11].mxu0 }
 0x38a   : > { %v15015_v57 = vmax.f32 %v12809_v11, 0.0  ;;  %v12822_v41 = vadd.f32 %v2653_v26, %v12804_v39  ;;  %v2655_v50 = vpop.f32.mrb[9].mxu1  ;;  %v15581_v23 = vmax.f32 %v12809_v11, 0.0  ;;  %v2922_v11 = vadd.s32 344, %v15564_v18 }
 0x38b   : > { %v2657_v21 = vpop.f32.mrb[10].mxu1  ;;  %2758 = vrot.lane.b32.xlu0 %v12812_v27, %s15058_s1  ;;  %v12876_v10 = vadd.f32 %v2655_v50, %v12804_v39 }
 0x38c   : > { %v15012_v59 = vmax.f32 %v12822_v41, 0.0  ;;  %v2658_v52 = vpop.f32.mrb[11].mxu1 }
 0x38d   : > { %v15011_v40 = vmax.f32 %v12876_v10, 0.0 }
 0x38e   : > { %v10044_v62 = vpack.i.bf16 %v15012_v59, %v15015_v57  ;;  %v2914_v59 = vadd.s32 280, %v15564_v18 }
 0x390   : > { %10045 = vrot.lane.b32.xlu1 %v10044_v62, %s15058_s1  ;;  %10050 = vrot.lane.b32.xlu0 %v10044_v62, %s10754_s7  ;;  %vm3088_vm12 = vcmp.eq.s32.totalorder %v2914_v59, %v12573_v30  ;;  %vm3087_vm14 = vcmp.eq.s32.totalorder %v2914_v59, %v12607_v3 }
 0x394   : > { %10055 = vrot.lane.b32.xlu1 %v10044_v62, %s10755_s10  ;;  %2830 = vrot.lane.b32.xlu0 %v12812_v27, %s10755_s10 }
 0x398   : > { %2798 = vrot.lane.b32.xlu1 %v12812_v27, %s10754_s7 }
 0x3a7   : > { %v2694_v56 = vpop.f32.mrb[12].mxu0 }
 0x3a8   : > { %v12879_v14 = vadd.f32 %v2694_v56, %v12804_v39  ;;  %v2696_v28 = vpop.f32.mrb[13].mxu0 }
 0x3a9   : > { %v2698_v2 = vpop.f32.mrb[14].mxu0  ;;  %v12891_v44 = vadd.f32 %v2696_v28, %v12804_v39 }
 0x3aa   : > { %v15010_v17 = vmax.f32 %v12879_v14, 0.0  ;;  %v2699_v19 = vpop.f32.mrb[15].mxu0 }
 0x3ab   : > { %v15008_v45 = vmax.f32 %v12891_v44, 0.0 }
 0x3ac   : > { %v10059_v26 = vpack.i.bf16 %v15010_v17, %v15011_v40 }
 0x3ae   : > { %10060 = vrot.lane.b32.xlu1 %v10059_v26, %s15058_s1  ;;  %10065 = vrot.lane.b32.xlu0 %v10059_v26, %s10754_s7 }
 0x3b2   : > { %10070 = vrot.lane.b32.xlu1 %v10059_v26, %s10755_s10 }
 0x3b9   : > { %v2735_v50 = vpop.f32.mrb[12].mxu1 }
 0x3ba   : > { %v12894_v21 = vadd.f32 %v2735_v50, %v12804_v39  ;;  %v2737_v52 = vpop.f32.mrb[13].mxu1 }
 0x3bb   : > { %v2739_v62 = vpop.f32.mrb[14].mxu1  ;;  %v2738_v2 = vadd.f32 %v2737_v52, %v12804_v39 }
 0x3bc   : > { %v15009_v58 = vmax.f32 %v12894_v21, 0.0  ;;  %v2740_v56 = vpop.f32.mrb[15].mxu1 }
 0x3bd   : > { %v12905_v28 = vmax.f32 %v2738_v2, 0.0 }
 0x3be   : > { %v10079_v19 = vpack.i.bf16 %v15009_v58, %v15008_v45  ;;  %v2913_v45 = vadd.s32 272, %v15564_v18 }
 0x3c0   : > { %10080 = vrot.lane.b32.xlu1 %v10079_v19, %s10754_s7  ;;  %10075 = vrot.lane.b32.xlu0 %v10079_v19, %s15058_s1  ;;  %vm3086_vm10 = vcmp.eq.s32.totalorder %v2913_v45, %v12573_v30  ;;  %vm3085_vm0 = vcmp.eq.s32.totalorder %v2913_v45, %v12607_v3  ;;  %v2926_v45 = vadd.s32 376, %v15564_v18 }
 0x3c1   : > { %vm9441_vm8 = vmpackc.low %vm3088_vm12, %vm3086_vm10 }
 0x3c2   : > { %vm9443_vm1 = vmpackc.low %vm3087_vm14, %vm3085_vm0 }
 0x3c4   : > { %2772 = vrot.lane.b32.xlu1 %v12905_v28, %s15058_s1  ;;  %10085 = vrot.lane.b32.xlu0 %v10079_v19, %s10755_s10 }
 0x3c8   : > { %2844 = vrot.lane.b32.xlu1 %v12905_v28, %s10755_s10  ;;  %2812 = vrot.lane.b32.xlu0 %v12905_v28, %s10754_s7  ;;  %s10768_s7 = smov 9   ;;  %s10769_s10 = smov 7  }
 0x3fd   : > { %v2759_v39 = vpop.permute.xlu0 %2758 }
 0x402   : > { %v12914_v26 = vpop.permute.xlu1 %10045  ;;  %v12916_v50 = vpop.permute.xlu0 %10050 }
 0x403   : > { %v15022_v52 = vunpack.i.h.bf16 %v12914_v26  ;;  %v10047_v62 = vunpack.i.l.bf16 %v12914_v26  ;;  %v15023_v56 = vunpack.i.h.bf16 %v12916_v50  ;;  %v10052_v2 = vunpack.i.l.bf16 %v12916_v50 }
 0x405   : > { %v2775_v40 = vsel %vm15577_vm4, %v10047_v62, %v15022_v52  ;;  %v2774_v61 = vsel %vm15578_vm13, %v2759_v39, %v10047_v62  ;;  %v2815_v57 = vsel %vm15579_vm2, %v10052_v2, %v15023_v56  ;;  %v2915_v62 = vadd.s32 288, %v15564_v18 }
 0x406   : > { %v12922_v19 = vpop.permute.xlu1 %10055  ;;  %v2831_v6 = vpop.permute.xlu0 %2830  ;;  %v2791_v54 = vmax.f32 %v15581_v23, %v2775_v40  ;;  %v2790_v56 = vmax.f32 %v12812_v27, %v2774_v61  ;;  %v2918_v61 = vadd.s32 312, %v15564_v18  ;;  %vm3091_vm2 = vcmp.eq.s32.totalorder %v2916_v37, %v12607_v3 }
 0x407   : > { %v15025_v58 = vunpack.i.h.bf16 %v12922_v19  ;;  %v10057_v17 = vunpack.i.l.bf16 %v12922_v19  ;;  %vm3090_vm9 = vcmp.eq.s32.totalorder %v2915_v62, %v12573_v30  ;;  %vm3089_vm13 = vcmp.eq.s32.totalorder %v2915_v62, %v12607_v3 }
 0x408   : > { %vm9445_vm4 = vmpackc.low %vm3092_vm5, %vm3090_vm9  ;;  %vm3096_vm10 = vcmp.eq.s32.totalorder %v2918_v61, %v12573_v30  ;;  %vm3095_vm12 = vcmp.eq.s32.totalorder %v2918_v61, %v12607_v3  ;;  %v15588_v62 = vunpack.i.h.bf16 %v12916_v50  ;;  %v15594_v50 = vmax.f32 %v12822_v41, 0.0 }
 0x409   : > { %v2847_v20 = vsel %vm15580_vm15, %v10057_v17, %v15025_v58  ;;  %v2846_v52 = vsel %vm15582_vm11, %v2831_v6, %v10057_v17  ;;  %v2917_v6 = vadd.s32 304, %v15564_v18  ;;  %v2925_v17 = vadd.s32 368, %v15564_v18 }
 0x40a   : > { %v2799_v15 = vpop.permute.xlu1 %2798  ;;  %v2863_v9 = vmax.f32 %v2815_v57, %v2847_v20  ;;  %v15584_v20 = vmov 1.0|1.0   ;;  %v2924_v57 = vadd.s32 360, %v15564_v18 }
 0x40b   : > { %v2814_v39 = vsel %vm15583_vm3, %v2799_v15, %v10052_v2  ;;  %vm3094_vm15 = vcmp.eq.s32.totalorder %v2917_v6, %v12573_v30  ;;  %vm3093_vm3 = vcmp.eq.s32.totalorder %v2917_v6, %v12607_v3 }
 0x40c   : > { %v2862_v35 = vmax.f32 %v2814_v39, %v2846_v52  ;;  %v2871_v58 = vmax.f32 %v2791_v54, %v2863_v9  ;;  %v2920_v9 = vadd.s32 328, %v15564_v18  ;;  %vm9449_vm11 = vmpackc.low %vm3096_vm10, %vm3094_vm15  ;;  %v2921_v54 = vadd.s32 336, %v15564_v18 }
 0x40d   : > { %vm9451_vm14 = vmpackc.low %vm3095_vm12, %vm3093_vm3  ;;  %vm3103_vm10 = vcmp.eq.s32.totalorder %v2922_v11, %v12607_v3  ;;  %vm3108_vm3 = vcmp.eq.s32.totalorder %v2924_v57, %v12573_v30  ;;  %vm15586_vm12 = vcmask 1039360  }
 0x40e   : > { %v2870_v55 = vmax.f32 %v2790_v56, %v2862_v35  ;;  %3849 = vmatprep.mubr.f32.mxu0 %v2871_v58  ;;  %vm3100_vm0 = vcmp.eq.s32.totalorder %v2920_v9, %v12573_v30  ;;  %v2923_v35 = vadd.s32 352, %v15564_v18  ;;  %vm3101_vm15 = vcmp.eq.s32.totalorder %v2921_v54, %v12607_v3 }
 0x40f   : > { %v15585_v58 = vunpack.i.h.bf16 %v12914_v26  ;;  %v15590_v26 = vunpack.i.h.bf16 %v12922_v19  ;;  %v15595_v19 = vmax.f32 %v12876_v10, 0.0 }
 0x410   : > { %3850 = vmatmul.mubr.f32.vlgmr.msra.gmra.mrb[16].mxu0 %v2870_v55  ;;  %v2919_v55 = vadd.s32 320, %v15564_v18 }
 0x411   : > { %9440 = vmatpush1.bf16.msk.msra.mxu0 %vm12868_vm7, %v15584_v20  ;;  %vm9447_vm7 = vmpackc.low %vm3091_vm2, %vm3089_vm13  ;;  %vm3104_vm13 = vcmp.eq.s32.totalorder %v2922_v11, %v12573_v30  ;;  %v2928_v11 = vadd.s32 392, %v15564_v18 }
 0x412   : > { %9442 = vmatprep.subr.msk.bf16.mxu0 %vm9441_vm8, %v15584_v20  ;;  %vm3098_vm8 = vcmp.eq.s32.totalorder %v2919_v55, %v12573_v30  ;;  %vm3097_vm5 = vcmp.eq.s32.totalorder %v2919_v55, %v12607_v3 }
 0x413   : > { %vm9453_vm9 = vmpackc.low %vm3100_vm0, %vm3098_vm8  ;;  %vm3105_vm0 = vcmp.eq.s32.totalorder %v2923_v35, %v12607_v3 }
 0x414   : > { %vm15587_vm8 = vmmov %vm15586_vm12 }
 0x415   : > { %9444 = vmatpush1.bf16.msk.msra.mxu0 %vm9443_vm1, %v15584_v20  ;;  %vm3099_vm1 = vcmp.eq.s32.totalorder %v2920_v9, %v12607_v3 }
 0x416   : > { %9446 = vmatprep.subr.msk.bf16.mxu0 %vm9445_vm4, %v15584_v20  ;;  %vm3102_vm4 = vcmp.eq.s32.totalorder %v2921_v54, %v12573_v30  ;;  %vm9455_vm2 = vmpackc.low %vm3099_vm1, %vm3097_vm5  ;;  %vm15591_vm5 = vcmask 777216   ;;  %v2927_v54 = vadd.s32 384, %v15564_v18 }
 0x419   : > { %9448 = vmatpush1.bf16.msk.msra.mxu0 %vm9447_vm7, %v15584_v20  ;;  %vm9457_vm7 = vmpackc.low %vm3104_vm13, %vm3102_vm4 }
 0x41a   : > { %9450 = vmatprep.subr.msk.bf16.mxu0 %vm9449_vm11, %v15584_v20  ;;  %vm3106_vm11 = vcmp.eq.s32.totalorder %v2923_v35, %v12573_v30  ;;  %vm15593_vm4 = vmmov %vm15591_vm5  ;;  %v2930_v35 = vadd.s32 408, %v15564_v18 }
 0x41b   : > { %vm9459_vm13 = vmpackc.low %vm3103_vm10, %vm3101_vm15 }
 0x41d   : > { %9452 = vmatpush1.bf16.msk.msra.mxu0 %vm9451_vm14, %v15584_v20  ;;  %vm3107_vm14 = vcmp.eq.s32.totalorder %v2924_v57, %v12607_v3 }
 0x41e   : > { %9454 = vmatprep.subr.msk.bf16.mxu0 %vm9453_vm9, %v15584_v20  ;;  %vm15589_vm9 = vcmask 785408   ;;  %vm9463_vm15 = vmpackc.low %vm3107_vm14, %vm3105_vm0 }
 0x41f   : > { %vm15592_vm1 = vmmov %vm15589_vm9 }
 0x420   : > { %v12973_v27 = vpop.permute.xlu1 %10060  ;;  %v12975_v37 = vpop.permute.xlu0 %10065  ;;  %vm15596_vm14 = vmmov %vm15592_vm1 }
 0x421   : > { %v10063_v59 = vunpack.i.h.bf16 %v12973_v27  ;;  %v10062_v23 = vunpack.i.l.bf16 %v12973_v27  ;;  %v10068_v15 = vunpack.i.h.bf16 %v12975_v37  ;;  %v10067_v53 = vunpack.i.l.bf16 %v12975_v37  ;;  %9456 = vmatpush1.bf16.msk.msra.mxu0 %vm9455_vm2, %v15584_v20  ;;  %vm9461_vm2 = vmpackc.low %vm3108_vm3, %vm3106_vm11 }
 0x422   : > { %9458 = vmatprep.subr.msk.bf16.mxu0 %vm9457_vm7, %v15584_v20  ;;  %vm3110_vm7 = vcmp.eq.s32.totalorder %v2925_v17, %v12573_v30  ;;  %vm3109_vm11 = vcmp.eq.s32.totalorder %v2925_v17, %v12607_v3  ;;  %vm3111_vm3 = vcmp.eq.s32.totalorder %v2926_v45, %v12607_v3  ;;  %v2931_v17 = vadd.s32 416, %v15564_v18 }
 0x423   : > { %v2776_v52 = vsel %vm15586_vm12, %v15585_v58, %v10062_v23  ;;  %v2777_v39 = vsel %vm15587_vm8, %v10062_v23, %v10063_v59  ;;  %v2816_v6 = vsel %vm15589_vm9, %v15588_v62, %v10067_v53  ;;  %v2817_v55 = vsel %vm15592_vm1, %v10067_v53, %v10068_v15  ;;  %vm9467_vm0 = vmpackc.low %vm3111_vm3, %vm3109_vm11 }
 0x424   : > { %v12991_v40 = vpop.permute.xlu1 %10070  ;;  %v2792_v27 = vmax.f32 %v15594_v50, %v2776_v52  ;;  %v2793_v23 = vmax.f32 %v15595_v19, %v2777_v39  ;;  %vm3112_vm12 = vcmp.eq.s32.totalorder %v2926_v45, %v12573_v30  ;;  %vm3114_vm8 = vcmp.eq.s32.totalorder %v2927_v54, %v12573_v30 }
 0x425   : > { %v10073_v56 = vunpack.i.h.bf16 %v12991_v40  ;;  %v10072_v2 = vunpack.i.l.bf16 %v12991_v40  ;;  %9460 = vmatpush1.bf16.msk.msra.mxu0 %vm9459_vm13, %v15584_v20  ;;  %vm9465_vm10 = vmpackc.low %vm3112_vm12, %vm3110_vm7  ;;  %vm3116_vm9 = vcmp.eq.s32.totalorder %v2928_v11, %v12573_v30  ;;  %vm3115_vm13 = vcmp.eq.s32.totalorder %v2928_v11, %v12607_v3 }
 0x426   : > { %9462 = vmatprep.subr.msk.bf16.mxu0 %vm9461_vm2, %v15584_v20  ;;  %vm9469_vm1 = vmpackc.low %vm3116_vm9, %vm3114_vm8  ;;  %vm3120_vm7 = vcmp.eq.s32.totalorder %v2930_v35, %v12573_v30  ;;  %vm3122_vm11 = vcmp.eq.s32.totalorder %v2931_v17, %v12573_v30  ;;  %vm15601_vm8 = vcmask 777216  }
 0x427   : > { %v2848_v61 = vsel %vm15591_vm5, %v15590_v26, %v10072_v2  ;;  %v2849_v9 = vsel %vm15593_vm4, %v10072_v2, %v10073_v56  ;;  %v2929_v2 = vadd.s32 400, %v15564_v18  ;;  %vm15597_vm5 = vcmask 1039360  }
 0x428   : > { %v2864_v37 = vmax.f32 %v2816_v6, %v2848_v61  ;;  %v2865_v58 = vmax.f32 %v2817_v55, %v2849_v9  ;;  %vm3113_vm4 = vcmp.eq.s32.totalorder %v2927_v54, %v12607_v3  ;;  %v2932_v61 = vadd.s32 424, %v15564_v18  ;;  %vm15600_vm3 = vmmov %vm15597_vm5 }
 0x429   : > { %9464 = vmatpush1.bf16.msk.msra.mxu0 %vm9463_vm15, %v15584_v20  ;;  %vm3118_vm2 = vcmp.eq.s32.totalorder %v2929_v2, %v12573_v30  ;;  %vm13075_vm12 = vmpackc.low %vm3115_vm13, %vm3113_vm4  ;;  %vm3117_vm15 = vcmp.eq.s32.totalorder %v2929_v2, %v12607_v3  ;;  %v2933_v9 = vadd.s32 432, %v15564_v18  ;;  %vm3121_vm13 = vcmp.eq.s32.totalorder %v2931_v17, %v12607_v3 }
 0x42a   : > { %v2873_v41 = vmax.f32 %v2793_v23, %v2865_v58  ;;  %v13034_v53 = vmax.f32 %v2792_v27, %v2864_v37  ;;  %9466 = vmatprep.subr.msk.bf16.mxu0 %vm9465_vm10, %v15584_v20  ;;  %vm3119_vm10 = vcmp.eq.s32.totalorder %v2930_v35, %v12607_v3  ;;  %vm9473_vm9 = vmpackc.low %vm3120_vm7, %vm3118_vm2  ;;  %v15602_v23 = vmax.f32 %v12879_v14, 0.0 }
 0x42b   : > { %vm3123_vm2 = vcmp.eq.s32.totalorder %v2932_v61, %v12607_v3  ;;  %vm3126_vm7 = vcmp.eq.s32.totalorder %v2933_v9, %v12573_v30  ;;  %v2935_v2 = vadd.s32 448, %v15564_v18  ;;  %v2936_v35 = vadd.s32 456, %v15564_v18 }
 0x42c   : > { %3920 = vmatprep.mubr.f32.mxu0 %v2873_v41  ;;  %v2937_v17 = vadd.s32 464, %v15564_v18 }
 0x42d   : > { %9468 = vmatpush1.bf16.msk.msra.mxu0 %vm9467_vm0, %v15584_v20  ;;  %vm3124_vm0 = vcmp.eq.s32.totalorder %v2932_v61, %v12573_v30  ;;  %v2938_v61 = vadd.s32 472, %v15564_v18 }
 0x42e   : > { %9470 = vmatprep.subr.msk.bf16.mxu0 %vm9469_vm1, %v15584_v20  ;;  %vm9475_vm1 = vmpackc.low %vm3119_vm10, %vm3117_vm15 }
 0x42f   : > { %vm9477_vm4 = vmpackc.low %vm3124_vm0, %vm3122_vm11  ;;  %vm3125_vm11 = vcmp.eq.s32.totalorder %v2933_v9, %v12607_v3  ;;  %v2941_v9 = vadd.s32 496, %v15564_v18 }
 0x430   : > { %vm9479_vm15 = vmpackc.low %vm3123_vm2, %vm3121_vm13  ;;  %vm3136_vm13 = vcmp.eq.s32.totalorder %v2938_v61, %v12573_v30 }
 0x431   : > { %9472 = vmatpush1.bf16.msk.msra.mxu0 %vm13075_vm12, %v15584_v20 }
 0x432   : > { %v13043_v10 = vpop.permute.xlu1 %10080  ;;  %v13045_v52 = vpop.permute.xlu0 %10075  ;;  %9474 = vmatprep.subr.msk.bf16.mxu0 %vm9473_vm9, %v15584_v20  ;;  %vm3132_vm9 = vcmp.eq.s32.totalorder %v2936_v35, %v12573_v30 }
 0x433   : > { %v15028_v57 = vunpack.i.l.bf16 %v13043_v10  ;;  %v10077_v39 = vunpack.i.l.bf16 %v13045_v52  ;;  %v10083_v50 = vunpack.i.h.bf16 %v13043_v10 }
 0x435   : > { %v2818_v45 = vsel %vm15596_vm14, %v10068_v15, %v15028_v57  ;;  %v2778_v62 = vsel %vm15597_vm5, %v10063_v59, %v10077_v39  ;;  %v10078_v15 = vunpack.i.h.bf16 %v13045_v52  ;;  %v2934_v57 = vadd.s32 440, %v15564_v18  ;;  %vm15603_vm14 = vmmov %vm15601_vm8  ;;  %9476 = vmatpush1.bf16.msk.msra.mxu0 %vm9475_vm1, %v15584_v20 }
 0x436   : > { %v13064_v6 = vpop.permute.xlu1 %2772  ;;  %v13066_v26 = vpop.permute.xlu0 %10085  ;;  %v2794_v58 = vmax.f32 %v15602_v23, %v2778_v62  ;;  %vm15604_vm5 = vcmask 785408   ;;  %9478 = vmatprep.subr.msk.bf16.mxu0 %vm9477_vm4, %v15584_v20  ;;  %vm3131_vm1 = vcmp.eq.s32.totalorder %v2936_v35, %v12607_v3  ;;  %vm3134_vm4 = vcmp.eq.s32.totalorder %v2937_v17, %v12573_v30 }
 0x437   : > { %v10087_v55 = vunpack.i.l.bf16 %v13066_v26  ;;  %v2780_v27 = vsel %vm15600_vm3, %v10078_v15, %v13064_v6  ;;  %v10088_v37 = vunpack.i.h.bf16 %v13066_v26  ;;  %vm3128_vm12 = vcmp.eq.s32.totalorder %v2934_v57, %v12573_v30 }
 0x438   : > { %vm9481_vm10 = vmpackc.low %vm3128_vm12, %vm3126_vm7  ;;  %vm3127_vm3 = vcmp.eq.s32.totalorder %v2934_v57, %v12607_v3  ;;  %v2939_v57 = vadd.s32 480, %v15564_v18  ;;  %v2940_v59 = vadd.s32 488, %v15564_v18  ;;  %vm3133_vm12 = vcmp.eq.s32.totalorder %v2937_v17, %v12607_v3 }
 0x439   : > { %v2850_v19 = vsel %vm15601_vm8, %v10073_v56, %v10087_v55  ;;  %v15605_v56 = vmax.f32 %v12894_v21, 0.0  ;;  %vm3130_vm8 = vcmp.eq.s32.totalorder %v2935_v2, %v12573_v30  ;;  %9480 = vmatpush1.bf16.msk.msra.mxu0 %vm9479_vm15, %v15584_v20  ;;  %vm9483_vm0 = vmpackc.low %vm3127_vm3, %vm3125_vm11  ;;  %vm3135_vm15 = vcmp.eq.s32.totalorder %v2938_v61, %v12607_v3 }
 0x43a   : > { %v2866_v54 = vmax.f32 %v2818_v45, %v2850_v19  ;;  %v13100_v11 = vpop.permute.xlu1 %2844  ;;  %v13102_v41 = vpop.permute.xlu0 %2812  ;;  %9482 = vmatprep.subr.msk.bf16.mxu0 %vm9481_vm10, %v15584_v20  ;;  %vm9489_vm7 = vmpackc.low %vm3136_vm13, %vm3134_vm4  ;;  %vm3138_vm10 = vcmp.eq.s32.totalorder %v2939_v57, %v12573_v30  ;;  %vm3140_vm11 = vcmp.eq.s32.totalorder %v2940_v59, %v12573_v30  ;;  %v2943_v23 = vadd.s32 512, %v15564_v18 }
 0x43b   : > { %v2852_v40 = vsel %vm15603_vm14, %v10088_v37, %v13100_v11  ;;  %v2820_v14 = vsel %vm15604_vm5, %v10083_v50, %v13102_v41  ;;  %v2796_v45 = vmax.f32 %v15605_v56, %v2780_v27  ;;  %vm9485_vm14 = vmpackc.low %vm3132_vm9, %vm3130_vm8  ;;  %vm3129_vm5 = vcmp.eq.s32.totalorder %v2935_v2, %v12607_v3 }
 0x43c   : > { %v2868_v62 = vmax.f32 %v2820_v14, %v2852_v40  ;;  %v13124_v19 = vmax.f32 %v2794_v58, %v2866_v54  ;;  %vm9487_vm2 = vmpackc.low %vm3131_vm1, %vm3129_vm5  ;;  %v2942_v27 = vadd.s32 504, %v15564_v18  ;;  %vm3137_vm9 = vcmp.eq.s32.totalorder %v2939_v57, %v12607_v3 }
 0x43d   : > { %9484 = vmatpush1.bf16.msk.msra.mxu0 %vm9483_vm0, %v15584_v20  ;;  %vm9491_vm3 = vmpackc.low %vm3135_vm15, %vm3133_vm12  ;;  %vm3139_vm0 = vcmp.eq.s32.totalorder %v2940_v59, %v12607_v3  ;;  %v2944_v58 = vadd.s32 520, %v15564_v18  ;;  %vm3141_vm13 = vcmp.eq.s32.totalorder %v2941_v9, %v12607_v3  ;;  %v2945_v54 = vadd.s32 528, %v15564_v18 }
 0x43e   : > { %v13131_v21 = vmax.f32 %v2796_v45, %v2868_v62  ;;  %9486 = vmatprep.subr.msk.bf16.mxu0 %vm9485_vm14, %v15584_v20  ;;  %vm9493_vm8 = vmpackc.low %vm3140_vm11, %vm3138_vm10  ;;  %vm3142_vm14 = vcmp.eq.s32.totalorder %v2941_v9, %v12573_v30  ;;  %vm3144_vm5 = vcmp.eq.s32.totalorder %v2942_v27, %v12573_v30  ;;  %vm15606_vm15 = vcmask 777216  }
 0x43f   : > { %vm9495_vm1 = vmpackc.low %vm3139_vm0, %vm3137_vm9  ;;  %vm3148_vm12 = vcmp.eq.s32.totalorder %v2944_v58, %v12573_v30  ;;  %v2851_v40 = vsel %vm15606_vm15, %v10087_v55, %v10088_v37  ;;  %v2946_v14 = vadd.s32 536, %v15564_v18  ;;  %vm15607_vm11 = vcmask 1039360  }
 0x440   : > { %vm9497_vm4 = vmpackc.low %vm3144_vm5, %vm3142_vm14  ;;  %v2779_v56 = vsel %vm15607_vm11, %v10077_v39, %v10078_v15  ;;  %v15608_v45 = vunpack.i.l.bf16 %v13043_v10  ;;  %vm3145_vm9 = vcmp.eq.s32.totalorder %v2943_v23, %v12607_v3  ;;  %vm3147_vm0 = vcmp.eq.s32.totalorder %v2944_v58, %v12607_v3 }
 0x441   : > { %9488 = vmatpush1.bf16.msk.msra.mxu0 %vm9487_vm2, %v15584_v20  ;;  %vm3143_vm2 = vcmp.eq.s32.totalorder %v2942_v27, %v12607_v3  ;;  %vm3150_vm14 = vcmp.eq.s32.totalorder %v2945_v54, %v12573_v30  ;;  %vm3152_vm5 = vcmp.eq.s32.totalorder %v2946_v14, %v12573_v30  ;;  %v2947_v52 = vadd.s32 544, %v15564_v18 }
 0x442   : > { %9490 = vmatprep.subr.msk.bf16.mxu0 %vm9489_vm7, %v15584_v20  ;;  %vm3146_vm7 = vcmp.eq.s32.totalorder %v2943_v23, %v12573_v30  ;;  %vm9499_vm10 = vmpackc.low %vm3143_vm2, %vm3141_vm13  ;;  %v2948_v39 = vadd.s32 552, %v15564_v18  ;;  %v15610_v10 = vmax.f32 %v12891_v44, 0.0  ;;  %vm3149_vm13 = vcmp.eq.s32.totalorder %v2945_v54, %v12607_v3 }
 0x443   : > { %vm3151_vm2 = vcmp.eq.s32.totalorder %v2946_v14, %v12607_v3  ;;  %v2949_v37 = vadd.s32 560, %v15564_v18  ;;  %v2950_v44 = vadd.s32 568, %v15564_v18  ;;  %vm3153_vm11 = vcmp.eq.s32.totalorder %v2947_v52, %v12607_v3 }
 0x444   : > { %v2795_v15 = vmax.f32 %v15610_v10, %v2779_v56  ;;  %vm9507_vm15 = vmpackc.low %vm3151_vm2, %vm3149_vm13  ;;  %v2952_v62 = vadd.s32 584, %v15564_v18  ;;  %v2953_v2 = vadd.s32 592, %v15564_v18  ;;  %v2954_v35 = vadd.s32 600, %v15564_v18 }
 0x445   : > { %9492 = vmatpush1.bf16.msk.msra.mxu0 %vm9491_vm3, %v15584_v20  ;;  %vm15609_vm3 = vcmask 785408   ;;  %v2955_v17 = vadd.s32 608, %v15564_v18  ;;  %v2956_v61 = vadd.s32 616, %v15564_v18  ;;  %v2957_v57 = vadd.s32 624, %v15564_v18 }
 0x446   : > { %9494 = vmatprep.subr.msk.bf16.mxu0 %vm9493_vm8, %v15584_v20  ;;  %v2819_v26 = vsel %vm15609_vm3, %v15608_v45, %v10083_v50  ;;  %vm9501_vm8 = vmpackc.low %vm3148_vm12, %vm3146_vm7  ;;  %vm3154_vm7 = vcmp.eq.s32.totalorder %v2947_v52, %v12573_v30  ;;  %vm3156_vm12 = vcmp.eq.s32.totalorder %v2948_v39, %v12573_v30  ;;  %vm3155_vm3 = vcmp.eq.s32.totalorder %v2948_v39, %v12607_v3 }
 0x447   : > { %v2867_v55 = vmax.f32 %v2819_v26, %v2851_v40  ;;  %vm3164_vm13 = vcmp.eq.s32.totalorder %v2952_v62, %v12573_v30  ;;  %v2958_v59 = vadd.s32 632, %v15564_v18  ;;  %v2959_v9 = vadd.s32 640, %v15564_v18 }
 0x448   : > { %v2960_v27 = vadd.s32 648, %v15564_v18  ;;  %v2961_v23 = vadd.s32 656, %v15564_v18  ;;  %v2962_v58 = vadd.s32 664, %v15564_v18  ;;  %v2963_v54 = vadd.s32 672, %v15564_v18 }
 0x449   : > { %9496 = vmatpush1.bf16.msk.msra.mxu0 %vm9495_vm1, %v15584_v20  ;;  %vm9503_vm1 = vmpackc.low %vm3147_vm0, %vm3145_vm9  ;;  %v2875_v50 = vmax.f32 %v2795_v15, %v2867_v55  ;;  %vm3160_vm9 = vcmp.eq.s32.totalorder %v2950_v44, %v12573_v30  ;;  %v2964_v40 = vadd.s32 680, %v15564_v18  ;;  %v2965_v14 = vadd.s32 688, %v15564_v18 }
 0x44a   : > { %9498 = vmatprep.subr.msk.bf16.mxu0 %vm9497_vm4, %v15584_v20  ;;  %vm9505_vm4 = vmpackc.low %vm3152_vm5, %vm3150_vm14  ;;  %vm3157_vm5 = vcmp.eq.s32.totalorder %v2949_v37, %v12607_v3  ;;  %v2966_v56 = vadd.s32 696, %v15564_v18  ;;  %v2967_v45 = vadd.s32 704, %v15564_v18  ;;  %v2968_v26 = vadd.s32 712, %v15564_v18 }
 0x44b   : > { %vm9511_vm0 = vmpackc.low %vm3155_vm3, %vm3153_vm11  ;;  %vm3168_vm11 = vcmp.eq.s32.totalorder %v2954_v35, %v12573_v30  ;;  %v2969_v55 = vadd.s32 720, %v15564_v18  ;;  %v2970_v52 = vadd.s32 728, %v15564_v18  ;;  %v2971_v39 = vadd.s32 736, %v15564_v18 }
 0x44c   : > { %v2972_v10 = vadd.s32 744, %v15564_v18  ;;  %v2973_v15 = vadd.s32 752, %v15564_v18 }
 0x44d   : > { %9500 = vmatpush1.bf16.msk.msra.mxu0 %vm9499_vm10, %v15584_v20  ;;  %vm9509_vm10 = vmpackc.low %vm3156_vm12, %vm3154_vm7 }
 0x44e   : > { %9502 = vmatprep.subr.msk.bf16.mxu0 %vm9501_vm8, %v15584_v20  ;;  %vm3158_vm8 = vcmp.eq.s32.totalorder %v2949_v37, %v12573_v30  ;;  %v2975_v37 = vadd.s32 768, %v15564_v18 }
 0x44f   : > { %vm9513_vm14 = vmpackc.low %vm3160_vm9, %vm3158_vm8  ;;  %vm3165_vm9 = vcmp.eq.s32.totalorder %v2953_v2, %v12607_v3 }
 0x450   : > { %3921 = vmatmul.mubr.f32.vlgmr.msra.gmra.mrb[16].mxu0 %v13034_v53  ;;  %v2951_v53 = vadd.s32 576, %v15564_v18 }
 0x451   : > { %9504 = vmatpush1.bf16.msk.msra.mxu0 %vm9503_vm1, %v15584_v20  ;;  %3991 = vmatprep.mubr.f32.mxu0 %v2875_v50  ;;  %vm3159_vm1 = vcmp.eq.s32.totalorder %v2950_v44, %v12607_v3  ;;  %v2974_v50 = vadd.s32 760, %v15564_v18  ;;  %v2976_v44 = vadd.s32 776, %v15564_v18 }
 0x452   : > { %9506 = vmatprep.subr.msk.bf16.mxu0 %vm9505_vm4, %v15584_v20  ;;  %vm3162_vm4 = vcmp.eq.s32.totalorder %v2951_v53, %v12573_v30  ;;  %vm9515_vm2 = vmpackc.low %vm3159_vm1, %vm3157_vm5  ;;  %vm3161_vm12 = vcmp.eq.s32.totalorder %v2951_v53, %v12607_v3  ;;  %vm3172_vm5 = vcmp.eq.s32.totalorder %v2956_v61, %v12573_v30  ;;  %v2977_v53 = vadd.s32 784, %v15564_v18 }
 0x453   : > { %vm9517_vm7 = vmpackc.low %vm3164_vm13, %vm3162_vm4  ;;  %vm3169_vm13 = vcmp.eq.s32.totalorder %v2955_v17, %v12607_v3 }
 0x455   : > { %9508 = vmatpush1.bf16.msk.msra.mxu0 %vm9507_vm15, %v15584_v20  ;;  %vm3163_vm15 = vcmp.eq.s32.totalorder %v2952_v62, %v12607_v3  ;;  %v2978_v62 = vadd.s32 792, %v15564_v18 }
 0x456   : > { %9510 = vmatprep.subr.msk.bf16.mxu0 %vm9509_vm10, %v15584_v20  ;;  %vm3166_vm10 = vcmp.eq.s32.totalorder %v2953_v2, %v12573_v30  ;;  %vm9519_vm3 = vmpackc.low %vm3163_vm15, %vm3161_vm12  ;;  %vm3176_vm12 = vcmp.eq.s32.totalorder %v2958_v59, %v12573_v30 }
 0x457   : > { %vm9521_vm8 = vmpackc.low %vm3168_vm11, %vm3166_vm10  ;;  %vm3173_vm11 = vcmp.eq.s32.totalorder %v2957_v57, %v12607_v3 }
 0x459   : > { %9512 = vmatpush1.bf16.msk.msra.mxu0 %vm9511_vm0, %v15584_v20  ;;  %vm3167_vm0 = vcmp.eq.s32.totalorder %v2954_v35, %v12607_v3 }
 0x45a   : > { %9514 = vmatprep.subr.msk.bf16.mxu0 %vm9513_vm14, %v15584_v20  ;;  %vm3170_vm14 = vcmp.eq.s32.totalorder %v2955_v17, %v12573_v30  ;;  %vm9523_vm1 = vmpackc.low %vm3167_vm0, %vm3165_vm9  ;;  %vm3180_vm9 = vcmp.eq.s32.totalorder %v2960_v27, %v12573_v30 }
 0x45b   : > { %vm9525_vm4 = vmpackc.low %vm3172_vm5, %vm3170_vm14  ;;  %vm3177_vm5 = vcmp.eq.s32.totalorder %v2959_v9, %v12607_v3 }
 0x45d   : > { %9516 = vmatpush1.bf16.msk.msra.mxu0 %vm9515_vm2, %v15584_v20  ;;  %vm3171_vm2 = vcmp.eq.s32.totalorder %v2956_v61, %v12607_v3 }
 0x45e   : > { %9518 = vmatprep.subr.msk.bf16.mxu0 %vm9517_vm7, %v15584_v20  ;;  %vm3174_vm7 = vcmp.eq.s32.totalorder %v2957_v57, %v12573_v30  ;;  %vm9527_vm15 = vmpackc.low %vm3171_vm2, %vm3169_vm13  ;;  %vm3184_vm13 = vcmp.eq.s32.totalorder %v2962_v58, %v12573_v30 }
 0x45f   : > { %vm9529_vm10 = vmpackc.low %vm3176_vm12, %vm3174_vm7  ;;  %vm3181_vm12 = vcmp.eq.s32.totalorder %v2961_v23, %v12607_v3 }
 0x461   : > { %9520 = vmatpush1.bf16.msk.msra.mxu0 %vm9519_vm3, %v15584_v20  ;;  %vm3175_vm3 = vcmp.eq.s32.totalorder %v2958_v59, %v12607_v3  ;;  %v2981_v59 = vadd.s32 816, %v15564_v18 }
 0x462   : > { %9522 = vmatprep.subr.msk.bf16.mxu0 %vm9521_vm8, %v15584_v20  ;;  %vm3178_vm8 = vcmp.eq.s32.totalorder %v2959_v9, %v12573_v30  ;;  %vm9531_vm0 = vmpackc.low %vm3175_vm3, %vm3173_vm11  ;;  %vm3188_vm11 = vcmp.eq.s32.totalorder %v2964_v40, %v12573_v30  ;;  %v2984_v9 = vadd.s32 840, %v15564_v18 }
 0x463   : > { %vm9533_vm14 = vmpackc.low %vm3180_vm9, %vm3178_vm8  ;;  %vm3185_vm9 = vcmp.eq.s32.totalorder %v2963_v54, %v12607_v3 }
 0x465   : > { %9524 = vmatpush1.bf16.msk.msra.mxu0 %vm9523_vm1, %v15584_v20  ;;  %vm3179_vm1 = vcmp.eq.s32.totalorder %v2960_v27, %v12607_v3  ;;  %v2985_v27 = vadd.s32 848, %v15564_v18 }
 0x466   : > { %9526 = vmatprep.subr.msk.bf16.mxu0 %vm9525_vm4, %v15584_v20  ;;  %vm3182_vm4 = vcmp.eq.s32.totalorder %v2961_v23, %v12573_v30  ;;  %vm9535_vm2 = vmpackc.low %vm3179_vm1, %vm3177_vm5  ;;  %vm3192_vm5 = vcmp.eq.s32.totalorder %v2966_v56, %v12573_v30  ;;  %v2986_v23 = vadd.s32 856, %v15564_v18 }
 0x467   : > { %vm9537_vm7 = vmpackc.low %vm3184_vm13, %vm3182_vm4  ;;  %vm3189_vm13 = vcmp.eq.s32.totalorder %v2965_v14, %v12607_v3 }
 0x469   : > { %9528 = vmatpush1.bf16.msk.msra.mxu0 %vm9527_vm15, %v15584_v20  ;;  %vm3183_vm15 = vcmp.eq.s32.totalorder %v2962_v58, %v12607_v3  ;;  %v2987_v58 = vadd.s32 864, %v15564_v18 }
 0x46a   : > { %9530 = vmatprep.subr.msk.bf16.mxu0 %vm9529_vm10, %v15584_v20  ;;  %vm3186_vm10 = vcmp.eq.s32.totalorder %v2963_v54, %v12573_v30  ;;  %vm9539_vm3 = vmpackc.low %vm3183_vm15, %vm3181_vm12  ;;  %vm3196_vm12 = vcmp.eq.s32.totalorder %v2968_v26, %v12573_v30  ;;  %v2988_v54 = vadd.s32 872, %v15564_v18 }
 0x46b   : > { %vm9541_vm8 = vmpackc.low %vm3188_vm11, %vm3186_vm10  ;;  %vm3193_vm11 = vcmp.eq.s32.totalorder %v2967_v45, %v12607_v3 }
 0x46d   : > { %9532 = vmatpush1.bf16.msk.msra.mxu0 %vm9531_vm0, %v15584_v20  ;;  %vm3187_vm0 = vcmp.eq.s32.totalorder %v2964_v40, %v12607_v3  ;;  %v2989_v40 = vadd.s32 880, %v15564_v18 }
 0x46e   : > { %9534 = vmatprep.subr.msk.bf16.mxu0 %vm9533_vm14, %v15584_v20  ;;  %vm3190_vm14 = vcmp.eq.s32.totalorder %v2965_v14, %v12573_v30  ;;  %vm9543_vm1 = vmpackc.low %vm3187_vm0, %vm3185_vm9  ;;  %vm3200_vm9 = vcmp.eq.s32.totalorder %v2970_v52, %v12573_v30  ;;  %v2990_v14 = vadd.s32 888, %v15564_v18 }
 0x46f   : > { %vm9545_vm4 = vmpackc.low %vm3192_vm5, %vm3190_vm14  ;;  %vm3197_vm5 = vcmp.eq.s32.totalorder %v2969_v55, %v12607_v3 }
 0x471   : > { %9536 = vmatpush1.bf16.msk.msra.mxu0 %vm9535_vm2, %v15584_v20  ;;  %vm3191_vm2 = vcmp.eq.s32.totalorder %v2966_v56, %v12607_v3  ;;  %v2991_v56 = vadd.s32 896, %v15564_v18 }
 0x472   : > { %9538 = vmatprep.subr.msk.bf16.mxu0 %vm9537_vm7, %v15584_v20  ;;  %vm3194_vm7 = vcmp.eq.s32.totalorder %v2967_v45, %v12573_v30  ;;  %vm9547_vm15 = vmpackc.low %vm3191_vm2, %vm3189_vm13  ;;  %vm3204_vm13 = vcmp.eq.s32.totalorder %v2972_v10, %v12573_v30  ;;  %v2992_v45 = vadd.s32 904, %v15564_v18 }
 0x473   : > { %vm9549_vm10 = vmpackc.low %vm3196_vm12, %vm3194_vm7  ;;  %vm3201_vm12 = vcmp.eq.s32.totalorder %v2971_v39, %v12607_v3 }
 0x475   : > { %9540 = vmatpush1.bf16.msk.msra.mxu0 %vm9539_vm3, %v15584_v20  ;;  %vm3195_vm3 = vcmp.eq.s32.totalorder %v2968_v26, %v12607_v3  ;;  %v2993_v26 = vadd.s32 912, %v15564_v18 }
 0x476   : > { %9542 = vmatprep.subr.msk.bf16.mxu0 %vm9541_vm8, %v15584_v20  ;;  %vm3198_vm8 = vcmp.eq.s32.totalorder %v2969_v55, %v12573_v30  ;;  %vm9551_vm0 = vmpackc.low %vm3195_vm3, %vm3193_vm11  ;;  %vm3208_vm11 = vcmp.eq.s32.totalorder %v2974_v50, %v12573_v30  ;;  %v2994_v55 = vadd.s32 920, %v15564_v18 }
 0x477   : > { %vm9553_vm14 = vmpackc.low %vm3200_vm9, %vm3198_vm8  ;;  %vm3205_vm9 = vcmp.eq.s32.totalorder %v2973_v15, %v12607_v3 }
 0x479   : > { %9544 = vmatpush1.bf16.msk.msra.mxu0 %vm9543_vm1, %v15584_v20  ;;  %vm3199_vm1 = vcmp.eq.s32.totalorder %v2970_v52, %v12607_v3  ;;  %v2995_v52 = vadd.s32 928, %v15564_v18 }
 0x47a   : > { %9546 = vmatprep.subr.msk.bf16.mxu0 %vm9545_vm4, %v15584_v20  ;;  %vm3202_vm4 = vcmp.eq.s32.totalorder %v2971_v39, %v12573_v30  ;;  %vm9555_vm2 = vmpackc.low %vm3199_vm1, %vm3197_vm5  ;;  %vm15612_vm5 = vcmask 785408   ;;  %vm3210_vm1 = vcmp.eq.s32.totalorder %v2975_v37, %v12573_v30  ;;  %v2996_v39 = vadd.s32 936, %v15564_v18 }
 0x47b   : > { %vm9557_vm7 = vmpackc.low %vm3204_vm13, %vm3202_vm4  ;;  %v2829_v35 = vsel %vm15612_vm5, %v13102_v41, 0.0  ;;  %vm3212_vm4 = vcmp.eq.s32.totalorder %v2976_v44, %v12573_v30  ;;  %vm15613_vm13 = vcmask 1039360   ;;  %v2980_v41 = vadd.s32 808, %v15564_v18 }
 0x47c   : > { %v2789_v17 = vsel %vm15613_vm13, %v13064_v6, 0.0 }
 0x47d   : > { %9548 = vmatpush1.bf16.msk.msra.mxu0 %vm9547_vm15, %v15584_v20  ;;  %vm3203_vm15 = vcmp.eq.s32.totalorder %v2972_v10, %v12607_v3  ;;  %v2797_v57 = vmax.f32 %v12905_v28, %v2789_v17  ;;  %vm3220_vm5 = vcmp.eq.s32.totalorder %v2980_v41, %v12573_v30  ;;  %v2982_v28 = vadd.s32 824, %v15564_v18 }
 0x47e   : > { %9550 = vmatprep.subr.msk.bf16.mxu0 %vm9549_vm10, %v15584_v20  ;;  %vm3206_vm10 = vcmp.eq.s32.totalorder %v2973_v15, %v12573_v30  ;;  %vm9559_vm3 = vmpackc.low %vm3203_vm15, %vm3201_vm12  ;;  %vm3209_vm12 = vcmp.eq.s32.totalorder %v2975_v37, %v12607_v3  ;;  %vm3211_vm15 = vcmp.eq.s32.totalorder %v2976_v44, %v12607_v3  ;;  %v2997_v10 = vadd.s32 944, %v15564_v18 }
 0x47f   : > { %vm9561_vm8 = vmpackc.low %vm3208_vm11, %vm3206_vm10  ;;  %vm3214_vm10 = vcmp.eq.s32.totalorder %v2977_v53, %v12573_v30  ;;  %vm3216_vm11 = vcmp.eq.s32.totalorder %v2978_v62, %v12573_v30  ;;  %v2998_v15 = vadd.s32 952, %v15564_v18  ;;  %v3000_v37 = vadd.s32 968, %v15564_v18 }
 0x480   : > { %v3001_v44 = vadd.s32 976, %v15564_v18  ;;  %v3006_v17 = vadd.s32 1016, %v15564_v18 }
 0x481   : > { %9552 = vmatpush1.bf16.msk.msra.mxu0 %vm9551_vm0, %v15584_v20  ;;  %vm3207_vm0 = vcmp.eq.s32.totalorder %v2974_v50, %v12607_v3  ;;  %v2999_v50 = vadd.s32 960, %v15564_v18 }
 0x482   : > { %9554 = vmatprep.subr.msk.bf16.mxu0 %vm9553_vm14, %v15584_v20  ;;  %vm15611_vm14 = vcmask 777216  }
 0x483   : > { %v2861_v2 = vsel %vm15611_vm14, %v13100_v11, 0.0  ;;  %v2979_v11 = vadd.s32 800, %v15564_v18 }
 0x484   : > { %v2869_v61 = vmax.f32 %v2829_v35, %v2861_v2  ;;  %v3004_v2 = vadd.s32 1000, %v15564_v18  ;;  %v3005_v35 = vadd.s32 1008, %v15564_v18 }
 0x485   : > { %9556 = vmatpush1.bf16.msk.msra.mxu0 %vm9555_vm2, %v15584_v20  ;;  %vm9563_vm2 = vmpackc.low %vm3207_vm0, %vm3205_vm9  ;;  %vm3213_vm9 = vcmp.eq.s32.totalorder %v2977_v53, %v12607_v3  ;;  %vm3215_vm0 = vcmp.eq.s32.totalorder %v2978_v62, %v12607_v3  ;;  %vm3218_vm14 = vcmp.eq.s32.totalorder %v2979_v11, %v12573_v30  ;;  %vm3217_vm13 = vcmp.eq.s32.totalorder %v2979_v11, %v12607_v3 }
 0x486   : > { %9558 = vmatprep.subr.msk.bf16.mxu0 %vm9557_vm7, %v15584_v20  ;;  %vm9565_vm7 = vmpackc.low %vm3212_vm4, %vm3210_vm1  ;;  %v2877_v6 = vmax.f32 %v2797_v57, %v2869_v61  ;;  %v3002_v53 = vadd.s32 984, %v15564_v18  ;;  %v3003_v62 = vadd.s32 992, %v15564_v18 }
 0x487   : > { %vm9571_vm1 = vmpackc.low %vm3215_vm0, %vm3213_vm9  ;;  %vm3228_vm9 = vcmp.eq.s32.totalorder %v2984_v9, %v12573_v30 }
 0x488   : > { %vm9573_vm4 = vmpackc.low %vm3220_vm5, %vm3218_vm14 }
 0x489   : > { %9560 = vmatpush1.bf16.msk.msra.mxu0 %vm9559_vm3, %v15584_v20  ;;  %vm9567_vm3 = vmpackc.low %vm3211_vm15, %vm3209_vm12  ;;  %vm3224_vm12 = vcmp.eq.s32.totalorder %v2982_v28, %v12573_v30 }
 0x48a   : > { %9562 = vmatprep.subr.msk.bf16.mxu0 %vm9561_vm8, %v15584_v20  ;;  %vm9569_vm8 = vmpackc.low %vm3216_vm11, %vm3214_vm10  ;;  %vm3221_vm11 = vcmp.eq.s32.totalorder %v2981_v59, %v12607_v3 }
 0x48d   : > { %9564 = vmatpush1.bf16.msk.msra.mxu0 %vm9563_vm2, %v15584_v20  ;;  %vm3219_vm2 = vcmp.eq.s32.totalorder %v2980_v41, %v12607_v3 }
 0x48e   : > { %9566 = vmatprep.subr.msk.bf16.mxu0 %vm9565_vm7, %v15584_v20  ;;  %vm3222_vm7 = vcmp.eq.s32.totalorder %v2981_v59, %v12573_v30  ;;  %vm9575_vm15 = vmpackc.low %vm3219_vm2, %vm3217_vm13  ;;  %vm3232_vm13 = vcmp.eq.s32.totalorder %v2986_v23, %v12573_v30 }
 0x48f   : > { %vm9577_vm10 = vmpackc.low %vm3224_vm12, %vm3222_vm7  ;;  %vm3229_vm12 = vcmp.eq.s32.totalorder %v2985_v27, %v12607_v3 }
 0x490   : > { %3992 = vmatmul.mubr.f32.vlgmr.msra.gmra.mrb[16].mxu0 %v13124_v19  ;;  %v2983_v19 = vadd.s32 832, %v15564_v18 }
 0x491   : > { %9568 = vmatpush1.bf16.msk.msra.mxu0 %vm9567_vm3, %v15584_v20  ;;  %4062 = vmatprep.mubr.f32.mxu0 %v2877_v6  ;;  %vm3223_vm3 = vcmp.eq.s32.totalorder %v2982_v28, %v12607_v3 }
 0x492   : > { %9570 = vmatprep.subr.msk.bf16.mxu0 %vm9569_vm8, %v15584_v20  ;;  %vm3226_vm8 = vcmp.eq.s32.totalorder %v2983_v19, %v12573_v30  ;;  %vm9579_vm0 = vmpackc.low %vm3223_vm3, %vm3221_vm11  ;;  %vm3225_vm5 = vcmp.eq.s32.totalorder %v2983_v19, %v12607_v3  ;;  %vm3236_vm11 = vcmp.eq.s32.totalorder %v2988_v54, %v12573_v30 }
 0x493   : > { %vm9581_vm14 = vmpackc.low %vm3228_vm9, %vm3226_vm8  ;;  %vm3233_vm9 = vcmp.eq.s32.totalorder %v2987_v58, %v12607_v3 }
 0x495   : > { %9572 = vmatpush1.bf16.msk.msra.mxu0 %vm9571_vm1, %v15584_v20  ;;  %vm3227_vm1 = vcmp.eq.s32.totalorder %v2984_v9, %v12607_v3 }
 0x496   : > { %9574 = vmatprep.subr.msk.bf16.mxu0 %vm9573_vm4, %v15584_v20  ;;  %vm3230_vm4 = vcmp.eq.s32.totalorder %v2985_v27, %v12573_v30  ;;  %vm9583_vm2 = vmpackc.low %vm3227_vm1, %vm3225_vm5  ;;  %vm3240_vm5 = vcmp.eq.s32.totalorder %v2990_v14, %v12573_v30 }
 0x497   : > { %vm9585_vm7 = vmpackc.low %vm3232_vm13, %vm3230_vm4  ;;  %vm3237_vm13 = vcmp.eq.s32.totalorder %v2989_v40, %v12607_v3 }
 0x499   : > { %9576 = vmatpush1.bf16.msk.msra.mxu0 %vm9575_vm15, %v15584_v20  ;;  %vm3231_vm15 = vcmp.eq.s32.totalorder %v2986_v23, %v12607_v3 }
 0x49a   : > { %9578 = vmatprep.subr.msk.bf16.mxu0 %vm9577_vm10, %v15584_v20  ;;  %vm3234_vm10 = vcmp.eq.s32.totalorder %v2987_v58, %v12573_v30  ;;  %vm9587_vm3 = vmpackc.low %vm3231_vm15, %vm3229_vm12  ;;  %vm3244_vm12 = vcmp.eq.s32.totalorder %v2992_v45, %v12573_v30 }
 0x49b   : > { %vm9589_vm8 = vmpackc.low %vm3236_vm11, %vm3234_vm10  ;;  %vm3241_vm11 = vcmp.eq.s32.totalorder %v2991_v56, %v12607_v3 }
 0x49d   : > { %9580 = vmatpush1.bf16.msk.msra.mxu0 %vm9579_vm0, %v15584_v20  ;;  %vm3235_vm0 = vcmp.eq.s32.totalorder %v2988_v54, %v12607_v3 }
 0x49e   : > { %9582 = vmatprep.subr.msk.bf16.mxu0 %vm9581_vm14, %v15584_v20  ;;  %vm3238_vm14 = vcmp.eq.s32.totalorder %v2989_v40, %v12573_v30  ;;  %vm9591_vm1 = vmpackc.low %vm3235_vm0, %vm3233_vm9  ;;  %vm3248_vm9 = vcmp.eq.s32.totalorder %v2994_v55, %v12573_v30 }
 0x49f   : > { %vm9593_vm4 = vmpackc.low %vm3240_vm5, %vm3238_vm14  ;;  %vm3245_vm5 = vcmp.eq.s32.totalorder %v2993_v26, %v12607_v3 }
 0x4a1   : > { %9584 = vmatpush1.bf16.msk.msra.mxu0 %vm9583_vm2, %v15584_v20  ;;  %vm3239_vm2 = vcmp.eq.s32.totalorder %v2990_v14, %v12607_v3 }
 0x4a2   : > { %9586 = vmatprep.subr.msk.bf16.mxu0 %vm9585_vm7, %v15584_v20  ;;  %vm3242_vm7 = vcmp.eq.s32.totalorder %v2991_v56, %v12573_v30  ;;  %vm9595_vm15 = vmpackc.low %vm3239_vm2, %vm3237_vm13  ;;  %vm3252_vm13 = vcmp.eq.s32.totalorder %v2996_v39, %v12573_v30 }
 0x4a3   : > { %vm9597_vm10 = vmpackc.low %vm3244_vm12, %vm3242_vm7  ;;  %vm3249_vm12 = vcmp.eq.s32.totalorder %v2995_v52, %v12607_v3 }
 0x4a5   : > { %9588 = vmatpush1.bf16.msk.msra.mxu0 %vm9587_vm3, %v15584_v20  ;;  %vm3243_vm3 = vcmp.eq.s32.totalorder %v2992_v45, %v12607_v3 }
 0x4a6   : > { %9590 = vmatprep.subr.msk.bf16.mxu0 %vm9589_vm8, %v15584_v20  ;;  %vm3246_vm8 = vcmp.eq.s32.totalorder %v2993_v26, %v12573_v30  ;;  %vm9599_vm0 = vmpackc.low %vm3243_vm3, %vm3241_vm11  ;;  %vm3256_vm11 = vcmp.eq.s32.totalorder %v2998_v15, %v12573_v30 }
 0x4a7   : > { %vm9601_vm14 = vmpackc.low %vm3248_vm9, %vm3246_vm8  ;;  %vm3253_vm9 = vcmp.eq.s32.totalorder %v2997_v10, %v12607_v3 }
 0x4a9   : > { %9592 = vmatpush1.bf16.msk.msra.mxu0 %vm9591_vm1, %v15584_v20  ;;  %vm3247_vm1 = vcmp.eq.s32.totalorder %v2994_v55, %v12607_v3 }
 0x4aa   : > { %9594 = vmatprep.subr.msk.bf16.mxu0 %vm9593_vm4, %v15584_v20  ;;  %vm3250_vm4 = vcmp.eq.s32.totalorder %v2995_v52, %v12573_v30  ;;  %vm9603_vm2 = vmpackc.low %vm3247_vm1, %vm3245_vm5  ;;  %vm3260_vm5 = vcmp.eq.s32.totalorder %v3000_v37, %v12573_v30 }
 0x4ab   : > { %vm9605_vm7 = vmpackc.low %vm3252_vm13, %vm3250_vm4  ;;  %vm3257_vm13 = vcmp.eq.s32.totalorder %v2999_v50, %v12607_v3 }
 0x4ad   : > { %9596 = vmatpush1.bf16.msk.msra.mxu0 %vm9595_vm15, %v15584_v20  ;;  %vm3251_vm15 = vcmp.eq.s32.totalorder %v2996_v39, %v12607_v3 }
 0x4ae   : > { %9598 = vmatprep.subr.msk.bf16.mxu0 %vm9597_vm10, %v15584_v20  ;;  %vm3254_vm10 = vcmp.eq.s32.totalorder %v2997_v10, %v12573_v30  ;;  %vm9607_vm3 = vmpackc.low %vm3251_vm15, %vm3249_vm12  ;;  %vm3264_vm12 = vcmp.eq.s32.totalorder %v3002_v53, %v12573_v30 }
 0x4af   : > { %vm9609_vm8 = vmpackc.low %vm3256_vm11, %vm3254_vm10  ;;  %vm3261_vm11 = vcmp.eq.s32.totalorder %v3001_v44, %v12607_v3 }
 0x4b1   : > { %9600 = vmatpush1.bf16.msk.msra.mxu0 %vm9599_vm0, %v15584_v20  ;;  %vm3255_vm0 = vcmp.eq.s32.totalorder %v2998_v15, %v12607_v3 }
 0x4b2   : > { %9602 = vmatprep.subr.msk.bf16.mxu0 %vm9601_vm14, %v15584_v20  ;;  %vm3258_vm14 = vcmp.eq.s32.totalorder %v2999_v50, %v12573_v30  ;;  %vm9611_vm1 = vmpackc.low %vm3255_vm0, %vm3253_vm9  ;;  %vm3268_vm9 = vcmp.eq.s32.totalorder %v3004_v2, %v12573_v30 }
 0x4b3   : > { %vm9613_vm4 = vmpackc.low %vm3260_vm5, %vm3258_vm14  ;;  %vm3265_vm5 = vcmp.eq.s32.totalorder %v3003_v62, %v12607_v3 }
 0x4b5   : > { %9604 = vmatpush1.bf16.msk.msra.mxu0 %vm9603_vm2, %v15584_v20  ;;  %vm3259_vm2 = vcmp.eq.s32.totalorder %v3000_v37, %v12607_v3 }
 0x4b6   : > { %9606 = vmatprep.subr.msk.bf16.mxu0 %vm9605_vm7, %v15584_v20  ;;  %vm3262_vm7 = vcmp.eq.s32.totalorder %v3001_v44, %v12573_v30  ;;  %vm9615_vm15 = vmpackc.low %vm3259_vm2, %vm3257_vm13  ;;  %vm3272_vm13 = vcmp.eq.s32.totalorder %v3006_v17, %v12573_v30 }
 0x4b7   : > { %vm9617_vm10 = vmpackc.low %vm3264_vm12, %vm3262_vm7  ;;  %vm3269_vm12 = vcmp.eq.s32.totalorder %v3005_v35, %v12607_v3 }
 0x4b9   : > { %9608 = vmatpush1.bf16.msk.msra.mxu0 %vm9607_vm3, %v15584_v20  ;;  %vm3263_vm3 = vcmp.eq.s32.totalorder %v3002_v53, %v12607_v3 }
 0x4ba   : > { %9610 = vmatprep.subr.msk.bf16.mxu0 %vm9609_vm8, %v15584_v20  ;;  %vm3266_vm8 = vcmp.eq.s32.totalorder %v3003_v62, %v12573_v30  ;;  %vm9619_vm0 = vmpackc.low %vm3263_vm3, %vm3261_vm11  ;;  %vm15038_vm11 = vcmp.ge.s32.totalorder %v12584_v33, 1  ;;  %vm15031_vm3 = vcmp.ge.s32.totalorder %v12569_v36, 1 }
 0x4bb   : > { %vm9621_vm14 = vmpackc.low %vm3268_vm9, %vm3266_vm8  ;;  %vm15033_vm8 = vcmp.ge.s32.totalorder %v12581_v46, 1  ;;  %vm15029_vm9 = vcmask 130048  }
 0x4bd   : > { %9612 = vmatpush1.bf16.msk.msra.mxu0 %vm9611_vm1, %v15584_v20  ;;  %vm3267_vm1 = vcmp.eq.s32.totalorder %v3004_v2, %v12607_v3 }
 0x4be   : > { %9614 = vmatprep.subr.msk.bf16.mxu0 %vm9613_vm4, %v15584_v20  ;;  %vm3270_vm4 = vcmp.eq.s32.totalorder %v3005_v35, %v12573_v30  ;;  %vm9623_vm2 = vmpackc.low %vm3267_vm1, %vm3265_vm5  ;;  %vm15043_vm5 = vcmp.lt.s32.totalorder %v12584_v33, 15  ;;  %vm15035_vm1 = vcmask 138240  }
 0x4bf   : > { %vm9625_vm7 = vmpackc.low %vm3272_vm13, %vm3270_vm4  ;;  %vm15614_vm4 = vcmask 7168  }
 0x4c0   : > { %vm15615_vm13 = vmmov %vm15614_vm4 }
 0x4c1   : > { %9616 = vmatpush1.bf16.msk.msra.mxu0 %vm9615_vm15, %v15584_v20  ;;  %vm3271_vm15 = vcmp.eq.s32.totalorder %v3006_v17, %v12607_v3 }
 0x4c2   : > { %9618 = vmatprep.subr.msk.bf16.mxu0 %vm9617_vm10, %v15584_v20  ;;  %vm9627_vm10 = vmpackc.low %vm3271_vm15, %vm3269_vm12  ;;  %vm15040_vm15 = vcmp.lt.s32.totalorder %v12566_v16, 15 }
 0x4c3   : > { %vm13498_vm12 = vmand %vm15033_vm8, %vm15043_vm5 }
 0x4c5   : > { %9620 = vmatpush1.bf16.msk.msra.mxu0 %vm9619_vm0, %v15584_v20  ;;  %vm15034_vm0 = vcmp.ge.s32.totalorder %v12566_v16, 1 }
 0x4c6   : > { %9622 = vmatprep.subr.msk.bf16.mxu0 %vm9621_vm14, %v15584_v20  ;;  %vm15032_vm14 = vcmask 121856  }
 0x4c9   : > { %9624 = vmatpush1.bf16.msk.msra.mxu0 %vm9623_vm2, %v15584_v20  ;;  %vm15039_vm2 = vcmp.lt.s32.totalorder %v12581_v46, 15 }
 0x4ca   : > { %9626 = vmatprep.subr.msk.bf16.mxu0 %vm9625_vm7, %v15584_v20  ;;  %vm15037_vm7 = vcmp.lt.s32.totalorder %v12569_v36, 15 }
 0x4cb   : > { %vm13516_vm6 = vmand %vm15034_vm0, %vm15037_vm7 }
 0x4cd   : > { %9628 = vmatpush1.bf16.msk.msra.mxu0 %vm9627_vm10, %v15584_v20  ;;  %vm15036_vm10 = vcmask 916480  }
 0x4d0   : > { %4063 = vmatmul.mubr.f32.vlgmr.msra.gmra.mrb[16].mxu0 %v13131_v21  ;;  %v4070_v21 = vld [vmem:[%s10820_s29] sm:$0xff] }
 0x5a3   : > { %v13456_v30 = vpop.f32.mrb[16].mxu0 }
 0x5a4   : > { %v13458_v61 = vpop.f32.mrb[17].mxu0 }
 0x5a5   : > { %v10094_v11 = vpack.i.bf16 %v13458_v61, %v13456_v30  ;;  %v10114_v3 = vpack.i.bf16 %v13456_v30, %v13458_v61 }
 0x5a7   : > { %10095 = vrot.lane.b32.xlu1 %v10094_v11, %s15056_s26  ;;  %10090 = vrot.lane.b32.xlu0 %v10094_v11, %s10759_s11 }
 0x5ab   : > { %10105 = vrot.lane.b32.xlu1 %v10094_v11, %s10760_s0  ;;  %10100 = vrot.lane.b32.xlu0 %v10094_v11, %s10761_s18 }
 0x5af   : > { %10115 = vrot.lane.b32.xlu1 %v10114_v3, %s10762_s22  ;;  %10110 = vrot.lane.b32.xlu0 %v10114_v3, %s15058_s1 }
 0x5b3   : > { %10125 = vrot.lane.b32.xlu1 %v10094_v11, %s10763_s23  ;;  %10120 = vrot.lane.b32.xlu0 %v10114_v3, %s10764_s28 }
 0x5b7   : > { %4247 = vperm.xlu0 %9903, %v4070_v21  }
 0x619   : > { %v10096_v41 = vpop.permute.xlu1 %10095  ;;  %v10091_v57 = vpop.permute.xlu0 %10090 }
 0x61a   : > { %v10098_v6 = vunpack.i.h.bf16 %v10096_v41  ;;  %v10097_v59 = vunpack.i.l.bf16 %v10096_v41  ;;  %v10093_v28 = vunpack.i.h.bf16 %v10091_v57  ;;  %v10092_v19 = vunpack.i.l.bf16 %v10091_v57 }
 0x61c   : > { %v4132_v9 = vsel %vm15614_vm4, %v10097_v59, %v10098_v6  ;;  %v4135_v27 = vsel %vm15615_vm13, 0.0, %v10097_v59  ;;  %v4099_v23 = vsel %vm15029_vm9, %v10092_v19, %v10093_v28  ;;  %v4102_v58 = vsel %vm15029_vm9, 0.0, %v10092_v19  ;;  %vm13507_vm4 = vmand %vm15034_vm0, %vm15031_vm3 }
 0x61d   : > { %v13484_v54 = vsel %vm15038_vm11, %v4135_v27, 0.0  ;;  %v4141_v40 = vsel %vm15031_vm3, %v4132_v9, 0.0  ;;  %v10106_v14 = vpop.permute.xlu1 %10105  ;;  %v10101_v56 = vpop.permute.xlu0 %10100  ;;  %v4107_v45 = vsel %vm15033_vm8, %v4102_v58, 0.0  ;;  %v4108_v26 = vsel %vm15034_vm0, %v4099_v23, 0.0  ;;  %vm13526_vm3 = vmand %vm15033_vm8, %vm15038_vm11 }
 0x61e   : > { %v10108_v52 = vunpack.i.h.bf16 %v10106_v14  ;;  %v10107_v39 = vunpack.i.l.bf16 %v10106_v14  ;;  %v10103_v10 = vunpack.i.h.bf16 %v10101_v56  ;;  %v10102_v15 = vunpack.i.l.bf16 %v10101_v56 }
 0x61f   : > { %v4215_v37 = vrot.slane %v13484_v54, 4  ;;  %v4216_v44 = vrot.slane %v4141_v40, 4  ;;  %vm15041_vm13 = vcmask 908288   ;;  %vm15042_vm9 = vcmask 924672  }
 0x620   : > { %v4114_v62 = vsel %vm15032_vm14, %v10107_v39, %v10108_v52  ;;  %v4117_v2 = vsel %vm15032_vm14, 0.0, %v10107_v39  ;;  %v4078_v17 = vsel %vm15035_vm1, %v10102_v15, %v10103_v10  ;;  %v4081_v11 = vsel %vm15035_vm1, 0.0, %v10102_v15 }
 0x621   : > { %v10116_v3 = vpop.permute.xlu1 %10115  ;;  %v10111_v21 = vpop.permute.xlu0 %10110  ;;  %v4209_v41 = vrot.slane %v4107_v45, 4  ;;  %v4210_v57 = vrot.slane %v4108_v26, 4  ;;  %v4093_v9 = vsel %vm13507_vm4, %v4078_v17, 0.0  ;;  %v4127_v27 = vsel %vm13516_vm6, %v4114_v62, 0.0  ;;  %v4302_v17 = vld [vmem:[%s15667_s3] sm:$0xf] }
 0x622   : > { %v10118_v6 = vunpack.i.h.bf16 %v10116_v3  ;;  %v10117_v59 = vunpack.i.l.bf16 %v10116_v3  ;;  %v10113_v28 = vunpack.i.h.bf16 %v10111_v21  ;;  %v10112_v19 = vunpack.i.l.bf16 %v10111_v21  ;;  %s15784_s3 = smov 3  }
 0x623   : > { %v4126_v23 = vsel %vm13498_vm12, %v4117_v2, 0.0  ;;  %v4092_v58 = vsel %vm13526_vm3, %v4081_v11, 0.0  ;;  %vm15624_vm14 = vcmask 1039360   ;;  %vm15626_vm0 = vcmask 1043456  }
 0x624   : > { %v4180_v54 = vsel %vm15036_vm10, %v10118_v6, %v10117_v59  ;;  %v4183_v40 = vsel %vm15036_vm10, %v10117_v59, 0.0  ;;  %v4146_v14 = vsel %vm15624_vm14, %v10113_v28, %v10112_v19  ;;  %vm15625_vm8 = vmmov %vm15624_vm14  ;;  %v4232_v52 = vsel %vm15626_vm0, %v4093_v9, %v4210_v57 }
 0x625   : > { %v4149_v56 = vsel %vm15625_vm8, %v10112_v19, 0.0  ;;  %v10126_v45 = vpop.permute.xlu1 %10125  ;;  %v10121_v26 = vpop.permute.xlu0 %10120  ;;  %vm15627_vm1 = vmmov %vm15626_vm0  ;;  %v4188_v10 = vsel %vm15039_vm2, %v4180_v54, 0.0  ;;  %v4189_v15 = vsel %vm15040_vm15, %v4183_v40, 0.0  ;;  %v4154_v62 = vsel %vm15043_vm5, %v4146_v14, 0.0 }
 0x626   : > { %v4234_v39 = vsel %vm15627_vm1, %v4127_v27, %v4216_v44  ;;  %v4155_v2 = vsel %vm15037_vm7, %v4149_v56, 0.0  ;;  %vm13558_vm8 = vmand %vm15040_vm15, %vm15037_vm7  ;;  %v4221_v44 = vrot.slane %v4154_v62, 4  ;;  %v10128_v3 = vunpack.i.h.bf16 %v10126_v45 }
 0x627   : > { %v4222_v11 = vrot.slane %v4155_v2, 4  ;;  %v10127_v21 = vunpack.i.l.bf16 %v10126_v45  ;;  %vm13566_vm0 = vmand %vm15039_vm2, %vm15038_vm11  ;;  %vm15632_vm14 = vcmp.ge.s32.totalorder %v12569_v36, 1  ;;  %v10123_v59 = vunpack.i.h.bf16 %v10121_v26 }
 0x628   : > { %vm13574_vm1 = vmand %vm15040_vm15, %vm15632_vm14  ;;  %v10122_v28 = vunpack.i.l.bf16 %v10121_v26  ;;  %v4240_v19 = vpack.c.bf16 %v4234_v39, %v4232_v52  ;;  %vm15635_vm10 = vcmask 1043456   ;;  %v4227_v27 = vrot.slane %v4188_v10, 4 }
 0x629   : > { %v4231_v9 = vsel %vm15635_vm10, %v4092_v58, %v4209_v41  ;;  %v4228_v54 = vrot.slane %v4189_v15, 4  ;;  %v4198_v40 = vsel %vm15041_vm13, %v10128_v3, 0.0  ;;  %vm15636_vm7 = vmmov %vm15635_vm10  ;;  %v4195_v39 = vsel %vm15041_vm13, %v10127_v21, %v10128_v3 }
 0x62a   : > { %v4233_v14 = vsel %vm15636_vm7, %v4126_v23, %v4215_v37  ;;  %vm13585_vm11 = vmand %vm15039_vm2, %vm15043_vm5  ;;  %v4161_v45 = vsel %vm15042_vm9, %v10123_v59, %v10122_v28  ;;  %v4164_v26 = vsel %vm15042_vm9, %v10122_v28, 0.0  ;;  %4259 = vmatprep.subr.bf16.mxu1 %v4240_v19  ;;  %v4235_v52 = vsel %vm15636_vm7, %v13456_v30, %v4221_v44  ;;  %v4069_v44 = vld [vmem:[%s10815_s25] sm:$0xf] }
 0x62b   : > { %v4239_v41 = vpack.c.bf16 %v4233_v14, %v4231_v9  ;;  %vm15639_vm10 = vmmov %vm15636_vm7  ;;  %v4173_v37 = vsel %vm13566_vm0, %v4161_v45, 0.0  ;;  %v4174_v23 = vsel %vm13574_vm1, %v4164_v26, 0.0  ;;  %v4206_v10 = vsel %vm13558_vm8, %v4198_v40, 0.0 }
 0x62c   : > { %v4236_v58 = vsel %vm15639_vm10, %v13458_v61, %v4222_v11  ;;  %vm15640_vm14 = vmmov %vm15636_vm7  ;;  %v4205_v62 = vsel %vm13585_vm11, %v4195_v39, 0.0  ;;  %v4244_v59 = vpack.c.bf16 %v4206_v10, %v4206_v10  ;;  %vm15642_vm10 = vcmask 1041408  }
 0x62d   : > { %4260 = vmatpush1.bf16.msra.mxu1 %v4239_v41  ;;  %v4238_v15 = vsel %vm15640_vm14, %v4174_v23, %v4228_v54  ;;  %vm15641_vm2 = vmmov %vm15636_vm7  ;;  %v4243_v28 = vpack.c.bf16 %v4205_v62, %v4205_v62  ;;  %vm15644_vm15 = vcmask 293888   ;;  %vm15648_vm14 = vcmask 138240  }
 0x62e   : > { %v4237_v61 = vsel %vm15641_vm2, %v4173_v37, %v4227_v27  ;;  %v4242_v2 = vpack.c.bf16 %v4238_v15, %v4236_v58  ;;  %vm15643_vm7 = vmmov %vm15642_vm10  ;;  %v4303_v58 = vld [vmem:[%s15645_s8] sm:$0xff]  ;;  %vm15646_vm2 = vcmask 130048   ;;  %vm15651_vm9 = vcmp.ge.s32.totalorder %v12581_v46, 1  ;;  %s15852_s8 = smov 126  }
 0x62f   : > { %v4241_v11 = vpack.c.bf16 %v4237_v61, %v4235_v52  ;;  %v4254_v30 = vsel %vm15643_vm7, %v4243_v28, 0  ;;  %vm15650_vm7 = vcmp.ge.s32.totalorder %v12566_v16, 1  ;;  %v13685_v57 = vshra.s32 %v15565_v51, 3 }
 0x630   : > { %4261 = vmatprep.subr.bf16.mxu1 %v4242_v2  ;;  %vm8481_vm13 = vmpackc.low %vm15650_vm7, %vm13507_vm4  ;;  %vm15656_vm7 = vcmp.ge.s32.totalorder %v12569_v36, 1 }
 0x631   : > { %4262 = vmatpush1.bf16.msra.mxu1 %v4241_v11  ;;  %vm8487_vm5 = vmpackc.low %vm15656_vm7, %vm13516_vm6  ;;  %vm10765_vm6 = vmmov 1   ;;  %vm15664_vm7 = vcmask 908288   ;;  %v4488_v56 = vshll.u32 %v13685_v57, 5 }
 0x632   : > { %8479 = vmatprep.subr.msk.bf16.mxu1 %vm15642_vm10, %v4244_v59  ;;  %vm15649_vm10 = vmmov %vm15648_vm14 }
 0x635   : > { %4264 = vmatpush1.bf16.msra.mxu1 %v4254_v30 }
 0x636   : > { %v4248_v3 = vpop.permute.xlu0 %4247 }
 0x638   : > { %8480 = vmatmul.mubr.msk.bf16.vlgmr.msra.gmra.mrb[16].mxu1 %vm15644_vm15, %v4069_v44  ;;  %vm15647_vm15 = vmmov %vm15646_vm2 }
 0x639   : > { %4443 = vmatprep.mubr.bf16.mxu1 %v15335_v1 }
 0x70b   : > { %v4293_v21 = vpop.f32.mrb[16].mxu1 }
 0x70c   : > { %v4294_v19 = vadd.f32 %v4293_v21, %v4248_v3  ;;  %v4295_v9 = vpop.f32.mrb[17].mxu1 }
 0x70d   : > { %v4296_v27 = vadd.f32 %v4295_v9, %v4248_v3  ;;  %v4297_v54 = vpop.f32.mrb[18].mxu1 }
 0x70e   : > { %v13611_v40 = vmax.f32 %v4294_v19, 0.0  ;;  %v4298_v14 = vpop.f32.mrb[19].mxu1 }
 0x70f   : > { %v13613_v45 = vmax.f32 %v4296_v27, 0.0 }
 0x711   : > { %v10134_v26 = vpack.i.bf16 %v13613_v45, %v13611_v40  ;;  %v10154_v41 = vpack.i.bf16 %v13611_v40, %v13613_v45 }
 0x713   : > { %10135 = vrot.lane.b32.xlu0 %v10134_v26, %s10759_s11  ;;  %10130 = vrot.lane.b32.xlu1 %v10134_v26, %s10761_s18  ;;  %s10771_s11 = smov 121   ;;  %s10773_s18 = smov 120  }
 0x717   : > { %10145 = vrot.lane.b32.xlu0 %v10134_v26, %s15056_s26  ;;  %10140 = vrot.lane.b32.xlu1 %v10134_v26, %s10760_s0  ;;  %s10772_s0 = smov 119  }
 0x71b   : > { %10155 = vrot.lane.b32.xlu0 %v10154_v41, %s10764_s28  ;;  %10150 = vrot.lane.b32.xlu1 %v10154_v41, %s15058_s1  ;;  %s10774_s28 = smov 4  }
 0x71f   : > { %10165 = vrot.lane.b32.xlu0 %v10134_v26, %s10763_s23  ;;  %10160 = vrot.lane.b32.xlu1 %v10154_v41, %s10762_s22 }
 0x723   : > { %4398 = vperm.xlu1 %10169, %v4303_v58  }
 0x785   : > { %v10136_v37 = vpop.permute.xlu0 %10135  ;;  %v10131_v23 = vpop.permute.xlu1 %10130 }
 0x786   : > { %v10138_v52 = vunpack.i.h.bf16 %v10136_v37  ;;  %v10137_v39 = vunpack.i.l.bf16 %v10136_v37  ;;  %v10133_v10 = vunpack.i.h.bf16 %v10131_v23  ;;  %v10132_v15 = vunpack.i.l.bf16 %v10131_v23 }
 0x788   : > { %v4320_v61 = vsel %vm15646_vm2, %v10137_v39, %v10138_v52  ;;  %v4323_v62 = vsel %vm15647_vm15, 0.0, %v10137_v39  ;;  %v4310_v2 = vsel %vm15648_vm14, %v10132_v15, %v10133_v10  ;;  %v4313_v11 = vsel %vm15649_vm10, 0.0, %v10132_v15  ;;  %vm8484_vm2 = vmpackc.low %vm15651_vm9, %vm13526_vm3 }
 0x789   : > { %v8485_v59 = vpack.c.bf16 %v4323_v62, %v4313_v11  ;;  %v10146_v28 = vpop.permute.xlu0 %10145  ;;  %v10141_v30 = vpop.permute.xlu1 %10140  ;;  %v8482_v44 = vpack.c.bf16 %v4320_v61, %v4310_v2  ;;  %vm15652_vm15 = vcmask 7168   ;;  %vm15654_vm10 = vcmask 121856  }
 0x78a   : > { %v10148_v3 = vunpack.i.h.bf16 %v10146_v28  ;;  %v10147_v21 = vunpack.i.l.bf16 %v10146_v28  ;;  %v10143_v19 = vunpack.i.h.bf16 %v10141_v30  ;;  %v10142_v9 = vunpack.i.l.bf16 %v10141_v30  ;;  %vm15653_vm14 = vmmov %vm15652_vm15 }
 0x78b   : > { %8483 = vmatprep.subr.msk.bf16.mxu1 %vm8481_vm13, %v8482_v44  ;;  %vm15655_vm4 = vmmov %vm15654_vm10  ;;  %vm15657_vm3 = vcmp.ge.s32.totalorder %v12584_v33, 1  ;;  %vm15658_vm13 = vcmask 1039360  }
 0x78c   : > { %v4340_v27 = vsel %vm15652_vm15, %v10147_v21, %v10148_v3  ;;  %v4343_v50 = vsel %vm15653_vm14, 0.0, %v10147_v21  ;;  %v4330_v54 = vsel %vm15654_vm10, %v10142_v9, %v10143_v19  ;;  %v4333_v14 = vsel %vm15655_vm4, 0.0, %v10142_v9  ;;  %8486 = vmatpush1.bf16.msk.msra.mxu1 %vm8484_vm2, %v8485_v59  ;;  %vm8490_vm9 = vmpackc.low %vm15657_vm3, %vm13498_vm12 }
 0x78d   : > { %v8491_v35 = vpack.c.bf16 %v4343_v50, %v4333_v14  ;;  %v10156_v26 = vpop.permute.xlu0 %10155  ;;  %v10151_v41 = vpop.permute.xlu1 %10150  ;;  %v8488_v58 = vpack.c.bf16 %v4340_v27, %v4330_v54  ;;  %vm15659_vm2 = vmmov %vm15658_vm13  ;;  %vm15660_vm15 = vcmp.lt.s32.totalorder %v12569_v36, 15  ;;  %vm15661_vm12 = vcmp.lt.s32.totalorder %v12584_v33, 15 }
 0x78e   : > { %v10153_v37 = vunpack.i.h.bf16 %v10151_v41  ;;  %v10152_v23 = vunpack.i.l.bf16 %v10151_v41  ;;  %v10158_v52 = vunpack.i.h.bf16 %v10156_v26  ;;  %v10157_v39 = vunpack.i.l.bf16 %v10156_v26  ;;  %vm8493_vm14 = vmpackc.low %vm15660_vm15, %vm10765_vm6  ;;  %v15681_v26 = vld [vmem:[#allocation33_spill] sm:$0xff] }
 0x78f   : > { %8489 = vmatprep.subr.msk.bf16.mxu1 %vm8487_vm5, %v8488_v58  ;;  %vm8496_vm5 = vmpackc.low %vm15661_vm12, %vm10765_vm6  ;;  %vm15662_vm10 = vcmask 924672   ;;  %vm15665_vm3 = vcmask 916480  }
 0x790   : > { %v4350_v10 = vsel %vm15658_vm13, %v10153_v37, %v10152_v23  ;;  %v4353_v53 = vsel %vm15659_vm2, %v10152_v23, 0.0  ;;  %8492 = vmatpush1.bf16.msk.msra.mxu1 %vm8490_vm9, %v8491_v35  ;;  %v4360_v30 = vsel %vm15662_vm10, %v10158_v52, %v10157_v39  ;;  %vm15663_vm4 = vmmov %vm15662_vm10  ;;  %vm15668_vm13 = vcmp.lt.s32.totalorder %v12566_v16, 15  ;;  %v15680_v35 = vld [vmem:[#allocation29_spill] sm:$0xff] }
 0x791   : > { %v8494_v55 = vpack.c.bf16 %v4353_v53, %v13613_v45  ;;  %v8497_v15 = vpack.c.bf16 %v4350_v10, %v13611_v40  ;;  %v10166_v61 = vpop.permute.xlu0 %10165  ;;  %v10161_v62 = vpop.permute.xlu1 %10160  ;;  %v4363_v44 = vsel %vm15663_vm4, %v10157_v39, 0.0  ;;  %vm15666_vm9 = vmmov %vm15665_vm3 }
 0x792   : > { %v10168_v2 = vunpack.i.h.bf16 %v10166_v61  ;;  %v10167_v11 = vunpack.i.l.bf16 %v10166_v61  ;;  %v10163_v59 = vunpack.i.h.bf16 %v10161_v62  ;;  %v10162_v28 = vunpack.i.l.bf16 %v10161_v62  ;;  %vm8499_vm2 = vmpackc.low %vm15668_vm13, %vm13574_vm1 }
 0x793   : > { %8495 = vmatprep.subr.msk.bf16.mxu1 %vm8493_vm14, %v8494_v55  ;;  %vm15669_vm15 = vmmov %vm15664_vm7  ;;  %vm15670_vm14 = vcmp.lt.s32.totalorder %v12581_v46, 15  ;;  %vm15671_vm1 = vcmask 1043456   ;;  %v13688_v46 = vand.u32 7, %v15565_v51 }
 0x794   : > { %v4383_v36 = vsel %vm15664_vm7, %v10168_v2, 0.0  ;;  %v4370_v45 = vsel %vm15665_vm3, %v10163_v59, %v10162_v28  ;;  %v4373_v40 = vsel %vm15666_vm9, %v10162_v28, 0.0  ;;  %8498 = vmatpush1.bf16.msk.msra.mxu1 %vm8496_vm5, %v8497_v15  ;;  %v4380_v33 = vsel %vm15669_vm15, %v10167_v11, %v10168_v2  ;;  %vm8502_vm12 = vmpackc.low %vm15670_vm14, %vm13566_vm0 }
 0x795   : > { %v4385_v3 = vsel %vm13558_vm8, %v4383_v36, 0.0  ;;  %v8500_v21 = vpack.c.bf16 %v4373_v40, %v4363_v44  ;;  %v8503_v19 = vpack.c.bf16 %v4370_v45, %v4360_v30  ;;  %v4384_v9 = vsel %vm13585_vm11, %v4380_v33, 0.0  ;;  %vm15672_vm5 = vmmov %vm15671_vm1 }
 0x796   : > { %v4395_v27 = vpack.c.bf16 %v4385_v3, %v4385_v3  ;;  %v4394_v6 = vpack.c.bf16 %v4384_v9, %v4384_v9  ;;  %vm4401_vm8 = vcmask 588800   ;;  %v4489_v50 = vshll.u32 %v13688_v46, 1 }
 0x797   : > { %8501 = vmatprep.subr.msk.bf16.mxu1 %vm8499_vm2, %v8500_v21  ;;  %v10766_v3 = vmov 0.0  }
 0x798   : > { %8504 = vmatpush1.bf16.msk.msra.mxu1 %vm8502_vm12, %v8503_v19  ;;  %v4406_v16 = vsel %vm15672_vm5, %v4394_v6, 0  ;;  %v13692_v54 = vadd.s32 %v4489_v50, %v4488_v56  ;;  %v4659_v6 = vld [vmem:[%s10840_s19] sm:$0xff] }
 0x799   : > { %8505 = vmatprep.subr.msk.bf16.mxu1 %vm15671_vm1, %v4395_v27  ;;  %v4660_v27 = vld [vmem:[%s10840_s19 + $0x8] sm:$0xff] }
 0x79a   : > { %vm4507_vm11 = vcmp.eq.s32.totalorder %v12702_v4, %v13692_v54  ;;  %vm4508_vm0 = vcmp.eq.s32.totalorder %v12705_v7, %v13692_v54  ;;  %vm4491_vm10 = vcmp.eq.s32.totalorder %v15564_v18, %v13692_v54  ;;  %vm4492_vm4 = vcmp.eq.s32.totalorder %v12576_v25, %v13692_v54 }
 0x79b   : > { %vm9629_vm7 = vmpackc.low %vm4508_vm0, %vm4507_vm11  ;;  %vm4509_vm3 = vcmp.eq.s32.totalorder %v12718_v24, %v13692_v54  ;;  %vm4510_vm9 = vcmp.eq.s32.totalorder %v12721_v12, %v13692_v54  ;;  %vm4493_vm13 = vcmp.eq.s32.totalorder %v12587_v0, %v13692_v54  ;;  %vm4494_vm2 = vcmp.eq.s32.totalorder %v12590_v13, %v13692_v54 }
 0x79c   : > { %4420 = vmatpush1.bf16.msra.mxu1 %v4406_v16  ;;  %vm9631_vm15 = vmpackc.low %vm4492_vm4, %vm4491_vm10  ;;  %vm4511_vm14 = vcmp.eq.s32.totalorder %v12734_v42, %v13692_v54  ;;  %vm4512_vm12 = vcmp.eq.s32.totalorder %v12737_v38, %v13692_v54  ;;  %vm4495_vm0 = vcmp.eq.s32.totalorder %v12602_v47, %v13692_v54  ;;  %vm4513_vm10 = vcmp.eq.s32.totalorder %v12750_v5, %v13692_v54  ;;  %v15674_v38 = vld [vmem:[#allocation32_spill] sm:$0xff]  ;;  %v15675_v5 = vld [vmem:[#allocation34_spill] sm:$0xff] }
 0x79d   : > { %9630 = vmatprep.subr.msk.bf16.mxu1 %vm9629_vm7, %v15584_v20  ;;  %vm9633_vm1 = vmpackc.low %vm4510_vm9, %vm4509_vm3  ;;  %vm4496_vm7 = vcmp.eq.s32.totalorder %v12605_v34, %v13692_v54  ;;  %vm4514_vm4 = vcmp.eq.s32.totalorder %v12753_v43, %v13692_v54 }
 0x79e   : > { %vm9635_vm5 = vmpackc.low %vm4494_vm2, %vm4493_vm13  ;;  %vm4497_vm13 = vcmp.eq.s32.totalorder %v12622_v22, %v13692_v54  ;;  %vm4498_vm2 = vcmp.eq.s32.totalorder %v12625_v32, %v13692_v54 }
 0x79f   : > { %8506 = vmatmul.mubr.msk.bf16.vlgmr.msra.gmra.mrb[20].mxu1 %vm4401_vm8, %v4302_v17  ;;  %vm9637_vm11 = vmpackc.low %vm4512_vm12, %vm4511_vm14  ;;  %vm4516_vm14 = vcmp.eq.s32.totalorder %v12778_v8, %v13692_v54  ;;  %v15677_v8 = vld [vmem:[#allocation28_spill] sm:$0xff] }
 0x7a0   : > { %9632 = vmatpush3.bf16.msk.msra.mxu1 %vm9631_vm15, %v15584_v20  ;;  %vm9639_vm3 = vmpackc.low %vm4496_vm7, %vm4495_vm0  ;;  %vm4515_vm15 = vcmp.eq.s32.totalorder %v12775_v48, %v13692_v54  ;;  %vm4517_vm7 = vcmp.eq.s32.totalorder %v12791_v49, %v13692_v54  ;;  %v15678_v49 = vld [vmem:[#allocation30_spill] sm:$0xff] }
 0x7a1   : > { %9634 = vmatprep.subr.msk.bf16.mxu1 %vm9633_vm1, %v15584_v20  ;;  %vm9641_vm9 = vmpackc.low %vm4514_vm4, %vm4513_vm10  ;;  %vm4518_vm10 = vcmp.eq.s32.totalorder %v12794_v29, %v13692_v54  ;;  %vm4501_vm4 = vcmp.eq.s32.totalorder %v12654_v60, %v13692_v54  ;;  %v15676_v60 = vld [vmem:[#allocation27_spill] sm:$0xff] }
 0x7a2   : > { %vm9643_vm12 = vmpackc.low %vm4498_vm2, %vm4497_vm13  ;;  %v4399_v4 = vpop.permute.xlu1 %4398  ;;  %vm4519_vm2 = vcmp.eq.s32.totalorder %v15674_v38, %v13692_v54  ;;  %v15679_v29 = vld [vmem:[#allocation31_spill] sm:$0xff] }
 0x7a3   : > { %vm9645_vm1 = vmpackc.low %vm4516_vm14, %vm4515_vm15  ;;  %vm4520_vm15 = vcmp.eq.s32.totalorder %v15675_v5, %v13692_v54  ;;  %vm4503_vm14 = vcmp.eq.s32.totalorder %v15676_v60, %v13692_v54 }
 0x7a4   : > { %9636 = vmatpush3.bf16.msk.msra.mxu1 %vm9635_vm5, %v15584_v20  ;;  %vm4499_vm5 = vcmp.eq.s32.totalorder %v12638_v31, %v13692_v54  ;;  %v15673_v31 = vld [vmem:[#allocation26_spill] sm:$0xff] }
 0x7a5   : > { %9638 = vmatprep.subr.msk.bf16.mxu1 %vm9637_vm11, %v15584_v20  ;;  %vm4500_vm11 = vcmp.eq.s32.totalorder %v12641_v63, %v13692_v54 }
 0x7a6   : > { %vm9647_vm0 = vmpackc.low %vm4500_vm11, %vm4499_vm5  ;;  %vm4521_vm5 = vcmp.eq.s32.totalorder %v15678_v49, %v13692_v54  ;;  %vm4522_vm11 = vcmp.eq.s32.totalorder %v15679_v29, %v13692_v54 }
 0x7a8   : > { %9640 = vmatpush3.bf16.msk.msra.mxu1 %vm9639_vm3, %v15584_v20  ;;  %vm4502_vm3 = vcmp.eq.s32.totalorder %v15673_v31, %v13692_v54 }
 0x7a9   : > { %9642 = vmatprep.subr.msk.bf16.mxu1 %vm9641_vm9, %v15584_v20  ;;  %vm9649_vm9 = vmpackc.low %vm4518_vm10, %vm4517_vm7  ;;  %vm4505_vm7 = vcmp.eq.s32.totalorder %v15680_v35, %v13692_v54  ;;  %vm4506_vm10 = vcmp.eq.s32.totalorder %v15681_v26, %v13692_v54 }
 0x7aa   : > { %vm9651_vm13 = vmpackc.low %vm4502_vm3, %vm4501_vm4 }
 0x7ab   : > { %vm9657_vm4 = vmpackc.low %vm4522_vm11, %vm4521_vm5  ;;  %vm4666_vm5 = vcmp.ge.s32.totalorder %v13685_v57, 1  ;;  %vm4667_vm11 = vcmp.ge.s32.totalorder %v13688_v46, 1 }
 0x7ac   : > { %9644 = vmatpush3.bf16.msk.msra.mxu1 %vm9643_vm12, %v15584_v20  ;;  %vm9653_vm12 = vmpackc.low %vm4520_vm15, %vm4519_vm2  ;;  %vm15684_vm2 = vcmask 916480  }
 0x7ad   : > { %9646 = vmatprep.subr.msk.bf16.mxu1 %vm9645_vm1, %v15584_v20  ;;  %vm4504_vm1 = vcmp.eq.s32.totalorder %v15677_v8, %v13692_v54  ;;  %vm9659_vm3 = vmpackc.low %vm4506_vm10, %vm4505_vm7  ;;  %vm4685_vm10 = vcmp.lt.s32.totalorder %v13688_v46, 7 }
 0x7ae   : > { %vm15685_vm15 = vmmov %vm15684_vm2 }
 0x7af   : > { %vm13802_vm7 = vmand %vm4666_vm5, %vm4667_vm11 }
 0x7b0   : > { %9648 = vmatpush3.bf16.msk.msra.mxu1 %vm9647_vm0, %v15584_v20  ;;  %vm9655_vm0 = vmpackc.low %vm4504_vm1, %vm4503_vm14  ;;  %vm15686_vm14 = vcmask 908288   ;;  %vm15044_vm1 = vmmov 0  }
 0x7b1   : > { %9650 = vmatprep.subr.msk.bf16.mxu1 %vm9649_vm9, %v15584_v20  ;;  %vm15682_vm9 = vcmask 1039360  }
 0x7b4   : > { %9652 = vmatpush3.bf16.msk.msra.mxu1 %vm9651_vm13, %v15584_v20  ;;  %vm15683_vm13 = vmmov %vm15682_vm9 }
 0x7b5   : > { %9654 = vmatprep.subr.msk.bf16.mxu1 %vm9653_vm12, %v15584_v20  ;;  %vm15687_vm12 = vmmov %vm15686_vm14 }
 0x7b8   : > { %9656 = vmatpush3.bf16.msk.msra.mxu1 %vm9655_vm0, %v15584_v20  ;;  %vm15048_vm0 = vcmask 64512  }
 0x7b9   : > { %9658 = vmatprep.subr.msk.bf16.mxu1 %vm9657_vm4, %v15584_v20  ;;  %vm15690_vm4 = vcmask 72704  }
 0x7bc   : > { %9660 = vmatpush3.bf16.msk.msra.mxu1 %vm9659_vm3, %v15584_v20  ;;  %vm8572_vm3 = vmpackc.low %vm4666_vm5, %vm13802_vm7 }
 0x7bd   : > { %9242 = vmatprep.subr.bf16.mxu1 %v10766_v3 }
 0x872   : > { %v4445_v63 = vpop.f32.mrb[20].mxu1 }
 0x873   : > { %v4446_v7 = vadd.f32 %v4445_v63, %v4399_v4  ;;  %v4447_v24 = vpop.f32.mrb[21].mxu1 }
 0x874   : > { %v4448_v12 = vadd.f32 %v4447_v24, %v4399_v4  ;;  %v4449_v42 = vpop.f32.mrb[22].mxu1 }
 0x875   : > { %v4452_v43 = vmax.f32 %v4446_v7, 0.0  ;;  %v4450_v48 = vpop.f32.mrb[23].mxu1 }
 0x876   : > { %v4453_v14 = vmax.f32 %v4448_v12, 0.0  ;;  %v14037_v48 = vshra.s32 %v15565_v51, 2 }
 0x878   : > { %v10175_v41 = vpack.i.bf16 %v4452_v43, %v4453_v14 }
 0x87a   : > { %10176 = vrot.lane.b32.xlu1 %v10175_v41, %s10762_s22  ;;  %10171 = vrot.lane.b32.xlu0 %v10175_v41, %s15058_s1  ;;  %s15716_s22 = sld [smem:[#allocation6_spill]] }
 0x87e   : > { %10181 = vrot.lane.b32.xlu0 %v10175_v41, %s10763_s23  ;;  %s15736_s23 = sld [smem:[#allocation8_spill]] }
 0x8ec   : > { %v10177_v58 = vpop.permute.xlu1 %10176  ;;  %v10172_v37 = vpop.permute.xlu0 %10171 }
 0x8ed   : > { %v10174_v23 = vunpack.i.h.bf16 %v10172_v37  ;;  %v10173_v52 = vunpack.i.l.bf16 %v10172_v37  ;;  %v10179_v39 = vunpack.i.h.bf16 %v10177_v58  ;;  %v10178_v10 = vunpack.i.l.bf16 %v10177_v58 }
 0x8ef   : > { %v4460_v55 = vsel %vm15682_vm9, %v10174_v23, %v10173_v52  ;;  %v4463_v15 = vsel %vm15683_vm13, %v10173_v52, 0.0  ;;  %v4470_v2 = vsel %vm15684_vm2, %v10179_v39, %v10178_v10  ;;  %v4473_v11 = vsel %vm15685_vm15, %v10178_v10, 0.0  ;;  %vm13817_vm13 = vmand %vm4666_vm5, %vm4685_vm10  ;;  %v10645_v52 = vld [vmem:[%s10835_s14] sm:$0xff]  }
 0x8f0   : > { %v10182_v53 = vpop.permute.xlu0 %10181  ;;  %v4464_v30 = vmax.f32 %v4452_v43, %v4460_v55  ;;  %v4465_v36 = vmax.f32 %v4453_v14, %v4463_v15  ;;  %vm15045_vm9 = vcmask 56320   ;;  %vm15693_vm2 = vcmask 7168   ;;  %vm8575_vm15 = vmpackc.low %vm4667_vm11, %vm13817_vm13 }
 0x8f1   : > { %v10184_v61 = vunpack.i.h.bf16 %v10182_v53  ;;  %v10183_v62 = vunpack.i.l.bf16 %v10182_v53 }
 0x8f3   : > { %v4478_v59 = vsel %vm15686_vm14, %v10184_v61, %v10183_v62  ;;  %v4481_v28 = vsel %vm15687_vm12, %v10183_v62, 0.0  ;;  %vm4700_vm14 = vcmask 515072   ;;  %vm4710_vm12 = vcmp.lt.s32.totalorder %v13685_v57, 7 }
 0x8f4   : > { %v4482_v44 = vmax.f32 %v4470_v2, %v4478_v59  ;;  %v4483_v45 = vmax.f32 %v4473_v11, %v4481_v28 }
 0x8f6   : > { %v4485_v40 = vmax.f32 %v4465_v36, %v4483_v45  ;;  %v4484_v33 = vmax.f32 %v4464_v30, %v4482_v44  ;;  %v4804_v44 = vld [vmem:[%s10850_s30 + $0x8] sm:$0xff]  ;;  %v4803_v36 = vld [vmem:[%s10850_s30] sm:$0xff] }
 0x8f7   : > { %v10646_v45 = vld [vmem:[%s10845_s24 + $0x4] ss:$8 sps:$4 sm:$0xff]  }
 0x8f8   : > { %4651 = vmatprep.mubr.f32.mxu1 %v4485_v40 }
 0x8f9   : > { %4652 = vmatmul.mubr.f32.vlgmr.msra.gmra.mrb[24].mxu1 %v4484_v33 }
 0x8fa   : > { %9252 = vmatprep.mubr.msk.bf16.mxu1 %vm15044_vm1, %v10766_v3  ;;  %vm15051_vm1 = vcmask 457728  }
 0x9cc   : > { %v9033_v21 = vpop.f32.mrb[24].mxu1 }
 0x9cd   : > { %v9034_v19 = vpop.f32.mrb[25].mxu1 }
 0x9ce   : > { %v9035_v9 = vadd.f32 %v9034_v19, %v9033_v21 }
 0x9d0   : > { %4672 = vrot.lane.b32.xlu0 %v9035_v9, %s10767_s2  ;;  %4662 = vrot.lane.b32.xlu1 %v9035_v9, %s10768_s7 }
 0x9d4   : > { %4690 = vrot.lane.b32.xlu0 %v9035_v9, %s15056_s26  ;;  %4680 = vrot.lane.b32.xlu1 %v9035_v9, %s10769_s10 }
 0x9d8   : > { %4705 = vrot.lane.b32.xlu0 %v9035_v9, %s10771_s11  ;;  %4697 = vrot.lane.b32.xlu1 %v9035_v9, %s15058_s1 }
 0x9dc   : > { %4723 = vrot.lane.b32.xlu0 %v9035_v9, %s10772_s0  ;;  %4715 = vrot.lane.b32.xlu1 %v9035_v9, %s10773_s18 }
 0x9e0   : > { %4744 = vperm.xlu0 %9903, %v4660_v27   ;;  %4739 = vperm.xlu1 %10169, %v4659_v6  }
 0xa42   : > { %v4673_v17 = vpop.permute.xlu0 %4672  ;;  %v4663_v56 = vpop.permute.xlu1 %4662 }
 0xa43   : > { %v4676_v50 = vsel %vm15048_vm0, 0.0, %v4673_v17  ;;  %v4665_v54 = vsel %vm15690_vm4, 0.0, %v4663_v56  ;;  %vm8578_vm4 = vmpackc.low %vm4685_vm10, %vm10765_vm6 }
 0xa44   : > { %v8573_v4 = vpack.c.bf16 %v4676_v50, %v4665_v54 }
 0xa46   : > { %v4691_v63 = vpop.permute.xlu0 %4690  ;;  %9243 = vmatpush3.bf16.msk.msra.mxu1 %vm8572_vm3, %v8573_v4  ;;  %v4681_v7 = vpop.permute.xlu1 %4680  ;;  %vm4708_vm3 = vcmask 465920  }
 0xa47   : > { %v4693_v24 = vsel %vm15693_vm2, 0.0, %v4691_v63  ;;  %v4684_v12 = vsel %vm15045_vm9, 0.0, %v4681_v7  ;;  %9244 = vmatprep.subr.bf16.mxu1 %v10766_v3  ;;  %vm15046_vm2 = vcmask 449536   ;;  %vm13838_vm9 = vmand %vm4710_vm12, %vm4667_vm11 }
 0xa48   : > { %v8576_v42 = vpack.c.bf16 %v4693_v24, %v4684_v12  ;;  %vm8581_vm6 = vmpackc.low %vm4710_vm12, %vm13838_vm9 }
 0xa4a   : > { %v4706_v38 = vpop.permute.xlu0 %4705  ;;  %9245 = vmatpush3.bf16.msk.msra.mxu1 %vm8575_vm15, %v8576_v42  ;;  %v4698_v5 = vpop.permute.xlu1 %4697  ;;  %vm13846_vm15 = vmand %vm4710_vm12, %vm4685_vm10 }
 0xa4b   : > { %v4701_v60 = vsel %vm4700_vm14, %v4698_v5, 0.0  ;;  %9246 = vmatprep.subr.bf16.mxu1 %v10766_v3  ;;  %v4709_v14 = vsel %vm4708_vm3, %v4706_v38, 0.0 }
 0xa4c   : > { %v8579_v43 = vpack.c.bf16 %v4701_v60, %v9035_v9 }
 0xa4e   : > { %v4724_v49 = vpop.permute.xlu0 %4723  ;;  %9247 = vmatpush3.bf16.msk.msra.mxu1 %vm8578_vm4, %v8579_v43  ;;  %v4716_v29 = vpop.permute.xlu1 %4715  ;;  %vm15698_vm4 = vcmask 1043456  }
 0xa4f   : > { %v4727_v35 = vsel %vm15046_vm2, %v4724_v49, 0.0  ;;  %v4719_v26 = vsel %vm15051_vm1, %v4716_v29, 0.0  ;;  %9248 = vmatprep.subr.bf16.mxu1 %v10766_v3  ;;  %vm15047_vm2 = vmpackc.low %vm13802_vm7, %vm13802_vm7 }
 0xa50   : > { %v4731_v41 = vsel %vm13846_vm15, %v4727_v35, 0.0  ;;  %v8582_v58 = vpack.c.bf16 %v4719_v26, %v4709_v14 }
 0xa51   : > { %v4736_v37 = vpack.c.bf16 %v4731_v41, %v4731_v41 }
 0xa52   : > { %9249 = vmatpush3.bf16.msk.msra.mxu1 %vm8581_vm6, %v8582_v58  ;;  %vm15700_vm6 = vcmask 72704  }
 0xa53   : > { %9250 = vmatprep.subr.bf16.mxu1 %v10766_v3  ;;  %v4756_v23 = vsel %vm15698_vm4, %v4736_v37, 0  ;;  %vm15701_vm4 = vmmov %vm15700_vm6 }
 0xa56   : > { %9251 = vmatpush3.bf16.msra.mxu1 %v4756_v23 }
 0xa57   : > { %4918 = vmatprep.subr.bf16.mxu1 %v15335_v1 }
 0xa59   : > { %9253 = vmatmul.mubr.msk.bf16.vlgmr.msra.gmra.mrb[28].mxu1 %vm4401_vm8, %v10645_v52  ;;  %vm15699_vm8 = vcmask 130048  }
 0xa5a   : > { %8611 = vmatprep.mubr.msk.bf16.mxu1 %vm15699_vm8, %v10646_v45  ;;  %vm13893_vm8 = vmpackc.low %vm4666_vm5, %vm4666_vm5  ;;  %vm15706_vm5 = vcmask 7168  }
 0xa5f   : > { %v4740_v39 = vpop.permute.xlu1 %4739  ;;  %v4745_v15 = vpop.permute.xlu0 %4744 }
 0xb2c   : > { %v4792_v10 = vpop.f32.mrb[28].mxu1 }
 0xb2d   : > { %v4793_v53 = vadd.f32 %v4792_v10, %v4740_v39  ;;  %v9254_v55 = vpop.f32.mrb[29].mxu1 }
 0xb2e   : > { %v4795_v61 = vpop.f32.mrb[30].mxu1 }
 0xb2f   : > { %v4796_v62 = vadd.f32 %v4795_v61, %v4745_v15  ;;  %v9255_v2 = vpop.f32.mrb[31].mxu1  ;;  %v4799_v11 = vmax.f32 %v4793_v53, 0.0 }
 0xb31   : > { %v4800_v59 = vmax.f32 %v4796_v62, 0.0 }
 0xb33   : > { %v10190_v28 = vpack.i.bf16 %v4800_v59, %v4799_v11  ;;  %v4891_v30 = vpack.c.bf16 %v4800_v59, %v4799_v11 }
 0xb35   : > { %10191 = vrot.lane.b32.xlu0 %v10190_v28, %s10767_s2  ;;  %10186 = vrot.lane.b32.xlu1 %v10190_v28, %s10768_s7 }
 0xb39   : > { %10201 = vrot.lane.b32.xlu0 %v10190_v28, %s15056_s26  ;;  %10196 = vrot.lane.b32.xlu1 %v10190_v28, %s10769_s10 }
 0xb3d   : > { %10211 = vrot.lane.b32.xlu0 %v10190_v28, %s10771_s11  ;;  %10206 = vrot.lane.b32.xlu1 %v10190_v28, %s15058_s1 }
 0xb41   : > { %10221 = vrot.lane.b32.xlu0 %v10190_v28, %s10772_s0  ;;  %10216 = vrot.lane.b32.xlu1 %v10190_v28, %s10773_s18 }
 0xb45   : > { %4903 = vperm.xlu0 %9903, %v4804_v44   ;;  %4898 = vperm.xlu1 %10169, %v4803_v36  }
 0xba7   : > { %v10192_v40 = vpop.permute.xlu0 %10191  ;;  %v10187_v33 = vpop.permute.xlu1 %10186 }
 0xba8   : > { %v10194_v21 = vunpack.i.h.bf16 %v10192_v40  ;;  %v10193_v19 = vunpack.i.l.bf16 %v10192_v40  ;;  %v10189_v9 = vunpack.i.h.bf16 %v10187_v33  ;;  %v10188_v27 = vunpack.i.l.bf16 %v10187_v33 }
 0xba9   : > { %v5155_v40 = vshll.u32 %v14037_v48, 4 }
 0xbaa   : > { %v4814_v6 = vsel %vm15700_vm6, 0.0, %v10189_v9  ;;  %v4813_v17 = vsel %vm15701_vm4, 0.0, %v10188_v27  ;;  %v4824_v54 = vsel %vm15048_vm0, 0.0, %v10194_v21  ;;  %v4823_v4 = vsel %vm15048_vm0, 0.0, %v10193_v19  ;;  %vm15707_vm0 = vmmov %vm15706_vm5  ;;  %v10648_v9 = vld [vmem:[%s10845_s24] ss:$8 sps:$4 sm:$0xff]  }
 0xbab   : > { %v8588_v56 = vpack.c.bf16 %v4814_v6, %v4813_v17  ;;  %v10197_v50 = vpop.permute.xlu1 %10196  ;;  %v10202_v24 = vpop.permute.xlu0 %10201  ;;  %v8591_v42 = vpack.c.bf16 %v4824_v54, %v4823_v4  ;;  %vm15704_vm6 = vcmask 56320  }
 0xbac   : > { %v10199_v63 = vunpack.i.h.bf16 %v10197_v50  ;;  %v10198_v7 = vunpack.i.l.bf16 %v10197_v50  ;;  %v10204_v38 = vunpack.i.h.bf16 %v10202_v24  ;;  %v10203_v5 = vunpack.i.l.bf16 %v10202_v24  ;;  %vm15705_vm4 = vmmov %vm15704_vm6 }
 0xbad   : > { %8589 = vmatpush1.bf16.msk.msra.mxu1 %vm15047_vm2, %v8588_v56  ;;  %vm8593_vm2 = vmpackc.low %vm13817_vm13, %vm13817_vm13 }
 0xbae   : > { %4920 = vmatprep.subr.bf16.mxu1 %v15335_v1  ;;  %v4834_v60 = vsel %vm15704_vm6, 0.0, %v10199_v63  ;;  %v4833_v43 = vsel %vm15705_vm4, 0.0, %v10198_v7  ;;  %v4844_v29 = vsel %vm15706_vm5, 0.0, %v10204_v38  ;;  %v4843_v14 = vsel %vm15707_vm0, 0.0, %v10203_v5  ;;  %vm13916_vm6 = vmpackc.low %vm4667_vm11, %vm4667_vm11  ;;  %v4964_v5 = vld [vmem:[%s10860_s12 + $0x8] sm:$0xff] }
 0xbaf   : > { %v8594_v49 = vpack.c.bf16 %v4834_v60, %v4833_v43  ;;  %v10207_v35 = vpop.permute.xlu1 %10206  ;;  %v8597_v41 = vpack.c.bf16 %v4844_v29, %v4843_v14  ;;  %v10212_v23 = vpop.permute.xlu0 %10211  ;;  %vm13929_vm11 = vmpackc.low %vm4685_vm10, %vm4685_vm10  ;;  %vm15714_vm4 = vcmask 449536   ;;  %v4963_v60 = vld [vmem:[%s10860_s12] sm:$0xff] }
 0xbb0   : > { %v10209_v58 = vunpack.i.h.bf16 %v10207_v35  ;;  %v10208_v37 = vunpack.i.l.bf16 %v10207_v35  ;;  %v10214_v52 = vunpack.i.h.bf16 %v10212_v23  ;;  %v10213_v39 = vunpack.i.l.bf16 %v10212_v23  ;;  %vm15049_vm0 = vmpackc.low %vm13838_vm9, %vm13838_vm9  ;;  %v10649_v43 = vld [vmem:[%s15716_s22 + $0x4] ss:$8 sps:$4 sm:$0xff]  }
 0xbb1   : > { %8592 = vmatpush1.bf16.msk.msra.mxu1 %vm13893_vm8, %v8591_v42  ;;  %vm13952_vm10 = vmpackc.low %vm4710_vm12, %vm4710_vm12  ;;  %vm15717_vm12 = vcmask 130048  }
 0xbb2   : > { %4922 = vmatprep.subr.bf16.mxu1 %v15335_v1  ;;  %v4854_v10 = vsel %vm4700_vm14, %v10209_v58, 0.0  ;;  %v4853_v53 = vsel %vm4700_vm14, %v10208_v37, 0.0  ;;  %v4864_v62 = vsel %vm4708_vm3, %v10214_v52, 0.0  ;;  %v4863_v2 = vsel %vm4708_vm3, %v10213_v39, 0.0  ;;  %vm15715_vm5 = vmmov %vm15714_vm4 }
 0xbb3   : > { %v10217_v55 = vpop.permute.xlu1 %10216  ;;  %v8600_v61 = vpack.c.bf16 %v4854_v10, %v4853_v53  ;;  %v10222_v28 = vpop.permute.xlu0 %10221  ;;  %v8603_v46 = vpack.c.bf16 %v4864_v62, %v4863_v2 }
 0xbb4   : > { %v10219_v11 = vunpack.i.h.bf16 %v10217_v55  ;;  %v10218_v59 = vunpack.i.l.bf16 %v10217_v55  ;;  %v10223_v44 = vunpack.i.l.bf16 %v10222_v28 }
 0xbb5   : > { %8595 = vmatpush1.bf16.msk.msra.mxu1 %vm8593_vm2, %v8594_v49 }
 0xbb6   : > { %4924 = vmatprep.subr.bf16.mxu1 %v15335_v1  ;;  %v4874_v36 = vsel %vm15051_vm1, %v10219_v11, 0.0  ;;  %v4873_v45 = vsel %vm15051_vm1, %v10218_v59, 0.0  ;;  %v4883_v19 = vsel %vm15715_vm5, %v10223_v44, 0.0 }
 0xbb7   : > { %v8606_v33 = vpack.c.bf16 %v4874_v36, %v4873_v45 }
 0xbb9   : > { %8598 = vmatpush1.bf16.msk.msra.mxu1 %vm13916_vm6, %v8597_v41 }
 0xbba   : > { %4926 = vmatprep.subr.bf16.mxu1 %v15335_v1 }
 0xbbd   : > { %4927 = vmatpush1.bf16.msra.mxu1 %v4891_v30  ;;  %v10224_v30 = vunpack.i.h.bf16 %v10222_v28 }
 0xbbe   : > { %4928 = vmatprep.subr.bf16.mxu1 %v15335_v1 }
 0xbbf   : > { %v4884_v21 = vsel %vm15714_vm4, %v10224_v30, 0.0  ;;  %vm15718_vm4 = vcmask 72704  }
 0xbc0   : > { %v8609_v57 = vpack.c.bf16 %v4884_v21, %v4883_v19  ;;  %vm15719_vm5 = vmmov %vm15718_vm4 }
 0xbc1   : > { %8601 = vmatpush1.bf16.msk.msra.mxu1 %vm13929_vm11, %v8600_v61 }
 0xbc2   : > { %4930 = vmatprep.subr.bf16.mxu1 %v15335_v1 }
 0xbc4   : > { %v4899_v27 = vpop.permute.xlu1 %4898  ;;  %v4904_v50 = vpop.permute.xlu0 %4903 }
 0xbc5   : > { %8604 = vmatpush1.bf16.msk.msra.mxu1 %vm15049_vm0, %v8603_v46  ;;  %vm15050_vm0 = vmpackc.low %vm13846_vm15, %vm13846_vm15 }
 0xbc6   : > { %4932 = vmatprep.subr.bf16.mxu1 %v15335_v1 }
 0xbc9   : > { %8607 = vmatpush1.bf16.msk.msra.mxu1 %vm13952_vm10, %v8606_v33 }
 0xbca   : > { %4934 = vmatprep.subr.bf16.mxu1 %v15335_v1 }
 0xbcd   : > { %8610 = vmatpush1.bf16.msk.msra.mxu1 %vm15050_vm0, %v8609_v57  ;;  %vm15720_vm0 = vcmask 64512  }
 0xbce   : > { %5078 = vmatprep.subr.bf16.mxu1 %v15335_v1  ;;  %vm15721_vm1 = vmmov %vm15720_vm0 }
 0xbd0   : > { %4951 = vmatmul.mubr.bf16.vlgmr.msra.gmra.mrb[32].mxu1 %v10648_v9 }
 0xbd1   : > { %8638 = vmatprep.mubr.msk.bf16.mxu1 %vm15717_vm12, %v10649_v43  ;;  %vm15722_vm12 = vmpackc.low %vm13802_vm7, %vm13802_vm7  ;;  %vm15727_vm7 = vcmask 457728   ;;  %v10651_v43 = vld [vmem:[%s15716_s22] ss:$8 sps:$4 sm:$0xff]  }
 0xbd2   : > { %vm15728_vm13 = vmmov %vm15727_vm7 }
 0xca3   : > { %v4952_v6 = vpop.f32.mrb[32].mxu1 }
 0xca4   : > { %v4953_v17 = vadd.f32 %v4952_v6, %v4899_v27  ;;  %v4954_v56 = vpop.f32.mrb[33].mxu1 }
 0xca5   : > { %v4955_v54 = vpop.f32.mrb[34].mxu1 }
 0xca6   : > { %v4956_v4 = vadd.f32 %v4955_v54, %v4904_v50  ;;  %v4957_v63 = vpop.f32.mrb[35].mxu1  ;;  %v4959_v7 = vmax.f32 %v4953_v17, 0.0 }
 0xca8   : > { %v4960_v24 = vmax.f32 %v4956_v4, 0.0 }
 0xcaa   : > { %v10230_v42 = vpack.i.bf16 %v4960_v24, %v4959_v7  ;;  %v5051_v38 = vpack.c.bf16 %v4960_v24, %v4959_v7 }
 0xcac   : > { %10231 = vrot.lane.b32.xlu0 %v10230_v42, %s10767_s2  ;;  %10226 = vrot.lane.b32.xlu1 %v10230_v42, %s10768_s7  ;;  %s15060_s2 = smov 5   ;;  %s15067_s7 = smov 3  }
 0xcb0   : > { %10241 = vrot.lane.b32.xlu0 %v10230_v42, %s15056_s26  ;;  %10236 = vrot.lane.b32.xlu1 %v10230_v42, %s10769_s10  ;;  %s15737_s10 = sld [smem:[#allocation7_spill]] }
 0xcb4   : > { %10251 = vrot.lane.b32.xlu0 %v10230_v42, %s10771_s11  ;;  %10246 = vrot.lane.b32.xlu1 %v10230_v42, %s15058_s1  ;;  %s15065_s11 = smov 125  }
 0xcb8   : > { %10261 = vrot.lane.b32.xlu0 %v10230_v42, %s10772_s0  ;;  %10256 = vrot.lane.b32.xlu1 %v10230_v42, %s10773_s18 }
 0xcbc   : > { %5063 = vperm.xlu0 %9903, %v4964_v5   ;;  %5058 = vperm.xlu1 %10169, %v4963_v60  }
 0xd1e   : > { %v10232_v49 = vpop.permute.xlu0 %10231  ;;  %v10227_v29 = vpop.permute.xlu1 %10226 }
 0xd1f   : > { %v10234_v14 = vunpack.i.h.bf16 %v10232_v49  ;;  %v10233_v35 = vunpack.i.l.bf16 %v10232_v49  ;;  %v10229_v41 = vunpack.i.h.bf16 %v10227_v29  ;;  %v10228_v58 = vunpack.i.l.bf16 %v10227_v29 }
 0xd20   : > { %v14040_v49 = vand.u32 3, %v15565_v51 }
 0xd21   : > { %v4974_v37 = vsel %vm15718_vm4, 0.0, %v10229_v41  ;;  %v4973_v23 = vsel %vm15719_vm5, 0.0, %v10228_v58  ;;  %v4984_v10 = vsel %vm15720_vm0, 0.0, %v10234_v14  ;;  %v4983_v53 = vsel %vm15721_vm1, 0.0, %v10233_v35 }
 0xd22   : > { %v8615_v52 = vpack.c.bf16 %v4974_v37, %v4973_v23  ;;  %v10237_v39 = vpop.permute.xlu1 %10236  ;;  %v10242_v62 = vpop.permute.xlu0 %10241  ;;  %v8618_v2 = vpack.c.bf16 %v4984_v10, %v4983_v53  ;;  %vm15723_vm4 = vcmask 56320   ;;  %vm15725_vm1 = vcmask 7168  }
 0xd23   : > { %v10239_v55 = vunpack.i.h.bf16 %v10237_v39  ;;  %v10238_v61 = vunpack.i.l.bf16 %v10237_v39  ;;  %v10244_v11 = vunpack.i.h.bf16 %v10242_v62  ;;  %v10243_v59 = vunpack.i.l.bf16 %v10242_v62  ;;  %vm15724_vm5 = vmmov %vm15723_vm4 }
 0xd24   : > { %8616 = vmatpush1.bf16.msk.msra.mxu1 %vm15722_vm12, %v8615_v52  ;;  %vm15726_vm0 = vmmov %vm15725_vm1  ;;  %v5156_v29 = vshll.u32 %v14040_v49, 1 }
 0xd25   : > { %5080 = vmatprep.subr.bf16.mxu1 %v15335_v1  ;;  %v4994_v28 = vsel %vm15723_vm4, 0.0, %v10239_v55  ;;  %v4993_v46 = vsel %vm15724_vm5, 0.0, %v10238_v61  ;;  %v5004_v44 = vsel %vm15725_vm1, 0.0, %v10244_v11  ;;  %v5003_v16 = vsel %vm15726_vm0, 0.0, %v10243_v59 }
 0xd26   : > { %v8621_v30 = vpack.c.bf16 %v4994_v28, %v4993_v46  ;;  %v10247_v36 = vpop.permute.xlu1 %10246  ;;  %v8624_v45 = vpack.c.bf16 %v5004_v44, %v5003_v16  ;;  %v10252_v21 = vpop.permute.xlu0 %10251  ;;  %v5157_v14 = vadd.s32 %v5156_v29, %v5155_v40 }
 0xd27   : > { %v10249_v33 = vunpack.i.h.bf16 %v10247_v36  ;;  %v10248_v12 = vunpack.i.l.bf16 %v10247_v36  ;;  %v10254_v19 = vunpack.i.h.bf16 %v10252_v21  ;;  %v10253_v57 = vunpack.i.l.bf16 %v10252_v21 }
 0xd28   : > { %8619 = vmatpush1.bf16.msk.msra.mxu1 %vm13893_vm8, %v8618_v2  ;;  %vm5161_vm12 = vcmp.eq.s32.totalorder %v12590_v13, %v5157_v14  ;;  %vm5162_vm5 = vcmp.eq.s32.totalorder %v12602_v47, %v5157_v14  ;;  %vm5163_vm1 = vcmp.eq.s32.totalorder %v12605_v34, %v5157_v14 }
 0xd29   : > { %5082 = vmatprep.subr.bf16.mxu1 %v15335_v1  ;;  %v5014_v9 = vsel %vm4700_vm14, %v10249_v33, 0.0  ;;  %v5013_v27 = vsel %vm4700_vm14, %v10248_v12, 0.0  ;;  %v5024_v17 = vsel %vm4708_vm3, %v10254_v19, 0.0  ;;  %v5023_v56 = vsel %vm4708_vm3, %v10253_v57, 0.0  ;;  %vm15729_vm3 = vmpackc.low %vm13838_vm9, %vm13838_vm9  ;;  %v5269_v19 = vld [vmem:[%s15736_s23 + $0x8] sm:$0xff]  ;;  %v5268_v57 = vld [vmem:[%s15736_s23] sm:$0xff] }
 0xd2a   : > { %v10257_v31 = vpop.permute.xlu1 %10256  ;;  %v8627_v6 = vpack.c.bf16 %v5014_v9, %v5013_v27  ;;  %v10262_v54 = vpop.permute.xlu0 %10261  ;;  %v8630_v4 = vpack.c.bf16 %v5024_v17, %v5023_v56  ;;  %vm15732_vm9 = vmpackc.low %vm13846_vm15, %vm13846_vm15  ;;  %vm5160_vm15 = vcmp.eq.s32.totalorder %v12587_v0, %v5157_v14  ;;  %v5271_v9 = vld [vmem:[%s15736_s23 + $0x18] sm:$0xff]  ;;  %v5270_v27 = vld [vmem:[%s15736_s23 + $0x10] sm:$0xff] }
 0xd2b   : > { %v10259_v50 = vunpack.i.h.bf16 %v10257_v31  ;;  %v10258_v26 = vunpack.i.l.bf16 %v10257_v31  ;;  %v10264_v63 = vunpack.i.h.bf16 %v10262_v54  ;;  %v10263_v7 = vunpack.i.l.bf16 %v10262_v54  ;;  %vm9665_vm4 = vmpackc.low %vm5161_vm12, %vm5160_vm15  ;;  %v10652_v31 = vld [vmem:[%s15737_s10 + $0x4] ss:$8 sps:$4 sm:$0xff]  }
 0xd2c   : > { %8622 = vmatpush1.bf16.msk.msra.mxu1 %vm8593_vm2, %v8621_v30  ;;  %vm15730_vm2 = vcmask 449536   ;;  %vm9669_vm0 = vmpackc.low %vm5163_vm1, %vm5162_vm5  ;;  %vm5284_vm15 = vcmp.ge.s32.totalorder %v14040_v49, 1  ;;  %vm5280_vm12 = vcmask 39936   ;;  %vm5296_vm5 = vcmask 31744  }
 0xd2d   : > { %5084 = vmatprep.subr.bf16.mxu1 %v15335_v1  ;;  %v5034_v24 = vsel %vm15727_vm7, %v10259_v50, 0.0  ;;  %v5033_v42 = vsel %vm15728_vm13, %v10258_v26, 0.0  ;;  %vm15731_vm8 = vmmov %vm15730_vm2  ;;  %vm5164_vm7 = vcmp.eq.s32.totalorder %v12622_v22, %v5157_v14  ;;  %vm5165_vm13 = vcmp.eq.s32.totalorder %v12625_v32, %v5157_v14 }
 0xd2e   : > { %v8633_v15 = vpack.c.bf16 %v5034_v24, %v5033_v42  ;;  %v5043_v5 = vsel %vm15731_vm8, %v10263_v7, 0.0 }
 0xd30   : > { %8625 = vmatpush1.bf16.msk.msra.mxu1 %vm13916_vm6, %v8624_v45  ;;  %vm5158_vm6 = vcmp.eq.s32.totalorder %v15564_v18, %v5157_v14 }
 0xd31   : > { %5086 = vmatprep.subr.bf16.mxu1 %v15335_v1 }
 0xd34   : > { %5087 = vmatpush1.bf16.msra.mxu1 %v5051_v38  ;;  %v5044_v38 = vsel %vm15730_vm2, %v10264_v63, 0.0  ;;  %vm15733_vm2 = vcmask 457728  }
 0xd35   : > { %5088 = vmatprep.subr.bf16.mxu1 %v15335_v1  ;;  %v8636_v60 = vpack.c.bf16 %v5044_v38, %v5043_v5 }
 0xd38   : > { %8628 = vmatpush1.bf16.msk.msra.mxu1 %vm13929_vm11, %v8627_v6  ;;  %vm5159_vm11 = vcmp.eq.s32.totalorder %v12576_v25, %v5157_v14 }
 0xd39   : > { %5090 = vmatprep.subr.bf16.mxu1 %v15335_v1 }
 0xd3b   : > { %v5059_v8 = vpop.permute.xlu1 %5058  ;;  %v5064_v37 = vpop.permute.xlu0 %5063 }
 0xd3c   : > { %8631 = vmatpush1.bf16.msk.msra.mxu1 %vm15729_vm3, %v8630_v4  ;;  %vm9673_vm3 = vmpackc.low %vm5165_vm13, %vm5164_vm7  ;;  %vm5309_vm7 = vcmask 23552  }
 0xd3d   : > { %5092 = vmatprep.subr.bf16.mxu1 %v15335_v1 }
 0xd40   : > { %8634 = vmatpush1.bf16.msk.msra.mxu1 %vm13952_vm10, %v8633_v15  ;;  %vm9661_vm10 = vmpackc.low %vm5159_vm11, %vm5158_vm6 }
 0xd41   : > { %5094 = vmatprep.subr.bf16.mxu1 %v15335_v1  ;;  %vm15734_vm6 = vmmov %vm15731_vm8 }
 0xd42   : > { %vm15735_vm11 = vmmov %vm15733_vm2 }
 0xd44   : > { %8637 = vmatpush1.bf16.msk.msra.mxu1 %vm15732_vm9, %v8636_v60  ;;  %vm15052_vm9 = vcmask 523264  }
 0xd45   : > { %9662 = vmatprep.subr.msk.bf16.mxu1 %vm9661_vm10, %v15584_v20 }
 0xd47   : > { %5111 = vmatmul.mubr.bf16.vlgmr.msra.gmra.mrb[36].mxu1 %v10651_v43 }
 0xd48   : > { %9664 = vmatpush3.bf16.msk.msra.mxu1 %vm9661_vm10, %v15584_v20  ;;  %vm5283_vm10 = vcmp.ge.s32.totalorder %v14037_v48, 1 }
 0xd49   : > { %9666 = vmatprep.subr.msk.bf16.mxu1 %vm9665_vm4, %v15584_v20  ;;  %vm14118_vm13 = vmpackc.low %vm5283_vm10, %vm5283_vm10 }
 0xd4c   : > { %9668 = vmatpush3.bf16.msk.msra.mxu1 %vm9665_vm4, %v15584_v20  ;;  %vm5285_vm4 = vmand %vm5283_vm10, %vm5284_vm15 }
 0xd4d   : > { %9670 = vmatprep.subr.msk.bf16.mxu1 %vm9669_vm0, %v15584_v20  ;;  %vm14105_vm1 = vmpackc.low %vm5285_vm4, %vm5285_vm4 }
 0xd50   : > { %9672 = vmatpush3.bf16.msk.msra.mxu1 %vm9669_vm0, %v15584_v20  ;;  %vm5312_vm0 = vcmp.lt.s32.totalorder %v14040_v49, 3  ;;  %v10657_v49 = vld [vmem:[%s15737_s10 + $0x10] ss:$8 sps:$4 sm:$0xff]  }
 0xd51   : > { %9674 = vmatprep.subr.msk.bf16.mxu1 %vm9673_vm3, %v15584_v20 }
 0xd54   : > { %9676 = vmatpush3.bf16.msk.msra.mxu1 %vm9673_vm3, %v15584_v20  ;;  %vm5313_vm3 = vmand %vm5283_vm10, %vm5312_vm0  ;;  %vm15749_vm10 = vcmask 121856  }
 0xd55   : > { %5437 = vmatprep.subr.bf16.mxu1 %v15335_v1  ;;  %vm15750_vm4 = vmmov %vm15749_vm10 }
 0xe1a   : > { %v5112_v35 = vpop.f32.mrb[36].mxu1 }
 0xe1b   : > { %v5113_v41 = vadd.f32 %v5112_v35, %v5059_v8  ;;  %v5114_v58 = vpop.f32.mrb[37].mxu1 }
 0xe1c   : > { %v5115_v0 = vpop.f32.mrb[38].mxu1 }
 0xe1d   : > { %v5119_v13 = vmax.f32 %v5113_v41, 0.0  ;;  %v5116_v23 = vadd.f32 %v5115_v0, %v5064_v37  ;;  %v5117_v52 = vpop.f32.mrb[39].mxu1 }
 0xe1f   : > { %5133 = vrot.lane.b32.xlu0 %v5119_v13, %s10773_s18  ;;  %5123 = vrot.lane.b32.xlu1 %v5119_v13, %s15058_s1  ;;  %v5120_v47 = vmax.f32 %v5116_v23, 0.0 }
 0xe23   : > { %5125 = vrot.lane.b32.xlu0 %v5120_v47, %s15058_s1  ;;  %5141 = vrot.lane.b32.xlu1 %v5119_v13, %s10772_s0 }
 0xe27   : > { %5143 = vrot.lane.b32.xlu0 %v5120_v47, %s10772_s0  ;;  %5135 = vrot.lane.b32.xlu1 %v5120_v47, %s10773_s18  ;;  %s15054_s0 = smov 123   ;;  %s15063_s18 = smov 124  }
 0xe91   : > { %v5134_v34 = vpop.permute.xlu0 %5133  ;;  %v5124_v22 = vpop.permute.xlu1 %5123 }
 0xe92   : > { %v5129_v32 = vsel %vm4700_vm14, %v5124_v22, 0.0  ;;  %v5139_v53 = vsel %vm15733_vm2, %v5134_v34, 0.0  ;;  %vm14131_vm2 = vmpackc.low %vm5313_vm3, %vm5313_vm3  ;;  %vm5348_vm3 = vcmask 105472  }
 0xe93   : > { %v5131_v61 = vmax.f32 %v5119_v13, %v5129_v32 }
 0xe95   : > { %v5126_v39 = vpop.permute.xlu0 %5125  ;;  %v5142_v10 = vpop.permute.xlu1 %5141 }
 0xe96   : > { %v5147_v55 = vsel %vm15731_vm8, %v5142_v10, 0.0  ;;  %v5130_v2 = vsel %vm4700_vm14, %v5126_v39, 0.0  ;;  %vm15738_vm14 = vcmask 130048   ;;  %vm15745_vm8 = vcmask 7168  }
 0xe97   : > { %v5149_v62 = vmax.f32 %v5139_v53, %v5147_v55  ;;  %v5132_v44 = vmax.f32 %v5120_v47, %v5130_v2 }
 0xe99   : > { %v5151_v11 = vmax.f32 %v5131_v61, %v5149_v62  ;;  %v5144_v59 = vpop.permute.xlu0 %5143  ;;  %v5136_v28 = vpop.permute.xlu1 %5135 }
 0xe9a   : > { %v5148_v46 = vsel %vm15734_vm6, %v5144_v59, 0.0  ;;  %v5140_v30 = vsel %vm15735_vm11, %v5136_v28, 0.0  ;;  %vm15746_vm6 = vmmov %vm15745_vm8 }
 0xe9b   : > { %v5150_v16 = vmax.f32 %v5140_v30, %v5148_v46  ;;  %9272 = vmatprep.mubr.msk.f32.mxu1 %vm15052_vm9, %v5151_v11  ;;  %vm14143_vm11 = vmpackc.low %vm5284_vm15, %vm5284_vm15 }
 0xe9d   : > { %v5152_v36 = vmax.f32 %v5132_v44, %v5150_v16 }
 0xe9f   : > { %9273 = vmatmul.mubr.msk.f32.vlgmr.msra.gmra.mrb[26].mxu1 %vm15052_vm9, %v5152_v36 }
 0xea0   : > { %8685 = vmatprep.mubr.msk.bf16.mxu1 %vm15738_vm14, %v10652_v31  ;;  %vm5351_vm14 = vcmp.lt.s32.totalorder %v14037_v48, 3  ;;  %v10655_v48 = vld [vmem:[%s15737_s10 + $0x14] ss:$8 sps:$4 sm:$0xff]  }
 0xea1   : > { %vm5379_vm9 = vmand %vm5351_vm14, %vm5312_vm0 }
 0xf72   : > { %v14075_v45 = vpop.f32.mrb[26].mxu1 }
 0xf73   : > { %v14077_v33 = vpop.f32.mrb[27].mxu1 }
 0xf74   : > { %v10270_v12 = vpack.i.bf16 %v14075_v45, %v14077_v33  ;;  %v5388_v21 = vpack.c.bf16 %v14075_v45, %v14077_v33 }
 0xf76   : > { %10271 = vrot.lane.b32.xlu0 %v10270_v12, %s10774_s28  ;;  %10266 = vrot.lane.b32.xlu1 %v10270_v12, %s15060_s2 }
 0xf7a   : > { %10281 = vrot.lane.b32.xlu0 %v10270_v12, %s15056_s26  ;;  %10276 = vrot.lane.b32.xlu1 %v10270_v12, %s15067_s7  ;;  %s15761_s26 = sld [smem:[#allocation10_spill]] }
 0xf7e   : > { %10291 = vrot.lane.b32.xlu0 %v10270_v12, %s15065_s11  ;;  %10286 = vrot.lane.b32.xlu1 %v10270_v12, %s15058_s1 }
 0xf82   : > { %10301 = vrot.lane.b32.xlu0 %v10270_v12, %s15054_s0  ;;  %10296 = vrot.lane.b32.xlu1 %v10270_v12, %s15063_s18  ;;  %s15760_s0 = sld [smem:[#allocation9_spill]] }
 0xf86   : > { %5400 = vperm.xlu0 %9903, %v5269_v19   ;;  %5395 = vperm.xlu1 %10169, %v5268_v57  }
 0xf8a   : > { %5410 = vperm.xlu0 %9903, %v5271_v9   ;;  %5405 = vperm.xlu1 %10169, %v5270_v27  }
 0xfe8   : > { %v10272_v6 = vpop.permute.xlu0 %10271  ;;  %v10267_v17 = vpop.permute.xlu1 %10266 }
 0xfe9   : > { %v10274_v56 = vunpack.i.h.bf16 %v10272_v6  ;;  %v10273_v50 = vunpack.i.l.bf16 %v10272_v6  ;;  %v10269_v26 = vunpack.i.h.bf16 %v10267_v17  ;;  %v10268_v54 = vunpack.i.l.bf16 %v10267_v17  ;;  %v10654_v6 = vld [vmem:[%s15737_s10] ss:$8 sps:$4 sm:$0xff]  }
 0xfeb   : > { %v5282_v4 = vsel %vm5280_vm12, 0.0, %v10269_v26  ;;  %v5281_v63 = vsel %vm5280_vm12, 0.0, %v10268_v54  ;;  %v5298_v15 = vsel %vm5296_vm5, 0.0, %v10274_v56  ;;  %v5297_v38 = vsel %vm5296_vm5, 0.0, %v10273_v50 }
 0xfec   : > { %v8662_v24 = vpack.c.bf16 %v5282_v4, %v5281_v63  ;;  %v10277_v42 = vpop.permute.xlu1 %10276  ;;  %v10282_v43 = vpop.permute.xlu0 %10281  ;;  %v8665_v29 = vpack.c.bf16 %v5298_v15, %v5297_v38 }
 0xfed   : > { %v10279_v5 = vunpack.i.h.bf16 %v10277_v42  ;;  %v10278_v60 = vunpack.i.l.bf16 %v10277_v42  ;;  %v10284_v14 = vunpack.i.h.bf16 %v10282_v43  ;;  %v10283_v8 = vunpack.i.l.bf16 %v10282_v43 }
 0xfee   : > { %8663 = vmatpush1.bf16.msk.msra.mxu1 %vm14105_vm1, %v8662_v24 }
 0xfef   : > { %5439 = vmatprep.subr.bf16.mxu1 %v15335_v1  ;;  %v5311_v35 = vsel %vm5309_vm7, 0.0, %v10279_v5  ;;  %v5310_v41 = vsel %vm5309_vm7, 0.0, %v10278_v60  ;;  %v5325_v0 = vsel %vm15745_vm8, 0.0, %v10284_v14  ;;  %v5324_v13 = vsel %vm15746_vm6, 0.0, %v10283_v8  ;;  %vm14160_vm8 = vmpackc.low %vm5312_vm0, %vm5312_vm0 }
 0xff0   : > { %v8668_v37 = vpack.c.bf16 %v5311_v35, %v5310_v41  ;;  %v10287_v23 = vpop.permute.xlu1 %10286  ;;  %v8671_v47 = vpack.c.bf16 %v5325_v0, %v5324_v13  ;;  %v10292_v32 = vpop.permute.xlu0 %10291  ;;  %vm5352_vm6 = vmand %vm5351_vm14, %vm5284_vm15  ;;  %vm15062_vm15 = vcmask 89088   ;;  %vm15759_vm0 = vcmask 130048  }
 0xff1   : > { %v10289_v34 = vunpack.i.h.bf16 %v10287_v23  ;;  %v10288_v22 = vunpack.i.l.bf16 %v10287_v23  ;;  %v10294_v39 = vunpack.i.h.bf16 %v10292_v32  ;;  %v10293_v10 = vunpack.i.l.bf16 %v10292_v32  ;;  %v5499_v32 = vld [vmem:[%s15761_s26 + $0x8] sm:$0xff] }
 0xff2   : > { %8666 = vmatpush1.bf16.msk.msra.mxu1 %vm14118_vm13, %v8665_v29 }
 0xff3   : > { %5441 = vmatprep.subr.bf16.mxu1 %v15335_v1  ;;  %v5337_v53 = vsel %vm15749_vm10, %v10289_v34, 0.0  ;;  %v5336_v55 = vsel %vm15750_vm4, %v10288_v22, 0.0  ;;  %v5350_v11 = vsel %vm5348_vm3, %v10294_v39, 0.0  ;;  %v5349_v59 = vsel %vm5348_vm3, %v10293_v10, 0.0  ;;  %vm14173_vm4 = vmpackc.low %vm5352_vm6, %vm5352_vm6  ;;  %v5498_v34 = vld [vmem:[%s15761_s26] sm:$0xff]  ;;  %v5500_v22 = vld [vmem:[%s15761_s26 + $0x10] sm:$0xff] }
 0xff4   : > { %v10297_v61 = vpop.permute.xlu1 %10296  ;;  %v8674_v2 = vpack.c.bf16 %v5337_v53, %v5336_v55  ;;  %v10302_v30 = vpop.permute.xlu0 %10301  ;;  %vm15053_vm10 = vcmask 97280   ;;  %v8677_v16 = vpack.c.bf16 %v5350_v11, %v5349_v59  ;;  %vm14185_vm6 = vmpackc.low %vm5351_vm14, %vm5351_vm14  ;;  %v5501_v39 = vld [vmem:[%s15761_s26 + $0x18] sm:$0xff] }
 0xff5   : > { %v10299_v28 = vunpack.i.h.bf16 %v10297_v61  ;;  %v10298_v46 = vunpack.i.l.bf16 %v10297_v61  ;;  %v10304_v36 = vunpack.i.h.bf16 %v10302_v30  ;;  %v10303_v45 = vunpack.i.l.bf16 %v10302_v30 }
 0xff6   : > { %8669 = vmatpush1.bf16.msk.msra.mxu1 %vm14131_vm2, %v8668_v37 }
 0xff7   : > { %5443 = vmatprep.subr.bf16.mxu1 %v15335_v1  ;;  %v5365_v33 = vsel %vm15053_vm10, %v10299_v28, 0.0  ;;  %v5364_v12 = vsel %vm15053_vm10, %v10298_v46, 0.0  ;;  %v5378_v57 = vsel %vm15062_vm15, %v10304_v36, 0.0  ;;  %v5377_v9 = vsel %vm15062_vm15, %v10303_v45, 0.0  ;;  %vm14197_vm10 = vmpackc.low %vm5379_vm9, %vm5379_vm9 }
 0xff8   : > { %v8680_v19 = vpack.c.bf16 %v5365_v33, %v5364_v12  ;;  %v8683_v31 = vpack.c.bf16 %v5378_v57, %v5377_v9  ;;  %vm15764_vm9 = vcmask 121856  }
 0xff9   : > { %vm15765_vm14 = vmmov %vm15764_vm9 }
 0xffa   : > { %8672 = vmatpush1.bf16.msk.msra.mxu1 %vm14143_vm11, %v8671_v47  ;;  %v10660_v47 = vld [vmem:[%s15760_s0 + $0x4] ss:$12 sps:$4 sm:$0xff]  }
 0xffb   : > { %5445 = vmatprep.subr.bf16.mxu1 %v15335_v1 }
 0xffe   : > { %5446 = vmatpush1.bf16.msra.mxu1 %v5388_v21 }
 0xfff   : > { %5447 = vmatprep.subr.bf16.mxu1 %v15335_v1 }
0x1002   : > { %8675 = vmatpush1.bf16.msk.msra.mxu1 %vm14160_vm8, %v8674_v2 }
0x1003   : > { %5449 = vmatprep.subr.bf16.mxu1 %v15335_v1 }
0x1005   : > { %v5396_v17 = vpop.permute.xlu1 %5395  ;;  %v5401_v54 = vpop.permute.xlu0 %5400 }
0x1006   : > { %8678 = vmatpush1.bf16.msk.msra.mxu1 %vm14173_vm4, %v8677_v16 }
0x1007   : > { %5451 = vmatprep.subr.bf16.mxu1 %v15335_v1 }
0x1009   : > { %v5406_v5 = vpop.permute.xlu1 %5405  ;;  %v5411_v14 = vpop.permute.xlu0 %5410 }
0x100a   : > { %8681 = vmatpush1.bf16.msk.msra.mxu1 %vm14185_vm6, %v8680_v19 }
0x100b   : > { %5453 = vmatprep.subr.bf16.mxu1 %v15335_v1 }
0x100e   : > { %8684 = vmatpush1.bf16.msk.msra.mxu1 %vm14197_vm10, %v8683_v31 }
0x1011   : > { %5470 = vmatmul.mubr.bf16.vlgmr.msra.gmra.mrb[40].mxu1 %v10654_v6 }
0x1012   : > { %8686 = vmatprep.mubr.msk.bf16.mxu1 %vm15759_vm0, %v10655_v48  ;;  %vm15766_vm0 = vmmov %vm15764_vm9 }
0x1013   : > { %vm15767_vm15 = vmmov %vm15766_vm0 }
0x1019   : > { %5478 = vmatmul.mubr.bf16.gmra.mrb[44].mxu1 %v10657_v49 }
0x101a   : > { %5772 = vmatprep.mubr.bf16.mxu1 %v10660_v47 }
0x10e4   : > { %v5471_v56 = vpop.f32.mrb[40].mxu1 }
0x10e5   : > { %v5472_v50 = vadd.f32 %v5471_v56, %v5396_v17  ;;  %v5473_v26 = vpop.f32.mrb[41].mxu1 }
0x10e6   : > { %v5474_v4 = vpop.f32.mrb[42].mxu1 }
0x10e7   : > { %v5475_v63 = vadd.f32 %v5474_v4, %v5401_v54  ;;  %v5476_v24 = vpop.f32.mrb[43].mxu1  ;;  %v5486_v1 = vmax.f32 %v5472_v50, 0.0 }
0x10e9   : > { %v5487_v42 = vmax.f32 %v5475_v63, 0.0 }
0x10eb   : > { %v10305_v15 = vpack.i.bf16 %v5487_v42, %v5486_v1  ;;  %v5674_v38 = vpack.c.bf16 %v5487_v42, %v5486_v1 }
0x10ec   : > { %v5479_v60 = vpop.f32.mrb[44].mxu1 }
0x10ed   : > { %v5480_v43 = vadd.f32 %v5479_v60, %v5406_v5  ;;  %v5481_v29 = vpop.f32.mrb[45].mxu1  ;;  %10306 = vrot.lane.b32.xlu1 %v10305_v15, %s15060_s2  ;;  %9052 = vmatprep.subr.bf16.mxu1 %v5674_v38 }
0x10ee   : > { %v5482_v8 = vpop.f32.mrb[46].mxu1 }
0x10ef   : > { %v5483_v35 = vadd.f32 %v5482_v8, %v5411_v14  ;;  %v5484_v41 = vpop.f32.mrb[47].mxu1  ;;  %v5488_v37 = vmax.f32 %v5480_v43, 0.0 }
0x10f1   : > { %v5489_v0 = vmax.f32 %v5483_v35, 0.0  ;;  %10311 = vrot.lane.b32.xlu1 %v10305_v15, %s15058_s1 }
0x10f3   : > { %v10315_v13 = vpack.i.bf16 %v5489_v0, %v5488_v37  ;;  %v5675_v23 = vpack.c.bf16 %v5489_v0, %v5488_v37 }
0x10f5   : > { %10316 = vrot.lane.b32.xlu0 %v10315_v13, %s15060_s2  ;;  %10326 = vrot.lane.b32.xlu1 %v10315_v13, %s15058_s1  ;;  %s15762_s1 = smov 1   ;;  %s15763_s2 = smov 123  }
0x10f9   : > { %10321 = vrot.lane.b32.xlu0 %v10305_v15, %s10774_s28  ;;  %10331 = vrot.lane.b32.xlu1 %v10305_v15, %s15065_s11 }
0x10fd   : > { %10336 = vrot.lane.b32.xlu0 %v10315_v13, %s10774_s28  ;;  %10346 = vrot.lane.b32.xlu1 %v10315_v13, %s15065_s11  ;;  %s15781_s11 = smov 5  }
0x1101   : > { %10341 = vrot.lane.b32.xlu0 %v10305_v15, %s15067_s7  ;;  %10351 = vrot.lane.b32.xlu1 %v10305_v15, %s15063_s18 }
0x1105   : > { %10356 = vrot.lane.b32.xlu0 %v10315_v13, %s15067_s7  ;;  %10366 = vrot.lane.b32.xlu1 %v10315_v13, %s15063_s18  ;;  %s15780_s18 = sld [smem:[#allocation11_spill]]  ;;  %s15782_s7 = smov 127  }
0x1109   : > { %10361 = vrot.lane.b32.xlu0 %v10305_v15, %s15762_s1  ;;  %10376 = vrot.lane.b32.xlu1 %v10305_v15, %s15763_s2 }
0x110b   : > { %v10670_v21 = vld [vmem:[%s15780_s18 + $0x20] ss:$12 sps:$4 sm:$0xff]  }
0x110d   : > { %10371 = vrot.lane.b32.xlu0 %v10315_v13, %s15762_s1  ;;  %5686 = vperm.xlu1 %10169, %v5498_v34  }
0x1111   : > { %10381 = vrot.lane.b32.xlu0 %v10315_v13, %s15763_s2  ;;  %5696 = vperm.xlu1 %10169, %v5500_v22  }
0x1115   : > { %5691 = vperm.xlu0 %9903, %v5499_v32  }
0x1119   : > { %5701 = vperm.xlu0 %9903, %v5501_v39  }
0x115f   : > { %v10307_v10 = vpop.permute.xlu1 %10306 }
0x1160   : > { %v10309_v53 = vunpack.i.h.bf16 %v10307_v10  ;;  %v10308_v55 = vunpack.i.l.bf16 %v10307_v10 }
0x1162   : > { %v5519_v61 = vsel %vm5280_vm12, 0.0, %v10309_v53  ;;  %v5518_v2 = vsel %vm5280_vm12, 0.0, %v10308_v55 }
0x1163   : > { %v8694_v11 = vpack.c.bf16 %v5519_v61, %v5518_v2  ;;  %v10312_v59 = vpop.permute.xlu1 %10311 }
0x1164   : > { %v10314_v28 = vunpack.i.h.bf16 %v10312_v59  ;;  %v10313_v46 = vunpack.i.l.bf16 %v10312_v59 }
0x1165   : > { %9053 = vmatpush3.bf16.msk.msra.mxu1 %vm14105_vm1, %v8694_v11 }
0x1166   : > { %9054 = vmatprep.subr.bf16.mxu1 %v5675_v23  ;;  %v5599_v33 = vsel %vm15764_vm9, %v10314_v28, 0.0  ;;  %v5598_v12 = vsel %vm15765_vm14, %v10313_v46, 0.0 }
0x1167   : > { %v10317_v30 = vpop.permute.xlu0 %10316  ;;  %v10327_v16 = vpop.permute.xlu1 %10326  ;;  %v8718_v17 = vpack.c.bf16 %v5599_v33, %v5598_v12 }
0x1168   : > { %v10319_v36 = vunpack.i.h.bf16 %v10317_v30  ;;  %v10318_v45 = vunpack.i.l.bf16 %v10317_v30  ;;  %v10329_v19 = vunpack.i.h.bf16 %v10327_v16  ;;  %v10328_v57 = vunpack.i.l.bf16 %v10327_v16 }
0x116a   : > { %v5521_v9 = vsel %vm5280_vm12, 0.0, %v10319_v36  ;;  %v5520_v31 = vsel %vm5280_vm12, 0.0, %v10318_v45  ;;  %v5601_v26 = vsel %vm15766_vm0, %v10329_v19, 0.0  ;;  %v5600_v54 = vsel %vm15767_vm15, %v10328_v57, 0.0 }
0x116b   : > { %v8697_v6 = vpack.c.bf16 %v5521_v9, %v5520_v31  ;;  %v10322_v48 = vpop.permute.xlu0 %10321  ;;  %v10332_v49 = vpop.permute.xlu1 %10331  ;;  %v8721_v5 = vpack.c.bf16 %v5601_v26, %v5600_v54  ;;  %vm15768_vm15 = vcmask 97280  }
0x116c   : > { %v10324_v56 = vunpack.i.h.bf16 %v10322_v48  ;;  %v10323_v50 = vunpack.i.l.bf16 %v10322_v48  ;;  %v10334_v4 = vunpack.i.h.bf16 %v10332_v49  ;;  %v10333_v63 = vunpack.i.l.bf16 %v10332_v49  ;;  %vm15769_vm9 = vmmov %vm15768_vm15 }
0x116d   : > { %9055 = vmatpush3.bf16.msk.msra.mxu1 %vm14105_vm1, %v8697_v6  ;;  %vm15770_vm14 = vmmov %vm15769_vm9 }
0x116e   : > { %v5539_v24 = vsel %vm5296_vm5, 0.0, %v10324_v56  ;;  %v5538_v1 = vsel %vm5296_vm5, 0.0, %v10323_v50  ;;  %9056 = vmatprep.subr.msk.bf16.mxu1 %vm14160_vm8, %v8718_v17  ;;  %v5619_v29 = vsel %vm5348_vm3, %v10334_v4, 0.0  ;;  %v5618_v14 = vsel %vm5348_vm3, %v10333_v63, 0.0  ;;  %vm15771_vm0 = vmmov %vm15769_vm9 }
0x116f   : > { %v8700_v42 = vpack.c.bf16 %v5539_v24, %v5538_v1  ;;  %v10337_v15 = vpop.permute.xlu0 %10336  ;;  %v10347_v38 = vpop.permute.xlu1 %10346  ;;  %v8724_v47 = vpack.c.bf16 %v5619_v29, %v5618_v14 }
0x1170   : > { %v10339_v60 = vunpack.i.h.bf16 %v10337_v15  ;;  %v10338_v43 = vunpack.i.l.bf16 %v10337_v15  ;;  %v10349_v8 = vunpack.i.h.bf16 %v10347_v38  ;;  %v10348_v35 = vunpack.i.l.bf16 %v10347_v38 }
0x1171   : > { %9057 = vmatpush3.bf16.msk.msra.mxu1 %vm14118_vm13, %v8700_v42 }
0x1172   : > { %v5541_v41 = vsel %vm5296_vm5, 0.0, %v10339_v60  ;;  %v5540_v37 = vsel %vm5296_vm5, 0.0, %v10338_v43  ;;  %9058 = vmatprep.subr.msk.bf16.mxu1 %vm14160_vm8, %v8721_v5  ;;  %v5621_v32 = vsel %vm5348_vm3, %v10349_v8, 0.0  ;;  %v5620_v39 = vsel %vm5348_vm3, %v10348_v35, 0.0 }
0x1173   : > { %v8703_v0 = vpack.c.bf16 %v5541_v41, %v5540_v37  ;;  %v10342_v13 = vpop.permute.xlu0 %10341  ;;  %v10352_v23 = vpop.permute.xlu1 %10351  ;;  %v8727_v28 = vpack.c.bf16 %v5621_v32, %v5620_v39  ;;  %v10658_v37 = vld [vmem:[%s15760_s0] ss:$12 sps:$4 sm:$0xff]  }
0x1174   : > { %v10344_v34 = vunpack.i.h.bf16 %v10342_v13  ;;  %v10343_v22 = vunpack.i.l.bf16 %v10342_v13  ;;  %v10354_v10 = vunpack.i.h.bf16 %v10352_v23  ;;  %v10353_v53 = vunpack.i.l.bf16 %v10352_v23  ;;  %v10665_v32 = vld [vmem:[%s15760_s0 + $0x20] ss:$12 sps:$4 sm:$0xff]  }
0x1175   : > { %9059 = vmatpush3.bf16.msk.msra.mxu1 %vm14118_vm13, %v8703_v0  ;;  %v10661_v0 = vld [vmem:[%s15760_s0 + $0x1c] ss:$12 sps:$4 sm:$0xff]  }
0x1176   : > { %v5559_v55 = vsel %vm5309_vm7, 0.0, %v10344_v34  ;;  %v5558_v61 = vsel %vm5309_vm7, 0.0, %v10343_v22  ;;  %9060 = vmatprep.subr.msk.bf16.mxu1 %vm14173_vm4, %v8724_v47  ;;  %v5639_v16 = vsel %vm15768_vm15, %v10354_v10, 0.0  ;;  %v5638_v36 = vsel %vm15769_vm9, %v10353_v53, 0.0  ;;  %v10663_v34 = vld [vmem:[%s15760_s0 + $0x18] ss:$12 sps:$4 sm:$0xff]  }
0x1177   : > { %v8706_v2 = vpack.c.bf16 %v5559_v55, %v5558_v61  ;;  %v10357_v11 = vpop.permute.xlu0 %10356  ;;  %v10367_v59 = vpop.permute.xlu1 %10366  ;;  %v8730_v6 = vpack.c.bf16 %v5639_v16, %v5638_v36  ;;  %vm15772_vm15 = vcmask 7168   ;;  %v10664_v22 = vld [vmem:[%s15760_s0 + $0x8] ss:$12 sps:$4 sm:$0xff]   ;;  %s15783_s0 = sld [smem:[#allocation12_spill]] }
0x1178   : > { %v10359_v46 = vunpack.i.h.bf16 %v10357_v11  ;;  %v10358_v30 = vunpack.i.l.bf16 %v10357_v11  ;;  %v10369_v45 = vunpack.i.h.bf16 %v10367_v59  ;;  %v10368_v33 = vunpack.i.l.bf16 %v10367_v59  ;;  %vm15773_vm9 = vmmov %vm15772_vm15 }
0x1179   : > { %9061 = vmatpush3.bf16.msk.msra.mxu1 %vm14131_vm2, %v8706_v2 }
0x117a   : > { %v5561_v12 = vsel %vm5309_vm7, 0.0, %v10359_v46  ;;  %v5560_v19 = vsel %vm5309_vm7, 0.0, %v10358_v30  ;;  %9062 = vmatprep.subr.msk.bf16.mxu1 %vm14173_vm4, %v8727_v28  ;;  %v5641_v17 = vsel %vm15770_vm14, %v10369_v45, 0.0  ;;  %v5640_v56 = vsel %vm15771_vm0, %v10368_v33, 0.0 }
0x117b   : > { %v8709_v57 = vpack.c.bf16 %v5561_v12, %v5560_v19  ;;  %v10362_v9 = vpop.permute.xlu0 %10361  ;;  %v10377_v31 = vpop.permute.xlu1 %10376  ;;  %v8733_v1 = vpack.c.bf16 %v5641_v17, %v5640_v56  ;;  %vm15774_vm14 = vcmask 89088  }
0x117c   : > { %v10364_v48 = vunpack.i.h.bf16 %v10362_v9  ;;  %v10363_v49 = vunpack.i.l.bf16 %v10362_v9  ;;  %v10379_v50 = vunpack.i.h.bf16 %v10377_v31  ;;  %v10378_v26 = vunpack.i.l.bf16 %v10377_v31  ;;  %vm15775_vm0 = vmmov %vm15774_vm14 }
0x117d   : > { %9063 = vmatpush3.bf16.msk.msra.mxu1 %vm14131_vm2, %v8709_v57 }
0x117e   : > { %v5579_v54 = vsel %vm15772_vm15, 0.0, %v10364_v48  ;;  %v5578_v4 = vsel %vm15773_vm9, 0.0, %v10363_v49  ;;  %9064 = vmatprep.subr.msk.bf16.mxu1 %vm14185_vm6, %v8730_v6  ;;  %v5659_v38 = vsel %vm15774_vm14, %v10379_v50, 0.0  ;;  %v5658_v5 = vsel %vm15775_vm0, %v10378_v26, 0.0  ;;  %vm15776_vm15 = vmmov %vm15773_vm9 }
0x117f   : > { %v8712_v63 = vpack.c.bf16 %v5579_v54, %v5578_v4  ;;  %v10372_v24 = vpop.permute.xlu0 %10371  ;;  %v8736_v8 = vpack.c.bf16 %v5659_v38, %v5658_v5  ;;  %vm15777_vm14 = vmmov %vm15775_vm0 }
0x1180   : > { %v10374_v42 = vunpack.i.h.bf16 %v10372_v24  ;;  %v10373_v15 = vunpack.i.l.bf16 %v10372_v24 }
0x1181   : > { %9065 = vmatpush3.bf16.msk.msra.mxu1 %vm14143_vm11, %v8712_v63 }
0x1182   : > { %v5581_v60 = vsel %vm15776_vm15, 0.0, %v10374_v42  ;;  %v5580_v43 = vsel %vm15773_vm9, 0.0, %v10373_v15  ;;  %9066 = vmatprep.subr.msk.bf16.mxu1 %vm14185_vm6, %v8733_v1  ;;  %vm15778_vm15 = vcmask 261120  }
0x1183   : > { %v8715_v29 = vpack.c.bf16 %v5581_v60, %v5580_v43  ;;  %v10382_v14 = vpop.permute.xlu0 %10381  ;;  %vm15779_vm9 = vmmov %vm15778_vm15  ;;  %v10668_v60 = vld [vmem:[%s15780_s18 + $0x4] ss:$12 sps:$4 sm:$0xff]   ;;  %v10669_v43 = vld [vmem:[%s15780_s18 + $0x8] ss:$12 sps:$4 sm:$0xff]  }
0x1184   : > { %v10384_v35 = vunpack.i.h.bf16 %v10382_v14  ;;  %v10383_v41 = vunpack.i.l.bf16 %v10382_v14  ;;  %6124 = vmatprep.mubr.bf16.mxu0 %v10668_v60  ;;  %v5850_v14 = vld [vmem:[%s15783_s0] sm:$0xff] }
0x1185   : > { %9067 = vmatpush3.bf16.msk.msra.mxu1 %vm14143_vm11, %v8715_v29  ;;  %v5851_v29 = vld [vmem:[%s15783_s0 + $0x8] sm:$0xff] }
0x1186   : > { %v5661_v13 = vsel %vm15777_vm14, %v10384_v35, 0.0  ;;  %v5660_v23 = vsel %vm15775_vm0, %v10383_v41, 0.0  ;;  %9275 = vmatprep.subr.msk.bf16.mxu1 %vm14197_vm10, %v8736_v8  ;;  %vm15787_vm14 = vmmov %vm15779_vm9  ;;  %v5852_v35 = vld [vmem:[%s15783_s0 + $0x10] sm:$0xff]  ;;  %vm15788_vm0 = vcmask 121856  }
0x1187   : > { %v8739_v47 = vpack.c.bf16 %v5661_v13, %v5660_v23 }
0x1188   : > { %5773 = vmatmul.mubr.bf16.vlgmr.msra.gmra.mrb[48].mxu1 %v10658_v37 }
0x1189   : > { %9276 = vmatpush3.bf16.msk.msra.mxu1 %vm14197_vm10, %v8736_v8  ;;  %5780 = vmatprep.mubr.bf16.mxu1 %v10661_v0  ;;  %v5853_v8 = vld [vmem:[%s15783_s0 + $0x18] sm:$0xff]  ;;  %s15071_s0 = smov 126  }
0x118a   : > { %9277 = vmatprep.subr.msk.bf16.mxu1 %vm14197_vm10, %v8739_v47 }
0x118c   : > { %v5687_v11 = vpop.permute.xlu1 %5686 }
0x118d   : > { %9278 = vmatpush3.bf16.msk.msra.mxu1 %vm14197_vm10, %v8739_v47 }
0x1190   : > { %5781 = vmatmul.mubr.bf16.gmra.mrb[52].mxu1 %v10663_v34  ;;  %v5697_v33 = vpop.permute.xlu1 %5696 }
0x1191   : > { %9279 = vmatprep.mubr.msk.bf16.mxu1 %vm15778_vm15, %v10664_v22  ;;  %vm15789_vm15 = vmmov %vm15788_vm0 }
0x1194   : > { %v5692_v46 = vpop.permute.xlu0 %5691 }
0x1198   : > { %9280 = vmatmul.mubr.msk.bf16.vlgmr.msra.gmra.mrb[56].mxu1 %vm15779_vm9, %v10665_v32  ;;  %v5702_v19 = vpop.permute.xlu0 %5701  ;;  %vm15791_vm9 = vmmov %vm15788_vm0 }
0x1199   : > { %9287 = vmatprep.mubr.msk.bf16.mxu1 %vm15787_vm14, %v10669_v43 }
0x125b   : > { %v9068_v39 = vpop.f32.mrb[48].mxu1 }
0x125c   : > { %v9069_v10 = vpop.f32.mrb[49].mxu1 }
0x125d   : > { %v9070_v53 = vadd.f32 %v9069_v10, %v9068_v39  ;;  %v9071_v55 = vpop.f32.mrb[50].mxu1 }
0x125e   : > { %v9072_v61 = vpop.f32.mrb[51].mxu1 }
0x125f   : > { %v9073_v2 = vadd.f32 %v9072_v61, %v9071_v55  ;;  %v5775_v9 = vadd.f32 %v9070_v53, %v5687_v11 }
0x1261   : > { %v5778_v56 = vadd.f32 %v9073_v2, %v5692_v46 }
0x1263   : > { %v9074_v59 = vpop.f32.mrb[52].mxu1 }
0x1264   : > { %v9075_v28 = vpop.f32.mrb[53].mxu1 }
0x1265   : > { %v9076_v30 = vadd.f32 %v9075_v28, %v9074_v59  ;;  %v9077_v16 = vpop.f32.mrb[54].mxu1 }
0x1266   : > { %v9078_v36 = vpop.f32.mrb[55].mxu1 }
0x1267   : > { %v9079_v45 = vadd.f32 %v9078_v36, %v9077_v16  ;;  %v5783_v12 = vadd.f32 %v9076_v30, %v5697_v33 }
0x1269   : > { %v5786_v48 = vadd.f32 %v9079_v45, %v5702_v19 }
0x126b   : > { %v9281_v57 = vpop.f32.mrb[56].mxu1 }
0x126c   : > { %v5832_v31 = vadd.f32 %v9281_v57, %v5783_v12  ;;  %v5823_v6 = vpop.f32.mrb[57].mxu1 }
0x126d   : > { %v5824_v49 = vadd.f32 %v5823_v6, %v5775_v9  ;;  %v9282_v17 = vpop.f32.mrb[58].mxu1 }
0x126e   : > { %v5835_v50 = vadd.f32 %v9282_v17, %v5786_v48  ;;  %v5826_v26 = vpop.f32.mrb[59].mxu1  ;;  %v5840_v4 = vmax.f32 %v5832_v31, 0.0 }
0x126f   : > { %v5827_v54 = vadd.f32 %v5826_v26, %v5778_v56  ;;  %v5838_v24 = vmax.f32 %v5824_v49, 0.0 }
0x1270   : > { %v5841_v63 = vmax.f32 %v5835_v50, 0.0 }
0x1271   : > { %v5839_v1 = vmax.f32 %v5827_v54, 0.0 }
0x1272   : > { %v10390_v42 = vpack.i.bf16 %v5841_v63, %v5840_v4  ;;  %v6027_v5 = vpack.c.bf16 %v5841_v63, %v5840_v4 }
0x1273   : > { %v10385_v15 = vpack.i.bf16 %v5839_v1, %v5838_v24  ;;  %v6026_v38 = vpack.c.bf16 %v5839_v1, %v5838_v24 }
0x1274   : > { %10391 = vrot.lane.b32.xlu0 %v10390_v42, %s15781_s11 }
0x1275   : > { %10386 = vrot.lane.b32.xlu1 %v10385_v15, %s15781_s11  ;;  %9084 = vmatprep.subr.bf16.mxu0 %v6026_v38  ;;  %s15786_s11 = smov 124  }
0x1278   : > { %10406 = vrot.lane.b32.xlu0 %v10385_v15, %s10774_s28 }
0x1279   : > { %10396 = vrot.lane.b32.xlu1 %v10385_v15, %s15782_s7 }
0x127c   : > { %10411 = vrot.lane.b32.xlu0 %v10390_v42, %s10774_s28  ;;  %s15821_s28 = sld [smem:[#allocation14_spill]] }
0x127d   : > { %10401 = vrot.lane.b32.xlu1 %v10390_v42, %s15782_s7 }
0x1280   : > { %10426 = vrot.lane.b32.xlu0 %v10385_v15, %s15784_s3 }
0x1281   : > { %10416 = vrot.lane.b32.xlu1 %v10385_v15, %s15785_s5 }
0x1284   : > { %10431 = vrot.lane.b32.xlu0 %v10390_v42, %s15784_s3 }
0x1285   : > { %10421 = vrot.lane.b32.xlu1 %v10390_v42, %s15785_s5 }
0x1288   : > { %10446 = vrot.lane.b32.xlu0 %v10385_v15, %s15762_s1 }
0x1289   : > { %10436 = vrot.lane.b32.xlu1 %v10385_v15, %s15786_s11 }
0x128c   : > { %10451 = vrot.lane.b32.xlu0 %v10390_v42, %s15762_s1 }
0x128d   : > { %10441 = vrot.lane.b32.xlu1 %v10390_v42, %s15786_s11 }
0x1290   : > { %10461 = vrot.lane.b32.xlu0 %v10390_v42, %s15763_s2 }
0x1291   : > { %10456 = vrot.lane.b32.xlu1 %v10385_v15, %s15763_s2 }
0x1294   : > { %6043 = vperm.xlu0 %9903, %v5851_v29  }
0x1295   : > { %6038 = vperm.xlu1 %10169, %v5850_v14  }
0x1298   : > { %6053 = vperm.xlu0 %9903, %v5853_v8  }
0x1299   : > { %6048 = vperm.xlu1 %10169, %v5852_v35  }
0x12e6   : > { %v10392_v41 = vpop.permute.xlu0 %10391 }
0x12e7   : > { %v10387_v37 = vpop.permute.xlu1 %10386  ;;  %v10394_v0 = vunpack.i.h.bf16 %v10392_v41  ;;  %v10393_v13 = vunpack.i.l.bf16 %v10392_v41 }
0x12e8   : > { %v10389_v23 = vunpack.i.h.bf16 %v10387_v37  ;;  %v10388_v47 = vunpack.i.l.bf16 %v10387_v37 }
0x12e9   : > { %v5873_v61 = vsel %vm5280_vm12, 0.0, %v10394_v0  ;;  %v5872_v2 = vsel %vm5280_vm12, 0.0, %v10393_v13 }
0x12ea   : > { %v5871_v34 = vsel %vm5280_vm12, 0.0, %v10389_v23  ;;  %v5870_v22 = vsel %vm5280_vm12, 0.0, %v10388_v47  ;;  %v10407_v32 = vpop.permute.xlu0 %10406  ;;  %v8753_v16 = vpack.c.bf16 %v5873_v61, %v5872_v2  ;;  %vm15790_vm12 = vmmov %vm15788_vm0 }
0x12eb   : > { %v8750_v39 = vpack.c.bf16 %v5871_v34, %v5870_v22  ;;  %v10409_v10 = vunpack.i.h.bf16 %v10407_v32  ;;  %v10408_v53 = vunpack.i.l.bf16 %v10407_v32  ;;  %v10397_v55 = vpop.permute.xlu1 %10396 }
0x12ec   : > { %v10399_v11 = vunpack.i.h.bf16 %v10397_v55  ;;  %v10398_v59 = vunpack.i.l.bf16 %v10397_v55 }
0x12ed   : > { %9085 = vmatpush3.bf16.msk.msra.mxu0 %vm14105_vm1, %v8750_v39  ;;  %v5891_v36 = vsel %vm5296_vm5, 0.0, %v10409_v10  ;;  %v5890_v45 = vsel %vm5296_vm5, 0.0, %v10408_v53 }
0x12ee   : > { %v5951_v28 = vsel %vm15788_vm0, %v10399_v11, 0.0  ;;  %v5950_v46 = vsel %vm15789_vm15, %v10398_v59, 0.0  ;;  %v10412_v30 = vpop.permute.xlu0 %10411  ;;  %9086 = vmatprep.subr.bf16.mxu0 %v6027_v5  ;;  %v8756_v17 = vpack.c.bf16 %v5891_v36, %v5890_v45 }
0x12ef   : > { %v8774_v33 = vpack.c.bf16 %v5951_v28, %v5950_v46  ;;  %v10402_v12 = vpop.permute.xlu1 %10401  ;;  %v10414_v19 = vunpack.i.h.bf16 %v10412_v30  ;;  %v10413_v57 = vunpack.i.l.bf16 %v10412_v30 }
0x12f0   : > { %v10404_v9 = vunpack.i.h.bf16 %v10402_v12  ;;  %v10403_v31 = vunpack.i.l.bf16 %v10402_v12 }
0x12f1   : > { %9087 = vmatpush3.bf16.msk.msra.mxu0 %vm14105_vm1, %v8753_v16  ;;  %v5893_v4 = vsel %vm5296_vm5, 0.0, %v10414_v19  ;;  %v5892_v63 = vsel %vm5296_vm5, 0.0, %v10413_v57  ;;  %vm15792_vm1 = vcmask 97280  }
0x12f2   : > { %v5953_v6 = vsel %vm15790_vm12, %v10404_v9, 0.0  ;;  %v5952_v48 = vsel %vm15791_vm9, %v10403_v31, 0.0  ;;  %v10427_v49 = vpop.permute.xlu0 %10426  ;;  %9088 = vmatprep.subr.msk.bf16.mxu0 %vm14160_vm8, %v8774_v33  ;;  %v8759_v38 = vpack.c.bf16 %v5893_v4, %v5892_v63  ;;  %vm15796_vm14 = vmmov %vm15792_vm1 }
0x12f3   : > { %v8777_v56 = vpack.c.bf16 %v5953_v6, %v5952_v48  ;;  %v10429_v50 = vunpack.i.h.bf16 %v10427_v49  ;;  %v10428_v26 = vunpack.i.l.bf16 %v10427_v49  ;;  %v10417_v54 = vpop.permute.xlu1 %10416  ;;  %vm15797_vm0 = vmmov %vm15792_vm1 }
0x12f4   : > { %v10419_v24 = vunpack.i.h.bf16 %v10417_v54  ;;  %v10418_v7 = vunpack.i.l.bf16 %v10417_v54 }
0x12f5   : > { %9089 = vmatpush3.bf16.msk.msra.mxu0 %vm14118_vm13, %v8756_v17  ;;  %v5911_v5 = vsel %vm5309_vm7, 0.0, %v10429_v50  ;;  %v5910_v60 = vsel %vm5309_vm7, 0.0, %v10428_v26 }
0x12f6   : > { %v5971_v1 = vsel %vm5348_vm3, %v10419_v24, 0.0  ;;  %v5970_v42 = vsel %vm5348_vm3, %v10418_v7, 0.0  ;;  %v10432_v15 = vpop.permute.xlu0 %10431  ;;  %9090 = vmatprep.subr.msk.bf16.mxu0 %vm14160_vm8, %v8777_v56  ;;  %v8762_v13 = vpack.c.bf16 %v5911_v5, %v5910_v60  ;;  %v10666_v24 = vld [vmem:[%s15780_s18] ss:$12 sps:$4 sm:$0xff]  }
0x12f7   : > { %v8780_v43 = vpack.c.bf16 %v5971_v1, %v5970_v42  ;;  %v10422_v29 = vpop.permute.xlu1 %10421  ;;  %v10434_v14 = vunpack.i.h.bf16 %v10432_v15  ;;  %v10433_v8 = vunpack.i.l.bf16 %v10432_v15  ;;  %v10671_v1 = vld [vmem:[%s15780_s18 + $0x1c] ss:$12 sps:$4 sm:$0xff]   ;;  %v10673_v42 = vld [vmem:[%s15780_s18 + $0x18] ss:$12 sps:$4 sm:$0xff]  }
0x12f8   : > { %v10424_v35 = vunpack.i.h.bf16 %v10422_v29  ;;  %v10423_v41 = vunpack.i.l.bf16 %v10422_v29 }
0x12f9   : > { %9091 = vmatpush3.bf16.msk.msra.mxu0 %vm14118_vm13, %v8759_v38  ;;  %v5913_v32 = vsel %vm5309_vm7, 0.0, %v10434_v14  ;;  %v5912_v39 = vsel %vm5309_vm7, 0.0, %v10433_v8  ;;  %vm15793_vm13 = vmmov %vm15792_vm1 }
0x12fa   : > { %v5973_v37 = vsel %vm5348_vm3, %v10424_v35, 0.0  ;;  %v5972_v0 = vsel %vm5348_vm3, %v10423_v41, 0.0  ;;  %v10447_v62 = vpop.permute.xlu0 %10446  ;;  %9092 = vmatprep.subr.msk.bf16.mxu0 %vm14173_vm4, %v8780_v43  ;;  %v8765_v2 = vpack.c.bf16 %v5913_v32, %v5912_v39  ;;  %vm15794_vm3 = vcmask 7168  }
0x12fb   : > { %v8783_v23 = vpack.c.bf16 %v5973_v37, %v5972_v0  ;;  %v10449_v47 = vunpack.i.h.bf16 %v10447_v62  ;;  %v10448_v34 = vunpack.i.l.bf16 %v10447_v62  ;;  %v10437_v22 = vpop.permute.xlu1 %10436  ;;  %vm15795_vm8 = vmmov %vm15794_vm3  ;;  %v14404_v32 = vand.u32 1, %v15565_v51 }
0x12fc   : > { %v10439_v10 = vunpack.i.h.bf16 %v10437_v22  ;;  %v10438_v40 = vunpack.i.l.bf16 %v10437_v22  ;;  %vm15799_vm15 = vmmov %vm15794_vm3  ;;  %v14401_v22 = vshra.s32 %v15565_v51, 1 }
0x12fd   : > { %9093 = vmatpush3.bf16.msk.msra.mxu0 %vm14131_vm2, %v8762_v13  ;;  %v5931_v11 = vsel %vm15794_vm3, 0.0, %v10449_v47  ;;  %v5930_v59 = vsel %vm15795_vm8, 0.0, %v10448_v34  ;;  %vm15806_vm8 = vmmov %vm15797_vm0 }
0x12fe   : > { %v5991_v53 = vsel %vm15792_vm1, %v10439_v10, 0.0  ;;  %v5990_v55 = vsel %vm15793_vm13, %v10438_v40, 0.0  ;;  %v10452_v61 = vpop.permute.xlu0 %10451  ;;  %9094 = vmatprep.subr.msk.bf16.mxu0 %vm14173_vm4, %v8783_v23  ;;  %v8768_v19 = vpack.c.bf16 %v5931_v11, %v5930_v59  ;;  %vm15798_vm4 = vmmov %vm15794_vm3  ;;  %vm15805_vm3 = vcmask 121856  }
0x12ff   : > { %v8786_v28 = vpack.c.bf16 %v5991_v53, %v5990_v55  ;;  %v10442_v46 = vpop.permute.xlu1 %10441  ;;  %v10454_v30 = vunpack.i.h.bf16 %v10452_v61  ;;  %v10453_v16 = vunpack.i.l.bf16 %v10452_v61  ;;  %v6260_v55 = vshll.u32 %v14401_v22, 3 }
0x1300   : > { %v10444_v36 = vunpack.i.h.bf16 %v10442_v46  ;;  %v10443_v45 = vunpack.i.l.bf16 %v10442_v46  ;;  %v6261_v61 = vshll.u32 %v14404_v32, 1 }
0x1301   : > { %9095 = vmatpush3.bf16.msk.msra.mxu0 %vm14131_vm2, %v8765_v2  ;;  %v5933_v48 = vsel %vm15798_vm4, 0.0, %v10454_v30  ;;  %v5932_v58 = vsel %vm15799_vm15, 0.0, %v10453_v16  ;;  %vm15800_vm2 = vcmask 89088   ;;  %vm15810_vm15 = vmmov %vm15806_vm8 }
0x1302   : > { %v5993_v33 = vsel %vm15796_vm14, %v10444_v36, 0.0  ;;  %v5992_v12 = vsel %vm15797_vm0, %v10443_v45, 0.0  ;;  %v10462_v44 = vpop.permute.xlu0 %10461  ;;  %9096 = vmatprep.subr.msk.bf16.mxu0 %vm14185_vm6, %v8786_v28  ;;  %vm15801_vm12 = vmmov %vm15800_vm2  ;;  %v8771_v4 = vpack.c.bf16 %v5933_v48, %v5932_v58  ;;  %v6262_v46 = vadd.s32 %v6261_v61, %v6260_v55  ;;  %v6375_v61 = vld [vmem:[%s15821_s28 + $0x8] sm:$0xff] }
0x1303   : > { %v8789_v57 = vpack.c.bf16 %v5993_v33, %v5992_v12  ;;  %v10464_v9 = vunpack.i.h.bf16 %v10462_v44  ;;  %v10463_v31 = vunpack.i.l.bf16 %v10462_v44  ;;  %v10457_v6 = vpop.permute.xlu1 %10456  ;;  %vm15802_vm9 = vmmov %vm15800_vm2 }
0x1304   : > { %v10459_v49 = vunpack.i.h.bf16 %v10457_v6  ;;  %v10458_v17 = vunpack.i.l.bf16 %v10457_v6  ;;  %vm15803_vm1 = vmmov %vm15800_vm2 }
0x1305   : > { %9097 = vmatpush3.bf16.msk.msra.mxu0 %vm14143_vm11, %v8768_v19  ;;  %v6013_v56 = vsel %vm15800_vm2, %v10464_v9, 0.0  ;;  %v6012_v50 = vsel %vm15801_vm12, %v10463_v31, 0.0  ;;  %vm15807_vm14 = vmmov %vm15803_vm1  ;;  %vm15811_vm2 = vcmask 130048  }
0x1306   : > { %v6011_v26 = vsel %vm15802_vm9, %v10459_v49, 0.0  ;;  %v6010_v54 = vsel %vm15803_vm1, %v10458_v17, 0.0  ;;  %9098 = vmatprep.subr.msk.bf16.mxu0 %vm14185_vm6, %v8789_v57  ;;  %v8795_v7 = vpack.c.bf16 %v6013_v56, %v6012_v50  ;;  %vm15804_vm6 = vcmask 261120   ;;  %vm15808_vm0 = vmmov %vm15805_vm3 }
0x1307   : > { %v8792_v63 = vpack.c.bf16 %v6011_v26, %v6010_v54  ;;  %vm15809_vm4 = vmmov %vm15803_vm1 }
0x1308   : > { %vm15812_vm12 = vmmov %vm15811_vm2 }
0x1309   : > { %9099 = vmatpush3.bf16.msk.msra.mxu0 %vm14143_vm11, %v8771_v4  ;;  %9283 = vmatprep.subr.msk.bf16.mxu1 %vm14197_vm10, %v8792_v63  ;;  %vm6263_vm11 = vcmp.eq.s32.totalorder %v15564_v18, %v6262_v46  ;;  %vm15813_vm9 = vmmov %vm15808_vm0 }
0x130a   : > { %9284 = vmatpush3.bf16.msk.msra.mxu1 %vm14197_vm10, %v8792_v63  ;;  %vm15814_vm1 = vmmov %vm15806_vm8 }
0x130b   : > { %9285 = vmatprep.subr.msk.bf16.mxu1 %vm14197_vm10, %v8795_v7 }
0x130c   : > { %6125 = vmatmul.mubr.bf16.vlgmr.msra.gmra.mrb[20].mxu0 %v10666_v24 }
0x130d   : > { %6132 = vmatprep.mubr.bf16.mxu0 %v10671_v1 }
0x130e   : > { %9286 = vmatpush3.bf16.msk.msra.mxu1 %vm14197_vm10, %v8795_v7  ;;  %vm6264_vm10 = vcmp.eq.s32.totalorder %v12576_v25, %v6262_v46 }
0x130f   : > { %vm9677_vm13 = vmpackc.low %vm6264_vm10, %vm6263_vm11 }
0x1310   : > { %9678 = vmatprep.subr.msk.bf16.mxu1 %vm9677_vm13, %v15584_v20  ;;  %vm15816_vm11 = vmmov %vm15808_vm0 }
0x1311   : > { %9288 = vmatmul.mubr.msk.bf16.vlgmr.msra.gmra.mrb[60].mxu1 %vm15804_vm6, %v10670_v21  ;;  %vm15815_vm6 = vmmov %vm15809_vm4 }
0x1312   : > { %9680 = vmatpush3.bf16.msk.msra.mxu1 %vm9677_vm13, %v15584_v20  ;;  %vm15817_vm10 = vmmov %vm15809_vm4 }
0x1313   : > { %v6044_v8 = vpop.permute.xlu0 %6043  ;;  %vm15818_vm13 = vmmov %vm15814_vm1 }
0x1314   : > { %6133 = vmatmul.mubr.bf16.gmra.mrb[24].mxu0 %v10673_v42  ;;  %v6039_v60 = vpop.permute.xlu1 %6038 }
0x1317   : > { %v6054_v59 = vpop.permute.xlu0 %6053 }
0x1318   : > { %v6049_v40 = vpop.permute.xlu1 %6048 }
0x13df   : > { %v9100_v52 = vpop.f32.mrb[20].mxu0 }
0x13e0   : > { %v9101_v15 = vpop.f32.mrb[21].mxu0 }
0x13e1   : > { %v9102_v38 = vadd.f32 %v9101_v15, %v9100_v52  ;;  %v9103_v5 = vpop.f32.mrb[22].mxu0 }
0x13e2   : > { %v9104_v43 = vpop.f32.mrb[23].mxu0 }
0x13e3   : > { %v9105_v29 = vadd.f32 %v9104_v43, %v9103_v5  ;;  %v6127_v14 = vadd.f32 %v9102_v38, %v6039_v60 }
0x13e4   : > { %v9289_v35 = vpop.f32.mrb[60].mxu1 }
0x13e5   : > { %v6175_v41 = vpop.f32.mrb[61].mxu1  ;;  %v6130_v37 = vadd.f32 %v9105_v29, %v6044_v8 }
0x13e6   : > { %v6176_v0 = vadd.f32 %v6175_v41, %v6127_v14  ;;  %v9290_v62 = vpop.f32.mrb[62].mxu1 }
0x13e7   : > { %v9106_v27 = vpop.f32.mrb[24].mxu0  ;;  %v6178_v13 = vpop.f32.mrb[63].mxu1 }
0x13e8   : > { %v6190_v23 = vmax.f32 %v6176_v0, 0.0  ;;  %v6179_v47 = vadd.f32 %v6178_v13, %v6130_v37  ;;  %v9107_v34 = vpop.f32.mrb[25].mxu0 }
0x13e9   : > { %v9108_v39 = vadd.f32 %v9107_v34, %v9106_v27  ;;  %v9109_v10 = vpop.f32.mrb[26].mxu0 }
0x13ea   : > { %v9110_v53 = vpop.f32.mrb[27].mxu0  ;;  %6218 = vrot.lane.b32.xlu0 %v6190_v23, %s15786_s11  ;;  %6198 = vrot.lane.b32.xlu1 %v6190_v23, %s15782_s7  ;;  %v6191_v28 = vmax.f32 %v6179_v47, 0.0 }
0x13eb   : > { %v6135_v2 = vadd.f32 %v9108_v39, %v6049_v40  ;;  %v9111_v11 = vadd.f32 %v9110_v53, %v9109_v10  ;;  %v6374_v10 = vld [vmem:[%s15821_s28] sm:$0xff]  ;;  %v6376_v53 = vld [vmem:[%s15821_s28 + $0x10] sm:$0xff] }
0x13ed   : > { %v6184_v30 = vadd.f32 %v9289_v35, %v6135_v2  ;;  %v6138_v16 = vadd.f32 %v9111_v11, %v6054_v59  ;;  %v6377_v2 = vld [vmem:[%s15821_s28 + $0x18] sm:$0xff] }
0x13ee   : > { %6200 = vrot.lane.b32.xlu0 %v6191_v28, %s15782_s7  ;;  %6234 = vrot.lane.b32.xlu1 %v6190_v23, %s15763_s2 }
0x13ef   : > { %v6187_v36 = vadd.f32 %v9290_v62, %v6138_v16  ;;  %v6192_v45 = vmax.f32 %v6184_v30, 0.0 }
0x13f1   : > { %v6193_v33 = vmax.f32 %v6187_v36, 0.0 }
0x13f2   : > { %6236 = vrot.lane.b32.xlu0 %v6191_v28, %s15763_s2  ;;  %6220 = vrot.lane.b32.xlu1 %v6191_v28, %s15786_s11 }
0x13f6   : > { %6222 = vrot.lane.b32.xlu0 %v6192_v45, %s15786_s11  ;;  %6202 = vrot.lane.b32.xlu1 %v6192_v45, %s15782_s7 }
0x13fa   : > { %6204 = vrot.lane.b32.xlu0 %v6193_v33, %s15782_s7  ;;  %6238 = vrot.lane.b32.xlu1 %v6192_v45, %s15763_s2 }
0x13fe   : > { %6240 = vrot.lane.b32.xlu0 %v6193_v33, %s15763_s2  ;;  %6224 = vrot.lane.b32.xlu1 %v6193_v33, %s15786_s11  ;;  %s15822_s2 = sld [smem:[#allocation13_spill]]  ;;  %s15073_s11 = smov 2  }
0x1404   : > { %v10676_v40 = vld [vmem:[%s15822_s2 + $0x4] ss:$12 sps:$4 sm:$0xff]   ;;  %v10677_v55 = vld [vmem:[%s15822_s2 + $0x8] ss:$12 sps:$4 sm:$0xff]  }
0x145c   : > { %v6219_v25 = vpop.permute.xlu0 %6218  ;;  %v6199_v20 = vpop.permute.xlu1 %6198 }
0x145d   : > { %v6210_v12 = vsel %vm15805_vm3, %v6199_v20, 0.0  ;;  %v6230_v57 = vsel %vm15806_vm8, %v6219_v25, 0.0  ;;  %vm15819_vm3 = vmmov %vm15811_vm2 }
0x145e   : > { %v6214_v31 = vmax.f32 %v6190_v23, %v6210_v12  ;;  %vm15820_vm8 = vmmov %vm15811_vm2 }
0x1460   : > { %v6201_v44 = vpop.permute.xlu0 %6200  ;;  %v6235_v19 = vpop.permute.xlu1 %6234 }
0x1461   : > { %v6246_v9 = vsel %vm15807_vm14, %v6235_v19, 0.0  ;;  %v6211_v48 = vsel %vm15808_vm0, %v6201_v44, 0.0  ;;  %vm15823_vm14 = vcmask 261120   ;;  %vm6398_vm0 = vcmp.ge.s32.totalorder %v14401_v22, 1 }
0x1462   : > { %v6250_v6 = vmax.f32 %v6230_v57, %v6246_v9  ;;  %v6215_v26 = vmax.f32 %v6191_v28, %v6211_v48  ;;  %9305 = vmatprep.mubr.msk.bf16.mxu0 %vm15823_vm14, %v10677_v55 }
0x1464   : > { %v6254_v58 = vmax.f32 %v6214_v31, %v6250_v6  ;;  %v6237_v49 = vpop.permute.xlu0 %6236  ;;  %v6221_v17 = vpop.permute.xlu1 %6220 }
0x1465   : > { %v6247_v56 = vsel %vm15809_vm4, %v6237_v49, 0.0  ;;  %v6231_v50 = vsel %vm15810_vm15, %v6221_v17, 0.0  ;;  %vm6399_vm4 = vcmp.ge.s32.totalorder %v14404_v32, 1 }
0x1466   : > { %v6251_v54 = vmax.f32 %v6231_v50, %v6247_v56  ;;  %9295 = vmatprep.mubr.msk.f32.mxu1 %vm15811_vm2, %v6254_v58  ;;  %vm6400_vm15 = vmand %vm6398_vm0, %vm6399_vm4 }
0x1467   : > { %vm14467_vm2 = vmpackc.low %vm6400_vm15, %vm6400_vm15 }
0x1468   : > { %v6255_v4 = vmax.f32 %v6215_v26, %v6251_v54  ;;  %v6223_v63 = vpop.permute.xlu0 %6222  ;;  %v6203_v24 = vpop.permute.xlu1 %6202 }
0x1469   : > { %v6212_v7 = vsel %vm15813_vm9, %v6203_v24, 0.0  ;;  %v6232_v42 = vsel %vm15814_vm1, %v6223_v63, 0.0  ;;  %vm6419_vm9 = vcmask 15360  }
0x146a   : > { %9296 = vmatmul.mubr.msk.f32.vlgmr.msra.gmra.mrb[64].mxu1 %vm15812_vm12, %v6255_v4  ;;  %v6216_v15 = vmax.f32 %v6192_v45, %v6212_v7  ;;  %vm6446_vm12 = vcmp.lt.s32.totalorder %v14404_v32, 1  ;;  %v10674_v32 = vld [vmem:[%s15822_s2] ss:$12 sps:$4 sm:$0xff]  }
0x146b   : > { %vm14481_vm1 = vmpackc.low %vm6446_vm12, %vm6446_vm12 }
0x146c   : > { %v6205_v1 = vpop.permute.xlu0 %6204  ;;  %v6239_v21 = vpop.permute.xlu1 %6238  ;;  %vm6447_vm15 = vmand %vm6398_vm0, %vm6446_vm12 }
0x146d   : > { %v6248_v52 = vsel %vm15815_vm6, %v6239_v21, 0.0  ;;  %v6213_v5 = vsel %vm15816_vm11, %v6205_v1, 0.0  ;;  %vm6482_vm6 = vcmp.lt.s32.totalorder %v14401_v22, 1  ;;  %vm14497_vm11 = vmpackc.low %vm6398_vm0, %vm6398_vm0 }
0x146e   : > { %v6252_v38 = vmax.f32 %v6232_v42, %v6248_v52  ;;  %v6217_v35 = vmax.f32 %v6193_v33, %v6213_v5  ;;  %vm14542_vm0 = vmpackc.low %vm6447_vm15, %vm6447_vm15 }
0x146f   : > { %vm14561_vm15 = vmpackc.low %vm6482_vm6, %vm6482_vm6 }
0x1470   : > { %v6256_v60 = vmax.f32 %v6216_v15, %v6252_v38  ;;  %v6241_v43 = vpop.permute.xlu0 %6240  ;;  %v6225_v29 = vpop.permute.xlu1 %6224 }
0x1471   : > { %v6249_v14 = vsel %vm15817_vm10, %v6241_v43, 0.0  ;;  %v6233_v8 = vsel %vm15818_vm13, %v6225_v29, 0.0  ;;  %vm6483_vm10 = vmand %vm6482_vm6, %vm6399_vm4 }
0x1472   : > { %v6253_v41 = vmax.f32 %v6233_v8, %v6249_v14  ;;  %9298 = vmatprep.mubr.msk.f32.mxu1 %vm15819_vm3, %v6256_v60  ;;  %vm14511_vm13 = vmand %vm6482_vm6, %vm6446_vm12 }
0x1473   : > { %vm14519_vm3 = vmpackc.low %vm6483_vm10, %vm6483_vm10 }
0x1474   : > { %v6257_v37 = vmax.f32 %v6217_v35, %v6253_v41  ;;  %vm14534_vm10 = vmpackc.low %vm14511_vm13, %vm14511_vm13 }
0x1475   : > { %vm14576_vm6 = vmpackc.low %vm6399_vm4, %vm6399_vm4  ;;  %vm15848_vm4 = vcmask 261120  }
0x1476   : > { %9299 = vmatmul.mubr.msk.f32.gmra.mrb[66].mxu1 %vm15820_vm8, %v6257_v37  ;;  %vm15834_vm8 = vcmask 7168  }
0x1477   : > { %6641 = vmatprep.mubr.bf16.mxu1 %v10676_v40  ;;  %vm15835_vm14 = vmmov %vm15834_vm8 }
0x1478   : > { %vm15841_vm12 = vmmov %vm15834_vm8 }
0x1479   : > { %vm15842_vm13 = vmmov %vm15834_vm8 }
0x153d   : > { %v9297_v0 = vpop.f32.mrb[64].mxu1 }
0x153e   : > { %v6347_v62 = vpop.f32.mrb[65].mxu1 }
0x153f   : > { %v10465_v27 = vpack.i.bf16 %v9297_v0, %v6347_v62  ;;  %v6543_v13 = vpack.c.bf16 %v9297_v0, %v6347_v62 }
0x1541   : > { %10466 = vrot.lane.b32.xlu1 %v10465_v27, %s15784_s3  ;;  %9122 = vmatprep.subr.bf16.mxu1 %v6543_v13 }
0x1545   : > { %10471 = vrot.lane.b32.xlu1 %v10465_v27, %s15782_s7 }
0x1549   : > { %v9300_v23 = vpop.f32.mrb[66].mxu1 }
0x154a   : > { %v6357_v47 = vpop.f32.mrb[67].mxu1 }
0x154b   : > { %v10485_v34 = vpack.i.bf16 %v9300_v23, %v6357_v47  ;;  %v6544_v39 = vpack.c.bf16 %v9300_v23, %v6357_v47 }
0x154d   : > { %10486 = vrot.lane.b32.xlu1 %v10485_v34, %s15782_s7  ;;  %10476 = vrot.lane.b32.xlu0 %v10485_v34, %s15784_s3 }
0x1551   : > { %10496 = vrot.lane.b32.xlu1 %v10465_v27, %s15762_s1  ;;  %10481 = vrot.lane.b32.xlu0 %v10465_v27, %s15073_s11 }
0x1555   : > { %10506 = vrot.lane.b32.xlu1 %v10465_v27, %s15071_s0  ;;  %10491 = vrot.lane.b32.xlu0 %v10485_v34, %s15073_s11  ;;  %s15850_s11 = sld [smem:[#allocation15_spill]] }
0x1559   : > { %10516 = vrot.lane.b32.xlu1 %v10465_v27, %s15785_s5  ;;  %10501 = vrot.lane.b32.xlu0 %v10485_v34, %s15762_s1 }
0x155d   : > { %6555 = vperm.xlu1 %10169, %v6374_v10   ;;  %10511 = vrot.lane.b32.xlu0 %v10485_v34, %s15071_s0  ;;  %s15849_s0 = sld [smem:[#allocation16_spill]] }
0x1561   : > { %6565 = vperm.xlu1 %10169, %v6376_v53   ;;  %10521 = vrot.lane.b32.xlu0 %v10485_v34, %s15785_s5 }
0x1565   : > { %6560 = vperm.xlu0 %9903, %v6375_v61  }
0x1569   : > { %6570 = vperm.xlu0 %9903, %v6377_v2   ;;  %v10690_v2 = vld [vmem:[%s15863_s9] ss:$12 sps:$4 sm:$0xff]  }
0x15b3   : > { %v10467_v11 = vpop.permute.xlu1 %10466 }
0x15b4   : > { %v10469_v59 = vunpack.i.h.bf16 %v10467_v11  ;;  %v10468_v28 = vunpack.i.l.bf16 %v10467_v11 }
0x15b6   : > { %v6395_v46 = vsel %vm5309_vm7, 0.0, %v10469_v59  ;;  %v6394_v30 = vsel %vm5309_vm7, 0.0, %v10468_v28 }
0x15b7   : > { %v8814_v36 = vpack.c.bf16 %v6395_v46, %v6394_v30  ;;  %v10472_v45 = vpop.permute.xlu1 %10471 }
0x15b8   : > { %v10474_v33 = vunpack.i.h.bf16 %v10472_v45  ;;  %v10473_v25 = vunpack.i.l.bf16 %v10472_v45 }
0x15b9   : > { %9123 = vmatpush3.bf16.msk.msra.mxu1 %vm14467_vm2, %v8814_v36 }
0x15ba   : > { %9124 = vmatprep.subr.bf16.mxu1 %v6544_v39  ;;  %v6473_v57 = vsel %vm5309_vm7, %v10474_v33, 0.0  ;;  %v6472_v9 = vsel %vm5309_vm7, %v10473_v25, 0.0 }
0x15bb   : > { %v8838_v26 = vpack.c.bf16 %v6473_v57, %v6472_v9 }
0x15bf   : > { %v10477_v20 = vpop.permute.xlu0 %10476  ;;  %v10487_v12 = vpop.permute.xlu1 %10486 }
0x15c0   : > { %v10479_v44 = vunpack.i.h.bf16 %v10477_v20  ;;  %v10478_v19 = vunpack.i.l.bf16 %v10477_v20  ;;  %v10489_v31 = vunpack.i.h.bf16 %v10487_v12  ;;  %v10488_v6 = vunpack.i.l.bf16 %v10487_v12 }
0x15c2   : > { %v6397_v48 = vsel %vm5309_vm7, 0.0, %v10479_v44  ;;  %v6396_v58 = vsel %vm5309_vm7, 0.0, %v10478_v19  ;;  %v6475_v63 = vsel %vm5309_vm7, %v10489_v31, 0.0  ;;  %v6474_v24 = vsel %vm5309_vm7, %v10488_v6, 0.0 }
0x15c3   : > { %v8817_v49 = vpack.c.bf16 %v6397_v48, %v6396_v58  ;;  %v10482_v17 = vpop.permute.xlu0 %10481  ;;  %v10497_v56 = vpop.permute.xlu1 %10496  ;;  %v8841_v60 = vpack.c.bf16 %v6475_v63, %v6474_v24 }
0x15c4   : > { %v10484_v54 = vunpack.i.h.bf16 %v10482_v17  ;;  %v10483_v4 = vunpack.i.l.bf16 %v10482_v17  ;;  %v10499_v52 = vunpack.i.h.bf16 %v10497_v56  ;;  %v10498_v15 = vunpack.i.l.bf16 %v10497_v56  ;;  %v10678_v56 = vld [vmem:[%s15822_s2 + $0x20] ss:$12 sps:$4 sm:$0xff]  }
0x15c5   : > { %9125 = vmatpush3.bf16.msk.msra.mxu1 %vm14467_vm2, %v8817_v49 }
0x15c6   : > { %v6421_v7 = vsel %vm6419_vm9, 0.0, %v10484_v54  ;;  %v6420_v1 = vsel %vm6419_vm9, 0.0, %v10483_v4  ;;  %9126 = vmatprep.subr.msk.bf16.mxu1 %vm14481_vm1, %v8838_v26  ;;  %v6443_v37 = vsel %vm15834_vm8, 0.0, %v10499_v52  ;;  %v6442_v0 = vsel %vm15835_vm14, 0.0, %v10498_v15  ;;  %vm15838_vm14 = vmmov %vm15834_vm8  ;;  %v10681_v54 = vld [vmem:[%s15822_s2 + $0x18] ss:$12 sps:$4 sm:$0xff]  }
0x15c7   : > { %v8820_v42 = vpack.c.bf16 %v6421_v7, %v6420_v1  ;;  %v10492_v38 = vpop.permute.xlu0 %10491  ;;  %v10507_v5 = vpop.permute.xlu1 %10506  ;;  %v8826_v11 = vpack.c.bf16 %v6443_v37, %v6442_v0 }
0x15c8   : > { %v10494_v43 = vunpack.i.h.bf16 %v10492_v38  ;;  %v10493_v29 = vunpack.i.l.bf16 %v10492_v38  ;;  %v10509_v10 = vunpack.i.h.bf16 %v10507_v5  ;;  %v10508_v40 = vunpack.i.l.bf16 %v10507_v5 }
0x15c9   : > { %9127 = vmatpush3.bf16.msk.msra.mxu1 %vm14497_vm11, %v8820_v42 }
0x15ca   : > { %v6423_v8 = vsel %vm6419_vm9, 0.0, %v10494_v43  ;;  %v6422_v35 = vsel %vm6419_vm9, 0.0, %v10493_v29  ;;  %9128 = vmatprep.subr.msk.bf16.mxu1 %vm14481_vm1, %v8841_v60  ;;  %v6503_v36 = vsel %vm6419_vm9, %v10509_v10, 0.0  ;;  %v6502_v45 = vsel %vm6419_vm9, %v10508_v40, 0.0 }
0x15cb   : > { %v8823_v62 = vpack.c.bf16 %v6423_v8, %v6422_v35  ;;  %v10502_v27 = vpop.permute.xlu0 %10501  ;;  %v10517_v13 = vpop.permute.xlu1 %10516  ;;  %v8850_v19 = vpack.c.bf16 %v6503_v36, %v6502_v45 }
0x15cc   : > { %v10504_v23 = vunpack.i.h.bf16 %v10502_v27  ;;  %v10503_v47 = vunpack.i.l.bf16 %v10502_v27  ;;  %v10519_v34 = vunpack.i.h.bf16 %v10517_v13  ;;  %v10518_v39 = vunpack.i.l.bf16 %v10517_v13 }
0x15cd   : > { %9129 = vmatpush3.bf16.msk.msra.mxu1 %vm14497_vm11, %v8823_v62 }
0x15ce   : > { %v6525_v55 = vsel %vm15834_vm8, %v10519_v34, 0.0  ;;  %v6524_v61 = vsel %vm15838_vm14, %v10518_v39, 0.0  ;;  %9130 = vmatprep.subr.msk.bf16.mxu1 %vm14519_vm3, %v8838_v26  ;;  %v6445_v46 = vsel %vm15841_vm12, 0.0, %v10504_v23  ;;  %v6444_v30 = vsel %vm15842_vm13, 0.0, %v10503_v47  ;;  %vm15845_vm14 = vmmov %vm15834_vm8  ;;  %v10679_v26 = vld [vmem:[%s15822_s2 + $0x1c] ss:$12 sps:$4 sm:$0xff]  }
0x15cf   : > { %v8856_v59 = vpack.c.bf16 %v6525_v55, %v6524_v61  ;;  %v10512_v28 = vpop.permute.xlu0 %10511  ;;  %v8829_v20 = vpack.c.bf16 %v6445_v46, %v6444_v30  ;;  %s15851_s2 = smov 2   ;;  %vm15853_vm12 = vmmov %vm15848_vm4 }
0x15d0   : > { %v10514_v33 = vunpack.i.h.bf16 %v10512_v28  ;;  %v10513_v25 = vunpack.i.l.bf16 %v10512_v28  ;;  %vm15854_vm13 = vmmov %vm15834_vm8 }
0x15d1   : > { %9131 = vmatpush3.bf16.msk.msra.mxu1 %vm14542_vm0, %v8826_v11  ;;  %9301 = vmatprep.subr.msk.bf16.mxu0 %vm14534_vm10, %v8856_v59 }
0x15d2   : > { %9132 = vmatprep.subr.msk.bf16.mxu1 %vm14519_vm3, %v8841_v60  ;;  %9302 = vmatpush3.bf16.msk.msra.mxu0 %vm14534_vm10, %v8856_v59  ;;  %v6505_v31 = vsel %vm6419_vm9, %v10514_v33, 0.0  ;;  %v6504_v6 = vsel %vm6419_vm9, %v10513_v25, 0.0  ;;  %v6719_v33 = vld [vmem:[%s15849_s0] sm:$0xff] }
0x15d3   : > { %v10522_v12 = vpop.permute.xlu0 %10521  ;;  %v8853_v17 = vpack.c.bf16 %v6505_v31, %v6504_v6  ;;  %v10684_v25 = vld [vmem:[%s15850_s11 + $0x4] ss:$12 sps:$4 sm:$0xff]  }
0x15d4   : > { %v10524_v57 = vunpack.i.h.bf16 %v10522_v12  ;;  %v10523_v9 = vunpack.i.l.bf16 %v10522_v12  ;;  %v10685_v12 = vld [vmem:[%s15850_s11 + $0x8] ss:$12 sps:$4 sm:$0xff]  }
0x15d5   : > { %9133 = vmatpush3.bf16.msk.msra.mxu1 %vm14542_vm0, %v8829_v20 }
0x15d6   : > { %v6527_v22 = vsel %vm15834_vm8, %v10524_v57, 0.0  ;;  %v6526_v48 = vsel %vm15845_vm14, %v10523_v9, 0.0  ;;  %9134 = vmatprep.subr.msk.bf16.mxu1 %vm14561_vm15, %v8850_v19  ;;  %v6720_v19 = vld [vmem:[%s15849_s0 + $0x8] sm:$0xff]  ;;  %v6722_v57 = vld [vmem:[%s15849_s0 + $0x18] sm:$0xff]  ;;  %vm15855_vm14 = vmmov %vm15834_vm8 }
0x15d7   : > { %v8859_v49 = vpack.c.bf16 %v6527_v22, %v6526_v48 }
0x15d9   : > { %9135 = vmatpush3.bf16.msk.msra.mxu1 %vm14576_vm6, %v8826_v11  ;;  %9303 = vmatprep.subr.msk.bf16.mxu0 %vm14534_vm10, %v8859_v49 }
0x15da   : > { %9136 = vmatprep.subr.msk.bf16.mxu1 %vm14561_vm15, %v8853_v17  ;;  %9304 = vmatpush3.bf16.msk.msra.mxu0 %vm14534_vm10, %v8859_v49 }
0x15dc   : > { %v6556_v38 = vpop.permute.xlu1 %6555 }
0x15dd   : > { %9137 = vmatpush3.bf16.msk.msra.mxu1 %vm14576_vm6, %v8829_v20  ;;  %9306 = vmatmul.mubr.msk.bf16.vlgmr.msra.gmra.mrb[28].mxu0 %vm15848_vm4, %v10678_v56  ;;  %v6721_v20 = vld [vmem:[%s15849_s0 + $0x10] sm:$0xff]  ;;  %vm15856_vm4 = vmmov %vm15834_vm8  ;;  %s15862_s0 = sld [smem:[#allocation18_spill]] }
0x15de   : > { %6961 = vmatprep.mubr.bf16.mxu0 %v10684_v25 }
0x15e0   : > { %6642 = vmatmul.mubr.bf16.vlgmr.msra.gmra.mrb[68].mxu1 %v10674_v32  ;;  %v6566_v47 = vpop.permute.xlu1 %6565 }
0x15e1   : > { %6649 = vmatprep.mubr.bf16.mxu1 %v10679_v26 }
0x15e4   : > { %v6561_v29 = vpop.permute.xlu0 %6560 }
0x15e8   : > { %6650 = vmatmul.mubr.bf16.gmra.mrb[72].mxu1 %v10681_v54  ;;  %v6571_v61 = vpop.permute.xlu0 %6570 }
0x15e9   : > { %9313 = vmatprep.mubr.msk.bf16.mxu1 %vm15853_vm12, %v10685_v12  ;;  %vm15857_vm12 = vmmov %vm15856_vm4 }
0x16b0   : > { %v9307_v4 = vpop.f32.mrb[28].mxu0 }
0x16b1   : > { %v6692_v63 = vpop.f32.mrb[29].mxu0 }
0x16b2   : > { %v9308_v24 = vpop.f32.mrb[30].mxu0 }
0x16b3   : > { %v9138_v7 = vpop.f32.mrb[68].mxu1  ;;  %v6695_v1 = vpop.f32.mrb[31].mxu0 }
0x16b4   : > { %v9139_v42 = vpop.f32.mrb[69].mxu1 }
0x16b5   : > { %v9140_v52 = vadd.f32 %v9139_v42, %v9138_v7  ;;  %v9141_v15 = vpop.f32.mrb[70].mxu1 }
0x16b6   : > { %v9142_v5 = vpop.f32.mrb[71].mxu1 }
0x16b7   : > { %v9143_v60 = vadd.f32 %v9142_v5, %v9141_v15  ;;  %v6644_v43 = vadd.f32 %v9140_v52, %v6556_v38 }
0x16b9   : > { %v6693_v14 = vadd.f32 %v6692_v63, %v6644_v43  ;;  %v6647_v8 = vadd.f32 %v9143_v60, %v6561_v29 }
0x16bb   : > { %v6696_v35 = vadd.f32 %v6695_v1, %v6647_v8  ;;  %v9144_v37 = vpop.f32.mrb[72].mxu1  ;;  %v6707_v62 = vmax.f32 %v6693_v14, 0.0 }
0x16bc   : > { %v9145_v0 = vpop.f32.mrb[73].mxu1 }
0x16bd   : > { %v6708_v27 = vmax.f32 %v6696_v35, 0.0  ;;  %v9146_v13 = vadd.f32 %v9145_v0, %v9144_v37  ;;  %v9147_v23 = vpop.f32.mrb[74].mxu1 }
0x16be   : > { %v9148_v34 = vpop.f32.mrb[75].mxu1 }
0x16bf   : > { %v6652_v39 = vadd.f32 %v9146_v13, %v6566_v47  ;;  %v9149_v10 = vadd.f32 %v9148_v34, %v9147_v23  ;;  %v10525_v40 = vpack.i.bf16 %v6708_v27, %v6707_v62  ;;  %v6863_v55 = vpack.c.bf16 %v6708_v27, %v6707_v62 }
0x16c1   : > { %v6701_v11 = vadd.f32 %v9307_v4, %v6652_v39  ;;  %v6655_v59 = vadd.f32 %v9149_v10, %v6571_v61  ;;  %10526 = vrot.lane.b32.xlu1 %v10525_v40, %s15784_s3  ;;  %9154 = vmatprep.subr.bf16.mxu0 %v6863_v55 }
0x16c3   : > { %v6704_v28 = vadd.f32 %v9308_v24, %v6655_v59  ;;  %v6709_v46 = vmax.f32 %v6701_v11, 0.0 }
0x16c5   : > { %v6710_v30 = vmax.f32 %v6704_v28, 0.0  ;;  %10531 = vrot.lane.b32.xlu1 %v10525_v40, %s15782_s7 }
0x16c7   : > { %v10535_v36 = vpack.i.bf16 %v6710_v30, %v6709_v46  ;;  %v6864_v45 = vpack.c.bf16 %v6710_v30, %v6709_v46 }
0x16c9   : > { %10536 = vrot.lane.b32.xlu0 %v10535_v36, %s15784_s3  ;;  %10546 = vrot.lane.b32.xlu1 %v10535_v36, %s15782_s7 }
0x16cd   : > { %10541 = vrot.lane.b32.xlu0 %v10525_v40, %s15851_s2  ;;  %10556 = vrot.lane.b32.xlu1 %v10525_v40, %s15762_s1 }
0x16d1   : > { %10551 = vrot.lane.b32.xlu0 %v10535_v36, %s15851_s2  ;;  %10566 = vrot.lane.b32.xlu1 %v10525_v40, %s15852_s8 }
0x16d5   : > { %10561 = vrot.lane.b32.xlu0 %v10535_v36, %s15762_s1  ;;  %10576 = vrot.lane.b32.xlu1 %v10525_v40, %s15785_s5 }
0x16d9   : > { %10571 = vrot.lane.b32.xlu0 %v10535_v36, %s15852_s8  ;;  %6875 = vperm.xlu1 %10169, %v6719_v33  }
0x16dd   : > { %10581 = vrot.lane.b32.xlu0 %v10535_v36, %s15785_s5  ;;  %6885 = vperm.xlu1 %10169, %v6721_v20  }
0x16e1   : > { %6880 = vperm.xlu0 %9903, %v6720_v19  }
0x16e5   : > { %6890 = vperm.xlu0 %9903, %v6722_v57  }
0x1733   : > { %v10527_v9 = vpop.permute.xlu1 %10526 }
0x1734   : > { %v10529_v31 = vunpack.i.h.bf16 %v10527_v9  ;;  %v10528_v6 = vunpack.i.l.bf16 %v10527_v9 }
0x1736   : > { %v6740_v22 = vsel %vm5309_vm7, 0.0, %v10529_v31  ;;  %v6739_v48 = vsel %vm5309_vm7, 0.0, %v10528_v6 }
0x1737   : > { %v8870_v49 = vpack.c.bf16 %v6740_v22, %v6739_v48  ;;  %v10532_v17 = vpop.permute.xlu1 %10531 }
0x1738   : > { %v10534_v56 = vunpack.i.h.bf16 %v10532_v17  ;;  %v10533_v32 = vunpack.i.l.bf16 %v10532_v17 }
0x1739   : > { %9155 = vmatpush3.bf16.msk.msra.mxu0 %vm14467_vm2, %v8870_v49 }
0x173a   : > { %9156 = vmatprep.subr.bf16.mxu0 %v6864_v45  ;;  %v6804_v24 = vsel %vm5309_vm7, %v10534_v56, 0.0  ;;  %v6803_v7 = vsel %vm5309_vm7, %v10533_v32, 0.0 }
0x173b   : > { %v10537_v26 = vpop.permute.xlu0 %10536  ;;  %v10547_v54 = vpop.permute.xlu1 %10546  ;;  %v8894_v43 = vpack.c.bf16 %v6804_v24, %v6803_v7 }
0x173c   : > { %v10539_v4 = vunpack.i.h.bf16 %v10537_v26  ;;  %v10538_v63 = vunpack.i.l.bf16 %v10537_v26  ;;  %v10549_v1 = vunpack.i.h.bf16 %v10547_v54  ;;  %v10548_v42 = vunpack.i.l.bf16 %v10547_v54 }
0x173e   : > { %v6742_v52 = vsel %vm5309_vm7, 0.0, %v10539_v4  ;;  %v6741_v15 = vsel %vm5309_vm7, 0.0, %v10538_v63  ;;  %v6806_v8 = vsel %vm5309_vm7, %v10549_v1, 0.0  ;;  %v6805_v35 = vsel %vm5309_vm7, %v10548_v42, 0.0 }
0x173f   : > { %v8873_v38 = vpack.c.bf16 %v6742_v52, %v6741_v15  ;;  %v10542_v5 = vpop.permute.xlu0 %10541  ;;  %v10557_v60 = vpop.permute.xlu1 %10556  ;;  %v8897_v34 = vpack.c.bf16 %v6806_v8, %v6805_v35 }
0x1740   : > { %v10544_v29 = vunpack.i.h.bf16 %v10542_v5  ;;  %v10543_v14 = vunpack.i.l.bf16 %v10542_v5  ;;  %v10559_v27 = vunpack.i.h.bf16 %v10557_v60  ;;  %v10558_v13 = vunpack.i.l.bf16 %v10557_v60  ;;  %v10682_v5 = vld [vmem:[%s15850_s11] ss:$12 sps:$4 sm:$0xff]   ;;  %v10687_v60 = vld [vmem:[%s15850_s11 + $0x1c] ss:$12 sps:$4 sm:$0xff]  }
0x1741   : > { %9157 = vmatpush3.bf16.msk.msra.mxu0 %vm14467_vm2, %v8873_v38  ;;  %v10686_v38 = vld [vmem:[%s15850_s11 + $0x20] ss:$12 sps:$4 sm:$0xff]  }
0x1742   : > { %v6760_v37 = vsel %vm6419_vm9, 0.0, %v10544_v29  ;;  %v6759_v0 = vsel %vm6419_vm9, 0.0, %v10543_v14  ;;  %9158 = vmatprep.subr.msk.bf16.mxu0 %vm14481_vm1, %v8894_v43  ;;  %v6780_v61 = vsel %vm15854_vm13, 0.0, %v10559_v27  ;;  %v6779_v11 = vsel %vm15834_vm8, 0.0, %v10558_v13  ;;  %vm15858_vm13 = vmmov %vm15856_vm4 }
0x1743   : > { %v8876_v62 = vpack.c.bf16 %v6760_v37, %v6759_v0  ;;  %v10552_v23 = vpop.permute.xlu0 %10551  ;;  %v10567_v47 = vpop.permute.xlu1 %10566  ;;  %v8882_v57 = vpack.c.bf16 %v6780_v61, %v6779_v11  ;;  %vm15859_vm8 = vmmov %vm15856_vm4 }
0x1744   : > { %v10554_v39 = vunpack.i.h.bf16 %v10552_v23  ;;  %v10553_v10 = vunpack.i.l.bf16 %v10552_v23  ;;  %v10569_v25 = vunpack.i.h.bf16 %v10567_v47  ;;  %v10568_v20 = vunpack.i.l.bf16 %v10567_v47 }
0x1745   : > { %9159 = vmatpush3.bf16.msk.msra.mxu0 %vm14497_vm11, %v8876_v62 }
0x1746   : > { %v6762_v40 = vsel %vm6419_vm9, 0.0, %v10554_v39  ;;  %v6761_v55 = vsel %vm6419_vm9, 0.0, %v10553_v10  ;;  %9160 = vmatprep.subr.msk.bf16.mxu0 %vm14481_vm1, %v8897_v34  ;;  %v6828_v48 = vsel %vm6419_vm9, %v10569_v25, 0.0  ;;  %v6827_v49 = vsel %vm6419_vm9, %v10568_v20, 0.0 }
0x1747   : > { %v8879_v59 = vpack.c.bf16 %v6762_v40, %v6761_v55  ;;  %v10562_v28 = vpop.permute.xlu0 %10561  ;;  %v10577_v46 = vpop.permute.xlu1 %10576  ;;  %v8906_v54 = vpack.c.bf16 %v6828_v48, %v6827_v49 }
0x1748   : > { %v10564_v30 = vunpack.i.h.bf16 %v10562_v28  ;;  %v10563_v36 = vunpack.i.l.bf16 %v10562_v28  ;;  %v10579_v45 = vunpack.i.h.bf16 %v10577_v46  ;;  %v10578_v33 = vunpack.i.l.bf16 %v10577_v46 }
0x1749   : > { %9161 = vmatpush3.bf16.msk.msra.mxu0 %vm14497_vm11, %v8879_v59 }
0x174a   : > { %v6848_v12 = vsel %vm15855_vm14, %v10579_v45, 0.0  ;;  %v6847_v19 = vsel %vm15856_vm4, %v10578_v33, 0.0  ;;  %9162 = vmatprep.subr.msk.bf16.mxu0 %vm14519_vm3, %v8894_v43  ;;  %v6782_v6 = vsel %vm15857_vm12, 0.0, %v10564_v30  ;;  %v6781_v22 = vsel %vm15858_vm13, 0.0, %v10563_v36  ;;  %vm15860_vm14 = vmmov %vm15856_vm4  ;;  %v10689_v43 = vld [vmem:[%s15850_s11 + $0x18] ss:$12 sps:$4 sm:$0xff]  }
0x174b   : > { %v8912_v9 = vpack.c.bf16 %v6848_v12, %v6847_v19  ;;  %v10572_v31 = vpop.permute.xlu0 %10571  ;;  %v8885_v32 = vpack.c.bf16 %v6782_v6, %v6781_v22  ;;  %vm15861_vm4 = vcmask 261120  }
0x174c   : > { %v10574_v17 = vunpack.i.h.bf16 %v10572_v31  ;;  %v10573_v56 = vunpack.i.l.bf16 %v10572_v31  ;;  %vm15864_vm12 = vmmov %vm15861_vm4 }
0x174d   : > { %9163 = vmatpush3.bf16.msk.msra.mxu0 %vm14542_vm0, %v8882_v57  ;;  %9309 = vmatprep.subr.msk.bf16.mxu1 %vm14534_vm10, %v8912_v9 }
0x174e   : > { %9164 = vmatprep.subr.msk.bf16.mxu0 %vm14519_vm3, %v8897_v34  ;;  %9310 = vmatpush3.bf16.msk.msra.mxu1 %vm14534_vm10, %v8912_v9  ;;  %v6830_v24 = vsel %vm6419_vm9, %v10574_v17, 0.0  ;;  %v6829_v7 = vsel %vm6419_vm9, %v10573_v56, 0.0  ;;  %v7039_v17 = vld [vmem:[%s15862_s0] sm:$0xff] }
0x174f   : > { %v10582_v26 = vpop.permute.xlu0 %10581  ;;  %v8909_v15 = vpack.c.bf16 %v6830_v24, %v6829_v7  ;;  %v10692_v56 = vld [vmem:[%s15863_s9 + $0x4] ss:$12 sps:$4 sm:$0xff]  }
0x1750   : > { %v10584_v4 = vunpack.i.h.bf16 %v10582_v26  ;;  %v10583_v63 = vunpack.i.l.bf16 %v10582_v26  ;;  %v7041_v26 = vld [vmem:[%s15862_s0 + $0x10] sm:$0xff] }
0x1751   : > { %9165 = vmatpush3.bf16.msk.msra.mxu0 %vm14542_vm0, %v8885_v32 }
0x1752   : > { %v6850_v1 = vsel %vm15859_vm8, %v10584_v4, 0.0  ;;  %v6849_v42 = vsel %vm15860_vm14, %v10583_v63, 0.0  ;;  %9166 = vmatprep.subr.msk.bf16.mxu0 %vm14561_vm15, %v8906_v54  ;;  %v7040_v54 = vld [vmem:[%s15862_s0 + $0x8] sm:$0xff]  ;;  %v7042_v4 = vld [vmem:[%s15862_s0 + $0x18] sm:$0xff] }
0x1753   : > { %v8915_v52 = vpack.c.bf16 %v6850_v1, %v6849_v42 }
0x1755   : > { %9167 = vmatpush3.bf16.msk.msra.mxu0 %vm14576_vm6, %v8882_v57  ;;  %9311 = vmatprep.subr.msk.bf16.mxu1 %vm14534_vm10, %v8915_v52 }
0x1756   : > { %9168 = vmatprep.subr.msk.bf16.mxu0 %vm14561_vm15, %v8909_v15  ;;  %9312 = vmatpush3.bf16.msk.msra.mxu1 %vm14534_vm10, %v8915_v52 }
0x1758   : > { %v6876_v13 = vpop.permute.xlu1 %6875 }
0x1759   : > { %9169 = vmatpush3.bf16.msk.msra.mxu0 %vm14576_vm6, %v8885_v32  ;;  %9314 = vmatmul.mubr.msk.bf16.vlgmr.msra.gmra.mrb[76].mxu1 %vm15861_vm4, %v10686_v38  ;;  %v10693_v32 = vld [vmem:[%s15863_s9 + $0x8] ss:$12 sps:$4 sm:$0xff]  }
0x175a   : > { %7281 = vmatprep.mubr.bf16.mxu1 %v10692_v56 }
0x175c   : > { %6962 = vmatmul.mubr.bf16.vlgmr.msra.gmra.mrb[32].mxu0 %v10682_v5  ;;  %v6886_v36 = vpop.permute.xlu1 %6885 }
0x175d   : > { %6969 = vmatprep.mubr.bf16.mxu0 %v10687_v60 }
0x1760   : > { %v6881_v39 = vpop.permute.xlu0 %6880 }
0x1764   : > { %6970 = vmatmul.mubr.bf16.gmra.mrb[36].mxu0 %v10689_v43  ;;  %v6891_v19 = vpop.permute.xlu0 %6890 }
0x1765   : > { %9321 = vmatprep.mubr.msk.bf16.mxu0 %vm15864_vm12, %v10693_v32 }
0x182c   : > { %v9315_v29 = vpop.f32.mrb[76].mxu1 }
0x182d   : > { %v7012_v14 = vpop.f32.mrb[77].mxu1 }
0x182e   : > { %v9316_v8 = vpop.f32.mrb[78].mxu1 }
0x182f   : > { %v9170_v35 = vpop.f32.mrb[32].mxu0  ;;  %v7015_v37 = vpop.f32.mrb[79].mxu1 }
0x1830   : > { %v9171_v0 = vpop.f32.mrb[33].mxu0 }
0x1831   : > { %v9172_v62 = vadd.f32 %v9171_v0, %v9170_v35  ;;  %v9173_v27 = vpop.f32.mrb[34].mxu0 }
0x1832   : > { %v9174_v23 = vpop.f32.mrb[35].mxu0 }
0x1833   : > { %v9175_v47 = vadd.f32 %v9174_v23, %v9173_v27  ;;  %v6964_v34 = vadd.f32 %v9172_v62, %v6876_v13 }
0x1835   : > { %v7013_v10 = vadd.f32 %v7012_v14, %v6964_v34  ;;  %v6967_v40 = vadd.f32 %v9175_v47, %v6881_v39 }
0x1837   : > { %v7016_v55 = vadd.f32 %v7015_v37, %v6967_v40  ;;  %v9176_v61 = vpop.f32.mrb[36].mxu0  ;;  %v7027_v59 = vmax.f32 %v7013_v10, 0.0 }
0x1838   : > { %v9177_v11 = vpop.f32.mrb[37].mxu0 }
0x1839   : > { %v7028_v28 = vmax.f32 %v7016_v55, 0.0  ;;  %v9178_v46 = vadd.f32 %v9177_v11, %v9176_v61  ;;  %v9179_v30 = vpop.f32.mrb[38].mxu0 }
0x183a   : > { %v9180_v45 = vpop.f32.mrb[39].mxu0 }
0x183b   : > { %v6972_v33 = vadd.f32 %v9178_v46, %v6886_v36  ;;  %v9181_v25 = vadd.f32 %v9180_v45, %v9179_v30  ;;  %v10585_v20 = vpack.i.bf16 %v7028_v28, %v7027_v59  ;;  %v7183_v12 = vpack.c.bf16 %v7028_v28, %v7027_v59 }
0x183d   : > { %v7021_v57 = vadd.f32 %v9315_v29, %v6972_v33  ;;  %v6975_v9 = vadd.f32 %v9181_v25, %v6891_v19  ;;  %10586 = vrot.lane.b32.xlu1 %v10585_v20, %s15784_s3  ;;  %9186 = vmatprep.subr.bf16.mxu1 %v7183_v12 }
0x183f   : > { %v7024_v31 = vadd.f32 %v9316_v8, %v6975_v9  ;;  %v7029_v6 = vmax.f32 %v7021_v57, 0.0 }
0x1841   : > { %v7030_v22 = vmax.f32 %v7024_v31, 0.0  ;;  %10591 = vrot.lane.b32.xlu1 %v10585_v20, %s15782_s7 }
0x1843   : > { %v10595_v48 = vpack.i.bf16 %v7030_v22, %v7029_v6  ;;  %v7184_v49 = vpack.c.bf16 %v7030_v22, %v7029_v6 }
0x1845   : > { %10596 = vrot.lane.b32.xlu0 %v10595_v48, %s15784_s3  ;;  %10606 = vrot.lane.b32.xlu1 %v10595_v48, %s15782_s7  ;;  %s15882_s3 = sld [smem:[#allocation21_spill]] }
0x1849   : > { %10601 = vrot.lane.b32.xlu0 %v10585_v20, %s15851_s2  ;;  %10616 = vrot.lane.b32.xlu1 %v10585_v20, %s15762_s1 }
0x184d   : > { %10611 = vrot.lane.b32.xlu0 %v10595_v48, %s15851_s2  ;;  %10626 = vrot.lane.b32.xlu1 %v10585_v20, %s15852_s8 }
0x1851   : > { %10621 = vrot.lane.b32.xlu0 %v10595_v48, %s15762_s1  ;;  %10636 = vrot.lane.b32.xlu1 %v10585_v20, %s15785_s5  ;;  %s15889_s1 = sld [smem:[#allocation22_spill]] }
0x1855   : > { %10631 = vrot.lane.b32.xlu0 %v10595_v48, %s15852_s8  ;;  %7195 = vperm.xlu1 %10169, %v7039_v17  }
0x1859   : > { %10641 = vrot.lane.b32.xlu0 %v10595_v48, %s15785_s5  ;;  %7205 = vperm.xlu1 %10169, %v7041_v26  }
0x185d   : > { %7200 = vperm.xlu0 %9903, %v7040_v54  }
0x1861   : > { %7210 = vperm.xlu0 %9903, %v7042_v4  }
0x18af   : > { %v10587_v63 = vpop.permute.xlu1 %10586 }
0x18b0   : > { %v10589_v24 = vunpack.i.h.bf16 %v10587_v63  ;;  %v10588_v7 = vunpack.i.l.bf16 %v10587_v63 }
0x18b2   : > { %v7060_v1 = vsel %vm5309_vm7, 0.0, %v10589_v24  ;;  %v7059_v42 = vsel %vm5309_vm7, 0.0, %v10588_v7 }
0x18b3   : > { %v8926_v52 = vpack.c.bf16 %v7060_v1, %v7059_v42  ;;  %v10592_v15 = vpop.permute.xlu1 %10591 }
0x18b4   : > { %v10594_v38 = vunpack.i.h.bf16 %v10592_v15  ;;  %v10593_v5 = vunpack.i.l.bf16 %v10592_v15 }
0x18b5   : > { %9187 = vmatpush3.bf16.msk.msra.mxu1 %vm14467_vm2, %v8926_v52 }
0x18b6   : > { %9188 = vmatprep.subr.bf16.mxu1 %v7184_v49  ;;  %v7124_v8 = vsel %vm5309_vm7, %v10594_v38, 0.0  ;;  %v7123_v35 = vsel %vm5309_vm7, %v10593_v5, 0.0 }
0x18b7   : > { %v10597_v60 = vpop.permute.xlu0 %10596  ;;  %v10607_v43 = vpop.permute.xlu1 %10606  ;;  %v8950_v34 = vpack.c.bf16 %v7124_v8, %v7123_v35 }
0x18b8   : > { %v10599_v29 = vunpack.i.h.bf16 %v10597_v60  ;;  %v10598_v14 = vunpack.i.l.bf16 %v10597_v60  ;;  %v10609_v37 = vunpack.i.h.bf16 %v10607_v43  ;;  %v10608_v0 = vunpack.i.l.bf16 %v10607_v43 }
0x18ba   : > { %v7062_v62 = vsel %vm5309_vm7, 0.0, %v10599_v29  ;;  %v7061_v27 = vsel %vm5309_vm7, 0.0, %v10598_v14  ;;  %v7126_v40 = vsel %vm5309_vm7, %v10609_v37, 0.0  ;;  %v7125_v55 = vsel %vm5309_vm7, %v10608_v0, 0.0  ;;  %v10694_v37 = vld [vmem:[%s15863_s9 + $0x20] ss:$12 sps:$4 sm:$0xff]  }
0x18bb   : > { %v8929_v13 = vpack.c.bf16 %v7062_v62, %v7061_v27  ;;  %v10602_v23 = vpop.permute.xlu0 %10601  ;;  %v10617_v47 = vpop.permute.xlu1 %10616  ;;  %v8953_v45 = vpack.c.bf16 %v7126_v40, %v7125_v55  ;;  %v10695_v0 = vld [vmem:[%s15863_s9 + $0x1c] ss:$12 sps:$4 sm:$0xff]   ;;  %v10697_v62 = vld [vmem:[%s15863_s9 + $0x18] ss:$12 sps:$4 sm:$0xff]  }
0x18bc   : > { %v10604_v39 = vunpack.i.h.bf16 %v10602_v23  ;;  %v10603_v10 = vunpack.i.l.bf16 %v10602_v23  ;;  %v10619_v28 = vunpack.i.h.bf16 %v10617_v47  ;;  %v10618_v46 = vunpack.i.l.bf16 %v10617_v47 }
0x18bd   : > { %9189 = vmatpush3.bf16.msk.msra.mxu1 %vm14467_vm2, %v8929_v13  ;;  %vm15865_vm2 = vmmov %vm15859_vm8 }
0x18be   : > { %v7080_v61 = vsel %vm6419_vm9, 0.0, %v10604_v39  ;;  %v7079_v11 = vsel %vm6419_vm9, 0.0, %v10603_v10  ;;  %9190 = vmatprep.subr.msk.bf16.mxu1 %vm14481_vm1, %v8950_v34  ;;  %v7100_v12 = vsel %vm15865_vm2, 0.0, %v10619_v28  ;;  %vm15866_vm13 = vmmov %vm15865_vm2 }
0x18bf   : > { %v8932_v59 = vpack.c.bf16 %v7080_v61, %v7079_v11  ;;  %v10612_v30 = vpop.permute.xlu0 %10611  ;;  %v10627_v36 = vpop.permute.xlu1 %10626  ;;  %v7099_v19 = vsel %vm15866_vm13, 0.0, %v10618_v46  ;;  %vm15867_vm8 = vmmov %vm15865_vm2 }
0x18c0   : > { %v10614_v33 = vunpack.i.h.bf16 %v10612_v30  ;;  %v10613_v25 = vunpack.i.l.bf16 %v10612_v30  ;;  %v10629_v17 = vunpack.i.h.bf16 %v10627_v36  ;;  %v10628_v56 = vunpack.i.l.bf16 %v10627_v36  ;;  %vm15868_vm14 = vmmov %vm15865_vm2 }
0x18c1   : > { %9191 = vmatpush3.bf16.msk.msra.mxu1 %vm14497_vm11, %v8932_v59  ;;  %v8938_v26 = vpack.c.bf16 %v7100_v12, %v7099_v19  ;;  %v7415_v36 = vshll.u32 %v15565_v51, 2 }
0x18c2   : > { %v7082_v16 = vsel %vm6419_vm9, 0.0, %v10614_v33  ;;  %v7081_v20 = vsel %vm6419_vm9, 0.0, %v10613_v25  ;;  %9192 = vmatprep.subr.msk.bf16.mxu1 %vm14481_vm1, %v8953_v45  ;;  %vm15869_vm1 = vmmov %vm15865_vm2  ;;  %v7148_v7 = vsel %vm6419_vm9, %v10629_v17, 0.0  ;;  %v7147_v1 = vsel %vm6419_vm9, %v10628_v56, 0.0 }
0x18c3   : > { %v8935_v57 = vpack.c.bf16 %v7082_v16, %v7081_v20  ;;  %v10622_v9 = vpop.permute.xlu0 %10621  ;;  %v10637_v31 = vpop.permute.xlu1 %10636  ;;  %vm15870_vm4 = vmmov %vm15869_vm1  ;;  %v8962_v38 = vpack.c.bf16 %v7148_v7, %v7147_v1 }
0x18c4   : > { %v10624_v6 = vunpack.i.h.bf16 %v10622_v9  ;;  %v10623_v22 = vunpack.i.l.bf16 %v10622_v9  ;;  %v10639_v48 = vunpack.i.h.bf16 %v10637_v31  ;;  %v10638_v49 = vunpack.i.l.bf16 %v10637_v31  ;;  %vm15877_vm2 = vmmov %vm15869_vm1 }
0x18c5   : > { %9193 = vmatpush3.bf16.msk.msra.mxu1 %vm14497_vm11, %v8935_v57  ;;  %vm15871_vm11 = vmmov %vm15869_vm1 }
0x18c6   : > { %v7168_v32 = vsel %vm15867_vm8, %v10639_v48, 0.0  ;;  %v7167_v50 = vsel %vm15868_vm14, %v10638_v49, 0.0  ;;  %9194 = vmatprep.subr.msk.bf16.mxu1 %vm14519_vm3, %v8950_v34  ;;  %v7102_v63 = vsel %vm15869_vm1, 0.0, %v10624_v6  ;;  %v7101_v24 = vsel %vm15870_vm4, 0.0, %v10623_v22  ;;  %vm15879_vm13 = vmmov %vm15869_vm1 }
0x18c7   : > { %v8968_v54 = vpack.c.bf16 %v7168_v32, %v7167_v50  ;;  %v10632_v4 = vpop.permute.xlu0 %10631  ;;  %v8941_v52 = vpack.c.bf16 %v7102_v63, %v7101_v24  ;;  %vm15880_vm8 = vmmov %vm15869_vm1  ;;  %vm15888_vm4 = vcmask 523264  }
0x18c8   : > { %v10634_v21 = vunpack.i.h.bf16 %v10632_v4  ;;  %v10633_v42 = vunpack.i.l.bf16 %v10632_v4 }
0x18c9   : > { %9195 = vmatpush3.bf16.msk.msra.mxu1 %vm14542_vm0, %v8938_v26  ;;  %9317 = vmatprep.subr.msk.bf16.mxu0 %vm14534_vm10, %v8968_v54 }
0x18ca   : > { %9196 = vmatprep.subr.msk.bf16.mxu1 %vm14519_vm3, %v8953_v45  ;;  %9318 = vmatpush3.bf16.msk.msra.mxu0 %vm14534_vm10, %v8968_v54  ;;  %v7150_v43 = vsel %vm6419_vm9, %v10634_v21, 0.0  ;;  %v7149_v29 = vsel %vm6419_vm9, %v10633_v42, 0.0  ;;  %vm15872_vm3 = vmmov %vm15869_vm1 }
0x18cb   : > { %v10642_v15 = vpop.permute.xlu0 %10641  ;;  %v8965_v35 = vpack.c.bf16 %v7150_v43, %v7149_v29 }
0x18cc   : > { %v10644_v5 = vunpack.i.h.bf16 %v10642_v15  ;;  %v10643_v60 = vunpack.i.l.bf16 %v10642_v15 }
0x18cd   : > { %9197 = vmatpush3.bf16.msk.msra.mxu1 %vm14542_vm0, %v8941_v52  ;;  %vm15873_vm0 = vmmov %vm15864_vm12 }
0x18ce   : > { %v7170_v41 = vsel %vm15871_vm11, %v10644_v5, 0.0  ;;  %v7169_v14 = vsel %vm15872_vm3, %v10643_v60, 0.0  ;;  %9198 = vmatprep.subr.msk.bf16.mxu1 %vm14561_vm15, %v8962_v38  ;;  %vm15876_vm12 = vmmov %vm15869_vm1  ;;  %vm15887_vm1 = vmmov 0  }
0x18cf   : > { %v8971_v8 = vpack.c.bf16 %v7170_v41, %v7169_v14  ;;  %vm15881_vm14 = vmmov %vm15873_vm0 }
0x18d0   : > { %vm15890_vm11 = vmmov %vm15888_vm4 }
0x18d1   : > { %9199 = vmatpush3.bf16.msk.msra.mxu1 %vm14576_vm6, %v8938_v26  ;;  %9319 = vmatprep.subr.msk.bf16.mxu0 %vm14534_vm10, %v8971_v8  ;;  %vm15891_vm3 = vmmov %vm15888_vm4 }
0x18d2   : > { %9200 = vmatprep.subr.msk.bf16.mxu1 %vm14561_vm15, %v8965_v35  ;;  %9320 = vmatpush3.bf16.msk.msra.mxu0 %vm14534_vm10, %v8971_v8  ;;  %vm7416_vm10 = vcmp.eq.s32.totalorder %v15564_v18, %v7415_v36  ;;  %vm15874_vm15 = vcmask 1043456  }
0x18d3   : > { %v8975_v12 = vsel %vm7416_vm10, 1.0, %v10766_v3  ;;  %vm15893_vm10 = vmmov %vm15877_vm2 }
0x18d4   : > { %v7196_v10 = vpop.permute.xlu1 %7195  ;;  %9325 = vmatprep.subr.msk.mxu0 %vm15874_vm15, %v8975_v12 }
0x18d5   : > { %9201 = vmatpush3.bf16.msk.msra.mxu1 %vm14576_vm6, %v8941_v52  ;;  %9322 = vmatmul.mubr.msk.bf16.vlgmr.msra.gmra.mrb[40].mxu0 %vm15873_vm0, %v10694_v37  ;;  %vm15875_vm6 = vmmov %vm15874_vm15 }
0x18d6   : > { %9326 = vmatpush3.msk.msra.mxu0 %vm15875_vm6, %v8975_v12  ;;  %vm15894_vm15 = vmmov %vm15877_vm2 }
0x18d7   : > { %vm15895_vm6 = vmmov %vm15877_vm2 }
0x18d8   : > { %7282 = vmatmul.mubr.bf16.vlgmr.msra.gmra.mrb[80].mxu1 %v10690_v2  ;;  %v7206_v16 = vpop.permute.xlu1 %7205 }
0x18d9   : > { %7289 = vmatprep.mubr.bf16.mxu1 %v10695_v0 }
0x18dc   : > { %v7201_v61 = vpop.permute.xlu0 %7200 }
0x18e0   : > { %7290 = vmatmul.mubr.bf16.gmra.mrb[84].mxu1 %v10697_v62  ;;  %v7211_v31 = vpop.permute.xlu0 %7210 }
0x19a8   : > { %v9323_v27 = vpop.f32.mrb[40].mxu0 }
0x19a9   : > { %v7332_v13 = vpop.f32.mrb[41].mxu0 }
0x19aa   : > { %v9324_v23 = vpop.f32.mrb[42].mxu0 }
0x19ab   : > { %v9202_v47 = vpop.f32.mrb[80].mxu1  ;;  %v7335_v44 = vpop.f32.mrb[43].mxu0 }
0x19ac   : > { %v9203_v34 = vpop.f32.mrb[81].mxu1 }
0x19ad   : > { %v9204_v39 = vadd.f32 %v9203_v34, %v9202_v47  ;;  %v9205_v53 = vpop.f32.mrb[82].mxu1 }
0x19ae   : > { %v9206_v40 = vpop.f32.mrb[83].mxu1 }
0x19af   : > { %v7284_v55 = vadd.f32 %v9204_v39, %v7196_v10  ;;  %v9207_v58 = vadd.f32 %v9206_v40, %v9205_v53 }
0x19b1   : > { %v7333_v11 = vadd.f32 %v7332_v13, %v7284_v55  ;;  %v7287_v59 = vadd.f32 %v9207_v58, %v7201_v61 }
0x19b3   : > { %v7347_v28 = vmax.f32 %v7333_v11, 0.0  ;;  %v7336_v46 = vadd.f32 %v7335_v44, %v7287_v59  ;;  %v9208_v30 = vpop.f32.mrb[84].mxu1 }
0x19b4   : > { %v9209_v45 = vpop.f32.mrb[85].mxu1 }
0x19b5   : > { %v9210_v33 = vadd.f32 %v9209_v45, %v9208_v30  ;;  %v9211_v25 = vpop.f32.mrb[86].mxu1  ;;  %7375 = vrot.lane.b32.xlu0 %v7347_v28, %s15852_s8  ;;  %7355 = vrot.lane.b32.xlu1 %v7347_v28, %s15782_s7  ;;  %v7348_v19 = vmax.f32 %v7336_v46, 0.0  ;;  %v10702_v30 = vld [vmem:[%s15882_s3] sm:$0xff]  }
0x19b6   : > { %v9212_v20 = vpop.f32.mrb[87].mxu1  ;;  %9353 = vmatprep.mubr.msk.bf16.mxu1 %vm15888_vm4, %v10702_v30 }
0x19b7   : > { %v7292_v57 = vadd.f32 %v9210_v33, %v7206_v16  ;;  %v9213_v9 = vadd.f32 %v9212_v20, %v9211_v25 }
0x19b9   : > { %v7341_v51 = vadd.f32 %v9323_v27, %v7292_v57  ;;  %v7295_v6 = vadd.f32 %v9213_v9, %v7211_v31  ;;  %7357 = vrot.lane.b32.xlu0 %v7348_v19, %s15782_s7  ;;  %7391 = vrot.lane.b32.xlu1 %v7347_v28, %s15785_s5 }
0x19bb   : > { %v7344_v22 = vadd.f32 %v9324_v23, %v7295_v6  ;;  %v7349_v18 = vmax.f32 %v7341_v51, 0.0 }
0x19bd   : > { %7393 = vrot.lane.b32.xlu0 %v7348_v19, %s15785_s5  ;;  %7377 = vrot.lane.b32.xlu1 %v7348_v19, %s15852_s8  ;;  %v7350_v48 = vmax.f32 %v7344_v22, 0.0 }
0x19c1   : > { %7379 = vrot.lane.b32.xlu0 %v7349_v18, %s15852_s8  ;;  %7359 = vrot.lane.b32.xlu1 %v7349_v18, %s15782_s7 }
0x19c5   : > { %7361 = vrot.lane.b32.xlu0 %v7350_v48, %s15782_s7  ;;  %7395 = vrot.lane.b32.xlu1 %v7349_v18, %s15785_s5  ;;  %s9000_s7 = sshll.u32 %s15902_s16, 6 }
0x19c6   : > { %s14829_s2 = scalar_lea.vmem %s10955_s4, %s9000_s7  ;;  %s7954_s7 = sshll.u32 %s15902_s16, 1 }
0x19c7   : > { %s1050_s0 = scalar_lea.vmem %s10960_s6, %s7954_s7 }
0x19c9   : > { %7397 = vrot.lane.b32.xlu0 %v7350_v48, %s15785_s5  ;;  %7381 = vrot.lane.b32.xlu1 %v7350_v48, %s15852_s8  ;;  %s15878_s5 = sld [smem:[#allocation19_spill]]  ;;  %s15883_s8 = sld [smem:[#allocation20_spill]] }
0x19cf   : > { %v10698_v53 = vld [vmem:[%s15878_s5] sm:$0xff]   ;;  %v10699_v59 = vld [vmem:[%s15878_s5 + $0x8] sm:$0xff]   ;;  %v10701_v46 = vld [vmem:[%s15878_s5 + $0x18] sm:$0xff]  }
0x19d0   : > { %v7529_v36 = vld [vmem:[%s15883_s8 + $0x10] sm:$0xff]  ;;  %v7527_v45 = vld [vmem:[%s15883_s8] sm:$0xff]  ;;  %v7530_v25 = vld [vmem:[%s15883_s8 + $0x18] sm:$0xff] }
0x19d1   : > { %v7528_v12 = vld [vmem:[%s15883_s8 + $0x8] sm:$0xff] }
0x1a27   : > { %v7376_v49 = vpop.permute.xlu0 %7375  ;;  %v7356_v17 = vpop.permute.xlu1 %7355 }
0x1a28   : > { %v7367_v56 = vsel %vm5309_vm7, %v7356_v17, 0.0  ;;  %v7387_v26 = vsel %vm6419_vm9, %v7376_v49, 0.0  ;;  %v7533_v49 = vld [vmem:[%s15883_s8 + $0x30] sm:$0xff] }
0x1a29   : > { %v7371_v4 = vmax.f32 %v7347_v28, %v7367_v56  ;;  %v10700_v28 = vld [vmem:[%s15878_s5 + $0x10] sm:$0xff]   ;;  %v7531_v56 = vld [vmem:[%s15883_s8 + $0x20] sm:$0xff] }
0x1a2b   : > { %v7358_v32 = vpop.permute.xlu0 %7357  ;;  %v7392_v50 = vpop.permute.xlu1 %7391 }
0x1a2c   : > { %v7403_v54 = vsel %vm15876_vm12, %v7392_v50, 0.0  ;;  %v7368_v24 = vsel %vm5309_vm7, %v7358_v32, 0.0  ;;  %vm15896_vm12 = vmmov %vm15877_vm2 }
0x1a2d   : > { %v7407_v63 = vmax.f32 %v7387_v26, %v7403_v54  ;;  %v7372_v15 = vmax.f32 %v7348_v19, %v7368_v24  ;;  %v7534_v26 = vld [vmem:[%s15883_s8 + $0x38] sm:$0xff] }
0x1a2f   : > { %v7411_v7 = vmax.f32 %v7371_v4, %v7407_v63  ;;  %v7394_v1 = vpop.permute.xlu0 %7393  ;;  %v7378_v21 = vpop.permute.xlu1 %7377  ;;  %v7532_v63 = vld [vmem:[%s15883_s8 + $0x28] sm:$0xff] }
0x1a30   : > { %v7404_v42 = vsel %vm15877_vm2, %v7394_v1, 0.0  ;;  %v7388_v52 = vsel %vm6419_vm9, %v7378_v21, 0.0 }
0x1a31   : > { %v7408_v38 = vmax.f32 %v7388_v52, %v7404_v42  ;;  %9327 = vmatprep.mubr.msk.f32.mxu0 %vm5296_vm5, %v7411_v7 }
0x1a33   : > { %v7412_v5 = vmax.f32 %v7372_v15, %v7408_v38  ;;  %v7380_v60 = vpop.permute.xlu0 %7379  ;;  %v7360_v43 = vpop.permute.xlu1 %7359 }
0x1a34   : > { %v7369_v29 = vsel %vm5309_vm7, %v7360_v43, 0.0  ;;  %v7389_v8 = vsel %vm6419_vm9, %v7380_v60, 0.0 }
0x1a35   : > { %9328 = vmatmul.mubr.msk.f32.vlgmr.msra.gmra.mrb[18].mxu0 %vm5296_vm5, %v7412_v5  ;;  %v7373_v37 = vmax.f32 %v7349_v18, %v7369_v29  ;;  %v10703_v29 = vld [vmem:[%s15882_s3 + $0x8] sm:$0xff]  }
0x1a37   : > { %v7362_v41 = vpop.permute.xlu0 %7361  ;;  %v7396_v14 = vpop.permute.xlu1 %7395 }
0x1a38   : > { %v7405_v35 = vsel %vm15879_vm13, %v7396_v14, 0.0  ;;  %v7370_v0 = vsel %vm5309_vm7, %v7362_v41, 0.0  ;;  %vm15885_vm7 = vmmov %vm15873_vm0  ;;  %v10704_v41 = vld [vmem:[%s15882_s3 + $0x10] sm:$0xff]   ;;  %v10705_v14 = vld [vmem:[%s15882_s3 + $0x18] sm:$0xff]  }
0x1a39   : > { %v7409_v2 = vmax.f32 %v7389_v8, %v7405_v35  ;;  %v7374_v44 = vmax.f32 %v7350_v48, %v7370_v0  ;;  %v7545_v8 = vld [vmem:[%s15889_s1 + $0x10] sm:$0xff]  ;;  %v7543_v35 = vld [vmem:[%s15889_s1] sm:$0xff]  ;;  %vm15897_vm13 = vmmov %vm15877_vm2 }
0x1a3b   : > { %v7413_v62 = vmax.f32 %v7373_v37, %v7409_v2  ;;  %v7398_v27 = vpop.permute.xlu0 %7397  ;;  %v7382_v13 = vpop.permute.xlu1 %7381  ;;  %v7546_v2 = vld [vmem:[%s15889_s1 + $0x18] sm:$0xff] }
0x1a3c   : > { %v7406_v23 = vsel %vm15880_vm8, %v7398_v27, 0.0  ;;  %v7390_v47 = vsel %vm6419_vm9, %v7382_v13, 0.0  ;;  %vm15886_vm9 = vmmov %vm15873_vm0  ;;  %v7544_v27 = vld [vmem:[%s15889_s1 + $0x8] sm:$0xff] }
0x1a3d   : > { %v7410_v34 = vmax.f32 %v7390_v47, %v7406_v23  ;;  %9330 = vmatprep.mubr.msk.f32.mxu0 %vm5296_vm5, %v7413_v62  ;;  %vm15898_vm8 = vmmov %vm15877_vm2 }
0x1a3f   : > { %v7414_v39 = vmax.f32 %v7374_v44, %v7410_v34 }
0x1a41   : > { %9331 = vmatmul.mubr.msk.f32.gmra.mrb[44].mxu0 %vm5296_vm5, %v7414_v39  ;;  %vm15884_vm5 = vmmov %vm15873_vm0 }
0x1a42   : > { %9337 = vmatprep.mubr.msk.bf16.mxu0 %vm15881_vm14, %v10698_v53  ;;  %vm15892_vm0 = vmmov %vm15891_vm3 }
0x1a43   : > { %vm15899_vm14 = vmmov %vm15877_vm2 }
0x1b08   : > { %v9329_v10 = vpop.f32.mrb[18].mxu0 }
0x1b09   : > { %v7500_v40 = vpop.f32.mrb[19].mxu0 }
0x1b0a   : > { %v7553_v55 = vpack.c.bf16 %v9329_v10, %v7500_v40 }
0x1b0c   : > { %9333 = vmatprep.subr.bf16.mxu0 %v7553_v55 }
0x1b0d   : > { %9334 = vmatpush3.bf16.msra.mxu0 %v7553_v55  ;;  %v7549_v55 = vld [vmem:[%s15889_s1 + $0x30] sm:$0xff] }
0x1b14   : > { %v9332_v58 = vpop.f32.mrb[44].mxu0 }
0x1b15   : > { %v7510_v61 = vpop.f32.mrb[45].mxu0 }
0x1b16   : > { %v7554_v11 = vpack.c.bf16 %v9332_v58, %v7510_v61  ;;  %v7547_v61 = vld [vmem:[%s15889_s1 + $0x20] sm:$0xff] }
0x1b18   : > { %9335 = vmatprep.subr.bf16.mxu0 %v7554_v11 }
0x1b19   : > { %9336 = vmatpush3.bf16.msra.mxu0 %v7554_v11 }
0x1b1a   : > { %9361 = vmatprep.subr.bf16.mxu0 %v10766_v3 }
0x1b1c   : > { %9338 = vmatmul.mubr.msk.bf16.vlgmr.msra.gmra.mrb[48].mxu0 %vm15884_vm5, %v10699_v59  ;;  %vm15900_vm5 = vmmov %vm15892_vm0 }
0x1b1d   : > { %9341 = vmatprep.mubr.msk.bf16.mxu0 %vm15885_vm7, %v10700_v28  ;;  %v7550_v28 = vld [vmem:[%s15889_s1 + $0x38] sm:$0xff]  ;;  %vm7824_vm7 = vcmask 1024  }
0x1b24   : > { %9342 = vmatmul.mubr.msk.bf16.gmra.mrb[52].mxu0 %vm15886_vm9, %v10701_v46 }
0x1b25   : > { %9369 = vmatprep.mubr.msk.bf16.mxu0 %vm15887_vm1, %v10766_v3 }
0x1bef   : > { %v9339_v33 = vpop.f32.mrb[48].mxu0 }
0x1bf0   : > { %v7630_v16 = vadd.f32 %v9339_v33, %v7529_v36  ;;  %v7621_v20 = vpop.f32.mrb[49].mxu0  ;;  %v7548_v36 = vld [vmem:[%s15889_s1 + $0x28] sm:$0xff] }
0x1bf1   : > { %v7622_v19 = vadd.f32 %v7621_v20, %v7527_v45  ;;  %v9340_v57 = vpop.f32.mrb[50].mxu0 }
0x1bf2   : > { %v7633_v9 = vadd.f32 %v9340_v57, %v7530_v25  ;;  %v7624_v31 = vpop.f32.mrb[51].mxu0  ;;  %v7654_v6 = vmax.f32 %v7630_v16, 0.0 }
0x1bf3   : > { %v7625_v51 = vadd.f32 %v7624_v31, %v7528_v12  ;;  %v7652_v18 = vmax.f32 %v7622_v19, 0.0 }
0x1bf4   : > { %v7655_v22 = vmax.f32 %v7633_v9, 0.0 }
0x1bf5   : > { %v7653_v48 = vmax.f32 %v7625_v51, 0.0 }
0x1bf6   : > { %v7661_v17 = vpack.c.bf16 %v7655_v22, %v7654_v6  ;;  %v7551_v6 = vld [vmem:[%s10945_s20] sm:$0x1] }
0x1bf7   : > { %v7660_v32 = vpack.c.bf16 %v7653_v48, %v7652_v18  ;;  %v9343_v50 = vpop.f32.mrb[52].mxu0  ;;  %v7552_v22 = vld [vmem:[%s10950_s27] sm:$0x3] }
0x1bf8   : > { %v7646_v54 = vadd.f32 %v9343_v50, %v7533_v49  ;;  %v7637_v4 = vpop.f32.mrb[53].mxu0 }
0x1bf9   : > { %v7638_v24 = vadd.f32 %v7637_v4, %v7531_v56  ;;  %v9344_v7 = vpop.f32.mrb[54].mxu0  ;;  %9345 = vmatprep.subr.bf16.mxu1 %v7660_v32 }
0x1bfa   : > { %v7649_v1 = vadd.f32 %v9344_v7, %v7534_v26  ;;  %v7640_v21 = vpop.f32.mrb[55].mxu0  ;;  %9346 = vmatpush3.bf16.msra.mxu1 %v7660_v32  ;;  %v7658_v52 = vmax.f32 %v7646_v54, 0.0 }
0x1bfb   : > { %v7641_v42 = vadd.f32 %v7640_v21, %v7532_v63  ;;  %9347 = vmatprep.subr.bf16.mxu1 %v7661_v17  ;;  %v7656_v38 = vmax.f32 %v7638_v24, 0.0 }
0x1bfc   : > { %v7659_v15 = vmax.f32 %v7649_v1, 0.0 }
0x1bfd   : > { %v7657_v5 = vmax.f32 %v7641_v42, 0.0 }
0x1bfe   : > { %v7663_v60 = vpack.c.bf16 %v7659_v15, %v7658_v52  ;;  %9348 = vmatpush3.bf16.msra.mxu1 %v7661_v17 }
0x1bff   : > { %v7662_v43 = vpack.c.bf16 %v7657_v5, %v7656_v38 }
0x1c01   : > { %9349 = vmatprep.subr.bf16.mxu1 %v7662_v43 }
0x1c02   : > { %9350 = vmatpush3.bf16.msra.mxu1 %v7662_v43 }
0x1c03   : > { %9351 = vmatprep.subr.bf16.mxu1 %v7663_v60 }
0x1c06   : > { %9352 = vmatpush3.bf16.msra.mxu1 %v7663_v60 }
0x1c09   : > { %9354 = vmatmul.mubr.msk.bf16.vlgmr.msra.gmra.mrb[88].mxu1 %vm15890_vm11, %v10703_v29 }
0x1c0a   : > { %9357 = vmatprep.mubr.msk.bf16.mxu1 %vm15891_vm3, %v10704_v41 }
0x1c11   : > { %9358 = vmatmul.mubr.msk.bf16.gmra.mrb[92].mxu1 %vm15892_vm0, %v10705_v14 }
0x1cdc   : > { %v9355_v37 = vpop.f32.mrb[88].mxu1 }
0x1cdd   : > { %v7739_v0 = vadd.f32 %v9355_v37, %v7545_v8  ;;  %v7730_v62 = vpop.f32.mrb[89].mxu1 }
0x1cde   : > { %v7731_v13 = vadd.f32 %v7730_v62, %v7543_v35  ;;  %v9356_v23 = vpop.f32.mrb[90].mxu1 }
0x1cdf   : > { %v7763_v47 = vmax.f32 %v7739_v0, 0.0  ;;  %v7742_v44 = vadd.f32 %v9356_v23, %v7546_v2  ;;  %v7733_v34 = vpop.f32.mrb[91].mxu1 }
0x1ce0   : > { %v7761_v39 = vmax.f32 %v7731_v13, 0.0  ;;  %v7734_v53 = vadd.f32 %v7733_v34, %v7544_v27 }
0x1ce1   : > { %7818 = vst.msk [vmem:[%s14829_s2 + $0x10] sm:$0xff] %vm15893_vm10, %v7763_v47  ;;  %v7764_v10 = vmax.f32 %v7742_v44, 0.0 }
0x1ce2   : > { %7816 = vst.msk [vmem:[%s14829_s2] sm:$0xff] %vm15894_vm15, %v7761_v39  ;;  %v7762_v40 = vmax.f32 %v7734_v53, 0.0 }
0x1ce3   : > { %v7770_v58 = vpack.c.bf16 %v7764_v10, %v7763_v47  ;;  %7819 = vst.msk [vmem:[%s14829_s2 + $0x18] sm:$0xff] %vm15895_vm6, %v7764_v10 }
0x1ce4   : > { %v7769_v11 = vpack.c.bf16 %v7762_v40, %v7761_v39  ;;  %7817 = vst.msk [vmem:[%s14829_s2 + $0x8] sm:$0xff] %vm15896_vm12, %v7762_v40  ;;  %v9359_v59 = vpop.f32.mrb[92].mxu1 }
0x1ce5   : > { %v7755_v46 = vadd.f32 %v9359_v59, %v7549_v55  ;;  %v7746_v30 = vpop.f32.mrb[93].mxu1 }
0x1ce6   : > { %v7747_v45 = vadd.f32 %v7746_v30, %v7547_v61  ;;  %v9360_v33 = vpop.f32.mrb[94].mxu1  ;;  %9362 = vmatpush3.bf16.msra.mxu0 %v7769_v11 }
0x1ce7   : > { %v7767_v25 = vmax.f32 %v7755_v46, 0.0  ;;  %v7758_v16 = vadd.f32 %v9360_v33, %v7550_v28  ;;  %v7749_v20 = vpop.f32.mrb[95].mxu1  ;;  %9363 = vmatprep.subr.bf16.mxu0 %v10766_v3 }
0x1ce8   : > { %v7765_v12 = vmax.f32 %v7747_v45, 0.0  ;;  %v7750_v19 = vadd.f32 %v7749_v20, %v7548_v36 }
0x1ce9   : > { %7822 = vst.msk [vmem:[%s14829_s2 + $0x30] sm:$0xff] %vm15877_vm2, %v7767_v25  ;;  %v7768_v57 = vmax.f32 %v7758_v16, 0.0 }
0x1cea   : > { %7820 = vst.msk [vmem:[%s14829_s2 + $0x20] sm:$0xff] %vm15897_vm13, %v7765_v12  ;;  %v7766_v9 = vmax.f32 %v7750_v19, 0.0  ;;  %9364 = vmatpush3.bf16.msra.mxu0 %v7770_v58 }
0x1ceb   : > { %v7772_v31 = vpack.c.bf16 %v7768_v57, %v7767_v25  ;;  %7823 = vst.msk [vmem:[%s14829_s2 + $0x38] sm:$0xff] %vm15898_vm8, %v7768_v57  ;;  %9365 = vmatprep.subr.bf16.mxu0 %v10766_v3 }
0x1cec   : > { %v7771_v51 = vpack.c.bf16 %v7766_v9, %v7765_v12  ;;  %7821 = vst.msk [vmem:[%s14829_s2 + $0x28] sm:$0xff] %vm15899_vm14, %v7766_v9 }
0x1cee   : > { %9366 = vmatpush3.bf16.msra.mxu0 %v7771_v51 }
0x1cef   : > { %9367 = vmatprep.subr.bf16.mxu0 %v10766_v3 }
0x1cf2   : > { %9368 = vmatpush3.bf16.msra.mxu0 %v7772_v31 }
0x1cf5   : > { %9370 = vmatmul.mubr.msk.bf16.vlgmr.msra.gmra.mrb[56].mxu0 %vm15900_vm5, %v7551_v6 }
0x1dc8   : > { %v7810_v18 = vpop.f32.mrb[56].mxu0 }
0x1dc9   : > { %v7811_v48 = vadd.f32 %v7810_v18, %v7552_v22  ;;  %v9371_v49 = vpop.f32.mrb[57].mxu0 }
0x1dca   : > { %v7813_v17 = vpop.f32.mrb[58].mxu0 }
0x1dcb   : > { %7825 = vst.msk [vmem:[%s1050_s0] sm:$0x3] %vm7824_vm7, %v7811_v48  ;;  %v9372_v56 = vpop.f32.mrb[59].mxu0 }
0x1dcc PF: > { %s80_s15 = sadd.s32 1, %s10712_s15  }
0x1dcd   : > { %p77_p4 = scmp.ge.s32.totalorder %s80_s15, 4  }
0x1dcf   :  { %79 = sbr.rel (!%p77_p4) target bundleno = 61 (0x3d), region = 228 }

</bundles_post_ra>
